<compile_context>
chip_gen: v5e
topology: v5e:2x2
jax: 0.10.0
libtpu: 0.0.40
codegen_flags: <defaults>
</compile_context>

<pallas_src>
import functools

import jax
import jax.numpy as jnp
from jax.experimental import pallas as pl
from jax.experimental.pallas import tpu as pltpu


# ---------------------------------------------------------------------------
# Fused encoder + greedy-decoder kernel (single invocation, loops unrolled)
# ---------------------------------------------------------------------------
def seq2seq_kernel(x_emb_ref,      # (T_enc*B, E)  bf16  time-major encoder inputs
                   enc_wih_ref,    # (E, 3H)       bf16
                   enc_whh_ref,    # (H, 3H)       bf16
                   enc_bih_ref,    # (1, 3H)       f32
                   enc_bhh_ref,    # (1, 3H)       f32
                   table_hbm,      # (V, 3H)       bf16  dec_emb @ Wih^T + bih   [HBM]
                   dwhh_hbm,       # (H, 3H)       bf16  decoder Whh^T           [HBM]
                   wout_hbm,       # (H, V)        bf16  output Linear W^T       [HBM]
                   dec_bhh_ref,    # (1, 3H)       f32
                   bout_ref,       # (1, V)        f32
                   sos_gi_ref,     # (B, 3H)       f32   input-gate proj of SOS
                   logp_ref,       # out: (T_dec*B, V) f32
                   table_vmem,     # (V, 3H)       bf16  scratch
                   dwhh_vmem,      # (H, 3H)       bf16  scratch
                   wout_vmem,      # (H, V)        bf16  scratch
                   logits_scratch, # (T_dec*B, V)  f32   scratch
                   dma_sem,        # DMA sems (3,)
                   *, hidden, vocab, batch, t_enc, t_dec):
    H = hidden
    B = batch
    V = vocab

    # ---- kick off decoder-weight DMAs; hidden behind encoder compute -------
    cp_table = pltpu.make_async_copy(table_hbm, table_vmem, dma_sem.at[0])
    cp_dwhh = pltpu.make_async_copy(dwhh_hbm, dwhh_vmem, dma_sem.at[1])
    cp_wout = pltpu.make_async_copy(wout_hbm, wout_vmem, dma_sem.at[2])
    cp_table.start()
    cp_dwhh.start()
    cp_wout.start()

    # ------------------------- encoder -------------------------------------
    # Input-gate projection for ALL time steps in one MXU call (off the serial
    # recurrence path); bih folded in here.
    gi_all = jnp.dot(x_emb_ref[...], enc_wih_ref[...],
                     preferred_element_type=jnp.float32) + enc_bih_ref[...]
    enc_whh = enc_whh_ref[...]
    enc_bhh = jnp.broadcast_to(enc_bhh_ref[...], (B, 3 * H))   # hoisted broadcast

    h = jnp.zeros((B, H), jnp.float32)
    for t in range(t_enc):                                     # unrolled, static
        gi = gi_all[t * B:(t + 1) * B]                         # (B, 3H) static slice
        gh = jnp.dot(h.astype(jnp.bfloat16), enc_whh,
                     preferred_element_type=jnp.float32) + enc_bhh
        r = jax.nn.sigmoid(gi[:, :H] + gh[:, :H])
        z = jax.nn.sigmoid(gi[:, H:2 * H] + gh[:, H:2 * H])
        n = jnp.tanh(gi[:, 2 * H:] + r * gh[:, 2 * H:])
        h = (1.0 - z) * n + z * h

    # ------------------ decoder (greedy, teacher_forcing_ratio = 0) --------
    cp_table.wait()
    cp_dwhh.wait()
    cp_wout.wait()
    table = table_vmem[...]                                    # (V, 3H) bf16
    dec_whh = dwhh_vmem[...]                                   # (H, 3H) bf16
    wout = wout_vmem[...]                                      # (H, V)  bf16
    dec_bhh = jnp.broadcast_to(dec_bhh_ref[...], (B, 3 * H))   # hoisted broadcast
    bout = jnp.broadcast_to(bout_ref[...], (B, V))             # hoisted broadcast
    iota_v = jax.lax.broadcasted_iota(jnp.int32, (B, V), 1)    # hoisted iota

    gi = sos_gi_ref[...]                                       # gi_0: SOS row of table
    for t in range(t_dec):                                     # unrolled, static
        # gh depends only on h (not on gi / previous argmax) -> overlaps with
        # the previous step's logits->argmax->table chain under the scheduler.
        gh = jnp.dot(h.astype(jnp.bfloat16), dec_whh,
                     preferred_element_type=jnp.float32) + dec_bhh
        r = jax.nn.sigmoid(gi[:, :H] + gh[:, :H])
        z = jax.nn.sigmoid(gi[:, H:2 * H] + gh[:, H:2 * H])
        n = jnp.tanh(gi[:, 2 * H:] + r * gh[:, 2 * H:])
        h = (1.0 - z) * n + z * h

        # output projection; log_softmax is deferred, only the store is here.
        logits = jnp.dot(h.astype(jnp.bfloat16), wout,
                         preferred_element_type=jnp.float32) + bout         # (B, V)
        logits_scratch[t * B:(t + 1) * B, :] = logits

        if t + 1 < t_dec:   # last step's argmax / next-input are dead work
            m = jnp.max(logits, axis=-1, keepdims=True)
            idx = jnp.min(jnp.where(logits == m, iota_v, V),
                          axis=-1, keepdims=True)              # first-max tie break
            onehot = (iota_v == idx).astype(jnp.bfloat16)
            # next-step input-gate projection directly from the table:
            # onehot @ (dec_emb @ Wih^T + bih)  ==  emb(token) @ Wih^T + bih
            gi = jnp.dot(onehot, table, preferred_element_type=jnp.float32)

    # ---- one batched log_softmax (decode_function) + dense output store ----
    logits_all = logits_scratch[...]                           # (T_dec*B, V)
    m_all = jnp.max(logits_all, axis=-1, keepdims=True)
    lse = jnp.log(jnp.sum(jnp.exp(logits_all - m_all), axis=-1,
                          keepdims=True)) + m_all
    logp_ref[...] = (logits_all - lse).astype(logp_ref.dtype)


def seq2seq_pallas_call(x_emb_2d, enc_wih_t, enc_whh_t, enc_bih, enc_bhh,
                        table_ih, dec_whh_t, wout_t, dec_bhh, bout, sos_gi,
                        *, batch, t_enc, t_dec):
    TB, E = x_emb_2d.shape
    H = enc_whh_t.shape[0]
    V = table_ih.shape[0]
    B = batch
    kernel = functools.partial(seq2seq_kernel, hidden=H, vocab=V, batch=B,
                               t_enc=t_enc, t_dec=t_dec)
    full = lambda shape: pl.BlockSpec(shape, lambda i: (0,) * len(shape))
    return pl.pallas_call(
        kernel,
        out_shape=jax.ShapeDtypeStruct((t_dec * B, V), jnp.float32),
        grid_spec=pltpu.PrefetchScalarGridSpec(
            num_scalar_prefetch=0,
            grid=(1,),                       # single invocation: no per-step pipeline tax
            in_specs=[full((TB, E)),
                      full((E, 3 * H)),
                      full((H, 3 * H)),
                      full((1, 3 * H)),
                      full((1, 3 * H)),
                      pl.BlockSpec(memory_space=pl.ANY),   # table_ih  (manual DMA)
                      pl.BlockSpec(memory_space=pl.ANY),   # dec_whh_t (manual DMA)
                      pl.BlockSpec(memory_space=pl.ANY),   # wout_t    (manual DMA)
                      full((1, 3 * H)),
                      full((1, V)),
                      full((B, 3 * H))],
            out_specs=full((t_dec * B, V)),
            scratch_shapes=[pltpu.VMEM((V, 3 * H), jnp.bfloat16),
                            pltpu.VMEM((H, 3 * H), jnp.bfloat16),
                            pltpu.VMEM((H, V), jnp.bfloat16),
                            pltpu.VMEM((t_dec * B, V), jnp.float32),
                            pltpu.SemaphoreType.DMA((3,))]),
        compiler_params=pltpu.CompilerParams(
            dimension_semantics=("arbitrary",)),
    )(x_emb_2d, enc_wih_t, enc_whh_t, enc_bih, enc_bhh,
      table_ih, dec_whh_t, wout_t, dec_bhh, bout, sos_gi)


# ---------------------------------------------------------------------------
# Parameter construction (deterministic, mirrors _initialize_weights)
# ---------------------------------------------------------------------------
def _orthogonal(key, shape):
    a = jax.random.normal(key, shape, jnp.float32)
    q, _ = jnp.linalg.qr(a)
    return q[:, :shape[1]] if shape[0] >= shape[1] else q[:shape[0], :]


def make_params(key, vocab, emb, hidden):
    ks = jax.random.split(key, 8)
    p = {}
    # encoder
    p["enc_emb"] = jax.random.normal(ks[0], (vocab, emb), jnp.float32)
    p["enc_wih_t"] = _orthogonal(ks[1], (3 * hidden, emb)).T          # (E, 3H)
    p["enc_whh_t"] = _orthogonal(ks[2], (3 * hidden, hidden)).T       # (H, 3H)
    p["enc_bih"] = jnp.zeros((1, 3 * hidden), jnp.float32)
    p["enc_bhh"] = jnp.zeros((1, 3 * hidden), jnp.float32)
    # decoder
    p["dec_emb"] = jax.random.normal(ks[3], (vocab, emb), jnp.float32)
    p["dec_wih_t"] = _orthogonal(ks[4], (3 * hidden, emb)).T
    p["dec_whh_t"] = _orthogonal(ks[5], (3 * hidden, hidden)).T
    p["dec_bih"] = jnp.zeros((1, 3 * hidden), jnp.float32)
    p["dec_bhh"] = jnp.zeros((1, 3 * hidden), jnp.float32)
    # output Linear (kaiming normal, zero bias)
    std = (2.0 / hidden) ** 0.5
    p["out_w_t"] = (std * jax.random.normal(ks[6], (vocab, hidden),
                                            jnp.float32)).T           # (H, V)
    p["out_b"] = jnp.zeros((1, vocab), jnp.float32)
    return p


# ---------------------------------------------------------------------------
# Seq2seq.forward equivalent (returns result[0] = decoder log-prob outputs)
# ---------------------------------------------------------------------------
def seq2seq_forward(params, input_tokens, max_decode_len, sos_id=1):
    """input_tokens: int32 (B, T_enc). Returns (T_dec, B, V) log-probabilities."""
    B, T = input_tokens.shape
    E = params["enc_wih_t"].shape[0]
    H = params["enc_whh_t"].shape[0]
    V = params["dec_emb"].shape[0]
    bf16 = jnp.bfloat16

    # glue: encoder embedding lookup, time-major, flattened to (T*B, E)
    x_emb = jnp.take(params["enc_emb"], input_tokens.T, axis=0)       # (T, B, E)
    x_emb_2d = x_emb.reshape(T * B, E).astype(bf16)

    # Decoder input-gate table, computed in f32 (single bf16 rounding at the end):
    #   table_ih[v] = dec_emb[v] @ Wih^T + bih
    table_f32 = params["dec_emb"] @ params["dec_wih_t"] + params["dec_bih"]  # (V, 3H)
    # gi for the SOS step (replaces an in-kernel one-hot matmul at t == 0)
    sos_gi = jnp.broadcast_to(table_f32[sos_id], (B, 3 * H)).astype(jnp.float32)

    logp = seq2seq_pallas_call(
        x_emb_2d,
        params["enc_wih_t"].astype(bf16), params["enc_whh_t"].astype(bf16),
        params["enc_bih"], params["enc_bhh"],
        table_f32.astype(bf16),
        params["dec_whh_t"].astype(bf16),
        params["out_w_t"].astype(bf16),
        params["dec_bhh"], params["out_b"],
        sos_gi,
        batch=B, t_enc=T, t_dec=max_decode_len)
    return logp.reshape(max_decode_len, B, V)


if __name__ == "__main__":
    VOCAB, EMB, HIDDEN = 256, 128, 128
    B, T_ENC, T_DEC = 8, 8, 8

    key = jax.random.PRNGKey(0)
    pkey, tkey = jax.random.split(key)
    params = make_params(pkey, VOCAB, EMB, HIDDEN)
    input_tokens = jax.random.randint(tkey, (B, T_ENC), 0, VOCAB, jnp.int32)

    dec_out = seq2seq_forward(params, input_tokens, T_DEC)
    dec_out = jax.block_until_ready(dec_out)

    assert dec_out.shape == (T_DEC, B, VOCAB)
    # log_softmax rows should exponentiate-and-sum to ~1
    assert jnp.allclose(jnp.exp(dec_out).sum(-1), 1.0, atol=1e-3)
    print("KERNEL_OK")
</pallas_src>

<mosaic_0001>
module attributes {stable_mosaic.version = 11 : i64} {
  func.func @seq2seq_kernel(%arg0: i32, %arg1: memref<64x128xbf16, #tpu.memory_space<vmem>>, %arg2: memref<128x384xbf16, #tpu.memory_space<vmem>>, %arg3: memref<128x384xbf16, #tpu.memory_space<vmem>>, %arg4: memref<1x384xf32, #tpu.memory_space<vmem>>, %arg5: memref<1x384xf32, #tpu.memory_space<vmem>>, %arg6: memref<256x384xbf16, #tpu.memory_space<any>>, %arg7: memref<128x384xbf16, #tpu.memory_space<any>>, %arg8: memref<128x256xbf16, #tpu.memory_space<any>>, %arg9: memref<1x384xf32, #tpu.memory_space<vmem>>, %arg10: memref<1x256xf32, #tpu.memory_space<vmem>>, %arg11: memref<8x384xf32, #tpu.memory_space<vmem>>, %arg12: memref<64x256xf32, #tpu.memory_space<vmem>>, %arg13: memref<256x384xbf16, #tpu.memory_space<vmem>>, %arg14: memref<128x384xbf16, #tpu.memory_space<vmem>>, %arg15: memref<128x256xbf16, #tpu.memory_space<vmem>>, %arg16: memref<64x256xf32, #tpu.memory_space<vmem>>, %arg17: memref<3x!tpu.dma_semaphore, #tpu.memory_space<semaphore_mem>>) attributes {dimension_semantics = [#tpu.dimension_semantics<arbitrary>], iteration_bounds = array<i64: 1>, scalar_prefetch = 0 : i64, scratch_operands = 5 : i64, tpu.core_type = #tpu.core_type<tc>, window_params = [{pipeline_mode = #tpu.pipeline_mode<synchronous>, transform_indices = @transform_0, window_bounds = array<i64: 64, 128>}, {pipeline_mode = #tpu.pipeline_mode<synchronous>, transform_indices = @transform_1, window_bounds = array<i64: 128, 384>}, {pipeline_mode = #tpu.pipeline_mode<synchronous>, transform_indices = @transform_2, window_bounds = array<i64: 128, 384>}, {pipeline_mode = #tpu.pipeline_mode<synchronous>, transform_indices = @transform_3, window_bounds = array<i64: 1, 384>}, {pipeline_mode = #tpu.pipeline_mode<synchronous>, transform_indices = @transform_4, window_bounds = array<i64: 1, 384>}, {}, {}, {}, {pipeline_mode = #tpu.pipeline_mode<synchronous>, transform_indices = @transform_8, window_bounds = array<i64: 1, 384>}, {pipeline_mode = #tpu.pipeline_mode<synchronous>, transform_indices = @transform_9, window_bounds = array<i64: 1, 256>}, {pipeline_mode = #tpu.pipeline_mode<synchronous>, transform_indices = @transform_10, window_bounds = array<i64: 8, 384>}, {pipeline_mode = #tpu.pipeline_mode<synchronous>, transform_indices = @transform_11, window_bounds = array<i64: 64, 256>}]} {
    %c0_i32 = arith.constant 0 : i32
    %0 = tpu.memref_slice %arg17[%c0_i32] : memref<3x!tpu.dma_semaphore, #tpu.memory_space<semaphore_mem>> -> memref<1x!tpu.dma_semaphore, #tpu.memory_space<semaphore_mem>>
    %1 = tpu.memref_squeeze %0 : memref<1x!tpu.dma_semaphore, #tpu.memory_space<semaphore_mem>> -> memref<!tpu.dma_semaphore, #tpu.memory_space<semaphore_mem>>
    tpu.enqueue_dma source(%arg6 : memref<256x384xbf16, #tpu.memory_space<any>>) target(%arg13 : memref<256x384xbf16, #tpu.memory_space<vmem>>) target_semaphore(%1 : memref<!tpu.dma_semaphore, #tpu.memory_space<semaphore_mem>>)
    %c1_i32 = arith.constant 1 : i32
    %2 = tpu.memref_slice %arg17[%c1_i32] : memref<3x!tpu.dma_semaphore, #tpu.memory_space<semaphore_mem>> -> memref<1x!tpu.dma_semaphore, #tpu.memory_space<semaphore_mem>>
    %3 = tpu.memref_squeeze %2 : memref<1x!tpu.dma_semaphore, #tpu.memory_space<semaphore_mem>> -> memref<!tpu.dma_semaphore, #tpu.memory_space<semaphore_mem>>
    tpu.enqueue_dma source(%arg7 : memref<128x384xbf16, #tpu.memory_space<any>>) target(%arg14 : memref<128x384xbf16, #tpu.memory_space<vmem>>) target_semaphore(%3 : memref<!tpu.dma_semaphore, #tpu.memory_space<semaphore_mem>>)
    %c2_i32 = arith.constant 2 : i32
    %4 = tpu.memref_slice %arg17[%c2_i32] : memref<3x!tpu.dma_semaphore, #tpu.memory_space<semaphore_mem>> -> memref<1x!tpu.dma_semaphore, #tpu.memory_space<semaphore_mem>>
    %5 = tpu.memref_squeeze %4 : memref<1x!tpu.dma_semaphore, #tpu.memory_space<semaphore_mem>> -> memref<!tpu.dma_semaphore, #tpu.memory_space<semaphore_mem>>
    tpu.enqueue_dma source(%arg8 : memref<128x256xbf16, #tpu.memory_space<any>>) target(%arg15 : memref<128x256xbf16, #tpu.memory_space<vmem>>) target_semaphore(%5 : memref<!tpu.dma_semaphore, #tpu.memory_space<semaphore_mem>>)
    %c0 = arith.constant 0 : index
    %c0_0 = arith.constant 0 : index
    %6 = vector.load %arg1[%c0, %c0_0] : memref<64x128xbf16, #tpu.memory_space<vmem>>, vector<64x128xbf16>
    %c0_1 = arith.constant 0 : index
    %c0_2 = arith.constant 0 : index
    %7 = vector.load %arg2[%c0_1, %c0_2] : memref<128x384xbf16, #tpu.memory_space<vmem>>, vector<128x384xbf16>
    %cst = arith.constant dense<0.000000e+00> : vector<64x384xf32>
    %8 = tpu.matmul %6, %7, %cst {dimension_numbers = #tpu.dot_dimension_numbers<[1], [0], [0], [1], [0, 0, 1, 1], [], []>} : vector<64x128xbf16>, vector<128x384xbf16>, vector<64x384xf32> -> vector<64x384xf32>
    %c0_3 = arith.constant 0 : index
    %c0_4 = arith.constant 0 : index
    %9 = vector.load %arg4[%c0_3, %c0_4] : memref<1x384xf32, #tpu.memory_space<vmem>>, vector<1x384xf32>
    %10 = vector.broadcast %9 : vector<1x384xf32> to vector<64x384xf32>
    %11 = arith.addf %8, %10 : vector<64x384xf32>
    %c0_5 = arith.constant 0 : index
    %c0_6 = arith.constant 0 : index
    %12 = vector.load %arg3[%c0_5, %c0_6] : memref<128x384xbf16, #tpu.memory_space<vmem>>, vector<128x384xbf16>
    %c0_7 = arith.constant 0 : index
    %c0_8 = arith.constant 0 : index
    %13 = vector.load %arg5[%c0_7, %c0_8] : memref<1x384xf32, #tpu.memory_space<vmem>>, vector<1x384xf32>
    %14 = vector.shape_cast %13 : vector<1x384xf32> to vector<1x384xf32>
    %15 = vector.broadcast %14 : vector<1x384xf32> to vector<8x384xf32>
    %cst_9 = arith.constant 0.000000e+00 : f32
    %16 = vector.broadcast %cst_9 : f32 to vector<8x128xf32>
    %17 = vector.extract_strided_slice %11 {offsets = [0, 0], sizes = [8, 384], strides = [1, 1]} : vector<64x384xf32> to vector<8x384xf32>
    %18 = arith.truncf %16 : vector<8x128xf32> to vector<8x128xbf16>
    %cst_10 = arith.constant dense<0.000000e+00> : vector<8x384xf32>
    %19 = tpu.matmul %18, %12, %cst_10 {dimension_numbers = #tpu.dot_dimension_numbers<[1], [0], [0], [1], [0, 0, 1, 1], [], []>} : vector<8x128xbf16>, vector<128x384xbf16>, vector<8x384xf32> -> vector<8x384xf32>
    %20 = arith.addf %19, %15 : vector<8x384xf32>
    %21 = vector.extract_strided_slice %17 {offsets = [0, 0], sizes = [8, 128], strides = [1, 1]} : vector<8x384xf32> to vector<8x128xf32>
    %22 = vector.extract_strided_slice %20 {offsets = [0, 0], sizes = [8, 128], strides = [1, 1]} : vector<8x384xf32> to vector<8x128xf32>
    %23 = arith.addf %21, %22 : vector<8x128xf32>
    %24 = arith.negf %23 : vector<8x128xf32>
    %25 = math.exp %24 : vector<8x128xf32>
    %cst_11 = arith.constant 1.000000e+00 : f32
    %26 = vector.broadcast %cst_11 : f32 to vector<8x128xf32>
    %27 = arith.addf %26, %25 : vector<8x128xf32>
    %28 = arith.divf %26, %27 : vector<8x128xf32>
    %29 = vector.extract_strided_slice %17 {offsets = [0, 128], sizes = [8, 128], strides = [1, 1]} : vector<8x384xf32> to vector<8x128xf32>
    %30 = vector.extract_strided_slice %20 {offsets = [0, 128], sizes = [8, 128], strides = [1, 1]} : vector<8x384xf32> to vector<8x128xf32>
    %31 = arith.addf %29, %30 : vector<8x128xf32>
    %32 = arith.negf %31 : vector<8x128xf32>
    %33 = math.exp %32 : vector<8x128xf32>
    %cst_12 = arith.constant 1.000000e+00 : f32
    %34 = vector.broadcast %cst_12 : f32 to vector<8x128xf32>
    %35 = arith.addf %34, %33 : vector<8x128xf32>
    %36 = arith.divf %34, %35 : vector<8x128xf32>
    %37 = vector.extract_strided_slice %17 {offsets = [0, 256], sizes = [8, 128], strides = [1, 1]} : vector<8x384xf32> to vector<8x128xf32>
    %38 = vector.extract_strided_slice %20 {offsets = [0, 256], sizes = [8, 128], strides = [1, 1]} : vector<8x384xf32> to vector<8x128xf32>
    %39 = arith.mulf %28, %38 : vector<8x128xf32>
    %40 = arith.addf %37, %39 : vector<8x128xf32>
    %41 = math.tanh %40 : vector<8x128xf32>
    %cst_13 = arith.constant 1.000000e+00 : f32
    %42 = vector.broadcast %cst_13 : f32 to vector<8x128xf32>
    %43 = arith.subf %42, %36 : vector<8x128xf32>
    %44 = arith.mulf %43, %41 : vector<8x128xf32>
    %45 = arith.mulf %36, %16 : vector<8x128xf32>
    %46 = arith.addf %44, %45 : vector<8x128xf32>
    %47 = vector.extract_strided_slice %11 {offsets = [8, 0], sizes = [8, 384], strides = [1, 1]} : vector<64x384xf32> to vector<8x384xf32>
    %48 = arith.truncf %46 : vector<8x128xf32> to vector<8x128xbf16>
    %cst_14 = arith.constant dense<0.000000e+00> : vector<8x384xf32>
    %49 = tpu.matmul %48, %12, %cst_14 {dimension_numbers = #tpu.dot_dimension_numbers<[1], [0], [0], [1], [0, 0, 1, 1], [], []>} : vector<8x128xbf16>, vector<128x384xbf16>, vector<8x384xf32> -> vector<8x384xf32>
    %50 = arith.addf %49, %15 : vector<8x384xf32>
    %51 = vector.extract_strided_slice %47 {offsets = [0, 0], sizes = [8, 128], strides = [1, 1]} : vector<8x384xf32> to vector<8x128xf32>
    %52 = vector.extract_strided_slice %50 {offsets = [0, 0], sizes = [8, 128], strides = [1, 1]} : vector<8x384xf32> to vector<8x128xf32>
    %53 = arith.addf %51, %52 : vector<8x128xf32>
    %54 = arith.negf %53 : vector<8x128xf32>
    %55 = math.exp %54 : vector<8x128xf32>
    %cst_15 = arith.constant 1.000000e+00 : f32
    %56 = vector.broadcast %cst_15 : f32 to vector<8x128xf32>
    %57 = arith.addf %56, %55 : vector<8x128xf32>
    %58 = arith.divf %56, %57 : vector<8x128xf32>
    %59 = vector.extract_strided_slice %47 {offsets = [0, 128], sizes = [8, 128], strides = [1, 1]} : vector<8x384xf32> to vector<8x128xf32>
    %60 = vector.extract_strided_slice %50 {offsets = [0, 128], sizes = [8, 128], strides = [1, 1]} : vector<8x384xf32> to vector<8x128xf32>
    %61 = arith.addf %59, %60 : vector<8x128xf32>
    %62 = arith.negf %61 : vector<8x128xf32>
    %63 = math.exp %62 : vector<8x128xf32>
    %cst_16 = arith.constant 1.000000e+00 : f32
    %64 = vector.broadcast %cst_16 : f32 to vector<8x128xf32>
    %65 = arith.addf %64, %63 : vector<8x128xf32>
    %66 = arith.divf %64, %65 : vector<8x128xf32>
    %67 = vector.extract_strided_slice %47 {offsets = [0, 256], sizes = [8, 128], strides = [1, 1]} : vector<8x384xf32> to vector<8x128xf32>
    %68 = vector.extract_strided_slice %50 {offsets = [0, 256], sizes = [8, 128], strides = [1, 1]} : vector<8x384xf32> to vector<8x128xf32>
    %69 = arith.mulf %58, %68 : vector<8x128xf32>
    %70 = arith.addf %67, %69 : vector<8x128xf32>
    %71 = math.tanh %70 : vector<8x128xf32>
    %cst_17 = arith.constant 1.000000e+00 : f32
    %72 = vector.broadcast %cst_17 : f32 to vector<8x128xf32>
    %73 = arith.subf %72, %66 : vector<8x128xf32>
    %74 = arith.mulf %73, %71 : vector<8x128xf32>
    %75 = arith.mulf %66, %46 : vector<8x128xf32>
    %76 = arith.addf %74, %75 : vector<8x128xf32>
    %77 = vector.extract_strided_slice %11 {offsets = [16, 0], sizes = [8, 384], strides = [1, 1]} : vector<64x384xf32> to vector<8x384xf32>
    %78 = arith.truncf %76 : vector<8x128xf32> to vector<8x128xbf16>
    %cst_18 = arith.constant dense<0.000000e+00> : vector<8x384xf32>
    %79 = tpu.matmul %78, %12, %cst_18 {dimension_numbers = #tpu.dot_dimension_numbers<[1], [0], [0], [1], [0, 0, 1, 1], [], []>} : vector<8x128xbf16>, vector<128x384xbf16>, vector<8x384xf32> -> vector<8x384xf32>
    %80 = arith.addf %79, %15 : vector<8x384xf32>
    %81 = vector.extract_strided_slice %77 {offsets = [0, 0], sizes = [8, 128], strides = [1, 1]} : vector<8x384xf32> to vector<8x128xf32>
    %82 = vector.extract_strided_slice %80 {offsets = [0, 0], sizes = [8, 128], strides = [1, 1]} : vector<8x384xf32> to vector<8x128xf32>
    %83 = arith.addf %81, %82 : vector<8x128xf32>
    %84 = arith.negf %83 : vector<8x128xf32>
    %85 = math.exp %84 : vector<8x128xf32>
    %cst_19 = arith.constant 1.000000e+00 : f32
    %86 = vector.broadcast %cst_19 : f32 to vector<8x128xf32>
    %87 = arith.addf %86, %85 : vector<8x128xf32>
    %88 = arith.divf %86, %87 : vector<8x128xf32>
    %89 = vector.extract_strided_slice %77 {offsets = [0, 128], sizes = [8, 128], strides = [1, 1]} : vector<8x384xf32> to vector<8x128xf32>
    %90 = vector.extract_strided_slice %80 {offsets = [0, 128], sizes = [8, 128], strides = [1, 1]} : vector<8x384xf32> to vector<8x128xf32>
    %91 = arith.addf %89, %90 : vector<8x128xf32>
    %92 = arith.negf %91 : vector<8x128xf32>
    %93 = math.exp %92 : vector<8x128xf32>
    %cst_20 = arith.constant 1.000000e+00 : f32
    %94 = vector.broadcast %cst_20 : f32 to vector<8x128xf32>
    %95 = arith.addf %94, %93 : vector<8x128xf32>
    %96 = arith.divf %94, %95 : vector<8x128xf32>
    %97 = vector.extract_strided_slice %77 {offsets = [0, 256], sizes = [8, 128], strides = [1, 1]} : vector<8x384xf32> to vector<8x128xf32>
    %98 = vector.extract_strided_slice %80 {offsets = [0, 256], sizes = [8, 128], strides = [1, 1]} : vector<8x384xf32> to vector<8x128xf32>
    %99 = arith.mulf %88, %98 : vector<8x128xf32>
    %100 = arith.addf %97, %99 : vector<8x128xf32>
    %101 = math.tanh %100 : vector<8x128xf32>
    %cst_21 = arith.constant 1.000000e+00 : f32
    %102 = vector.broadcast %cst_21 : f32 to vector<8x128xf32>
    %103 = arith.subf %102, %96 : vector<8x128xf32>
    %104 = arith.mulf %103, %101 : vector<8x128xf32>
    %105 = arith.mulf %96, %76 : vector<8x128xf32>
    %106 = arith.addf %104, %105 : vector<8x128xf32>
    %107 = vector.extract_strided_slice %11 {offsets = [24, 0], sizes = [8, 384], strides = [1, 1]} : vector<64x384xf32> to vector<8x384xf32>
    %108 = arith.truncf %106 : vector<8x128xf32> to vector<8x128xbf16>
    %cst_22 = arith.constant dense<0.000000e+00> : vector<8x384xf32>
    %109 = tpu.matmul %108, %12, %cst_22 {dimension_numbers = #tpu.dot_dimension_numbers<[1], [0], [0], [1], [0, 0, 1, 1], [], []>} : vector<8x128xbf16>, vector<128x384xbf16>, vector<8x384xf32> -> vector<8x384xf32>
    %110 = arith.addf %109, %15 : vector<8x384xf32>
    %111 = vector.extract_strided_slice %107 {offsets = [0, 0], sizes = [8, 128], strides = [1, 1]} : vector<8x384xf32> to vector<8x128xf32>
    %112 = vector.extract_strided_slice %110 {offsets = [0, 0], sizes = [8, 128], strides = [1, 1]} : vector<8x384xf32> to vector<8x128xf32>
    %113 = arith.addf %111, %112 : vector<8x128xf32>
    %114 = arith.negf %113 : vector<8x128xf32>
    %115 = math.exp %114 : vector<8x128xf32>
    %cst_23 = arith.constant 1.000000e+00 : f32
    %116 = vector.broadcast %cst_23 : f32 to vector<8x128xf32>
    %117 = arith.addf %116, %115 : vector<8x128xf32>
    %118 = arith.divf %116, %117 : vector<8x128xf32>
    %119 = vector.extract_strided_slice %107 {offsets = [0, 128], sizes = [8, 128], strides = [1, 1]} : vector<8x384xf32> to vector<8x128xf32>
    %120 = vector.extract_strided_slice %110 {offsets = [0, 128], sizes = [8, 128], strides = [1, 1]} : vector<8x384xf32> to vector<8x128xf32>
    %121 = arith.addf %119, %120 : vector<8x128xf32>
    %122 = arith.negf %121 : vector<8x128xf32>
    %123 = math.exp %122 : vector<8x128xf32>
    %cst_24 = arith.constant 1.000000e+00 : f32
    %124 = vector.broadcast %cst_24 : f32 to vector<8x128xf32>
    %125 = arith.addf %124, %123 : vector<8x128xf32>
    %126 = arith.divf %124, %125 : vector<8x128xf32>
    %127 = vector.extract_strided_slice %107 {offsets = [0, 256], sizes = [8, 128], strides = [1, 1]} : vector<8x384xf32> to vector<8x128xf32>
    %128 = vector.extract_strided_slice %110 {offsets = [0, 256], sizes = [8, 128], strides = [1, 1]} : vector<8x384xf32> to vector<8x128xf32>
    %129 = arith.mulf %118, %128 : vector<8x128xf32>
    %130 = arith.addf %127, %129 : vector<8x128xf32>
    %131 = math.tanh %130 : vector<8x128xf32>
    %cst_25 = arith.constant 1.000000e+00 : f32
    %132 = vector.broadcast %cst_25 : f32 to vector<8x128xf32>
    %133 = arith.subf %132, %126 : vector<8x128xf32>
    %134 = arith.mulf %133, %131 : vector<8x128xf32>
    %135 = arith.mulf %126, %106 : vector<8x128xf32>
    %136 = arith.addf %134, %135 : vector<8x128xf32>
    %137 = vector.extract_strided_slice %11 {offsets = [32, 0], sizes = [8, 384], strides = [1, 1]} : vector<64x384xf32> to vector<8x384xf32>
    %138 = arith.truncf %136 : vector<8x128xf32> to vector<8x128xbf16>
    %cst_26 = arith.constant dense<0.000000e+00> : vector<8x384xf32>
    %139 = tpu.matmul %138, %12, %cst_26 {dimension_numbers = #tpu.dot_dimension_numbers<[1], [0], [0], [1], [0, 0, 1, 1], [], []>} : vector<8x128xbf16>, vector<128x384xbf16>, vector<8x384xf32> -> vector<8x384xf32>
    %140 = arith.addf %139, %15 : vector<8x384xf32>
    %141 = vector.extract_strided_slice %137 {offsets = [0, 0], sizes = [8, 128], strides = [1, 1]} : vector<8x384xf32> to vector<8x128xf32>
    %142 = vector.extract_strided_slice %140 {offsets = [0, 0], sizes = [8, 128], strides = [1, 1]} : vector<8x384xf32> to vector<8x128xf32>
    %143 = arith.addf %141, %142 : vector<8x128xf32>
    %144 = arith.negf %143 : vector<8x128xf32>
    %145 = math.exp %144 : vector<8x128xf32>
    %cst_27 = arith.constant 1.000000e+00 : f32
    %146 = vector.broadcast %cst_27 : f32 to vector<8x128xf32>
    %147 = arith.addf %146, %145 : vector<8x128xf32>
    %148 = arith.divf %146, %147 : vector<8x128xf32>
    %149 = vector.extract_strided_slice %137 {offsets = [0, 128], sizes = [8, 128], strides = [1, 1]} : vector<8x384xf32> to vector<8x128xf32>
    %150 = vector.extract_strided_slice %140 {offsets = [0, 128], sizes = [8, 128], strides = [1, 1]} : vector<8x384xf32> to vector<8x128xf32>
    %151 = arith.addf %149, %150 : vector<8x128xf32>
    %152 = arith.negf %151 : vector<8x128xf32>
    %153 = math.exp %152 : vector<8x128xf32>
    %cst_28 = arith.constant 1.000000e+00 : f32
    %154 = vector.broadcast %cst_28 : f32 to vector<8x128xf32>
    %155 = arith.addf %154, %153 : vector<8x128xf32>
    %156 = arith.divf %154, %155 : vector<8x128xf32>
    %157 = vector.extract_strided_slice %137 {offsets = [0, 256], sizes = [8, 128], strides = [1, 1]} : vector<8x384xf32> to vector<8x128xf32>
    %158 = vector.extract_strided_slice %140 {offsets = [0, 256], sizes = [8, 128], strides = [1, 1]} : vector<8x384xf32> to vector<8x128xf32>
    %159 = arith.mulf %148, %158 : vector<8x128xf32>
    %160 = arith.addf %157, %159 : vector<8x128xf32>
    %161 = math.tanh %160 : vector<8x128xf32>
    %cst_29 = arith.constant 1.000000e+00 : f32
    %162 = vector.broadcast %cst_29 : f32 to vector<8x128xf32>
    %163 = arith.subf %162, %156 : vector<8x128xf32>
    %164 = arith.mulf %163, %161 : vector<8x128xf32>
    %165 = arith.mulf %156, %136 : vector<8x128xf32>
    %166 = arith.addf %164, %165 : vector<8x128xf32>
    %167 = vector.extract_strided_slice %11 {offsets = [40, 0], sizes = [8, 384], strides = [1, 1]} : vector<64x384xf32> to vector<8x384xf32>
    %168 = arith.truncf %166 : vector<8x128xf32> to vector<8x128xbf16>
    %cst_30 = arith.constant dense<0.000000e+00> : vector<8x384xf32>
    %169 = tpu.matmul %168, %12, %cst_30 {dimension_numbers = #tpu.dot_dimension_numbers<[1], [0], [0], [1], [0, 0, 1, 1], [], []>} : vector<8x128xbf16>, vector<128x384xbf16>, vector<8x384xf32> -> vector<8x384xf32>
    %170 = arith.addf %169, %15 : vector<8x384xf32>
    %171 = vector.extract_strided_slice %167 {offsets = [0, 0], sizes = [8, 128], strides = [1, 1]} : vector<8x384xf32> to vector<8x128xf32>
    %172 = vector.extract_strided_slice %170 {offsets = [0, 0], sizes = [8, 128], strides = [1, 1]} : vector<8x384xf32> to vector<8x128xf32>
    %173 = arith.addf %171, %172 : vector<8x128xf32>
    %174 = arith.negf %173 : vector<8x128xf32>
    %175 = math.exp %174 : vector<8x128xf32>
    %cst_31 = arith.constant 1.000000e+00 : f32
    %176 = vector.broadcast %cst_31 : f32 to vector<8x128xf32>
    %177 = arith.addf %176, %175 : vector<8x128xf32>
    %178 = arith.divf %176, %177 : vector<8x128xf32>
    %179 = vector.extract_strided_slice %167 {offsets = [0, 128], sizes = [8, 128], strides = [1, 1]} : vector<8x384xf32> to vector<8x128xf32>
    %180 = vector.extract_strided_slice %170 {offsets = [0, 128], sizes = [8, 128], strides = [1, 1]} : vector<8x384xf32> to vector<8x128xf32>
    %181 = arith.addf %179, %180 : vector<8x128xf32>
    %182 = arith.negf %181 : vector<8x128xf32>
    %183 = math.exp %182 : vector<8x128xf32>
    %cst_32 = arith.constant 1.000000e+00 : f32
    %184 = vector.broadcast %cst_32 : f32 to vector<8x128xf32>
    %185 = arith.addf %184, %183 : vector<8x128xf32>
    %186 = arith.divf %184, %185 : vector<8x128xf32>
    %187 = vector.extract_strided_slice %167 {offsets = [0, 256], sizes = [8, 128], strides = [1, 1]} : vector<8x384xf32> to vector<8x128xf32>
    %188 = vector.extract_strided_slice %170 {offsets = [0, 256], sizes = [8, 128], strides = [1, 1]} : vector<8x384xf32> to vector<8x128xf32>
    %189 = arith.mulf %178, %188 : vector<8x128xf32>
    %190 = arith.addf %187, %189 : vector<8x128xf32>
    %191 = math.tanh %190 : vector<8x128xf32>
    %cst_33 = arith.constant 1.000000e+00 : f32
    %192 = vector.broadcast %cst_33 : f32 to vector<8x128xf32>
    %193 = arith.subf %192, %186 : vector<8x128xf32>
    %194 = arith.mulf %193, %191 : vector<8x128xf32>
    %195 = arith.mulf %186, %166 : vector<8x128xf32>
    %196 = arith.addf %194, %195 : vector<8x128xf32>
    %197 = vector.extract_strided_slice %11 {offsets = [48, 0], sizes = [8, 384], strides = [1, 1]} : vector<64x384xf32> to vector<8x384xf32>
    %198 = arith.truncf %196 : vector<8x128xf32> to vector<8x128xbf16>
    %cst_34 = arith.constant dense<0.000000e+00> : vector<8x384xf32>
    %199 = tpu.matmul %198, %12, %cst_34 {dimension_numbers = #tpu.dot_dimension_numbers<[1], [0], [0], [1], [0, 0, 1, 1], [], []>} : vector<8x128xbf16>, vector<128x384xbf16>, vector<8x384xf32> -> vector<8x384xf32>
    %200 = arith.addf %199, %15 : vector<8x384xf32>
    %201 = vector.extract_strided_slice %197 {offsets = [0, 0], sizes = [8, 128], strides = [1, 1]} : vector<8x384xf32> to vector<8x128xf32>
    %202 = vector.extract_strided_slice %200 {offsets = [0, 0], sizes = [8, 128], strides = [1, 1]} : vector<8x384xf32> to vector<8x128xf32>
    %203 = arith.addf %201, %202 : vector<8x128xf32>
    %204 = arith.negf %203 : vector<8x128xf32>
    %205 = math.exp %204 : vector<8x128xf32>
    %cst_35 = arith.constant 1.000000e+00 : f32
    %206 = vector.broadcast %cst_35 : f32 to vector<8x128xf32>
    %207 = arith.addf %206, %205 : vector<8x128xf32>
    %208 = arith.divf %206, %207 : vector<8x128xf32>
    %209 = vector.extract_strided_slice %197 {offsets = [0, 128], sizes = [8, 128], strides = [1, 1]} : vector<8x384xf32> to vector<8x128xf32>
    %210 = vector.extract_strided_slice %200 {offsets = [0, 128], sizes = [8, 128], strides = [1, 1]} : vector<8x384xf32> to vector<8x128xf32>
    %211 = arith.addf %209, %210 : vector<8x128xf32>
    %212 = arith.negf %211 : vector<8x128xf32>
    %213 = math.exp %212 : vector<8x128xf32>
    %cst_36 = arith.constant 1.000000e+00 : f32
    %214 = vector.broadcast %cst_36 : f32 to vector<8x128xf32>
    %215 = arith.addf %214, %213 : vector<8x128xf32>
    %216 = arith.divf %214, %215 : vector<8x128xf32>
    %217 = vector.extract_strided_slice %197 {offsets = [0, 256], sizes = [8, 128], strides = [1, 1]} : vector<8x384xf32> to vector<8x128xf32>
    %218 = vector.extract_strided_slice %200 {offsets = [0, 256], sizes = [8, 128], strides = [1, 1]} : vector<8x384xf32> to vector<8x128xf32>
    %219 = arith.mulf %208, %218 : vector<8x128xf32>
    %220 = arith.addf %217, %219 : vector<8x128xf32>
    %221 = math.tanh %220 : vector<8x128xf32>
    %cst_37 = arith.constant 1.000000e+00 : f32
    %222 = vector.broadcast %cst_37 : f32 to vector<8x128xf32>
    %223 = arith.subf %222, %216 : vector<8x128xf32>
    %224 = arith.mulf %223, %221 : vector<8x128xf32>
    %225 = arith.mulf %216, %196 : vector<8x128xf32>
    %226 = arith.addf %224, %225 : vector<8x128xf32>
    %227 = vector.extract_strided_slice %11 {offsets = [56, 0], sizes = [8, 384], strides = [1, 1]} : vector<64x384xf32> to vector<8x384xf32>
    %228 = arith.truncf %226 : vector<8x128xf32> to vector<8x128xbf16>
    %cst_38 = arith.constant dense<0.000000e+00> : vector<8x384xf32>
    %229 = tpu.matmul %228, %12, %cst_38 {dimension_numbers = #tpu.dot_dimension_numbers<[1], [0], [0], [1], [0, 0, 1, 1], [], []>} : vector<8x128xbf16>, vector<128x384xbf16>, vector<8x384xf32> -> vector<8x384xf32>
    %230 = arith.addf %229, %15 : vector<8x384xf32>
    %231 = vector.extract_strided_slice %227 {offsets = [0, 0], sizes = [8, 128], strides = [1, 1]} : vector<8x384xf32> to vector<8x128xf32>
    %232 = vector.extract_strided_slice %230 {offsets = [0, 0], sizes = [8, 128], strides = [1, 1]} : vector<8x384xf32> to vector<8x128xf32>
    %233 = arith.addf %231, %232 : vector<8x128xf32>
    %234 = arith.negf %233 : vector<8x128xf32>
    %235 = math.exp %234 : vector<8x128xf32>
    %cst_39 = arith.constant 1.000000e+00 : f32
    %236 = vector.broadcast %cst_39 : f32 to vector<8x128xf32>
    %237 = arith.addf %236, %235 : vector<8x128xf32>
    %238 = arith.divf %236, %237 : vector<8x128xf32>
    %239 = vector.extract_strided_slice %227 {offsets = [0, 128], sizes = [8, 128], strides = [1, 1]} : vector<8x384xf32> to vector<8x128xf32>
    %240 = vector.extract_strided_slice %230 {offsets = [0, 128], sizes = [8, 128], strides = [1, 1]} : vector<8x384xf32> to vector<8x128xf32>
    %241 = arith.addf %239, %240 : vector<8x128xf32>
    %242 = arith.negf %241 : vector<8x128xf32>
    %243 = math.exp %242 : vector<8x128xf32>
    %cst_40 = arith.constant 1.000000e+00 : f32
    %244 = vector.broadcast %cst_40 : f32 to vector<8x128xf32>
    %245 = arith.addf %244, %243 : vector<8x128xf32>
    %246 = arith.divf %244, %245 : vector<8x128xf32>
    %247 = vector.extract_strided_slice %227 {offsets = [0, 256], sizes = [8, 128], strides = [1, 1]} : vector<8x384xf32> to vector<8x128xf32>
    %248 = vector.extract_strided_slice %230 {offsets = [0, 256], sizes = [8, 128], strides = [1, 1]} : vector<8x384xf32> to vector<8x128xf32>
    %249 = arith.mulf %238, %248 : vector<8x128xf32>
    %250 = arith.addf %247, %249 : vector<8x128xf32>
    %251 = math.tanh %250 : vector<8x128xf32>
    %cst_41 = arith.constant 1.000000e+00 : f32
    %252 = vector.broadcast %cst_41 : f32 to vector<8x128xf32>
    %253 = arith.subf %252, %246 : vector<8x128xf32>
    %254 = arith.mulf %253, %251 : vector<8x128xf32>
    %255 = arith.mulf %246, %226 : vector<8x128xf32>
    %256 = arith.addf %254, %255 : vector<8x128xf32>
    %c0_i32_42 = arith.constant 0 : i32
    %257 = tpu.memref_slice %arg17[%c0_i32_42] : memref<3x!tpu.dma_semaphore, #tpu.memory_space<semaphore_mem>> -> memref<1x!tpu.dma_semaphore, #tpu.memory_space<semaphore_mem>>
    %258 = tpu.memref_squeeze %257 : memref<1x!tpu.dma_semaphore, #tpu.memory_space<semaphore_mem>> -> memref<!tpu.dma_semaphore, #tpu.memory_space<semaphore_mem>>
    tpu.wait_dma2 semaphore(%258 : memref<!tpu.dma_semaphore, #tpu.memory_space<semaphore_mem>>) src(%arg6 : memref<256x384xbf16, #tpu.memory_space<any>>) dst(%arg13 : memref<256x384xbf16, #tpu.memory_space<vmem>>)
    %c1_i32_43 = arith.constant 1 : i32
    %259 = tpu.memref_slice %arg17[%c1_i32_43] : memref<3x!tpu.dma_semaphore, #tpu.memory_space<semaphore_mem>> -> memref<1x!tpu.dma_semaphore, #tpu.memory_space<semaphore_mem>>
    %260 = tpu.memref_squeeze %259 : memref<1x!tpu.dma_semaphore, #tpu.memory_space<semaphore_mem>> -> memref<!tpu.dma_semaphore, #tpu.memory_space<semaphore_mem>>
    tpu.wait_dma2 semaphore(%260 : memref<!tpu.dma_semaphore, #tpu.memory_space<semaphore_mem>>) src(%arg7 : memref<128x384xbf16, #tpu.memory_space<any>>) dst(%arg14 : memref<128x384xbf16, #tpu.memory_space<vmem>>)
    %c2_i32_44 = arith.constant 2 : i32
    %261 = tpu.memref_slice %arg17[%c2_i32_44] : memref<3x!tpu.dma_semaphore, #tpu.memory_space<semaphore_mem>> -> memref<1x!tpu.dma_semaphore, #tpu.memory_space<semaphore_mem>>
    %262 = tpu.memref_squeeze %261 : memref<1x!tpu.dma_semaphore, #tpu.memory_space<semaphore_mem>> -> memref<!tpu.dma_semaphore, #tpu.memory_space<semaphore_mem>>
    tpu.wait_dma2 semaphore(%262 : memref<!tpu.dma_semaphore, #tpu.memory_space<semaphore_mem>>) src(%arg8 : memref<128x256xbf16, #tpu.memory_space<any>>) dst(%arg15 : memref<128x256xbf16, #tpu.memory_space<vmem>>)
    %c0_45 = arith.constant 0 : index
    %c0_46 = arith.constant 0 : index
    %263 = vector.load %arg13[%c0_45, %c0_46] : memref<256x384xbf16, #tpu.memory_space<vmem>>, vector<256x384xbf16>
    %c0_47 = arith.constant 0 : index
    %c0_48 = arith.constant 0 : index
    %264 = vector.load %arg14[%c0_47, %c0_48] : memref<128x384xbf16, #tpu.memory_space<vmem>>, vector<128x384xbf16>
    %c0_49 = arith.constant 0 : index
    %c0_50 = arith.constant 0 : index
    %265 = vector.load %arg15[%c0_49, %c0_50] : memref<128x256xbf16, #tpu.memory_space<vmem>>, vector<128x256xbf16>
    %c0_51 = arith.constant 0 : index
    %c0_52 = arith.constant 0 : index
    %266 = vector.load %arg9[%c0_51, %c0_52] : memref<1x384xf32, #tpu.memory_space<vmem>>, vector<1x384xf32>
    %267 = vector.shape_cast %266 : vector<1x384xf32> to vector<1x384xf32>
    %268 = vector.broadcast %267 : vector<1x384xf32> to vector<8x384xf32>
    %c0_53 = arith.constant 0 : index
    %c0_54 = arith.constant 0 : index
    %269 = vector.load %arg10[%c0_53, %c0_54] : memref<1x256xf32, #tpu.memory_space<vmem>>, vector<1x256xf32>
    %270 = vector.shape_cast %269 : vector<1x256xf32> to vector<1x256xf32>
    %271 = vector.broadcast %270 : vector<1x256xf32> to vector<8x256xf32>
    %272 = tpu.iota {dimensions = array<i32: 1>} : vector<8x256xi32>
    %c0_55 = arith.constant 0 : index
    %c0_56 = arith.constant 0 : index
    %273 = vector.load %arg11[%c0_55, %c0_56] : memref<8x384xf32, #tpu.memory_space<vmem>>, vector<8x384xf32>
    %274 = arith.truncf %256 : vector<8x128xf32> to vector<8x128xbf16>
    %cst_57 = arith.constant dense<0.000000e+00> : vector<8x384xf32>
    %275 = tpu.matmul %274, %264, %cst_57 {dimension_numbers = #tpu.dot_dimension_numbers<[1], [0], [0], [1], [0, 0, 1, 1], [], []>} : vector<8x128xbf16>, vector<128x384xbf16>, vector<8x384xf32> -> vector<8x384xf32>
    %276 = arith.addf %275, %268 : vector<8x384xf32>
    %277 = vector.extract_strided_slice %273 {offsets = [0, 0], sizes = [8, 128], strides = [1, 1]} : vector<8x384xf32> to vector<8x128xf32>
    %278 = vector.extract_strided_slice %276 {offsets = [0, 0], sizes = [8, 128], strides = [1, 1]} : vector<8x384xf32> to vector<8x128xf32>
    %279 = arith.addf %277, %278 : vector<8x128xf32>
    %280 = arith.negf %279 : vector<8x128xf32>
    %281 = math.exp %280 : vector<8x128xf32>
    %cst_58 = arith.constant 1.000000e+00 : f32
    %282 = vector.broadcast %cst_58 : f32 to vector<8x128xf32>
    %283 = arith.addf %282, %281 : vector<8x128xf32>
    %284 = arith.divf %282, %283 : vector<8x128xf32>
    %285 = vector.extract_strided_slice %273 {offsets = [0, 128], sizes = [8, 128], strides = [1, 1]} : vector<8x384xf32> to vector<8x128xf32>
    %286 = vector.extract_strided_slice %276 {offsets = [0, 128], sizes = [8, 128], strides = [1, 1]} : vector<8x384xf32> to vector<8x128xf32>
    %287 = arith.addf %285, %286 : vector<8x128xf32>
    %288 = arith.negf %287 : vector<8x128xf32>
    %289 = math.exp %288 : vector<8x128xf32>
    %cst_59 = arith.constant 1.000000e+00 : f32
    %290 = vector.broadcast %cst_59 : f32 to vector<8x128xf32>
    %291 = arith.addf %290, %289 : vector<8x128xf32>
    %292 = arith.divf %290, %291 : vector<8x128xf32>
    %293 = vector.extract_strided_slice %273 {offsets = [0, 256], sizes = [8, 128], strides = [1, 1]} : vector<8x384xf32> to vector<8x128xf32>
    %294 = vector.extract_strided_slice %276 {offsets = [0, 256], sizes = [8, 128], strides = [1, 1]} : vector<8x384xf32> to vector<8x128xf32>
    %295 = arith.mulf %284, %294 : vector<8x128xf32>
    %296 = arith.addf %293, %295 : vector<8x128xf32>
    %297 = math.tanh %296 : vector<8x128xf32>
    %cst_60 = arith.constant 1.000000e+00 : f32
    %298 = vector.broadcast %cst_60 : f32 to vector<8x128xf32>
    %299 = arith.subf %298, %292 : vector<8x128xf32>
    %300 = arith.mulf %299, %297 : vector<8x128xf32>
    %301 = arith.mulf %292, %256 : vector<8x128xf32>
    %302 = arith.addf %300, %301 : vector<8x128xf32>
    %303 = arith.truncf %302 : vector<8x128xf32> to vector<8x128xbf16>
    %cst_61 = arith.constant dense<0.000000e+00> : vector<8x256xf32>
    %304 = tpu.matmul %303, %265, %cst_61 {dimension_numbers = #tpu.dot_dimension_numbers<[1], [0], [0], [1], [0, 0, 1, 1], [], []>} : vector<8x128xbf16>, vector<128x256xbf16>, vector<8x256xf32> -> vector<8x256xf32>
    %305 = arith.addf %304, %271 : vector<8x256xf32>
    %c0_62 = arith.constant 0 : index
    %c0_63 = arith.constant 0 : index
    %306 = vector.load %arg16[%c0_62, %c0_63] : memref<64x256xf32, #tpu.memory_space<vmem>>, vector<8x256xf32>
    tpu.vector_store %arg16[%c0_62, %c0_63], %305 {strides = array<i32>} : memref<64x256xf32, #tpu.memory_space<vmem>>, vector<8x256xf32>,
    %cst_64 = arith.constant dense<0xFF800000> : vector<8xf32>
    %307 = vector.multi_reduction <maximumf>, %305, %cst_64 [1] : vector<8x256xf32> to vector<8xf32>
    %308 = vector.shape_cast %307 : vector<8xf32> to vector<8x1xf32>
    %309 = vector.broadcast %308 : vector<8x1xf32> to vector<8x256xf32>
    %310 = arith.cmpf oeq, %305, %309 : vector<8x256xf32>
    %c256_i32 = arith.constant 256 : i32
    %311 = vector.broadcast %c256_i32 : i32 to vector<8x256xi32>
    %312 = arith.select %310, %272, %311 : vector<8x256xi1>, vector<8x256xi32>
    %cst_65 = arith.constant dense<2147483647> : vector<8xi32>
    %313 = vector.multi_reduction <minsi>, %312, %cst_65 [1] : vector<8x256xi32> to vector<8xi32>
    %314 = vector.shape_cast %313 : vector<8xi32> to vector<8x1xi32>
    %315 = vector.broadcast %314 : vector<8x1xi32> to vector<8x256xi32>
    %316 = arith.cmpi eq, %272, %315 : vector<8x256xi32>
    %317 = arith.extui %316 : vector<8x256xi1> to vector<8x256xi32>
    %318 = arith.sitofp %317 : vector<8x256xi32> to vector<8x256xf32>
    %319 = arith.truncf %318 : vector<8x256xf32> to vector<8x256xbf16>
    %cst_66 = arith.constant dense<0.000000e+00> : vector<8x384xf32>
    %320 = tpu.matmul %319, %263, %cst_66 {dimension_numbers = #tpu.dot_dimension_numbers<[1], [0], [0], [1], [0, 0, 1, 1], [], []>} : vector<8x256xbf16>, vector<256x384xbf16>, vector<8x384xf32> -> vector<8x384xf32>
    %321 = arith.truncf %302 : vector<8x128xf32> to vector<8x128xbf16>
    %cst_67 = arith.constant dense<0.000000e+00> : vector<8x384xf32>
    %322 = tpu.matmul %321, %264, %cst_67 {dimension_numbers = #tpu.dot_dimension_numbers<[1], [0], [0], [1], [0, 0, 1, 1], [], []>} : vector<8x128xbf16>, vector<128x384xbf16>, vector<8x384xf32> -> vector<8x384xf32>
    %323 = arith.addf %322, %268 : vector<8x384xf32>
    %324 = vector.extract_strided_slice %320 {offsets = [0, 0], sizes = [8, 128], strides = [1, 1]} : vector<8x384xf32> to vector<8x128xf32>
    %325 = vector.extract_strided_slice %323 {offsets = [0, 0], sizes = [8, 128], strides = [1, 1]} : vector<8x384xf32> to vector<8x128xf32>
    %326 = arith.addf %324, %325 : vector<8x128xf32>
    %327 = arith.negf %326 : vector<8x128xf32>
    %328 = math.exp %327 : vector<8x128xf32>
    %cst_68 = arith.constant 1.000000e+00 : f32
    %329 = vector.broadcast %cst_68 : f32 to vector<8x128xf32>
    %330 = arith.addf %329, %328 : vector<8x128xf32>
    %331 = arith.divf %329, %330 : vector<8x128xf32>
    %332 = vector.extract_strided_slice %320 {offsets = [0, 128], sizes = [8, 128], strides = [1, 1]} : vector<8x384xf32> to vector<8x128xf32>
    %333 = vector.extract_strided_slice %323 {offsets = [0, 128], sizes = [8, 128], strides = [1, 1]} : vector<8x384xf32> to vector<8x128xf32>
    %334 = arith.addf %332, %333 : vector<8x128xf32>
    %335 = arith.negf %334 : vector<8x128xf32>
    %336 = math.exp %335 : vector<8x128xf32>
    %cst_69 = arith.constant 1.000000e+00 : f32
    %337 = vector.broadcast %cst_69 : f32 to vector<8x128xf32>
    %338 = arith.addf %337, %336 : vector<8x128xf32>
    %339 = arith.divf %337, %338 : vector<8x128xf32>
    %340 = vector.extract_strided_slice %320 {offsets = [0, 256], sizes = [8, 128], strides = [1, 1]} : vector<8x384xf32> to vector<8x128xf32>
    %341 = vector.extract_strided_slice %323 {offsets = [0, 256], sizes = [8, 128], strides = [1, 1]} : vector<8x384xf32> to vector<8x128xf32>
    %342 = arith.mulf %331, %341 : vector<8x128xf32>
    %343 = arith.addf %340, %342 : vector<8x128xf32>
    %344 = math.tanh %343 : vector<8x128xf32>
    %cst_70 = arith.constant 1.000000e+00 : f32
    %345 = vector.broadcast %cst_70 : f32 to vector<8x128xf32>
    %346 = arith.subf %345, %339 : vector<8x128xf32>
    %347 = arith.mulf %346, %344 : vector<8x128xf32>
    %348 = arith.mulf %339, %302 : vector<8x128xf32>
    %349 = arith.addf %347, %348 : vector<8x128xf32>
    %350 = arith.truncf %349 : vector<8x128xf32> to vector<8x128xbf16>
    %cst_71 = arith.constant dense<0.000000e+00> : vector<8x256xf32>
    %351 = tpu.matmul %350, %265, %cst_71 {dimension_numbers = #tpu.dot_dimension_numbers<[1], [0], [0], [1], [0, 0, 1, 1], [], []>} : vector<8x128xbf16>, vector<128x256xbf16>, vector<8x256xf32> -> vector<8x256xf32>
    %352 = arith.addf %351, %271 : vector<8x256xf32>
    %c8 = arith.constant 8 : index
    %c0_72 = arith.constant 0 : index
    %353 = vector.load %arg16[%c8, %c0_72] : memref<64x256xf32, #tpu.memory_space<vmem>>, vector<8x256xf32>
    tpu.vector_store %arg16[%c8, %c0_72], %352 {strides = array<i32>} : memref<64x256xf32, #tpu.memory_space<vmem>>, vector<8x256xf32>,
    %cst_73 = arith.constant dense<0xFF800000> : vector<8xf32>
    %354 = vector.multi_reduction <maximumf>, %352, %cst_73 [1] : vector<8x256xf32> to vector<8xf32>
    %355 = vector.shape_cast %354 : vector<8xf32> to vector<8x1xf32>
    %356 = vector.broadcast %355 : vector<8x1xf32> to vector<8x256xf32>
    %357 = arith.cmpf oeq, %352, %356 : vector<8x256xf32>
    %c256_i32_74 = arith.constant 256 : i32
    %358 = vector.broadcast %c256_i32_74 : i32 to vector<8x256xi32>
    %359 = arith.select %357, %272, %358 : vector<8x256xi1>, vector<8x256xi32>
    %cst_75 = arith.constant dense<2147483647> : vector<8xi32>
    %360 = vector.multi_reduction <minsi>, %359, %cst_75 [1] : vector<8x256xi32> to vector<8xi32>
    %361 = vector.shape_cast %360 : vector<8xi32> to vector<8x1xi32>
    %362 = vector.broadcast %361 : vector<8x1xi32> to vector<8x256xi32>
    %363 = arith.cmpi eq, %272, %362 : vector<8x256xi32>
    %364 = arith.extui %363 : vector<8x256xi1> to vector<8x256xi32>
    %365 = arith.sitofp %364 : vector<8x256xi32> to vector<8x256xf32>
    %366 = arith.truncf %365 : vector<8x256xf32> to vector<8x256xbf16>
    %cst_76 = arith.constant dense<0.000000e+00> : vector<8x384xf32>
    %367 = tpu.matmul %366, %263, %cst_76 {dimension_numbers = #tpu.dot_dimension_numbers<[1], [0], [0], [1], [0, 0, 1, 1], [], []>} : vector<8x256xbf16>, vector<256x384xbf16>, vector<8x384xf32> -> vector<8x384xf32>
    %368 = arith.truncf %349 : vector<8x128xf32> to vector<8x128xbf16>
    %cst_77 = arith.constant dense<0.000000e+00> : vector<8x384xf32>
    %369 = tpu.matmul %368, %264, %cst_77 {dimension_numbers = #tpu.dot_dimension_numbers<[1], [0], [0], [1], [0, 0, 1, 1], [], []>} : vector<8x128xbf16>, vector<128x384xbf16>, vector<8x384xf32> -> vector<8x384xf32>
    %370 = arith.addf %369, %268 : vector<8x384xf32>
    %371 = vector.extract_strided_slice %367 {offsets = [0, 0], sizes = [8, 128], strides = [1, 1]} : vector<8x384xf32> to vector<8x128xf32>
    %372 = vector.extract_strided_slice %370 {offsets = [0, 0], sizes = [8, 128], strides = [1, 1]} : vector<8x384xf32> to vector<8x128xf32>
    %373 = arith.addf %371, %372 : vector<8x128xf32>
    %374 = arith.negf %373 : vector<8x128xf32>
    %375 = math.exp %374 : vector<8x128xf32>
    %cst_78 = arith.constant 1.000000e+00 : f32
    %376 = vector.broadcast %cst_78 : f32 to vector<8x128xf32>
    %377 = arith.addf %376, %375 : vector<8x128xf32>
    %378 = arith.divf %376, %377 : vector<8x128xf32>
    %379 = vector.extract_strided_slice %367 {offsets = [0, 128], sizes = [8, 128], strides = [1, 1]} : vector<8x384xf32> to vector<8x128xf32>
    %380 = vector.extract_strided_slice %370 {offsets = [0, 128], sizes = [8, 128], strides = [1, 1]} : vector<8x384xf32> to vector<8x128xf32>
    %381 = arith.addf %379, %380 : vector<8x128xf32>
    %382 = arith.negf %381 : vector<8x128xf32>
    %383 = math.exp %382 : vector<8x128xf32>
    %cst_79 = arith.constant 1.000000e+00 : f32
    %384 = vector.broadcast %cst_79 : f32 to vector<8x128xf32>
    %385 = arith.addf %384, %383 : vector<8x128xf32>
    %386 = arith.divf %384, %385 : vector<8x128xf32>
    %387 = vector.extract_strided_slice %367 {offsets = [0, 256], sizes = [8, 128], strides = [1, 1]} : vector<8x384xf32> to vector<8x128xf32>
    %388 = vector.extract_strided_slice %370 {offsets = [0, 256], sizes = [8, 128], strides = [1, 1]} : vector<8x384xf32> to vector<8x128xf32>
    %389 = arith.mulf %378, %388 : vector<8x128xf32>
    %390 = arith.addf %387, %389 : vector<8x128xf32>
    %391 = math.tanh %390 : vector<8x128xf32>
    %cst_80 = arith.constant 1.000000e+00 : f32
    %392 = vector.broadcast %cst_80 : f32 to vector<8x128xf32>
    %393 = arith.subf %392, %386 : vector<8x128xf32>
    %394 = arith.mulf %393, %391 : vector<8x128xf32>
    %395 = arith.mulf %386, %349 : vector<8x128xf32>
    %396 = arith.addf %394, %395 : vector<8x128xf32>
    %397 = arith.truncf %396 : vector<8x128xf32> to vector<8x128xbf16>
    %cst_81 = arith.constant dense<0.000000e+00> : vector<8x256xf32>
    %398 = tpu.matmul %397, %265, %cst_81 {dimension_numbers = #tpu.dot_dimension_numbers<[1], [0], [0], [1], [0, 0, 1, 1], [], []>} : vector<8x128xbf16>, vector<128x256xbf16>, vector<8x256xf32> -> vector<8x256xf32>
    %399 = arith.addf %398, %271 : vector<8x256xf32>
    %c16 = arith.constant 16 : index
    %c0_82 = arith.constant 0 : index
    %400 = vector.load %arg16[%c16, %c0_82] : memref<64x256xf32, #tpu.memory_space<vmem>>, vector<8x256xf32>
    tpu.vector_store %arg16[%c16, %c0_82], %399 {strides = array<i32>} : memref<64x256xf32, #tpu.memory_space<vmem>>, vector<8x256xf32>,
    %cst_83 = arith.constant dense<0xFF800000> : vector<8xf32>
    %401 = vector.multi_reduction <maximumf>, %399, %cst_83 [1] : vector<8x256xf32> to vector<8xf32>
    %402 = vector.shape_cast %401 : vector<8xf32> to vector<8x1xf32>
    %403 = vector.broadcast %402 : vector<8x1xf32> to vector<8x256xf32>
    %404 = arith.cmpf oeq, %399, %403 : vector<8x256xf32>
    %c256_i32_84 = arith.constant 256 : i32
    %405 = vector.broadcast %c256_i32_84 : i32 to vector<8x256xi32>
    %406 = arith.select %404, %272, %405 : vector<8x256xi1>, vector<8x256xi32>
    %cst_85 = arith.constant dense<2147483647> : vector<8xi32>
    %407 = vector.multi_reduction <minsi>, %406, %cst_85 [1] : vector<8x256xi32> to vector<8xi32>
    %408 = vector.shape_cast %407 : vector<8xi32> to vector<8x1xi32>
    %409 = vector.broadcast %408 : vector<8x1xi32> to vector<8x256xi32>
    %410 = arith.cmpi eq, %272, %409 : vector<8x256xi32>
    %411 = arith.extui %410 : vector<8x256xi1> to vector<8x256xi32>
    %412 = arith.sitofp %411 : vector<8x256xi32> to vector<8x256xf32>
    %413 = arith.truncf %412 : vector<8x256xf32> to vector<8x256xbf16>
    %cst_86 = arith.constant dense<0.000000e+00> : vector<8x384xf32>
    %414 = tpu.matmul %413, %263, %cst_86 {dimension_numbers = #tpu.dot_dimension_numbers<[1], [0], [0], [1], [0, 0, 1, 1], [], []>} : vector<8x256xbf16>, vector<256x384xbf16>, vector<8x384xf32> -> vector<8x384xf32>
    %415 = arith.truncf %396 : vector<8x128xf32> to vector<8x128xbf16>
    %cst_87 = arith.constant dense<0.000000e+00> : vector<8x384xf32>
    %416 = tpu.matmul %415, %264, %cst_87 {dimension_numbers = #tpu.dot_dimension_numbers<[1], [0], [0], [1], [0, 0, 1, 1], [], []>} : vector<8x128xbf16>, vector<128x384xbf16>, vector<8x384xf32> -> vector<8x384xf32>
    %417 = arith.addf %416, %268 : vector<8x384xf32>
    %418 = vector.extract_strided_slice %414 {offsets = [0, 0], sizes = [8, 128], strides = [1, 1]} : vector<8x384xf32> to vector<8x128xf32>
    %419 = vector.extract_strided_slice %417 {offsets = [0, 0], sizes = [8, 128], strides = [1, 1]} : vector<8x384xf32> to vector<8x128xf32>
    %420 = arith.addf %418, %419 : vector<8x128xf32>
    %421 = arith.negf %420 : vector<8x128xf32>
    %422 = math.exp %421 : vector<8x128xf32>
    %cst_88 = arith.constant 1.000000e+00 : f32
    %423 = vector.broadcast %cst_88 : f32 to vector<8x128xf32>
    %424 = arith.addf %423, %422 : vector<8x128xf32>
    %425 = arith.divf %423, %424 : vector<8x128xf32>
    %426 = vector.extract_strided_slice %414 {offsets = [0, 128], sizes = [8, 128], strides = [1, 1]} : vector<8x384xf32> to vector<8x128xf32>
    %427 = vector.extract_strided_slice %417 {offsets = [0, 128], sizes = [8, 128], strides = [1, 1]} : vector<8x384xf32> to vector<8x128xf32>
    %428 = arith.addf %426, %427 : vector<8x128xf32>
    %429 = arith.negf %428 : vector<8x128xf32>
    %430 = math.exp %429 : vector<8x128xf32>
    %cst_89 = arith.constant 1.000000e+00 : f32
    %431 = vector.broadcast %cst_89 : f32 to vector<8x128xf32>
    %432 = arith.addf %431, %430 : vector<8x128xf32>
    %433 = arith.divf %431, %432 : vector<8x128xf32>
    %434 = vector.extract_strided_slice %414 {offsets = [0, 256], sizes = [8, 128], strides = [1, 1]} : vector<8x384xf32> to vector<8x128xf32>
    %435 = vector.extract_strided_slice %417 {offsets = [0, 256], sizes = [8, 128], strides = [1, 1]} : vector<8x384xf32> to vector<8x128xf32>
    %436 = arith.mulf %425, %435 : vector<8x128xf32>
    %437 = arith.addf %434, %436 : vector<8x128xf32>
    %438 = math.tanh %437 : vector<8x128xf32>
    %cst_90 = arith.constant 1.000000e+00 : f32
    %439 = vector.broadcast %cst_90 : f32 to vector<8x128xf32>
    %440 = arith.subf %439, %433 : vector<8x128xf32>
    %441 = arith.mulf %440, %438 : vector<8x128xf32>
    %442 = arith.mulf %433, %396 : vector<8x128xf32>
    %443 = arith.addf %441, %442 : vector<8x128xf32>
    %444 = arith.truncf %443 : vector<8x128xf32> to vector<8x128xbf16>
    %cst_91 = arith.constant dense<0.000000e+00> : vector<8x256xf32>
    %445 = tpu.matmul %444, %265, %cst_91 {dimension_numbers = #tpu.dot_dimension_numbers<[1], [0], [0], [1], [0, 0, 1, 1], [], []>} : vector<8x128xbf16>, vector<128x256xbf16>, vector<8x256xf32> -> vector<8x256xf32>
    %446 = arith.addf %445, %271 : vector<8x256xf32>
    %c24 = arith.constant 24 : index
    %c0_92 = arith.constant 0 : index
    %447 = vector.load %arg16[%c24, %c0_92] : memref<64x256xf32, #tpu.memory_space<vmem>>, vector<8x256xf32>
    tpu.vector_store %arg16[%c24, %c0_92], %446 {strides = array<i32>} : memref<64x256xf32, #tpu.memory_space<vmem>>, vector<8x256xf32>,
    %cst_93 = arith.constant dense<0xFF800000> : vector<8xf32>
    %448 = vector.multi_reduction <maximumf>, %446, %cst_93 [1] : vector<8x256xf32> to vector<8xf32>
    %449 = vector.shape_cast %448 : vector<8xf32> to vector<8x1xf32>
    %450 = vector.broadcast %449 : vector<8x1xf32> to vector<8x256xf32>
    %451 = arith.cmpf oeq, %446, %450 : vector<8x256xf32>
    %c256_i32_94 = arith.constant 256 : i32
    %452 = vector.broadcast %c256_i32_94 : i32 to vector<8x256xi32>
    %453 = arith.select %451, %272, %452 : vector<8x256xi1>, vector<8x256xi32>
    %cst_95 = arith.constant dense<2147483647> : vector<8xi32>
    %454 = vector.multi_reduction <minsi>, %453, %cst_95 [1] : vector<8x256xi32> to vector<8xi32>
    %455 = vector.shape_cast %454 : vector<8xi32> to vector<8x1xi32>
    %456 = vector.broadcast %455 : vector<8x1xi32> to vector<8x256xi32>
    %457 = arith.cmpi eq, %272, %456 : vector<8x256xi32>
    %458 = arith.extui %457 : vector<8x256xi1> to vector<8x256xi32>
    %459 = arith.sitofp %458 : vector<8x256xi32> to vector<8x256xf32>
    %460 = arith.truncf %459 : vector<8x256xf32> to vector<8x256xbf16>
    %cst_96 = arith.constant dense<0.000000e+00> : vector<8x384xf32>
    %461 = tpu.matmul %460, %263, %cst_96 {dimension_numbers = #tpu.dot_dimension_numbers<[1], [0], [0], [1], [0, 0, 1, 1], [], []>} : vector<8x256xbf16>, vector<256x384xbf16>, vector<8x384xf32> -> vector<8x384xf32>
    %462 = arith.truncf %443 : vector<8x128xf32> to vector<8x128xbf16>
    %cst_97 = arith.constant dense<0.000000e+00> : vector<8x384xf32>
    %463 = tpu.matmul %462, %264, %cst_97 {dimension_numbers = #tpu.dot_dimension_numbers<[1], [0], [0], [1], [0, 0, 1, 1], [], []>} : vector<8x128xbf16>, vector<128x384xbf16>, vector<8x384xf32> -> vector<8x384xf32>
    %464 = arith.addf %463, %268 : vector<8x384xf32>
    %465 = vector.extract_strided_slice %461 {offsets = [0, 0], sizes = [8, 128], strides = [1, 1]} : vector<8x384xf32> to vector<8x128xf32>
    %466 = vector.extract_strided_slice %464 {offsets = [0, 0], sizes = [8, 128], strides = [1, 1]} : vector<8x384xf32> to vector<8x128xf32>
    %467 = arith.addf %465, %466 : vector<8x128xf32>
    %468 = arith.negf %467 : vector<8x128xf32>
    %469 = math.exp %468 : vector<8x128xf32>
    %cst_98 = arith.constant 1.000000e+00 : f32
    %470 = vector.broadcast %cst_98 : f32 to vector<8x128xf32>
    %471 = arith.addf %470, %469 : vector<8x128xf32>
    %472 = arith.divf %470, %471 : vector<8x128xf32>
    %473 = vector.extract_strided_slice %461 {offsets = [0, 128], sizes = [8, 128], strides = [1, 1]} : vector<8x384xf32> to vector<8x128xf32>
    %474 = vector.extract_strided_slice %464 {offsets = [0, 128], sizes = [8, 128], strides = [1, 1]} : vector<8x384xf32> to vector<8x128xf32>
    %475 = arith.addf %473, %474 : vector<8x128xf32>
    %476 = arith.negf %475 : vector<8x128xf32>
    %477 = math.exp %476 : vector<8x128xf32>
    %cst_99 = arith.constant 1.000000e+00 : f32
    %478 = vector.broadcast %cst_99 : f32 to vector<8x128xf32>
    %479 = arith.addf %478, %477 : vector<8x128xf32>
    %480 = arith.divf %478, %479 : vector<8x128xf32>
    %481 = vector.extract_strided_slice %461 {offsets = [0, 256], sizes = [8, 128], strides = [1, 1]} : vector<8x384xf32> to vector<8x128xf32>
    %482 = vector.extract_strided_slice %464 {offsets = [0, 256], sizes = [8, 128], strides = [1, 1]} : vector<8x384xf32> to vector<8x128xf32>
    %483 = arith.mulf %472, %482 : vector<8x128xf32>
    %484 = arith.addf %481, %483 : vector<8x128xf32>
    %485 = math.tanh %484 : vector<8x128xf32>
    %cst_100 = arith.constant 1.000000e+00 : f32
    %486 = vector.broadcast %cst_100 : f32 to vector<8x128xf32>
    %487 = arith.subf %486, %480 : vector<8x128xf32>
    %488 = arith.mulf %487, %485 : vector<8x128xf32>
    %489 = arith.mulf %480, %443 : vector<8x128xf32>
    %490 = arith.addf %488, %489 : vector<8x128xf32>
    %491 = arith.truncf %490 : vector<8x128xf32> to vector<8x128xbf16>
    %cst_101 = arith.constant dense<0.000000e+00> : vector<8x256xf32>
    %492 = tpu.matmul %491, %265, %cst_101 {dimension_numbers = #tpu.dot_dimension_numbers<[1], [0], [0], [1], [0, 0, 1, 1], [], []>} : vector<8x128xbf16>, vector<128x256xbf16>, vector<8x256xf32> -> vector<8x256xf32>
    %493 = arith.addf %492, %271 : vector<8x256xf32>
    %c32 = arith.constant 32 : index
    %c0_102 = arith.constant 0 : index
    %494 = vector.load %arg16[%c32, %c0_102] : memref<64x256xf32, #tpu.memory_space<vmem>>, vector<8x256xf32>
    tpu.vector_store %arg16[%c32, %c0_102], %493 {strides = array<i32>} : memref<64x256xf32, #tpu.memory_space<vmem>>, vector<8x256xf32>,
    %cst_103 = arith.constant dense<0xFF800000> : vector<8xf32>
    %495 = vector.multi_reduction <maximumf>, %493, %cst_103 [1] : vector<8x256xf32> to vector<8xf32>
    %496 = vector.shape_cast %495 : vector<8xf32> to vector<8x1xf32>
    %497 = vector.broadcast %496 : vector<8x1xf32> to vector<8x256xf32>
    %498 = arith.cmpf oeq, %493, %497 : vector<8x256xf32>
    %c256_i32_104 = arith.constant 256 : i32
    %499 = vector.broadcast %c256_i32_104 : i32 to vector<8x256xi32>
    %500 = arith.select %498, %272, %499 : vector<8x256xi1>, vector<8x256xi32>
    %cst_105 = arith.constant dense<2147483647> : vector<8xi32>
    %501 = vector.multi_reduction <minsi>, %500, %cst_105 [1] : vector<8x256xi32> to vector<8xi32>
    %502 = vector.shape_cast %501 : vector<8xi32> to vector<8x1xi32>
    %503 = vector.broadcast %502 : vector<8x1xi32> to vector<8x256xi32>
    %504 = arith.cmpi eq, %272, %503 : vector<8x256xi32>
    %505 = arith.extui %504 : vector<8x256xi1> to vector<8x256xi32>
    %506 = arith.sitofp %505 : vector<8x256xi32> to vector<8x256xf32>
    %507 = arith.truncf %506 : vector<8x256xf32> to vector<8x256xbf16>
    %cst_106 = arith.constant dense<0.000000e+00> : vector<8x384xf32>
    %508 = tpu.matmul %507, %263, %cst_106 {dimension_numbers = #tpu.dot_dimension_numbers<[1], [0], [0], [1], [0, 0, 1, 1], [], []>} : vector<8x256xbf16>, vector<256x384xbf16>, vector<8x384xf32> -> vector<8x384xf32>
    %509 = arith.truncf %490 : vector<8x128xf32> to vector<8x128xbf16>
    %cst_107 = arith.constant dense<0.000000e+00> : vector<8x384xf32>
    %510 = tpu.matmul %509, %264, %cst_107 {dimension_numbers = #tpu.dot_dimension_numbers<[1], [0], [0], [1], [0, 0, 1, 1], [], []>} : vector<8x128xbf16>, vector<128x384xbf16>, vector<8x384xf32> -> vector<8x384xf32>
    %511 = arith.addf %510, %268 : vector<8x384xf32>
    %512 = vector.extract_strided_slice %508 {offsets = [0, 0], sizes = [8, 128], strides = [1, 1]} : vector<8x384xf32> to vector<8x128xf32>
    %513 = vector.extract_strided_slice %511 {offsets = [0, 0], sizes = [8, 128], strides = [1, 1]} : vector<8x384xf32> to vector<8x128xf32>
    %514 = arith.addf %512, %513 : vector<8x128xf32>
    %515 = arith.negf %514 : vector<8x128xf32>
    %516 = math.exp %515 : vector<8x128xf32>
    %cst_108 = arith.constant 1.000000e+00 : f32
    %517 = vector.broadcast %cst_108 : f32 to vector<8x128xf32>
    %518 = arith.addf %517, %516 : vector<8x128xf32>
    %519 = arith.divf %517, %518 : vector<8x128xf32>
    %520 = vector.extract_strided_slice %508 {offsets = [0, 128], sizes = [8, 128], strides = [1, 1]} : vector<8x384xf32> to vector<8x128xf32>
    %521 = vector.extract_strided_slice %511 {offsets = [0, 128], sizes = [8, 128], strides = [1, 1]} : vector<8x384xf32> to vector<8x128xf32>
    %522 = arith.addf %520, %521 : vector<8x128xf32>
    %523 = arith.negf %522 : vector<8x128xf32>
    %524 = math.exp %523 : vector<8x128xf32>
    %cst_109 = arith.constant 1.000000e+00 : f32
    %525 = vector.broadcast %cst_109 : f32 to vector<8x128xf32>
    %526 = arith.addf %525, %524 : vector<8x128xf32>
    %527 = arith.divf %525, %526 : vector<8x128xf32>
    %528 = vector.extract_strided_slice %508 {offsets = [0, 256], sizes = [8, 128], strides = [1, 1]} : vector<8x384xf32> to vector<8x128xf32>
    %529 = vector.extract_strided_slice %511 {offsets = [0, 256], sizes = [8, 128], strides = [1, 1]} : vector<8x384xf32> to vector<8x128xf32>
    %530 = arith.mulf %519, %529 : vector<8x128xf32>
    %531 = arith.addf %528, %530 : vector<8x128xf32>
    %532 = math.tanh %531 : vector<8x128xf32>
    %cst_110 = arith.constant 1.000000e+00 : f32
    %533 = vector.broadcast %cst_110 : f32 to vector<8x128xf32>
    %534 = arith.subf %533, %527 : vector<8x128xf32>
    %535 = arith.mulf %534, %532 : vector<8x128xf32>
    %536 = arith.mulf %527, %490 : vector<8x128xf32>
    %537 = arith.addf %535, %536 : vector<8x128xf32>
    %538 = arith.truncf %537 : vector<8x128xf32> to vector<8x128xbf16>
    %cst_111 = arith.constant dense<0.000000e+00> : vector<8x256xf32>
    %539 = tpu.matmul %538, %265, %cst_111 {dimension_numbers = #tpu.dot_dimension_numbers<[1], [0], [0], [1], [0, 0, 1, 1], [], []>} : vector<8x128xbf16>, vector<128x256xbf16>, vector<8x256xf32> -> vector<8x256xf32>
    %540 = arith.addf %539, %271 : vector<8x256xf32>
    %c40 = arith.constant 40 : index
    %c0_112 = arith.constant 0 : index
    %541 = vector.load %arg16[%c40, %c0_112] : memref<64x256xf32, #tpu.memory_space<vmem>>, vector<8x256xf32>
    tpu.vector_store %arg16[%c40, %c0_112], %540 {strides = array<i32>} : memref<64x256xf32, #tpu.memory_space<vmem>>, vector<8x256xf32>,
    %cst_113 = arith.constant dense<0xFF800000> : vector<8xf32>
    %542 = vector.multi_reduction <maximumf>, %540, %cst_113 [1] : vector<8x256xf32> to vector<8xf32>
    %543 = vector.shape_cast %542 : vector<8xf32> to vector<8x1xf32>
    %544 = vector.broadcast %543 : vector<8x1xf32> to vector<8x256xf32>
    %545 = arith.cmpf oeq, %540, %544 : vector<8x256xf32>
    %c256_i32_114 = arith.constant 256 : i32
    %546 = vector.broadcast %c256_i32_114 : i32 to vector<8x256xi32>
    %547 = arith.select %545, %272, %546 : vector<8x256xi1>, vector<8x256xi32>
    %cst_115 = arith.constant dense<2147483647> : vector<8xi32>
    %548 = vector.multi_reduction <minsi>, %547, %cst_115 [1] : vector<8x256xi32> to vector<8xi32>
    %549 = vector.shape_cast %548 : vector<8xi32> to vector<8x1xi32>
    %550 = vector.broadcast %549 : vector<8x1xi32> to vector<8x256xi32>
    %551 = arith.cmpi eq, %272, %550 : vector<8x256xi32>
    %552 = arith.extui %551 : vector<8x256xi1> to vector<8x256xi32>
    %553 = arith.sitofp %552 : vector<8x256xi32> to vector<8x256xf32>
    %554 = arith.truncf %553 : vector<8x256xf32> to vector<8x256xbf16>
    %cst_116 = arith.constant dense<0.000000e+00> : vector<8x384xf32>
    %555 = tpu.matmul %554, %263, %cst_116 {dimension_numbers = #tpu.dot_dimension_numbers<[1], [0], [0], [1], [0, 0, 1, 1], [], []>} : vector<8x256xbf16>, vector<256x384xbf16>, vector<8x384xf32> -> vector<8x384xf32>
    %556 = arith.truncf %537 : vector<8x128xf32> to vector<8x128xbf16>
    %cst_117 = arith.constant dense<0.000000e+00> : vector<8x384xf32>
    %557 = tpu.matmul %556, %264, %cst_117 {dimension_numbers = #tpu.dot_dimension_numbers<[1], [0], [0], [1], [0, 0, 1, 1], [], []>} : vector<8x128xbf16>, vector<128x384xbf16>, vector<8x384xf32> -> vector<8x384xf32>
    %558 = arith.addf %557, %268 : vector<8x384xf32>
    %559 = vector.extract_strided_slice %555 {offsets = [0, 0], sizes = [8, 128], strides = [1, 1]} : vector<8x384xf32> to vector<8x128xf32>
    %560 = vector.extract_strided_slice %558 {offsets = [0, 0], sizes = [8, 128], strides = [1, 1]} : vector<8x384xf32> to vector<8x128xf32>
    %561 = arith.addf %559, %560 : vector<8x128xf32>
    %562 = arith.negf %561 : vector<8x128xf32>
    %563 = math.exp %562 : vector<8x128xf32>
    %cst_118 = arith.constant 1.000000e+00 : f32
    %564 = vector.broadcast %cst_118 : f32 to vector<8x128xf32>
    %565 = arith.addf %564, %563 : vector<8x128xf32>
    %566 = arith.divf %564, %565 : vector<8x128xf32>
    %567 = vector.extract_strided_slice %555 {offsets = [0, 128], sizes = [8, 128], strides = [1, 1]} : vector<8x384xf32> to vector<8x128xf32>
    %568 = vector.extract_strided_slice %558 {offsets = [0, 128], sizes = [8, 128], strides = [1, 1]} : vector<8x384xf32> to vector<8x128xf32>
    %569 = arith.addf %567, %568 : vector<8x128xf32>
    %570 = arith.negf %569 : vector<8x128xf32>
    %571 = math.exp %570 : vector<8x128xf32>
    %cst_119 = arith.constant 1.000000e+00 : f32
    %572 = vector.broadcast %cst_119 : f32 to vector<8x128xf32>
    %573 = arith.addf %572, %571 : vector<8x128xf32>
    %574 = arith.divf %572, %573 : vector<8x128xf32>
    %575 = vector.extract_strided_slice %555 {offsets = [0, 256], sizes = [8, 128], strides = [1, 1]} : vector<8x384xf32> to vector<8x128xf32>
    %576 = vector.extract_strided_slice %558 {offsets = [0, 256], sizes = [8, 128], strides = [1, 1]} : vector<8x384xf32> to vector<8x128xf32>
    %577 = arith.mulf %566, %576 : vector<8x128xf32>
    %578 = arith.addf %575, %577 : vector<8x128xf32>
    %579 = math.tanh %578 : vector<8x128xf32>
    %cst_120 = arith.constant 1.000000e+00 : f32
    %580 = vector.broadcast %cst_120 : f32 to vector<8x128xf32>
    %581 = arith.subf %580, %574 : vector<8x128xf32>
    %582 = arith.mulf %581, %579 : vector<8x128xf32>
    %583 = arith.mulf %574, %537 : vector<8x128xf32>
    %584 = arith.addf %582, %583 : vector<8x128xf32>
    %585 = arith.truncf %584 : vector<8x128xf32> to vector<8x128xbf16>
    %cst_121 = arith.constant dense<0.000000e+00> : vector<8x256xf32>
    %586 = tpu.matmul %585, %265, %cst_121 {dimension_numbers = #tpu.dot_dimension_numbers<[1], [0], [0], [1], [0, 0, 1, 1], [], []>} : vector<8x128xbf16>, vector<128x256xbf16>, vector<8x256xf32> -> vector<8x256xf32>
    %587 = arith.addf %586, %271 : vector<8x256xf32>
    %c48 = arith.constant 48 : index
    %c0_122 = arith.constant 0 : index
    %588 = vector.load %arg16[%c48, %c0_122] : memref<64x256xf32, #tpu.memory_space<vmem>>, vector<8x256xf32>
    tpu.vector_store %arg16[%c48, %c0_122], %587 {strides = array<i32>} : memref<64x256xf32, #tpu.memory_space<vmem>>, vector<8x256xf32>,
    %cst_123 = arith.constant dense<0xFF800000> : vector<8xf32>
    %589 = vector.multi_reduction <maximumf>, %587, %cst_123 [1] : vector<8x256xf32> to vector<8xf32>
    %590 = vector.shape_cast %589 : vector<8xf32> to vector<8x1xf32>
    %591 = vector.broadcast %590 : vector<8x1xf32> to vector<8x256xf32>
    %592 = arith.cmpf oeq, %587, %591 : vector<8x256xf32>
    %c256_i32_124 = arith.constant 256 : i32
    %593 = vector.broadcast %c256_i32_124 : i32 to vector<8x256xi32>
    %594 = arith.select %592, %272, %593 : vector<8x256xi1>, vector<8x256xi32>
    %cst_125 = arith.constant dense<2147483647> : vector<8xi32>
    %595 = vector.multi_reduction <minsi>, %594, %cst_125 [1] : vector<8x256xi32> to vector<8xi32>
    %596 = vector.shape_cast %595 : vector<8xi32> to vector<8x1xi32>
    %597 = vector.broadcast %596 : vector<8x1xi32> to vector<8x256xi32>
    %598 = arith.cmpi eq, %272, %597 : vector<8x256xi32>
    %599 = arith.extui %598 : vector<8x256xi1> to vector<8x256xi32>
    %600 = arith.sitofp %599 : vector<8x256xi32> to vector<8x256xf32>
    %601 = arith.truncf %600 : vector<8x256xf32> to vector<8x256xbf16>
    %cst_126 = arith.constant dense<0.000000e+00> : vector<8x384xf32>
    %602 = tpu.matmul %601, %263, %cst_126 {dimension_numbers = #tpu.dot_dimension_numbers<[1], [0], [0], [1], [0, 0, 1, 1], [], []>} : vector<8x256xbf16>, vector<256x384xbf16>, vector<8x384xf32> -> vector<8x384xf32>
    %603 = arith.truncf %584 : vector<8x128xf32> to vector<8x128xbf16>
    %cst_127 = arith.constant dense<0.000000e+00> : vector<8x384xf32>
    %604 = tpu.matmul %603, %264, %cst_127 {dimension_numbers = #tpu.dot_dimension_numbers<[1], [0], [0], [1], [0, 0, 1, 1], [], []>} : vector<8x128xbf16>, vector<128x384xbf16>, vector<8x384xf32> -> vector<8x384xf32>
    %605 = arith.addf %604, %268 : vector<8x384xf32>
    %606 = vector.extract_strided_slice %602 {offsets = [0, 0], sizes = [8, 128], strides = [1, 1]} : vector<8x384xf32> to vector<8x128xf32>
    %607 = vector.extract_strided_slice %605 {offsets = [0, 0], sizes = [8, 128], strides = [1, 1]} : vector<8x384xf32> to vector<8x128xf32>
    %608 = arith.addf %606, %607 : vector<8x128xf32>
    %609 = arith.negf %608 : vector<8x128xf32>
    %610 = math.exp %609 : vector<8x128xf32>
    %cst_128 = arith.constant 1.000000e+00 : f32
    %611 = vector.broadcast %cst_128 : f32 to vector<8x128xf32>
    %612 = arith.addf %611, %610 : vector<8x128xf32>
    %613 = arith.divf %611, %612 : vector<8x128xf32>
    %614 = vector.extract_strided_slice %602 {offsets = [0, 128], sizes = [8, 128], strides = [1, 1]} : vector<8x384xf32> to vector<8x128xf32>
    %615 = vector.extract_strided_slice %605 {offsets = [0, 128], sizes = [8, 128], strides = [1, 1]} : vector<8x384xf32> to vector<8x128xf32>
    %616 = arith.addf %614, %615 : vector<8x128xf32>
    %617 = arith.negf %616 : vector<8x128xf32>
    %618 = math.exp %617 : vector<8x128xf32>
    %cst_129 = arith.constant 1.000000e+00 : f32
    %619 = vector.broadcast %cst_129 : f32 to vector<8x128xf32>
    %620 = arith.addf %619, %618 : vector<8x128xf32>
    %621 = arith.divf %619, %620 : vector<8x128xf32>
    %622 = vector.extract_strided_slice %602 {offsets = [0, 256], sizes = [8, 128], strides = [1, 1]} : vector<8x384xf32> to vector<8x128xf32>
    %623 = vector.extract_strided_slice %605 {offsets = [0, 256], sizes = [8, 128], strides = [1, 1]} : vector<8x384xf32> to vector<8x128xf32>
    %624 = arith.mulf %613, %623 : vector<8x128xf32>
    %625 = arith.addf %622, %624 : vector<8x128xf32>
    %626 = math.tanh %625 : vector<8x128xf32>
    %cst_130 = arith.constant 1.000000e+00 : f32
    %627 = vector.broadcast %cst_130 : f32 to vector<8x128xf32>
    %628 = arith.subf %627, %621 : vector<8x128xf32>
    %629 = arith.mulf %628, %626 : vector<8x128xf32>
    %630 = arith.mulf %621, %584 : vector<8x128xf32>
    %631 = arith.addf %629, %630 : vector<8x128xf32>
    %632 = arith.truncf %631 : vector<8x128xf32> to vector<8x128xbf16>
    %cst_131 = arith.constant dense<0.000000e+00> : vector<8x256xf32>
    %633 = tpu.matmul %632, %265, %cst_131 {dimension_numbers = #tpu.dot_dimension_numbers<[1], [0], [0], [1], [0, 0, 1, 1], [], []>} : vector<8x128xbf16>, vector<128x256xbf16>, vector<8x256xf32> -> vector<8x256xf32>
    %634 = arith.addf %633, %271 : vector<8x256xf32>
    %c56 = arith.constant 56 : index
    %c0_132 = arith.constant 0 : index
    %635 = vector.load %arg16[%c56, %c0_132] : memref<64x256xf32, #tpu.memory_space<vmem>>, vector<8x256xf32>
    tpu.vector_store %arg16[%c56, %c0_132], %634 {strides = array<i32>} : memref<64x256xf32, #tpu.memory_space<vmem>>, vector<8x256xf32>,
    %c0_133 = arith.constant 0 : index
    %c0_134 = arith.constant 0 : index
    %636 = vector.load %arg16[%c0_133, %c0_134] : memref<64x256xf32, #tpu.memory_space<vmem>>, vector<64x256xf32>
    %cst_135 = arith.constant dense<0xFF800000> : vector<64xf32>
    %637 = vector.multi_reduction <maximumf>, %636, %cst_135 [1] : vector<64x256xf32> to vector<64xf32>
    %638 = vector.shape_cast %637 : vector<64xf32> to vector<64x1xf32>
    %639 = vector.broadcast %638 : vector<64x1xf32> to vector<64x256xf32>
    %640 = arith.subf %636, %639 : vector<64x256xf32>
    %641 = math.exp %640 : vector<64x256xf32>
    %cst_136 = arith.constant dense<0.000000e+00> : vector<64xf32>
    %642 = vector.multi_reduction <add>, %641, %cst_136 [1] : vector<64x256xf32> to vector<64xf32>
    %643 = vector.shape_cast %642 : vector<64xf32> to vector<64x1xf32>
    %644 = math.log %643 : vector<64x1xf32>
    %645 = arith.addf %644, %638 : vector<64x1xf32>
    %646 = vector.broadcast %645 : vector<64x1xf32> to vector<64x256xf32>
    %647 = arith.subf %636, %646 : vector<64x256xf32>
    %c0_137 = arith.constant 0 : index
    %c0_138 = arith.constant 0 : index
    %648 = vector.load %arg12[%c0_137, %c0_138] : memref<64x256xf32, #tpu.memory_space<vmem>>, vector<64x256xf32>
    tpu.vector_store %arg12[%c0_137, %c0_138], %647 {strides = array<i32>} : memref<64x256xf32, #tpu.memory_space<vmem>>, vector<64x256xf32>,
    return
  }
  func.func @transform_0(%arg0: i32) -> (i32, i32) {
    %c0_i32 = arith.constant 0 : i32
    %c0_i32_0 = arith.constant 0 : i32
    %c0_i32_1 = arith.constant 0 : i32
    return %c0_i32, %c0_i32_0 : i32, i32
  }
  func.func @transform_1(%arg0: i32) -> (i32, i32) {
    %c0_i32 = arith.constant 0 : i32
    %c0_i32_0 = arith.constant 0 : i32
    %c0_i32_1 = arith.constant 0 : i32
    return %c0_i32, %c0_i32_0 : i32, i32
  }
  func.func @transform_2(%arg0: i32) -> (i32, i32) {
    %c0_i32 = arith.constant 0 : i32
    %c0_i32_0 = arith.constant 0 : i32
    %c0_i32_1 = arith.constant 0 : i32
    return %c0_i32, %c0_i32_0 : i32, i32
  }
  func.func @transform_3(%arg0: i32) -> (i32, i32) {
    %c0_i32 = arith.constant 0 : i32
    %c0_i32_0 = arith.constant 0 : i32
    %c0_i32_1 = arith.constant 0 : i32
    return %c0_i32, %c0_i32_0 : i32, i32
  }
  func.func @transform_4(%arg0: i32) -> (i32, i32) {
    %c0_i32 = arith.constant 0 : i32
    %c0_i32_0 = arith.constant 0 : i32
    %c0_i32_1 = arith.constant 0 : i32
    return %c0_i32, %c0_i32_0 : i32, i32
  }
  func.func @transform_8(%arg0: i32) -> (i32, i32) {
    %c0_i32 = arith.constant 0 : i32
    %c0_i32_0 = arith.constant 0 : i32
    %c0_i32_1 = arith.constant 0 : i32
    return %c0_i32, %c0_i32_0 : i32, i32
  }
  func.func @transform_9(%arg0: i32) -> (i32, i32) {
    %c0_i32 = arith.constant 0 : i32
    %c0_i32_0 = arith.constant 0 : i32
    %c0_i32_1 = arith.constant 0 : i32
    return %c0_i32, %c0_i32_0 : i32, i32
  }
  func.func @transform_10(%arg0: i32) -> (i32, i32) {
    %c0_i32 = arith.constant 0 : i32
    %c0_i32_0 = arith.constant 0 : i32
    %c0_i32_1 = arith.constant 0 : i32
    return %c0_i32, %c0_i32_0 : i32, i32
  }
  func.func @transform_11(%arg0: i32) -> (i32, i32) {
    %c0_i32 = arith.constant 0 : i32
    %c0_i32_0 = arith.constant 0 : i32
    %c0_i32_1 = arith.constant 0 : i32
    return %c0_i32, %c0_i32_0 : i32, i32
  }
}

</mosaic_0001>

<bundles_post_ra>
// kernel: tpu_custom_call.1
= control target key start
LH: loop header
LB: loop body
LE: loop exit
PB: predicated region body
PF: predicated region fallthrough
CT: control target
= control target key end

     0   :  { %16 = vsyncpa [#allocation8], 0  ;;  %s6938_s0 = inlined_call_operand.hbm [shape: bf16[64,128], index: 0, kind: input, shape index: {}]   ;;  %s6939_s1 = inlined_call_operand.hbm [shape: bf16[128,384], index: 1, kind: input, shape index: {}]   ;;  %s6940_s2 = inlined_call_operand.hbm [shape: bf16[128,384], index: 2, kind: input, shape index: {}]   ;;  %s6941_s3 = inlined_call_operand.hbm [shape: f32[1,384], index: 3, kind: input, shape index: {}]   ;;  %s6942_s4 = inlined_call_operand.vmem [shape: f32[1,384], index: 4, kind: input, shape index: {}]   ;;  %s6943_s5 = inlined_call_operand.hbm [shape: bf16[256,384], index: 5, kind: input, shape index: {}]   ;;  %s6944_s6 = inlined_call_operand.hbm [shape: bf16[128,384], index: 6, kind: input, shape index: {}]   ;;  %s6945_s7 = inlined_call_operand.hbm [shape: bf16[128,256], index: 7, kind: input, shape index: {}]   ;;  %s6946_s8 = inlined_call_operand.vmem [shape: f32[1,384], index: 8, kind: input, shape index: {}]   ;;  %s6947_s9 = inlined_call_operand.vmem [shape: f32[1,256], index: 9, kind: input, shape index: {}]   ;;  %s6948_s10 = inlined_call_operand.hbm [shape: f32[8,384], index: 10, kind: input, shape index: {}]   ;;  %s6949_s11 = inlined_call_operand.hbm [shape: f32[64,256], index: 11, kind: output, shape index: {}]  }
   0x1   :  { %17 = vsyncpa [#allocation11], 0 }
   0x2   :  { %18 = vsyncpa [#allocation14], 0  ;;  %s37_s19 = sshll.u32 %s6939_s1, 4  ;;  %s38_s19 = int_to_ptr.hbm [resolvable:$true] %s37_s19 }
   0x3   :  { %19 = vsyncpa [#allocation9], 0  ;;  %s5087_s20 = smov [#allocation10]   ;;  %s64_s24 = sshll.u32 %s6941_s3, 4  ;;  %s65_s24 = int_to_ptr.hbm [resolvable:$true] %s64_s24 }
   0x4   :  { %s39_s21 = sshll.u32 %s5087_s20, 4  ;;  %s5088_s25 = smov 192   ;;  %s40_s21 = int_to_ptr.vmem [resolvable:$true] %s39_s21 }
   0x5   :  { %s5089_s26 = smov 12   ;;  %s5090_s27 = smov [#allocation13]  }
   0x6   :  { %45 = dma.hbm_to_vmem [thread:$0]  %s38_s19, 3072, %s40_s21, [#allocation11], %s5088_s25, %s5088_s25, %s5089_s26  }
   0x7   :  { %s66_s28 = sshll.u32 %s5090_s27, 4  ;;  %s24_s12 = sshll.u32 %s6938_s0, 4  ;;  %s67_s28 = int_to_ptr.vmem [resolvable:$true] %s66_s28  ;;  %s25_s12 = int_to_ptr.hbm [resolvable:$true] %s24_s12 }
   0x8   :  { %69 = dma.hbm_to_vmem [thread:$0]  %s65_s24, 48, %s67_s28, [#allocation14]  }
   0x9   :  { %s5091_s1 = smov [#allocation7]   ;;  %s50_s3 = sshll.u32 %s6940_s2, 4  ;;  %s51_s3 = int_to_ptr.hbm [resolvable:$true] %s50_s3 }
   0xa   :  { %s26_s13 = sshll.u32 %s5091_s1, 4  ;;  %s5092_s16 = smov 64   ;;  %s27_s13 = int_to_ptr.vmem [resolvable:$true] %s26_s13 }
   0xb   :  { %s5093_s17 = smov 4   ;;  %s5094_s18 = smov [#allocation12]  }
   0xc   :  { %32 = dma.hbm_to_vmem [thread:$0]  %s25_s12, 512, %s27_s13, [#allocation8], %s5092_s16, %s5092_s16, %s5093_s17  }
   0xd   :  { %s52_s19 = sshll.u32 %s5094_s18, 4  ;;  %s81_s0 = sshll.u32 %s6948_s10, 4  ;;  %s53_s19 = int_to_ptr.vmem [resolvable:$true] %s52_s19  ;;  %s82_s0 = int_to_ptr.hbm [resolvable:$true] %s81_s0 }
   0xe   :  { %58 = dma.hbm_to_vmem [thread:$0]  %s51_s3, 3072, %s53_s19, [#allocation11], %s5088_s25, %s5088_s25, %s5089_s26  }
   0xf   :  { %s5095_s22 = smov [#allocation15]  }
  0x10   :  { %s83_s23 = sshll.u32 %s5095_s22, 4  ;;  %s84_s23 = int_to_ptr.vmem [resolvable:$true] %s83_s23 }
  0x11   :  { %86 = dma.hbm_to_vmem [thread:$0]  %s82_s0, 384, %s84_s23, [#allocation14]  }
  0x12   :  { %5073 = dma.done.wait [#allocation8], 512  }
  0x13   :  { %5074 = vsyncadd [#allocation8], 4294966784 }
  0x14   :  { %5075 = dma.done.wait [#allocation11], 6144  }
  0x15   :  { %5076 = vsyncadd [#allocation11], 4294961152 }
  0x16   :  { %5077 = dma.done.wait [#allocation14], 432  }
  0x17   :  { %5078 = vsyncadd [#allocation14], 4294966864  ;;  %v3901_v0 = vld [vmem:[#allocation10 + $0xa8] sm:$0xf]  ;;  %v4518_v1 = vld [vmem:[#allocation10 + $0xb0] sm:$0xf0] }
  0x18   :  { %v3997_v2 = vld [vmem:[#allocation12 + $0xa8] sm:$0xf]  ;;  %v3902_v3 = vor.u32 %v4518_v1, %v3901_v0  ;;  %v4542_v4 = vld [vmem:[#allocation12 + $0xb0] sm:$0xf0]  ;;  %v3889_v5 = vld [vmem:[#allocation10 + $0x90] sm:$0xf] }
  0x19   :  { %v4515_v6 = vld [vmem:[#allocation10 + $0x98] sm:$0xf0]  ;;  %v5179_v7 = vor.u32 %v4542_v4, %v3997_v2  ;;  %v3985_v8 = vld [vmem:[#allocation12 + $0x90] sm:$0xf]  ;;  %v3877_v12 = vld [vmem:[#allocation10 + $0x78] sm:$0xf] }
  0x1a   :  { %v4539_v9 = vld [vmem:[#allocation12 + $0x98] sm:$0xf0]  ;;  %349 = vmatpush.bf16.msra.mxu0 %v3902_v3  ;;  %v3890_v10 = vor.u32 %v4515_v6, %v3889_v5  ;;  %v4512_v13 = vld [vmem:[#allocation10 + $0x80] sm:$0xf0]  ;;  %v3973_v14 = vld [vmem:[#allocation12 + $0x78] sm:$0xf] }
  0x1b   :  { %604 = vmatpush.bf16.msra.mxu3 %v5179_v7  ;;  %v5182_v11 = vor.u32 %v4539_v9, %v3985_v8  ;;  %v4536_v15 = vld [vmem:[#allocation12 + $0x80] sm:$0xf0]  ;;  %v3878_v16 = vor.u32 %v4512_v13, %v3877_v12  ;;  %v3865_v18 = vld [vmem:[#allocation10 + $0x60] sm:$0xf]  ;;  %v4509_v19 = vld [vmem:[#allocation10 + $0x68] sm:$0xf0] }
  0x1c   :  { %v5185_v17 = vor.u32 %v4536_v15, %v3973_v14  ;;  %v3961_v20 = vld [vmem:[#allocation12 + $0x60] sm:$0xf]  ;;  %v4533_v21 = vld [vmem:[#allocation12 + $0x68] sm:$0xf0]  ;;  %v3866_v22 = vor.u32 %v4509_v19, %v3865_v18  ;;  %v3853_v24 = vld [vmem:[#allocation10 + $0x48] sm:$0xf] }
  0x1d   :  { %v5188_v23 = vor.u32 %v4533_v21, %v3961_v20  ;;  %v4506_v25 = vld [vmem:[#allocation10 + $0x50] sm:$0xf0]  ;;  %v3949_v26 = vld [vmem:[#allocation12 + $0x48] sm:$0xf]  ;;  %v4517_v28 = vld [vmem:[#allocation10 + $0xac] sm:$0xf] }
  0x1e   :  { %350 = vmatpush.bf16.msra.mxu0 %v3890_v10  ;;  %v4530_v27 = vld [vmem:[#allocation12 + $0x50] sm:$0xf0]  ;;  %v3903_v29 = vld [vmem:[#allocation10 + $0xb4] sm:$0xf0]  ;;  %v3891_v32 = vld [vmem:[#allocation10 + $0x9c] sm:$0xf0]  ;;  %v3854_v33 = vor.u32 %v4506_v25, %v3853_v24 }
  0x1f   :  { %605 = vmatpush.bf16.msra.mxu3 %v5182_v11  ;;  %v3906_v30 = vor.u32 %v4517_v28, %v3903_v29  ;;  %v4514_v31 = vld [vmem:[#allocation10 + $0x94] sm:$0xf]  ;;  %v5191_v34 = vor.u32 %v4530_v27, %v3949_v26  ;;  %v3841_v35 = vld [vmem:[#allocation10 + $0x30] sm:$0xf]  ;;  %v4503_v36 = vld [vmem:[#allocation10 + $0x38] sm:$0xf0] }
  0x20   :  { %v3937_v37 = vld [vmem:[#allocation12 + $0x30] sm:$0xf]  ;;  %v3894_v38 = vor.u32 %v4514_v31, %v3891_v32  ;;  %v4527_v39 = vld [vmem:[#allocation12 + $0x38] sm:$0xf0]  ;;  %v3879_v41 = vld [vmem:[#allocation10 + $0x84] sm:$0xf0]  ;;  %v3842_v42 = vor.u32 %v4503_v36, %v3841_v35 }
  0x21   :  { %378 = vmatpush.bf16.msra.mxu1 %v3906_v30  ;;  %v4511_v40 = vld [vmem:[#allocation10 + $0x7c] sm:$0xf]  ;;  %v3829_v43 = vld [vmem:[#allocation10 + $0x18] sm:$0xf]  ;;  %v4500_v44 = vld [vmem:[#allocation10 + $0x20] sm:$0xf0]  ;;  %v5194_v45 = vor.u32 %v4527_v39, %v3937_v37 }
  0x22   :  { %351 = vmatpush.bf16.msra.mxu0 %v3878_v16  ;;  %v3925_v46 = vld [vmem:[#allocation12 + $0x18] sm:$0xf]  ;;  %v4524_v47 = vld [vmem:[#allocation12 + $0x20] sm:$0xf0]  ;;  %v3882_v48 = vor.u32 %v4511_v40, %v3879_v41  ;;  %v3867_v50 = vld [vmem:[#allocation10 + $0x6c] sm:$0xf0]  ;;  %v3830_v54 = vor.u32 %v4500_v44, %v3829_v43 }
  0x23   :  { %606 = vmatpush.bf16.msra.mxu3 %v5185_v17  ;;  %v4508_v49 = vld [vmem:[#allocation10 + $0x64] sm:$0xf]  ;;  %v3909_v51 = vld [vmem:[#allocation10 + $0xb0] sm:$0xf]  ;;  %v4519_v52 = vld [vmem:[#allocation10 + $0xb8] sm:$0xf0]  ;;  %v5197_v58 = vor.u32 %v4524_v47, %v3925_v46 }
  0x24   :  { %v3910_v53 = vor.u32 %v4519_v52, %v3909_v51  ;;  %v3817_v55 = vld [vmem:[#allocation10] sm:$0xf]  ;;  %v4497_v56 = vld [vmem:[#allocation10 + $0x8] sm:$0xf0]  ;;  %v3999_v61 = vld [vmem:[#allocation12 + $0xb4] sm:$0xf0]  ;;  %v3870_v62 = vor.u32 %v4508_v49, %v3867_v50 }
  0x25   :  { %379 = vmatpush.bf16.msra.mxu1 %v3894_v38  ;;  %v3913_v57 = vld [vmem:[#allocation12] sm:$0xf]  ;;  %v4521_v59 = vld [vmem:[#allocation12 + $0x8] sm:$0xf0]  ;;  %v4005_v63 = vld [vmem:[#allocation12 + $0xb0] sm:$0xf]  ;;  %v3818_v5 = vor.u32 %v4497_v56, %v3817_v55 }
  0x26   :  { %352 = vmatpush.bf16.msra.mxu0 %v3866_v22  ;;  %v4541_v60 = vld [vmem:[#allocation12 + $0xac] sm:$0xf]  ;;  %v4543_v0 = vld [vmem:[#allocation12 + $0xb8] sm:$0xf0]  ;;  %407 = vmatpush.bf16.msra.mxu2 %v3910_v53  ;;  %v3897_v1 = vld [vmem:[#allocation10 + $0x98] sm:$0xf]  ;;  %v5200_v8 = vor.u32 %v4521_v59, %v3913_v57 }
  0x27   :  { %607 = vmatpush.bf16.msra.mxu3 %v5188_v23  ;;  %v4505_v2 = vld [vmem:[#allocation10 + $0x4c] sm:$0xf]  ;;  %v3855_v3 = vld [vmem:[#allocation10 + $0x54] sm:$0xf0]  ;;  %v4516_v4 = vld [vmem:[#allocation10 + $0xa0] sm:$0xf0]  ;;  %v5204_v10 = vor.u32 %v4543_v0, %v4005_v63  ;;  %v5206_v14 = vor.u32 %v4541_v60, %v3999_v61 }
  0x28   :  { %v3898_v6 = vor.u32 %v4516_v4, %v3897_v1  ;;  %v5202_v9 = vld [vmem:[#allocation7] sm:$0xff]  ;;  %v4538_v12 = vld [vmem:[#allocation12 + $0x94] sm:$0xf]  ;;  %v3993_v13 = vld [vmem:[#allocation12 + $0x98] sm:$0xf]  ;;  %v3858_v16 = vor.u32 %v4505_v2, %v3855_v3  ;;  %v5096_v38 = vmov 0  }
  0x29   :  { %380 = vmatpush.bf16.msra.mxu1 %v3882_v48  ;;  %v4540_v15 = vld [vmem:[#allocation12 + $0xa0] sm:$0xf0]  ;;  %v3885_v18 = vld [vmem:[#allocation10 + $0x80] sm:$0xf]  ;;  %v4513_v19 = vld [vmem:[#allocation10 + $0x88] sm:$0xf0] }
  0x2a   :  { %353 = vmatpush.bf16.msra.mxu0 %v3854_v33  ;;  %408 = vmatpush.bf16.msra.mxu2 %v3898_v6  ;;  %v3987_v20 = vld [vmem:[#allocation12 + $0x9c] sm:$0xf0]  ;;  %v4502_v21 = vld [vmem:[#allocation10 + $0x34] sm:$0xf]  ;;  %v3886_v24 = vor.u32 %v4513_v19, %v3885_v18  ;;  %v4535_v25 = vld [vmem:[#allocation12 + $0x7c] sm:$0xf]  ;;  %v5210_v26 = vor.u32 %v4540_v15, %v3993_v13 }
  0x2b   :  { %608 = vmatpush.bf16.msra.mxu3 %v5191_v34  ;;  %v3843_v22 = vld [vmem:[#allocation10 + $0x3c] sm:$0xf0]  ;;  %v5213_v28 = vor.u32 %v4538_v12, %v3987_v20  ;;  %v4537_v29 = vld [vmem:[#allocation12 + $0x88] sm:$0xf0]  ;;  %v3873_v31 = vld [vmem:[#allocation10 + $0x68] sm:$0xf] }
  0x2c   :  { %v3981_v27 = vld [vmem:[#allocation12 + $0x80] sm:$0xf]  ;;  %v3846_v30 = vor.u32 %v4502_v21, %v3843_v22  ;;  %v4510_v32 = vld [vmem:[#allocation10 + $0x70] sm:$0xf0]  ;;  %v3975_v33 = vld [vmem:[#allocation12 + $0x84] sm:$0xf0] }
  0x2d   :  { %381 = vmatpush.bf16.msra.mxu1 %v3870_v62  ;;  %v4499_v35 = vld [vmem:[#allocation10 + $0x1c] sm:$0xf]  ;;  %v3831_v36 = vld [vmem:[#allocation10 + $0x24] sm:$0xf0]  ;;  %v3874_v37 = vor.u32 %v4510_v32, %v3873_v31  ;;  %v3861_v39 = vld [vmem:[#allocation10 + $0x50] sm:$0xf]  ;;  %v5218_v41 = vor.u32 %v4537_v29, %v3981_v27 }
  0x2e   :  { %354 = vmatpush.bf16.msra.mxu0 %v3842_v42  ;;  %409 = vmatpush.bf16.msra.mxu2 %v3886_v24  ;;  %v4507_v40 = vld [vmem:[#allocation10 + $0x58] sm:$0xf0]  ;;  %v5221_v42 = vor.u32 %v4535_v25, %v3975_v33  ;;  %v4532_v43 = vld [vmem:[#allocation12 + $0x64] sm:$0xf]  ;;  %v3969_v44 = vld [vmem:[#allocation12 + $0x68] sm:$0xf]  ;;  %v3834_v47 = vor.u32 %v4499_v35, %v3831_v36 }
  0x2f   :  { %609 = vmatpush.bf16.msra.mxu3 %v5194_v45  ;;  %v4534_v46 = vld [vmem:[#allocation12 + $0x70] sm:$0xf0]  ;;  %v3963_v48 = vld [vmem:[#allocation12 + $0x6c] sm:$0xf0]  ;;  %v4496_v49 = vld [vmem:[#allocation10 + $0x4] sm:$0xf]  ;;  %v3862_v51 = vor.u32 %v4507_v40, %v3861_v39 }
  0x30   :  { %v3819_v50 = vld [vmem:[#allocation10 + $0xc] sm:$0xf0]  ;;  %v3849_v52 = vld [vmem:[#allocation10 + $0x38] sm:$0xf]  ;;  %v4504_v53 = vld [vmem:[#allocation10 + $0x40] sm:$0xf0]  ;;  %v5227_v55 = vor.u32 %v4532_v43, %v3963_v48 }
  0x31   :  { %382 = vmatpush.bf16.msra.mxu1 %v3858_v16  ;;  %v3822_v56 = vor.u32 %v4496_v49, %v3819_v50  ;;  %v3957_v57 = vld [vmem:[#allocation12 + $0x50] sm:$0xf]  ;;  %v4531_v59 = vld [vmem:[#allocation12 + $0x58] sm:$0xf0]  ;;  %v4529_v60 = vld [vmem:[#allocation12 + $0x4c] sm:$0xf]  ;;  %v3850_v62 = vor.u32 %v4504_v53, %v3849_v52 }
  0x32   :  { %355 = vmatpush.bf16.msra.mxu0 %v3830_v54  ;;  %410 = vmatpush.bf16.msra.mxu2 %v3874_v37  ;;  %v5224_v54 = vor.u32 %v4534_v46, %v3969_v44  ;;  %v3951_v61 = vld [vmem:[#allocation12 + $0x54] sm:$0xf0]  ;;  %v3837_v63 = vld [vmem:[#allocation10 + $0x20] sm:$0xf]  ;;  %v4501_v0 = vld [vmem:[#allocation10 + $0x28] sm:$0xf0]  ;;  %v5230_v1 = vor.u32 %v4531_v59, %v3957_v57 }
  0x33   :  { %610 = vmatpush.bf16.msra.mxu3 %v5197_v58  ;;  %v5233_v2 = vor.u32 %v4529_v60, %v3951_v61  ;;  %v3945_v3 = vld [vmem:[#allocation12 + $0x38] sm:$0xf]  ;;  %v4528_v4 = vld [vmem:[#allocation12 + $0x40] sm:$0xf0]  ;;  %v4526_v6 = vld [vmem:[#allocation12 + $0x34] sm:$0xf]  ;;  %v3838_v13 = vor.u32 %v4501_v0, %v3837_v63 }
  0x34   :  { %v3939_v12 = vld [vmem:[#allocation12 + $0x3c] sm:$0xf0]  ;;  %v5238_v15 = vor.u32 %v4528_v4, %v3945_v3  ;;  %v4523_v18 = vld [vmem:[#allocation12 + $0x1c] sm:$0xf]  ;;  %v3825_v19 = vld [vmem:[#allocation10 + $0x8] sm:$0xf] }
  0x35   :  { %383 = vmatpush.bf16.msra.mxu1 %v3846_v30  ;;  %v5241_v16 = vor.u32 %v4526_v6, %v3939_v12  ;;  %v4498_v20 = vld [vmem:[#allocation10 + $0x10] sm:$0xf0]  ;;  %v3927_v21 = vld [vmem:[#allocation12 + $0x24] sm:$0xf0]  ;;  %v3933_v22 = vld [vmem:[#allocation12 + $0x20] sm:$0xf] }
  0x36   :  { %356 = vmatpush.bf16.msra.mxu0 %v3818_v5  ;;  %411 = vmatpush.bf16.msra.mxu2 %v3862_v51  ;;  %v4493_v5 = vld [vmem:[#allocation7 + $0x8] sm:$0xff]  ;;  %v3826_v25 = vor.u32 %v4498_v20, %v3825_v19  ;;  %v5248_v29 = vor.u32 %v4523_v18, %v3927_v21  ;;  %v4522_v31 = vld [vmem:[#allocation12 + $0x10] sm:$0xf0]  ;;  %v4520_v32 = vld [vmem:[#allocation12 + $0x4] sm:$0xf]  ;;  %s115_s25 = sshll.u32 %s6943_s5, 4  ;;  %s116_s25 = int_to_ptr.hbm [resolvable:$true] %s115_s25 }
  0x37   :  { %611 = vmatpush.bf16.msra.mxu3 %v5200_v8  ;;  %v4525_v24 = vld [vmem:[#allocation12 + $0x28] sm:$0xf0]  ;;  %v3921_v30 = vld [vmem:[#allocation12 + $0x8] sm:$0xf]  ;;  %v3915_v33 = vld [vmem:[#allocation12 + $0xc] sm:$0xf0] }
  0x38   :  { %v5245_v27 = vor.u32 %v4525_v24, %v3933_v22  ;;  %v5253_v35 = vor.u32 %v4522_v31, %v3921_v30  ;;  %v5256_v36 = vor.u32 %v4520_v32, %v3915_v33  ;;  %v4494_v37 = vld [vmem:[#allocation7 + $0x10] sm:$0xff]  ;;  %v189_v39 = vld [vmem:[#allocation13] sm:$0x7]  ;;  %s5097_s26 = smov [#allocation2]   ;;  %s129_s30 = sshll.u32 %s6944_s6, 4  ;;  %s130_s30 = int_to_ptr.hbm [resolvable:$true] %s129_s30 }
  0x39   :  { %357 = vmatmul.bf16.vlgmr.msra.gmra.mxu0 %v5202_v9  ;;  %384 = vmatpush.bf16.msra.mxu1 %v3834_v47  ;;  %v468_v40 = vld [vmem:[%s6942_s4] sm:$0x7]  ;;  %v191_v43 = vperm.slane %v189_v39, 0  ;;  %v5335_v63 = vperm.slane %v189_v39, 1  ;;  %v5341_v12 = vperm.slane %v189_v39, 2  ;;  %s117_s27 = sshll.u32 %s5097_s26, 4  ;;  %s118_s27 = int_to_ptr.vmem [resolvable:$true] %s117_s27 }
  0x3a   :  { %630 = vmatpush.bf16.msrb.mxu0 %v5204_v10  ;;  %612 = vmatmul.bf16.vlgmr.msra.gmra.mxu3 %v5096_v38  ;;  %v5326_v47 = vperm.slane %v468_v40, 0  ;;  %120 = dma.hbm_to_vmem [thread:$0]  %s116_s25, 6144, %s118_s27, [#allocation6] }
  0x3b   :  { %617 = vmatpush.bf16.msrb.mxu3 %v5206_v14  ;;  %412 = vmatpush.bf16.msra.mxu2 %v3850_v62  ;;  %7134 = vst [vmem:[#allocation32_spill] sm:$0xff] %v5341_v12  ;;  %s5098_s12 = smov [#allocation3]   ;;  %s143_s15 = sshll.u32 %s6945_s7, 4  ;;  %s144_s15 = int_to_ptr.hbm [resolvable:$true] %s143_s15 }
  0x3c   :  { %s131_s1 = sshll.u32 %s5098_s12, 4  ;;  %s5099_s5 = smov [#allocation4]   ;;  %s132_s1 = int_to_ptr.vmem [resolvable:$true] %s131_s1 }
  0x3d   :  { %385 = vmatpush.bf16.msra.mxu1 %v3822_v56  ;;  %134 = dma.hbm_to_vmem [thread:$0]  %s130_s30, 3072, %s132_s1, [#allocation6 + $0x1] }
  0x3e   :  { %631 = vmatpush.bf16.msrb.mxu0 %v5210_v26  ;;  %s145_s3 = sshll.u32 %s5099_s5, 4  ;;  %s146_s3 = int_to_ptr.vmem [resolvable:$true] %s145_s3 }
  0x3f   :  { %618 = vmatpush.bf16.msrb.mxu3 %v5213_v28  ;;  %413 = vmatpush.bf16.msra.mxu2 %v3838_v13  ;;  %148 = dma.hbm_to_vmem [thread:$0]  %s144_s15, 2048, %s146_s3, [#allocation6 + $0x2] }
  0x40   :  { %386 = vmatmul.bf16.vlgmr.msra.gmra.mxu1 %v5202_v9 }
  0x41   :  { %691 = vmatpush.bf16.msrb.mxu1 %v5179_v7 }
  0x42   :  { %632 = vmatpush.bf16.msrb.mxu0 %v5218_v41 }
  0x43   :  { %619 = vmatpush.bf16.msrb.mxu3 %v5221_v42  ;;  %414 = vmatpush.bf16.msra.mxu2 %v3826_v25 }
  0x45   :  { %692 = vmatpush.bf16.msrb.mxu1 %v5182_v11 }
  0x46   :  { %633 = vmatpush.bf16.msrb.mxu0 %v5224_v54  ;;  %415 = vmatmul.bf16.vlgmr.msra.gmra.mxu2 %v5202_v9  ;;  %v4495_v9 = vld [vmem:[#allocation7 + $0x18] sm:$0xff] }
  0x47   :  { %620 = vmatpush.bf16.msrb.mxu3 %v5227_v55  ;;  %704 = vmatpush.bf16.msrb.mxu2 %v5206_v14 }
  0x49   :  { %362 = vmatmul.bf16.gmra.mxu0 %v4493_v5  ;;  %693 = vmatpush.bf16.msrb.mxu1 %v5185_v17 }
  0x4a   :  { %634 = vmatpush.bf16.msrb.mxu0 %v5230_v1 }
  0x4b   :  { %621 = vmatpush.bf16.msrb.mxu3 %v5233_v2  ;;  %705 = vmatpush.bf16.msrb.mxu2 %v5213_v28 }
  0x4d   :  { %694 = vmatpush.bf16.msrb.mxu1 %v5188_v23 }
  0x4e   :  { %635 = vmatpush.bf16.msrb.mxu0 %v5238_v15 }
  0x4f   :  { %622 = vmatpush.bf16.msrb.mxu3 %v5241_v16  ;;  %706 = vmatpush.bf16.msrb.mxu2 %v5221_v42 }
  0x50   :  { %391 = vmatmul.bf16.gmra.mxu1 %v4493_v5 }
  0x51   :  { %695 = vmatpush.bf16.msrb.mxu1 %v5191_v34 }
  0x52   :  { %636 = vmatpush.bf16.msrb.mxu0 %v5245_v27 }
  0x53   :  { %623 = vmatpush.bf16.msrb.mxu3 %v5248_v29  ;;  %707 = vmatpush.bf16.msrb.mxu2 %v5227_v55 }
  0x55   :  { %696 = vmatpush.bf16.msrb.mxu1 %v5194_v45 }
  0x56   :  { %637 = vmatpush.bf16.msrb.mxu0 %v5253_v35  ;;  %420 = vmatmul.bf16.gmra.mxu2 %v4493_v5  ;;  %v5339_v5 = vperm.slane %v468_v40, 1 }
  0x57   :  { %624 = vmatpush.bf16.msrb.mxu3 %v5256_v36  ;;  %708 = vmatpush.bf16.msrb.mxu2 %v5233_v2 }
  0x59   :  { %367 = vmatmul.bf16.gmra.mxu0 %v4494_v37  ;;  %697 = vmatpush.bf16.msrb.mxu1 %v5197_v58 }
  0x5a   :  { %778 = vmatpush.bf16.msra.mxu0 %v5179_v7  ;;  %625 = vmatmul.bf16.vlgmr.msrb.gmra.mxu3 %v5096_v38 }
  0x5b   :  { %717 = vmatpush.bf16.msra.mxu3 %v5204_v10  ;;  %709 = vmatpush.bf16.msrb.mxu2 %v5241_v16 }
  0x5d   :  { %698 = vmatpush.bf16.msrb.mxu1 %v5200_v8 }
  0x5e   :  { %779 = vmatpush.bf16.msra.mxu0 %v5182_v11 }
  0x5f   :  { %718 = vmatpush.bf16.msra.mxu3 %v5210_v26  ;;  %710 = vmatpush.bf16.msrb.mxu2 %v5248_v29 }
  0x60   :  { %396 = vmatmul.bf16.gmra.mxu1 %v4494_v37 }
  0x61   :  { %791 = vmatpush.bf16.msra.mxu1 %v5206_v14 }
  0x62   :  { %780 = vmatpush.bf16.msra.mxu0 %v5185_v17 }
  0x63   :  { %719 = vmatpush.bf16.msra.mxu3 %v5218_v41  ;;  %711 = vmatpush.bf16.msrb.mxu2 %v5256_v36 }
  0x65   :  { %792 = vmatpush.bf16.msra.mxu1 %v5213_v28 }
  0x66   :  { %781 = vmatpush.bf16.msra.mxu0 %v5188_v23  ;;  %425 = vmatmul.bf16.gmra.mxu2 %v4494_v37 }
  0x67   :  { %720 = vmatpush.bf16.msra.mxu3 %v5224_v54  ;;  %804 = vmatpush.bf16.msra.mxu2 %v5204_v10 }
  0x69   :  { %372 = vmatmul.bf16.gmra.mxu0 %v4495_v9  ;;  %793 = vmatpush.bf16.msra.mxu1 %v5221_v42 }
  0x6a   :  { %782 = vmatpush.bf16.msra.mxu0 %v5191_v34 }
  0x6b   :  { %721 = vmatpush.bf16.msra.mxu3 %v5230_v1  ;;  %805 = vmatpush.bf16.msra.mxu2 %v5210_v26 }
  0x6d   :  { %794 = vmatpush.bf16.msra.mxu1 %v5227_v55 }
  0x6e   :  { %783 = vmatpush.bf16.msra.mxu0 %v5194_v45 }
  0x6f   :  { %722 = vmatpush.bf16.msra.mxu3 %v5238_v15  ;;  %806 = vmatpush.bf16.msra.mxu2 %v5218_v41 }
  0x70   :  { %401 = vmatmul.bf16.gmra.mxu1 %v4495_v9 }
  0x71   :  { %795 = vmatpush.bf16.msra.mxu1 %v5233_v2 }
  0x72   :  { %784 = vmatpush.bf16.msra.mxu0 %v5197_v58 }
  0x73   :  { %723 = vmatpush.bf16.msra.mxu3 %v5245_v27  ;;  %807 = vmatpush.bf16.msra.mxu2 %v5224_v54 }
  0x75   :  { %796 = vmatpush.bf16.msra.mxu1 %v5241_v16 }
  0x76   :  { %785 = vmatpush.bf16.msra.mxu0 %v5200_v8  ;;  %430 = vmatmul.bf16.gmra.mxu2 %v4495_v9 }
  0x77   :  { %724 = vmatpush.bf16.msra.mxu3 %v5253_v35  ;;  %808 = vmatpush.bf16.msra.mxu2 %v5230_v1 }
  0x79   :  { %638 = vmatmul.bf16.vlgmr.msrb.gmra.mxu0 %v5096_v38  ;;  %797 = vmatpush.bf16.msra.mxu1 %v5248_v29 }
  0x7a   :  { %878 = vmatpush.bf16.msrb.mxu0 %v5206_v14 }
  0x7b   :  { %865 = vmatpush.bf16.msrb.mxu3 %v5179_v7  ;;  %809 = vmatpush.bf16.msra.mxu2 %v5238_v15 }
  0x7d   :  { %798 = vmatpush.bf16.msra.mxu1 %v5256_v36 }
  0x7e   :  { %879 = vmatpush.bf16.msrb.mxu0 %v5213_v28 }
  0x7f   :  { %866 = vmatpush.bf16.msrb.mxu3 %v5182_v11  ;;  %810 = vmatpush.bf16.msra.mxu2 %v5245_v27 }
  0x82   :  { %880 = vmatpush.bf16.msrb.mxu0 %v5221_v42 }
  0x83   :  { %867 = vmatpush.bf16.msrb.mxu3 %v5185_v17  ;;  %811 = vmatpush.bf16.msra.mxu2 %v5253_v35 }
  0x86   :  { %881 = vmatpush.bf16.msrb.mxu0 %v5227_v55 }
  0x87   :  { %868 = vmatpush.bf16.msrb.mxu3 %v5188_v23 }
  0x8a   :  { %882 = vmatpush.bf16.msrb.mxu0 %v5233_v2 }
  0x8b   :  { %869 = vmatpush.bf16.msrb.mxu3 %v5191_v34 }
  0x8e   :  { %883 = vmatpush.bf16.msrb.mxu0 %v5241_v16 }
  0x8f   :  { %870 = vmatpush.bf16.msrb.mxu3 %v5194_v45 }
  0x92   :  { %884 = vmatpush.bf16.msrb.mxu0 %v5248_v29 }
  0x93   :  { %871 = vmatpush.bf16.msrb.mxu3 %v5197_v58 }
  0x96   :  { %885 = vmatpush.bf16.msrb.mxu0 %v5256_v36 }
  0x97   :  { %872 = vmatpush.bf16.msrb.mxu3 %v5200_v8 }
  0xb6   :  { %v358_v38 = vpop.f32.mrf.mxu0 }
  0xb7   :  { %v359_v50 = vadd.f32 %v358_v38, %v191_v43 }
  0xbd   :  { %v613_v44 = vpop.f32.mrf.mxu3  ;;  %v387_v3 = vpop.f32.mrf.mxu1 }
  0xbe   :  { %v360_v46 = vpop.f32.mrf.mxu0  ;;  %v614_v49 = vadd.f32 %v613_v44, %v5326_v47  ;;  %v388_v13 = vadd.f32 %v387_v3, %v5335_v63  ;;  %v5357_v3 = vperm.slane %v468_v40, 2 }
  0xbf   :  { %v5328_v48 = vadd.f32 %v360_v46, %v191_v43 }
  0xc0   :  { %v643_v53 = vadd.f32 %v614_v49, %v359_v50 }
  0xc2   :  { %v4007_v57 = vmul.f32 -1.442695, %v643_v53 }
  0xc4   :  { %4649 = vpow2.f32 %v4007_v57 }
  0xc5   :  { %v615_v51 = vpop.f32.mrf.mxu3 }
  0xc6   :  { %v363_v52 = vpop.f32.mrf.mxu0 }
  0xc7   :  { %v5331_v56 = vadd.f32 %v363_v52, %v191_v43 }
  0xc9   :  { %v416_v61 = vpop.f32.mrf.mxu2 }
  0xca   :  { %v4650_v62 = vpop.eup %4649 }
  0xcb   :  { %v647_v6 = vadd.f32 1.0, %v4650_v62 }
  0xcd   :  { %4651 = vrcp.f32 %v647_v6  ;;  %v659_v62 = vand.u32 2147483648, %v647_v6  ;;  %vm653_vm1 = vweird.f32 %v647_v6 }
  0xce   :  { %v365_v59 = vpop.f32.mrf.mxu0 }
  0xcf   :  { %v5333_v60 = vadd.f32 %v365_v59, %v191_v43 }
  0xd1   :  { %v418_v20 = vpop.f32.mrf.mxu2 }
  0xd2   :  { %v5346_v21 = vadd.f32 %v418_v20, %v5341_v12 }
  0xd3   :  { %v4652_v31 = vpop.eup %4651 }
  0xd4   :  { %v649_v33 = vmul.f32 %v4652_v31, %v647_v6  ;;  %vm654_vm0 = vweird.f32 %v4652_v31 }
  0xd5   :  { %vm655_vm2 = vmor %vm653_vm1, %vm654_vm0 }
  0xd6   :  { %v368_v0 = vpop.f32.mrf.mxu0  ;;  %v650_v44 = vsub.f32 1.0, %v649_v33 }
  0xd7   :  { %v5337_v4 = vadd.f32 %v368_v0, %v191_v43 }
  0xd8   :  { %v651_v50 = vmul.f32 %v4652_v31, %v650_v44 }
  0xd9   :  { %v421_v46 = vpop.f32.mrf.mxu2 }
  0xda   :  { %v5353_v49 = vadd.f32 %v421_v46, %v5341_v12  ;;  %v652_v59 = vadd.f32 %v4652_v31, %v651_v50 }
  0xdc   :  { %v656_v20 = vsel %vm655_vm2, %v4652_v31, %v652_v59 }
  0xdd   :  { %v626_v18 = vpop.f32.mrf.mxu3 }
  0xde   :  { %v627_v19 = vadd.f32 %v626_v18, %v5339_v5  ;;  %v370_v24 = vpop.f32.mrf.mxu0 }
  0xdf   :  { %v5348_v30 = vadd.f32 %v370_v24, %v191_v43 }
  0xe0   :  { %v663_v22 = vadd.f32 %v627_v19, %v388_v13  ;;  %v657_v13 = vand.u32 2147483647, %v647_v6 }
  0xe1   :  { %v423_v18 = vpop.f32.mrf.mxu2 }
  0xe2   :  { %v4008_v25 = vmul.f32 -1.442695, %v663_v22  ;;  %v5360_v19 = vadd.f32 %v423_v18, %v5341_v12  ;;  %vm658_vm3 = vcmp.eq.f32.partialorder %v657_v13, 8.507059e+37 }
  0xe4   :  { %4653 = vpow2.f32 %v4008_v25  ;;  %v417_v25 = vadd.f32 %v416_v61, %v5341_v12 }
  0xe5   :  { %v628_v32 = vpop.f32.mrf.mxu3 }
  0xe6   :  { %v373_v37 = vpop.f32.mrf.mxu0 }
  0xe7   :  { %v5350_v38 = vadd.f32 %v373_v37, %v191_v43 }
  0xe9   :  { %7135 = vst [vmem:[#allocation33_spill] sm:$0xff] %v5350_v38  ;;  %v426_v46 = vpop.f32.mrf.mxu2 }
  0xea   :  { %v4654_v9 = vpop.eup %4653  ;;  %v5365_v31 = vadd.f32 %v426_v46, %v5341_v12 }
  0xeb   :  { %v667_v39 = vadd.f32 1.0, %v4654_v9 }
  0xed   :  { %4655 = vrcp.f32 %v667_v39  ;;  %vm673_vm4 = vweird.f32 %v667_v39  ;;  %v679_v6 = vand.u32 2147483648, %v667_v39  ;;  %v677_v9 = vand.u32 2147483647, %v667_v39 }
  0xee   :  { %v375_v51 = vpop.f32.mrf.mxu0 }
  0xef   :  { %v5355_v52 = vadd.f32 %v375_v51, %v191_v43  ;;  %v660_v43 = vor.u32 1.1754944e-38, %v659_v62  ;;  %v680_v51 = vor.u32 1.1754944e-38, %v679_v6  ;;  %vm678_vm7 = vcmp.eq.f32.partialorder %v677_v9, 8.507059e+37 }
  0xf1   :  { %7136 = vst [vmem:[#allocation34_spill] sm:$0xff] %v5355_v52  ;;  %v661_v33 = vsel %vm658_vm3, %v660_v43, %v656_v20  ;;  %v389_v43 = vpop.f32.mrf.mxu1 }
  0xf3   :  { %v4656_v53 = vpop.eup %4655 }
  0xf4   :  { %v669_v57 = vmul.f32 %v4656_v53, %v667_v39  ;;  %vm674_vm5 = vweird.f32 %v4656_v53 }
  0xf5   :  { %vm675_vm6 = vmor %vm673_vm4, %vm674_vm5 }
  0xf6   :  { %v670_v0 = vsub.f32 1.0, %v669_v57  ;;  %v639_v24 = vpop.f32.mrf.mxu0 }
  0xf7   :  { %v640_v32 = vadd.f32 %v639_v24, %v5357_v3 }
  0xf8   :  { %v671_v22 = vmul.f32 %v4656_v53, %v670_v0  ;;  %v428_v0 = vpop.f32.mrf.mxu2 }
  0xf9   :  { %v683_v40 = vmul.f32 %v661_v33, %v640_v32  ;;  %v5368_v20 = vadd.f32 %v428_v0, %v5341_v12 }
  0xfa   :  { %v672_v37 = vadd.f32 %v4656_v53, %v671_v22 }
  0xfb   :  { %v684_v44 = vadd.f32 %v683_v40, %v417_v25  ;;  %v5401_v25 = vpop.f32.mrf.mxu1 }
  0xfc   :  { %v676_v50 = vsel %vm675_vm6, %v4656_v53, %v672_v37 }
  0xfd   :  { %4657 = vtanh.f32 %v684_v44  ;;  %v681_v57 = vsel %vm678_vm7, %v680_v51, %v676_v50 }
  0xfe   :  { %v641_v61 = vpop.f32.mrf.mxu0  ;;  %v686_v59 = vsub.f32 1.0, %v681_v57  ;;  %v688_v18 = vmul.f32 0.0, %v681_v57  ;;  %v390_v57 = vadd.f32 %v389_v43, %v5335_v63 }
 0x100   :  { %v431_v22 = vpop.f32.mrf.mxu2 }
 0x101   :  { %v5376_v24 = vadd.f32 %v431_v22, %v5341_v12 }
 0x103   :  { %v4658_v62 = vpop.eup %4657  ;;  %7137 = vst [vmem:[#allocation35_spill] sm:$0xff] %v5376_v24  ;;  %v5403_v32 = vpop.f32.mrf.mxu1 }
 0x104   :  { %v687_v13 = vmul.f32 %v4658_v62, %v686_v59 }
 0x106   :  { %v5370_v39 = vadd.f32 %v688_v18, %v687_v13 }
 0x108   :  { %v690_v53 = vpack.c.bf16 %v5370_v39, %v5370_v39  ;;  %v5413_v9 = vpop.f32.mrf.mxu2 }
 0x109   :  { %7139 = vst [vmem:[#allocation37_spill] sm:$0xff] %v5413_v9 }
 0x10a   :  { %699 = vmatmul.bf16.vlgmr.msrb.gmra.mxu1 %v690_v53  ;;  %712 = vmatmul.bf16.vlgmr.msrb.gmra.mxu2 %v690_v53 }
 0x10b   :  { %725 = vmatmul.bf16.vlgmr.msra.gmra.mxu3 %v690_v53  ;;  %891 = vmatpush.bf16.msrb.mxu1 %v5204_v10  ;;  %v5405_v33 = vpop.f32.mrf.mxu1 }
 0x10c   :  { %952 = vmatpush.bf16.msrb.mxu2 %v5179_v7  ;;  %965 = vmatpush.bf16.msra.mxu3 %v5206_v14 }
 0x10f   :  { %892 = vmatpush.bf16.msrb.mxu1 %v5210_v26 }
 0x110   :  { %953 = vmatpush.bf16.msrb.mxu2 %v5182_v11  ;;  %966 = vmatpush.bf16.msra.mxu3 %v5213_v28 }
 0x113   :  { %893 = vmatpush.bf16.msrb.mxu1 %v5218_v41  ;;  %v5407_v37 = vpop.f32.mrf.mxu1 }
 0x114   :  { %954 = vmatpush.bf16.msrb.mxu2 %v5185_v17  ;;  %967 = vmatpush.bf16.msra.mxu3 %v5221_v42 }
 0x117   :  { %894 = vmatpush.bf16.msrb.mxu1 %v5224_v54 }
 0x118   :  { %955 = vmatpush.bf16.msrb.mxu2 %v5188_v23  ;;  %968 = vmatpush.bf16.msra.mxu3 %v5227_v55 }
 0x11b   :  { %895 = vmatpush.bf16.msrb.mxu1 %v5230_v1  ;;  %v5409_v40 = vpop.f32.mrf.mxu1 }
 0x11c   :  { %956 = vmatpush.bf16.msrb.mxu2 %v5191_v34  ;;  %969 = vmatpush.bf16.msra.mxu3 %v5233_v2 }
 0x11f   :  { %896 = vmatpush.bf16.msrb.mxu1 %v5238_v15 }
 0x120   :  { %957 = vmatpush.bf16.msrb.mxu2 %v5194_v45  ;;  %970 = vmatpush.bf16.msra.mxu3 %v5241_v16 }
 0x123   :  { %897 = vmatpush.bf16.msrb.mxu1 %v5245_v27  ;;  %v5411_v6 = vpop.f32.mrf.mxu1 }
 0x124   :  { %958 = vmatpush.bf16.msrb.mxu2 %v5197_v58  ;;  %971 = vmatpush.bf16.msra.mxu3 %v5248_v29  ;;  %7138 = vst [vmem:[#allocation36_spill] sm:$0xff] %v5411_v6 }
 0x127   :  { %898 = vmatpush.bf16.msrb.mxu1 %v5253_v35 }
 0x128   :  { %959 = vmatpush.bf16.msrb.mxu2 %v5200_v8  ;;  %972 = vmatpush.bf16.msra.mxu3 %v5256_v36 }
 0x187   :  { %v700_v44 = vpop.f32.mrf.mxu1 }
 0x188   :  { %v701_v46 = vadd.f32 %v700_v44, %v5326_v47 }
 0x18a   :  { %v730_v50 = vadd.f32 %v701_v46, %v5328_v48 }
 0x18c   :  { %v4009_v51 = vmul.f32 -1.442695, %v730_v50 }
 0x18d   :  { %v713_v61 = vpop.f32.mrf.mxu2 }
 0x18e   :  { %4659 = vpow2.f32 %v4009_v51  ;;  %v714_v59 = vadd.f32 %v713_v61, %v5339_v5  ;;  %v726_v62 = vpop.f32.mrf.mxu3 }
 0x18f   :  { %v702_v0 = vpop.f32.mrf.mxu1 }
 0x190   :  { %v750_v13 = vadd.f32 %v714_v59, %v390_v57 }
 0x192   :  { %v4010_v18 = vmul.f32 -1.442695, %v750_v13 }
 0x194   :  { %v4660_v53 = vpop.eup %4659  ;;  %4661 = vpow2.f32 %v4010_v18 }
 0x195   :  { %v734_v22 = vadd.f32 1.0, %v4660_v53  ;;  %v715_v9 = vpop.f32.mrf.mxu2 }
 0x196   :  { %v728_v12 = vpop.f32.mrf.mxu3 }
 0x197   :  { %4663 = vrcp.f32 %v734_v22  ;;  %v746_v43 = vand.u32 2147483648, %v734_v22  ;;  %v744_v61 = vand.u32 2147483647, %v734_v22  ;;  %vm740_vm9 = vweird.f32 %v734_v22 }
 0x198   :  { %v727_v12 = vadd.f32 %v726_v62, %v5357_v3 }
 0x199   :  { %v747_v59 = vor.u32 1.1754944e-38, %v746_v43  ;;  %vm745_vm11 = vcmp.eq.f32.partialorder %v744_v61, 8.507059e+37 }
 0x19a   :  { %v4662_v44 = vpop.eup %4661 }
 0x19b   :  { %v754_v52 = vadd.f32 1.0, %v4662_v44 }
 0x19d   :  { %v4664_v48 = vpop.eup %4663  ;;  %4665 = vrcp.f32 %v754_v52  ;;  %v764_v24 = vand.u32 2147483647, %v754_v52  ;;  %vm760_vm13 = vweird.f32 %v754_v52 }
 0x19e   :  { %v736_v46 = vmul.f32 %v4664_v48, %v734_v22  ;;  %vm741_vm8 = vweird.f32 %v4664_v48 }
 0x19f   :  { %vm742_vm10 = vmor %vm740_vm9, %vm741_vm8  ;;  %vm765_vm15 = vcmp.eq.f32.partialorder %v764_v24, 8.507059e+37 }
 0x1a0   :  { %v737_v50 = vsub.f32 1.0, %v736_v46  ;;  %v766_v46 = vand.u32 2147483648, %v754_v52 }
 0x1a2   :  { %v738_v51 = vmul.f32 %v4664_v48, %v737_v50 }
 0x1a3   :  { %v4666_v6 = vpop.eup %4665 }
 0x1a4   :  { %v756_v0 = vmul.f32 %v4666_v6, %v754_v52  ;;  %v739_v57 = vadd.f32 %v4664_v48, %v738_v51  ;;  %vm761_vm12 = vweird.f32 %v4666_v6  ;;  %v767_v51 = vor.u32 1.1754944e-38, %v766_v46 }
 0x1a5   :  { %vm762_vm14 = vmor %vm760_vm13, %vm761_vm12  ;;  %v393_v52 = vadd.f32 %v5401_v25, %v5335_v63 }
 0x1a6   :  { %v757_v13 = vsub.f32 1.0, %v756_v0  ;;  %v743_v9 = vsel %vm742_vm10, %v4664_v48, %v739_v57 }
 0x1a7   :  { %v748_v18 = vsel %vm745_vm11, %v747_v59, %v743_v9 }
 0x1a8   :  { %v758_v53 = vmul.f32 %v4666_v6, %v757_v13  ;;  %v770_v44 = vmul.f32 %v748_v18, %v727_v12 }
 0x1aa   :  { %v771_v50 = vadd.f32 %v770_v44, %v5346_v21  ;;  %v759_v38 = vadd.f32 %v4666_v6, %v758_v53 }
 0x1ac   :  { %4667 = vtanh.f32 %v771_v50  ;;  %v763_v22 = vsel %vm762_vm14, %v4666_v6, %v759_v38 }
 0x1ad   :  { %v768_v43 = vsel %vm765_vm15, %v767_v51, %v763_v22 }
 0x1ae   :  { %v773_v0 = vsub.f32 1.0, %v768_v43  ;;  %v775_v61 = vmul.f32 %v768_v43, %v5370_v39 }
 0x1b2   :  { %v4668_v62 = vpop.eup %4667 }
 0x1b3   :  { %v774_v48 = vmul.f32 %v4668_v62, %v773_v0 }
 0x1b5   :  { %v5422_v57 = vadd.f32 %v775_v61, %v774_v48 }
 0x1b7   :  { %v777_v59 = vpack.c.bf16 %v5422_v57, %v5422_v57 }
 0x1b9   :  { %786 = vmatmul.bf16.vlgmr.msra.gmra.mxu0 %v777_v59  ;;  %799 = vmatmul.bf16.vlgmr.msra.gmra.mxu1 %v777_v59 }
 0x1ba   :  { %812 = vmatmul.bf16.vlgmr.msra.gmra.mxu2 %v777_v59  ;;  %978 = vmatpush.bf16.msra.mxu0 %v5204_v10 }
 0x1bb   :  { %1039 = vmatpush.bf16.msra.mxu1 %v5179_v7  ;;  %1052 = vmatpush.bf16.msra.mxu2 %v5206_v14 }
 0x1be   :  { %979 = vmatpush.bf16.msra.mxu0 %v5210_v26 }
 0x1bf   :  { %1040 = vmatpush.bf16.msra.mxu1 %v5182_v11  ;;  %1053 = vmatpush.bf16.msra.mxu2 %v5213_v28 }
 0x1c2   :  { %980 = vmatpush.bf16.msra.mxu0 %v5218_v41 }
 0x1c3   :  { %1041 = vmatpush.bf16.msra.mxu1 %v5185_v17  ;;  %1054 = vmatpush.bf16.msra.mxu2 %v5221_v42 }
 0x1c6   :  { %981 = vmatpush.bf16.msra.mxu0 %v5224_v54 }
 0x1c7   :  { %1042 = vmatpush.bf16.msra.mxu1 %v5188_v23  ;;  %1055 = vmatpush.bf16.msra.mxu2 %v5227_v55 }
 0x1ca   :  { %982 = vmatpush.bf16.msra.mxu0 %v5230_v1 }
 0x1cb   :  { %1043 = vmatpush.bf16.msra.mxu1 %v5191_v34  ;;  %1056 = vmatpush.bf16.msra.mxu2 %v5233_v2 }
 0x1ce   :  { %983 = vmatpush.bf16.msra.mxu0 %v5238_v15 }
 0x1cf   :  { %1044 = vmatpush.bf16.msra.mxu1 %v5194_v45  ;;  %1057 = vmatpush.bf16.msra.mxu2 %v5241_v16 }
 0x1d2   :  { %984 = vmatpush.bf16.msra.mxu0 %v5245_v27 }
 0x1d3   :  { %1045 = vmatpush.bf16.msra.mxu1 %v5197_v58  ;;  %1058 = vmatpush.bf16.msra.mxu2 %v5248_v29 }
 0x1d6   :  { %985 = vmatpush.bf16.msra.mxu0 %v5253_v35 }
 0x1d7   :  { %1046 = vmatpush.bf16.msra.mxu1 %v5200_v8  ;;  %1059 = vmatpush.bf16.msra.mxu2 %v5256_v36 }
 0x236   :  { %v787_v21 = vpop.f32.mrf.mxu0  ;;  %v800_v38 = vpop.f32.mrf.mxu1 }
 0x237   :  { %v788_v39 = vadd.f32 %v787_v21, %v5326_v47  ;;  %v801_v24 = vadd.f32 %v800_v38, %v5339_v5 }
 0x239   :  { %v817_v6 = vadd.f32 %v788_v39, %v5331_v56  ;;  %v837_v13 = vadd.f32 %v801_v24, %v393_v52 }
 0x23b   :  { %v4011_v12 = vmul.f32 -1.442695, %v817_v6  ;;  %v4012_v9 = vmul.f32 -1.442695, %v837_v13 }
 0x23d   :  { %4669 = vpow2.f32 %v4011_v12  ;;  %v813_v18 = vpop.f32.mrf.mxu2 }
 0x23e   :  { %4671 = vpow2.f32 %v4012_v9  ;;  %v789_v53 = vpop.f32.mrf.mxu0  ;;  %v802_v44 = vpop.f32.mrf.mxu1  ;;  %v814_v6 = vadd.f32 %v813_v18, %v5357_v3 }
 0x243   :  { %v4670_v46 = vpop.eup %4669 }
 0x244   :  { %v4672_v50 = vpop.eup %4671  ;;  %v821_v22 = vadd.f32 1.0, %v4670_v46 }
 0x245   :  { %v841_v51 = vadd.f32 1.0, %v4672_v50  ;;  %v815_v43 = vpop.f32.mrf.mxu2 }
 0x246   :  { %4673 = vrcp.f32 %v821_v22  ;;  %v833_v59 = vand.u32 2147483648, %v821_v22  ;;  %v831_v38 = vand.u32 2147483647, %v821_v22  ;;  %vm827_vm1 = vweird.f32 %v821_v22 }
 0x247   :  { %4675 = vrcp.f32 %v841_v51  ;;  %v853_v44 = vand.u32 2147483648, %v841_v51  ;;  %vm847_vm5 = vweird.f32 %v841_v51  ;;  %v851_v46 = vand.u32 2147483647, %v841_v51 }
 0x248   :  { %v834_v24 = vor.u32 1.1754944e-38, %v833_v59  ;;  %vm832_vm3 = vcmp.eq.f32.partialorder %v831_v38, 8.507059e+37 }
 0x249   :  { %vm852_vm7 = vcmp.eq.f32.partialorder %v851_v46, 8.507059e+37 }
 0x24c   :  { %v4674_v25 = vpop.eup %4673 }
 0x24d   :  { %v4676_v0 = vpop.eup %4675  ;;  %v823_v62 = vmul.f32 %v4674_v25, %v821_v22  ;;  %vm828_vm0 = vweird.f32 %v4674_v25 }
 0x24e   :  { %v843_v48 = vmul.f32 %v4676_v0, %v841_v51  ;;  %vm829_vm2 = vmor %vm827_vm1, %vm828_vm0  ;;  %vm848_vm4 = vweird.f32 %v4676_v0 }
 0x24f   :  { %v824_v56 = vsub.f32 1.0, %v823_v62  ;;  %vm849_vm6 = vmor %vm847_vm5, %vm848_vm4  ;;  %v854_v62 = vor.u32 1.1754944e-38, %v853_v44 }
 0x250   :  { %v844_v61 = vsub.f32 1.0, %v843_v48 }
 0x251   :  { %v825_v21 = vmul.f32 %v4674_v25, %v824_v56 }
 0x252   :  { %v845_v52 = vmul.f32 %v4676_v0, %v844_v61 }
 0x253   :  { %v826_v39 = vadd.f32 %v4674_v25, %v825_v21 }
 0x254   :  { %v846_v9 = vadd.f32 %v4676_v0, %v845_v52 }
 0x255   :  { %v830_v13 = vsel %vm829_vm2, %v4674_v25, %v826_v39 }
 0x256   :  { %v835_v12 = vsel %vm832_vm3, %v834_v24, %v830_v13  ;;  %v850_v43 = vsel %vm849_vm6, %v4676_v0, %v846_v9 }
 0x257   :  { %v857_v53 = vmul.f32 %v835_v12, %v814_v6  ;;  %v855_v22 = vsel %vm852_vm7, %v854_v62, %v850_v43 }
 0x258   :  { %v860_v48 = vsub.f32 1.0, %v855_v22  ;;  %v862_v25 = vmul.f32 %v855_v22, %v5422_v57  ;;  %v395_v57 = vadd.f32 %v5403_v32, %v5335_v63 }
 0x259   :  { %v858_v50 = vadd.f32 %v857_v53, %v5353_v49 }
 0x25b   :  { %4677 = vtanh.f32 %v858_v50 }
 0x261   :  { %v4678_v56 = vpop.eup %4677 }
 0x262   :  { %v861_v18 = vmul.f32 %v4678_v56, %v860_v48 }
 0x264   :  { %v5458_v61 = vadd.f32 %v862_v25, %v861_v18 }
 0x266   :  { %v864_v59 = vpack.c.bf16 %v5458_v61, %v5458_v61 }
 0x268   :  { %873 = vmatmul.bf16.vlgmr.msrb.gmra.mxu3 %v864_v59  ;;  %886 = vmatmul.bf16.vlgmr.msrb.gmra.mxu0 %v864_v59 }
 0x269   :  { %899 = vmatmul.bf16.vlgmr.msrb.gmra.mxu1 %v864_v59  ;;  %1065 = vmatpush.bf16.msrb.mxu3 %v5204_v10 }
 0x26a   :  { %1126 = vmatpush.bf16.msrb.mxu0 %v5179_v7  ;;  %1139 = vmatpush.bf16.msrb.mxu1 %v5206_v14 }
 0x26d   :  { %1066 = vmatpush.bf16.msrb.mxu3 %v5210_v26 }
 0x26e   :  { %1127 = vmatpush.bf16.msrb.mxu0 %v5182_v11  ;;  %1140 = vmatpush.bf16.msrb.mxu1 %v5213_v28 }
 0x271   :  { %1067 = vmatpush.bf16.msrb.mxu3 %v5218_v41 }
 0x272   :  { %1128 = vmatpush.bf16.msrb.mxu0 %v5185_v17  ;;  %1141 = vmatpush.bf16.msrb.mxu1 %v5221_v42 }
 0x275   :  { %1068 = vmatpush.bf16.msrb.mxu3 %v5224_v54 }
 0x276   :  { %1129 = vmatpush.bf16.msrb.mxu0 %v5188_v23  ;;  %1142 = vmatpush.bf16.msrb.mxu1 %v5227_v55 }
 0x279   :  { %1069 = vmatpush.bf16.msrb.mxu3 %v5230_v1 }
 0x27a   :  { %1130 = vmatpush.bf16.msrb.mxu0 %v5191_v34  ;;  %1143 = vmatpush.bf16.msrb.mxu1 %v5233_v2 }
 0x27d   :  { %1070 = vmatpush.bf16.msrb.mxu3 %v5238_v15 }
 0x27e   :  { %1131 = vmatpush.bf16.msrb.mxu0 %v5194_v45  ;;  %1144 = vmatpush.bf16.msrb.mxu1 %v5241_v16 }
 0x281   :  { %1071 = vmatpush.bf16.msrb.mxu3 %v5245_v27 }
 0x282   :  { %1132 = vmatpush.bf16.msrb.mxu0 %v5197_v58  ;;  %1145 = vmatpush.bf16.msrb.mxu1 %v5248_v29 }
 0x285   :  { %1072 = vmatpush.bf16.msrb.mxu3 %v5253_v35 }
 0x286   :  { %1133 = vmatpush.bf16.msrb.mxu0 %v5200_v8  ;;  %1146 = vmatpush.bf16.msrb.mxu1 %v5256_v36 }
 0x2e5   :  { %v887_v49 = vpop.f32.mrf.mxu0 }
 0x2e6   :  { %v888_v51 = vadd.f32 %v887_v49, %v5339_v5  ;;  %v900_v0 = vpop.f32.mrf.mxu1 }
 0x2e8   :  { %v924_v21 = vadd.f32 %v888_v51, %v395_v57  ;;  %v901_v51 = vadd.f32 %v900_v0, %v5357_v3 }
 0x2ea   :  { %v4014_v38 = vmul.f32 -1.442695, %v924_v21 }
 0x2eb   :  { %v874_v52 = vpop.f32.mrf.mxu3 }
 0x2ec   :  { %4679 = vpow2.f32 %v4014_v38  ;;  %v875_v39 = vadd.f32 %v874_v52, %v5326_v47 }
 0x2ed   :  { %v889_v24 = vpop.f32.mrf.mxu0 }
 0x2ee   :  { %v904_v6 = vadd.f32 %v875_v39, %v5333_v60  ;;  %v902_v13 = vpop.f32.mrf.mxu1 }
 0x2f0   :  { %v4013_v12 = vmul.f32 -1.442695, %v904_v6 }
 0x2f2   :  { %v4680_v9 = vpop.eup %4679  ;;  %4681 = vpow2.f32 %v4013_v12 }
 0x2f3   :  { %v928_v53 = vadd.f32 1.0, %v4680_v9  ;;  %v876_v44 = vpop.f32.mrf.mxu3 }
 0x2f5   :  { %4683 = vrcp.f32 %v928_v53  ;;  %v940_v39 = vand.u32 2147483648, %v928_v53  ;;  %vm934_vm13 = vweird.f32 %v928_v53  ;;  %v938_v6 = vand.u32 2147483647, %v928_v53 }
 0x2f7   :  { %v941_v9 = vor.u32 1.1754944e-38, %v940_v39  ;;  %vm939_vm15 = vcmp.eq.f32.partialorder %v938_v6, 8.507059e+37 }
 0x2f8   :  { %v4682_v32 = vpop.eup %4681 }
 0x2f9   :  { %v908_v46 = vadd.f32 1.0, %v4682_v32 }
 0x2fb   :  { %4685 = vrcp.f32 %v908_v46  ;;  %v4684_v50 = vpop.eup %4683  ;;  %v920_v18 = vand.u32 2147483648, %v908_v46  ;;  %v918_v60 = vand.u32 2147483647, %v908_v46  ;;  %vm914_vm9 = vweird.f32 %v908_v46 }
 0x2fc   :  { %v930_v43 = vmul.f32 %v4684_v50, %v928_v53  ;;  %vm935_vm12 = vweird.f32 %v4684_v50 }
 0x2fd   :  { %v921_v57 = vor.u32 1.1754944e-38, %v920_v18  ;;  %vm919_vm11 = vcmp.eq.f32.partialorder %v918_v60, 8.507059e+37  ;;  %vm936_vm14 = vmor %vm934_vm13, %vm935_vm12 }
 0x2fe   :  { %v931_v48 = vsub.f32 1.0, %v930_v43 }
 0x300   :  { %v932_v59 = vmul.f32 %v4684_v50, %v931_v48 }
 0x301   :  { %v4686_v62 = vpop.eup %4685 }
 0x302   :  { %v910_v22 = vmul.f32 %v4686_v62, %v908_v46  ;;  %vm915_vm8 = vweird.f32 %v4686_v62  ;;  %v933_v52 = vadd.f32 %v4684_v50, %v932_v59 }
 0x303   :  { %vm916_vm10 = vmor %vm914_vm9, %vm915_vm8 }
 0x304   :  { %v911_v56 = vsub.f32 1.0, %v910_v22  ;;  %v937_v12 = vsel %vm936_vm14, %v4684_v50, %v933_v52 }
 0x305   :  { %v942_v44 = vsel %vm939_vm15, %v941_v9, %v937_v12 }
 0x306   :  { %v912_v25 = vmul.f32 %v4686_v62, %v911_v56  ;;  %v947_v32 = vsub.f32 1.0, %v942_v44  ;;  %v949_v43 = vmul.f32 %v942_v44, %v5458_v61 }
 0x308   :  { %v913_v49 = vadd.f32 %v4686_v62, %v912_v25 }
 0x30a   :  { %v917_v21 = vsel %vm916_vm10, %v4686_v62, %v913_v49 }
 0x30b   :  { %v922_v38 = vsel %vm919_vm11, %v921_v57, %v917_v21 }
 0x30c   :  { %v944_v24 = vmul.f32 %v922_v38, %v901_v51 }
 0x30e   :  { %v945_v13 = vadd.f32 %v944_v24, %v5360_v19 }
 0x310   :  { %4687 = vtanh.f32 %v945_v13 }
 0x316   :  { %v4688_v46 = vpop.eup %4687 }
 0x317   :  { %v948_v0 = vmul.f32 %v4688_v46, %v947_v32 }
 0x319   :  { %v5494_v62 = vadd.f32 %v949_v43, %v948_v0 }
 0x31b   :  { %v951_v22 = vpack.c.bf16 %v5494_v62, %v5494_v62 }
 0x31d   :  { %960 = vmatmul.bf16.vlgmr.msrb.gmra.mxu2 %v951_v22  ;;  %973 = vmatmul.bf16.vlgmr.msra.gmra.mxu3 %v951_v22 }
 0x31e   :  { %986 = vmatmul.bf16.vlgmr.msra.gmra.mxu0 %v951_v22  ;;  %1152 = vmatpush.bf16.msrb.mxu2 %v5204_v10 }
 0x31f   :  { %1213 = vmatpush.bf16.msra.mxu3 %v5179_v7  ;;  %1226 = vmatpush.bf16.msra.mxu0 %v5206_v14 }
 0x322   :  { %1153 = vmatpush.bf16.msrb.mxu2 %v5210_v26 }
 0x323   :  { %1214 = vmatpush.bf16.msra.mxu3 %v5182_v11  ;;  %1227 = vmatpush.bf16.msra.mxu0 %v5213_v28 }
 0x326   :  { %1154 = vmatpush.bf16.msrb.mxu2 %v5218_v41 }
 0x327   :  { %1215 = vmatpush.bf16.msra.mxu3 %v5185_v17  ;;  %1228 = vmatpush.bf16.msra.mxu0 %v5221_v42 }
 0x32a   :  { %1155 = vmatpush.bf16.msrb.mxu2 %v5224_v54 }
 0x32b   :  { %1216 = vmatpush.bf16.msra.mxu3 %v5188_v23  ;;  %1229 = vmatpush.bf16.msra.mxu0 %v5227_v55  ;;  %v398_v23 = vadd.f32 %v5405_v33, %v5335_v63 }
 0x32e   :  { %1156 = vmatpush.bf16.msrb.mxu2 %v5230_v1 }
 0x32f   :  { %1217 = vmatpush.bf16.msra.mxu3 %v5191_v34  ;;  %1230 = vmatpush.bf16.msra.mxu0 %v5233_v2 }
 0x332   :  { %1157 = vmatpush.bf16.msrb.mxu2 %v5238_v15 }
 0x333   :  { %1218 = vmatpush.bf16.msra.mxu3 %v5194_v45  ;;  %1231 = vmatpush.bf16.msra.mxu0 %v5241_v16 }
 0x336   :  { %1158 = vmatpush.bf16.msrb.mxu2 %v5245_v27 }
 0x337   :  { %1219 = vmatpush.bf16.msra.mxu3 %v5197_v58  ;;  %1232 = vmatpush.bf16.msra.mxu0 %v5248_v29 }
 0x33a   :  { %1159 = vmatpush.bf16.msrb.mxu2 %v5253_v35 }
 0x33b   :  { %1220 = vmatpush.bf16.msra.mxu3 %v5200_v8  ;;  %1233 = vmatpush.bf16.msra.mxu0 %v5256_v36 }
 0x39b   :  { %v987_v7 = vpop.f32.mrf.mxu0 }
 0x39c   :  { %v988_v57 = vadd.f32 %v987_v7, %v5357_v3 }
 0x3a0   :  { %v961_v11 = vpop.f32.mrf.mxu2  ;;  %v974_v17 = vpop.f32.mrf.mxu3 }
 0x3a1   :  { %v962_v34 = vadd.f32 %v961_v11, %v5326_v47  ;;  %v975_v45 = vadd.f32 %v974_v17, %v5339_v5 }
 0x3a3   :  { %v991_v58 = vadd.f32 %v962_v34, %v5337_v4  ;;  %v1011_v14 = vadd.f32 %v975_v45, %v398_v23  ;;  %v989_v28 = vpop.f32.mrf.mxu0 }
 0x3a5   :  { %v4015_v42 = vmul.f32 -1.442695, %v991_v58  ;;  %v4016_v55 = vmul.f32 -1.442695, %v1011_v14 }
 0x3a7   :  { %4689 = vpow2.f32 %v4015_v42 }
 0x3a8   :  { %4691 = vpow2.f32 %v4016_v55  ;;  %v963_v8 = vpop.f32.mrf.mxu2  ;;  %v976_v2 = vpop.f32.mrf.mxu3 }
 0x3ad   :  { %v4690_v16 = vpop.eup %4689 }
 0x3ae   :  { %v4692_v29 = vpop.eup %4691  ;;  %v995_v36 = vadd.f32 1.0, %v4690_v16 }
 0x3af   :  { %v1015_v19 = vadd.f32 1.0, %v4692_v29 }
 0x3b0   :  { %4693 = vrcp.f32 %v995_v36  ;;  %v1007_v4 = vand.u32 2147483648, %v995_v36  ;;  %v1005_v25 = vand.u32 2147483647, %v995_v36  ;;  %vm1001_vm1 = vweird.f32 %v995_v36 }
 0x3b1   :  { %4695 = vrcp.f32 %v1015_v19  ;;  %v1027_v52 = vand.u32 2147483648, %v1015_v19  ;;  %vm1021_vm5 = vweird.f32 %v1015_v19  ;;  %v1025_v24 = vand.u32 2147483647, %v1015_v19 }
 0x3b2   :  { %v1008_v49 = vor.u32 1.1754944e-38, %v1007_v4  ;;  %vm1006_vm3 = vcmp.eq.f32.partialorder %v1005_v25, 8.507059e+37 }
 0x3b3   :  { %v1028_v12 = vor.u32 1.1754944e-38, %v1027_v52  ;;  %vm1026_vm7 = vcmp.eq.f32.partialorder %v1025_v24, 8.507059e+37 }
 0x3b6   :  { %v4694_v33 = vpop.eup %4693 }
 0x3b7   :  { %v4696_v61 = vpop.eup %4695  ;;  %v997_v53 = vmul.f32 %v4694_v33, %v995_v36  ;;  %vm1002_vm0 = vweird.f32 %v4694_v33 }
 0x3b8   :  { %v1017_v50 = vmul.f32 %v4696_v61, %v1015_v19  ;;  %vm1003_vm2 = vmor %vm1001_vm1, %vm1002_vm0  ;;  %vm1022_vm4 = vweird.f32 %v4696_v61 }
 0x3b9   :  { %v998_v48 = vsub.f32 1.0, %v997_v53  ;;  %vm1023_vm6 = vmor %vm1021_vm5, %vm1022_vm4 }
 0x3ba   :  { %v1018_v56 = vsub.f32 1.0, %v1017_v50 }
 0x3bb   :  { %v999_v18 = vmul.f32 %v4694_v33, %v998_v48 }
 0x3bc   :  { %v1019_v60 = vmul.f32 %v4696_v61, %v1018_v56 }
 0x3bd   :  { %v1000_v59 = vadd.f32 %v4694_v33, %v999_v18 }
 0x3be   :  { %v1020_v38 = vadd.f32 %v4696_v61, %v1019_v60 }
 0x3bf   :  { %v1004_v51 = vsel %vm1003_vm2, %v4694_v33, %v1000_v59 }
 0x3c0   :  { %v1009_v21 = vsel %vm1006_vm3, %v1008_v49, %v1004_v51  ;;  %v1024_v13 = vsel %vm1023_vm6, %v4696_v61, %v1020_v38 }
 0x3c1   :  { %v1031_v39 = vmul.f32 %v1009_v21, %v988_v57  ;;  %v1029_v9 = vsel %vm1026_vm7, %v1028_v12, %v1024_v13  ;;  %v7140_v12 = vld [vmem:[#allocation33_spill] sm:$0xff] }
 0x3c2   :  { %v1034_v44 = vsub.f32 1.0, %v1029_v9  ;;  %v1036_v0 = vmul.f32 %v1029_v9, %v5494_v62 }
 0x3c3   :  { %v1032_v6 = vadd.f32 %v1031_v39, %v5365_v31 }
 0x3c5   :  { %4697 = vtanh.f32 %v1032_v6 }
 0x3cb   :  { %v4698_v32 = vpop.eup %4697 }
 0x3cc   :  { %v1035_v46 = vmul.f32 %v4698_v32, %v1034_v44 }
 0x3ce   :  { %v5530_v43 = vadd.f32 %v1036_v0, %v1035_v46 }
 0x3d0   :  { %v1038_v22 = vpack.c.bf16 %v5530_v43, %v5530_v43 }
 0x3d2   :  { %1047 = vmatmul.bf16.vlgmr.msra.gmra.mxu1 %v1038_v22  ;;  %1060 = vmatmul.bf16.vlgmr.msra.gmra.mxu2 %v1038_v22 }
 0x3d3   :  { %1073 = vmatmul.bf16.vlgmr.msrb.gmra.mxu3 %v1038_v22  ;;  %1239 = vmatpush.bf16.msra.mxu1 %v5204_v10 }
 0x3d7   :  { %1240 = vmatpush.bf16.msra.mxu1 %v5210_v26  ;;  %v400_v26 = vadd.f32 %v5407_v37, %v5335_v63 }
 0x3db   :  { %1241 = vmatpush.bf16.msra.mxu1 %v5218_v41 }
 0x3df   :  { %1242 = vmatpush.bf16.msra.mxu1 %v5224_v54 }
 0x3e3   :  { %1243 = vmatpush.bf16.msra.mxu1 %v5230_v1 }
 0x3e7   :  { %1244 = vmatpush.bf16.msra.mxu1 %v5238_v15 }
 0x3eb   :  { %1245 = vmatpush.bf16.msra.mxu1 %v5245_v27 }
 0x3ef   :  { %1246 = vmatpush.bf16.msra.mxu1 %v5253_v35 }
 0x44f   :  { %v1048_v31 = vpop.f32.mrf.mxu1 }
 0x450   :  { %v1049_v62 = vadd.f32 %v1048_v31, %v5326_v47 }
 0x452   :  { %v1078_v7 = vadd.f32 %v1049_v62, %v5348_v30 }
 0x454   :  { %v4017_v10 = vmul.f32 -1.442695, %v1078_v7 }
 0x455   :  { %v1061_v11 = vpop.f32.mrf.mxu2 }
 0x456   :  { %4699 = vpow2.f32 %v4017_v10  ;;  %v1062_v41 = vadd.f32 %v1061_v11, %v5339_v5  ;;  %v1074_v54 = vpop.f32.mrf.mxu3 }
 0x457   :  { %v1050_v1 = vpop.f32.mrf.mxu1  ;;  %v1075_v19 = vadd.f32 %v1074_v54, %v5357_v3 }
 0x458   :  { %v1098_v15 = vadd.f32 %v1062_v41, %v400_v26 }
 0x45a   :  { %v4018_v17 = vmul.f32 -1.442695, %v1098_v15 }
 0x45c   :  { %v4700_v27 = vpop.eup %4699  ;;  %4701 = vpow2.f32 %v4018_v17 }
 0x45d   :  { %v1082_v35 = vadd.f32 1.0, %v4700_v27  ;;  %v1063_v23 = vpop.f32.mrf.mxu2 }
 0x45e   :  { %v1076_v34 = vpop.f32.mrf.mxu3 }
 0x45f   :  { %4703 = vrcp.f32 %v1082_v35  ;;  %v1094_v37 = vand.u32 2147483648, %v1082_v35  ;;  %v1092_v55 = vand.u32 2147483647, %v1082_v35  ;;  %vm1088_vm9 = vweird.f32 %v1082_v35 }
 0x461   :  { %v1095_v29 = vor.u32 1.1754944e-38, %v1094_v37  ;;  %vm1093_vm11 = vcmp.eq.f32.partialorder %v1092_v55, 8.507059e+37 }
 0x462   :  { %v4702_v45 = vpop.eup %4701 }
 0x463   :  { %v1102_v30 = vadd.f32 1.0, %v4702_v45 }
 0x465   :  { %v4704_v58 = vpop.eup %4703  ;;  %4705 = vrcp.f32 %v1102_v30  ;;  %v1114_v48 = vand.u32 2147483648, %v1102_v30  ;;  %v1112_v4 = vand.u32 2147483647, %v1102_v30  ;;  %vm1108_vm13 = vweird.f32 %v1102_v30 }
 0x466   :  { %v1084_v14 = vmul.f32 %v4704_v58, %v1082_v35  ;;  %vm1089_vm8 = vweird.f32 %v4704_v58 }
 0x467   :  { %vm1090_vm10 = vmor %vm1088_vm9, %vm1089_vm8  ;;  %v1115_v60 = vor.u32 1.1754944e-38, %v1114_v48  ;;  %vm1113_vm15 = vcmp.eq.f32.partialorder %v1112_v4, 8.507059e+37 }
 0x468   :  { %v1085_v28 = vsub.f32 1.0, %v1084_v14 }
 0x46a   :  { %v1086_v42 = vmul.f32 %v4704_v58, %v1085_v28 }
 0x46b   :  { %v4706_v8 = vpop.eup %4705 }
 0x46c   :  { %v1104_v2 = vmul.f32 %v4706_v8, %v1102_v30  ;;  %v1087_v16 = vadd.f32 %v4704_v58, %v1086_v42  ;;  %vm1109_vm12 = vweird.f32 %v4706_v8 }
 0x46d   :  { %vm1110_vm14 = vmor %vm1108_vm13, %vm1109_vm12 }
 0x46e   :  { %v1105_v36 = vsub.f32 1.0, %v1104_v2  ;;  %v1091_v33 = vsel %vm1090_vm10, %v4704_v58, %v1087_v16 }
 0x46f   :  { %v1096_v61 = vsel %vm1093_vm11, %v1095_v29, %v1091_v33 }
 0x470   :  { %v1106_v53 = vmul.f32 %v4706_v8, %v1105_v36  ;;  %v1118_v50 = vmul.f32 %v1096_v61, %v1075_v19 }
 0x472   :  { %v1119_v56 = vadd.f32 %v1118_v50, %v5368_v20  ;;  %v1107_v18 = vadd.f32 %v4706_v8, %v1106_v53  ;;  %v403_v20 = vadd.f32 %v5409_v40, %v5335_v63 }
 0x474   :  { %4707 = vtanh.f32 %v1119_v56  ;;  %v1111_v25 = vsel %vm1110_vm14, %v4706_v8, %v1107_v18  ;;  %v7141_v8 = vld [vmem:[#allocation35_spill] sm:$0xff]  ;;  %v7142_v56 = vld [vmem:[#allocation36_spill] sm:$0xff] }
 0x475   :  { %v1116_v59 = vsel %vm1113_vm15, %v1115_v60, %v1111_v25  ;;  %v405_v18 = vadd.f32 %v7142_v56, %v5335_v63 }
 0x476   :  { %v1121_v49 = vsub.f32 1.0, %v1116_v59  ;;  %v1123_v21 = vmul.f32 %v1116_v59, %v5530_v43 }
 0x47a   :  { %v4708_v57 = vpop.eup %4707 }
 0x47b   :  { %v1122_v51 = vmul.f32 %v4708_v57, %v1121_v49 }
 0x47d   :  { %v1124_v38 = vadd.f32 %v1123_v21, %v1122_v51 }
 0x47f   :  { %v1125_v52 = vpack.c.bf16 %v1124_v38, %v1124_v38 }
 0x481   :  { %1134 = vmatmul.bf16.vlgmr.msrb.gmra.mxu0 %v1125_v52  ;;  %1147 = vmatmul.bf16.vlgmr.msrb.gmra.mxu1 %v1125_v52 }
 0x482   :  { %1160 = vmatmul.bf16.vlgmr.msrb.gmra.mxu2 %v1125_v52 }
 0x4fe   :  { %v1135_v39 = vpop.f32.mrf.mxu0  ;;  %v1148_v24 = vpop.f32.mrf.mxu1 }
 0x4ff   :  { %v1136_v6 = vadd.f32 %v1135_v39, %v5326_v47  ;;  %v1149_v13 = vadd.f32 %v1148_v24, %v5339_v5 }
 0x501   :  { %v1165_v9 = vadd.f32 %v1136_v6, %v7140_v12  ;;  %v1185_v44 = vadd.f32 %v1149_v13, %v403_v20 }
 0x503   :  { %v4019_v32 = vmul.f32 -1.442695, %v1165_v9  ;;  %v4020_v46 = vmul.f32 -1.442695, %v1185_v44 }
 0x505   :  { %4709 = vpow2.f32 %v4019_v32  ;;  %v1161_v0 = vpop.f32.mrf.mxu2 }
 0x506   :  { %4711 = vpow2.f32 %v4020_v46  ;;  %v1137_v43 = vpop.f32.mrf.mxu0  ;;  %v1150_v22 = vpop.f32.mrf.mxu1  ;;  %v1162_v30 = vadd.f32 %v1161_v0, %v5357_v3 }
 0x50b   :  { %v4710_v31 = vpop.eup %4709 }
 0x50c   :  { %v4712_v62 = vpop.eup %4711  ;;  %v1169_v7 = vadd.f32 1.0, %v4710_v31 }
 0x50d   :  { %v1189_v10 = vadd.f32 1.0, %v4712_v62  ;;  %v1163_v11 = vpop.f32.mrf.mxu2 }
 0x50e   :  { %4713 = vrcp.f32 %v1169_v7  ;;  %v1181_v17 = vand.u32 2147483648, %v1169_v7  ;;  %v1179_v35 = vand.u32 2147483647, %v1169_v7  ;;  %vm1175_vm1 = vweird.f32 %v1169_v7 }
 0x50f   :  { %4715 = vrcp.f32 %v1189_v10  ;;  %v1201_v42 = vand.u32 2147483648, %v1189_v10  ;;  %vm1195_vm5 = vweird.f32 %v1189_v10  ;;  %v1199_v55 = vand.u32 2147483647, %v1189_v10 }
 0x510   :  { %v1182_v45 = vor.u32 1.1754944e-38, %v1181_v17  ;;  %vm1180_vm3 = vcmp.eq.f32.partialorder %v1179_v35, 8.507059e+37 }
 0x511   :  { %v1202_v29 = vor.u32 1.1754944e-38, %v1201_v42  ;;  %vm1200_vm7 = vcmp.eq.f32.partialorder %v1199_v55, 8.507059e+37 }
 0x514   :  { %v4714_v40 = vpop.eup %4713 }
 0x515   :  { %v4716_v26 = vpop.eup %4715  ;;  %v1171_v41 = vmul.f32 %v4714_v40, %v1169_v7  ;;  %vm1176_vm0 = vweird.f32 %v4714_v40 }
 0x516   :  { %v1191_v54 = vmul.f32 %v4716_v26, %v1189_v10  ;;  %vm1177_vm2 = vmor %vm1175_vm1, %vm1176_vm0  ;;  %vm1196_vm4 = vweird.f32 %v4716_v26 }
 0x517   :  { %v1172_v1 = vsub.f32 1.0, %v1171_v41  ;;  %vm1197_vm6 = vmor %vm1195_vm5, %vm1196_vm4  ;;  %v7144_v41 = vld [vmem:[#allocation32_spill] sm:$0xff] }
 0x518   :  { %v1192_v15 = vsub.f32 1.0, %v1191_v54  ;;  %v7145_v54 = vld [vmem:[#allocation37_spill] sm:$0xff] }
 0x519   :  { %v1173_v27 = vmul.f32 %v4714_v40, %v1172_v1  ;;  %v434_v1 = vadd.f32 %v7145_v54, %v7144_v41 }
 0x51a   :  { %v1193_v23 = vmul.f32 %v4716_v26, %v1192_v15 }
 0x51b   :  { %v1174_v34 = vadd.f32 %v4714_v40, %v1173_v27 }
 0x51c   :  { %v1194_v28 = vadd.f32 %v4716_v26, %v1193_v23 }
 0x51d   :  { %v1178_v58 = vsel %vm1177_vm2, %v4714_v40, %v1174_v34 }
 0x51e   :  { %v1183_v14 = vsel %vm1180_vm3, %v1182_v45, %v1178_v58  ;;  %v1198_v16 = vsel %vm1197_vm6, %v4716_v26, %v1194_v28 }
 0x51f   :  { %v1205_v37 = vmul.f32 %v1183_v14, %v1162_v30  ;;  %v1203_v36 = vsel %vm1200_vm7, %v1202_v29, %v1198_v16 }
 0x520   :  { %v1208_v19 = vsub.f32 1.0, %v1203_v36  ;;  %v1210_v53 = vmul.f32 %v1203_v36, %v1124_v38  ;;  %v7143_v38 = vld [vmem:[#allocation34_spill] sm:$0xff] }
 0x521   :  { %v1206_v2 = vadd.f32 %v1205_v37, %v7141_v8 }
 0x523   :  { %4717 = vtanh.f32 %v1206_v2 }
 0x529   :  { %v4718_v33 = vpop.eup %4717 }
 0x52a   :  { %v1209_v61 = vmul.f32 %v4718_v33, %v1208_v19 }
 0x52c   :  { %v5557_v50 = vadd.f32 %v1210_v53, %v1209_v61 }
 0x52e   :  { %v1212_v48 = vpack.c.bf16 %v5557_v50, %v5557_v50 }
 0x530   :  { %1221 = vmatmul.bf16.vlgmr.msra.gmra.mxu3 %v1212_v48  ;;  %1234 = vmatmul.bf16.vlgmr.msra.gmra.mxu0 %v1212_v48 }
 0x531   :  { %1247 = vmatmul.bf16.vlgmr.msra.gmra.mxu1 %v1212_v48 }
 0x5ad   :  { %v1235_v4 = vpop.f32.mrf.mxu0 }
 0x5ae   :  { %v1236_v25 = vadd.f32 %v1235_v4, %v5339_v5  ;;  %v1248_v60 = vpop.f32.mrf.mxu1 }
 0x5af   :  { %v1249_v10 = vadd.f32 %v1248_v60, %v5357_v3 }
 0x5b0   :  { %v1272_v59 = vadd.f32 %v1236_v25, %v405_v18 }
 0x5b2   :  { %v4022_v49 = vmul.f32 -1.442695, %v1272_v59 }
 0x5b3   :  { %v1222_v57 = vpop.f32.mrf.mxu3 }
 0x5b4   :  { %4719 = vpow2.f32 %v4022_v49  ;;  %v1223_v51 = vadd.f32 %v1222_v57, %v5326_v47 }
 0x5b5   :  { %v1237_v21 = vpop.f32.mrf.mxu0 }
 0x5b6   :  { %v1252_v52 = vadd.f32 %v1223_v51, %v7143_v38  ;;  %v1250_v39 = vpop.f32.mrf.mxu1 }
 0x5b8   :  { %v4021_v24 = vmul.f32 -1.442695, %v1252_v52 }
 0x5ba   :  { %v4720_v20 = vpop.eup %4719  ;;  %4721 = vpow2.f32 %v4021_v24 }
 0x5bb   :  { %v1276_v6 = vadd.f32 1.0, %v4720_v20  ;;  %v1224_v13 = vpop.f32.mrf.mxu3 }
 0x5bd   :  { %4723 = vrcp.f32 %v1276_v6  ;;  %v1288_v15 = vand.u32 2147483648, %v1276_v6  ;;  %vm1282_vm13 = vweird.f32 %v1276_v6  ;;  %v1286_v27 = vand.u32 2147483647, %v1276_v6 }
 0x5bf   :  { %v1289_v34 = vor.u32 1.1754944e-38, %v1288_v15  ;;  %vm1287_vm15 = vcmp.eq.f32.partialorder %v1286_v27, 8.507059e+37 }
 0x5c0   :  { %v4722_v63 = vpop.eup %4721 }
 0x5c1   :  { %v1256_v12 = vadd.f32 1.0, %v4722_v63 }
 0x5c3   :  { %4725 = vrcp.f32 %v1256_v12  ;;  %v4724_v5 = vpop.eup %4723  ;;  %v1268_v47 = vand.u32 2147483648, %v1256_v12  ;;  %v1266_v22 = vand.u32 2147483647, %v1256_v12  ;;  %vm1262_vm9 = vweird.f32 %v1256_v12 }
 0x5c4   :  { %v1278_v9 = vmul.f32 %v4724_v5, %v1276_v6  ;;  %vm1283_vm12 = vweird.f32 %v4724_v5 }
 0x5c5   :  { %v1269_v7 = vor.u32 1.1754944e-38, %v1268_v47  ;;  %vm1267_vm11 = vcmp.eq.f32.partialorder %v1266_v22, 8.507059e+37  ;;  %vm1284_vm14 = vmor %vm1282_vm13, %vm1283_vm12 }
 0x5c6   :  { %v1279_v46 = vsub.f32 1.0, %v1278_v9 }
 0x5c8   :  { %v1280_v31 = vmul.f32 %v4724_v5, %v1279_v46 }
 0x5c9   :  { %v4726_v44 = vpop.eup %4725 }
 0x5ca   :  { %v1258_v32 = vmul.f32 %v4726_v44, %v1256_v12  ;;  %vm1263_vm8 = vweird.f32 %v4726_v44  ;;  %v1281_v40 = vadd.f32 %v4724_v5, %v1280_v31 }
 0x5cb   :  { %vm1264_vm10 = vmor %vm1262_vm9, %vm1263_vm8 }
 0x5cc   :  { %v1259_v0 = vsub.f32 1.0, %v1258_v32  ;;  %v1285_v23 = vsel %vm1284_vm14, %v4724_v5, %v1281_v40 }
 0x5cd   :  { %v1290_v45 = vsel %vm1287_vm15, %v1289_v34, %v1285_v23 }
 0x5ce   :  { %v1260_v43 = vmul.f32 %v4726_v44, %v1259_v0  ;;  %v1295_v3 = vsub.f32 1.0, %v1290_v45  ;;  %v1297_v58 = vmul.f32 %v1290_v45, %v5557_v50 }
 0x5d0   :  { %v1261_v62 = vadd.f32 %v4726_v44, %v1260_v43 }
 0x5d2   :  { %v1265_v11 = vsel %vm1264_vm10, %v4726_v44, %v1261_v62 }
 0x5d3   :  { %v1270_v26 = vsel %vm1267_vm11, %v1269_v7, %v1265_v11 }
 0x5d4   :  { %v1292_v17 = vmul.f32 %v1270_v26, %v1249_v10 }
 0x5d6   :  { %v1293_v35 = vadd.f32 %v1292_v17, %v434_v1 }
 0x5d8   :  { %4727 = vtanh.f32 %v1293_v35 }
 0x5de   :  { %v4728_v30 = vpop.eup %4727 }
 0x5df   :  { %v1296_v14 = vmul.f32 %v4728_v30, %v1295_v3 }
 0x5e1   :  { %v5579_v28 = vadd.f32 %v1297_v58, %v1296_v14 }
 0x5e2   :  { %5079 = dma.done.wait [#allocation6], 6144 }
 0x5e3   :  { %5080 = vsyncadd [#allocation6], 4294961152 }
 0x5e4   :  { %5081 = dma.done.wait [#allocation6 + $0x1], 3072 }
 0x5e5   :  { %5082 = vsyncadd [#allocation6 + $0x1], 4294964224 }
 0x5e6   :  { %5083 = dma.done.wait [#allocation6 + $0x2], 2048 }
 0x5e7   :  { %5084 = vsyncadd [#allocation6 + $0x2], 4294965248  ;;  %v4109_v37 = vld [vmem:[#allocation3 + $0xa8] sm:$0xf]  ;;  %v4614_v42 = vld [vmem:[#allocation3 + $0xb0] sm:$0xf0] }
 0x5e8   :  { %v4613_v55 = vld [vmem:[#allocation3 + $0xac] sm:$0xf]  ;;  %v5581_v8 = vor.u32 %v4614_v42, %v4109_v37  ;;  %v4111_v2 = vld [vmem:[#allocation3 + $0xb4] sm:$0xf0]  ;;  %v4097_v16 = vld [vmem:[#allocation3 + $0x90] sm:$0xf] }
 0x5e9   :  { %v4611_v29 = vld [vmem:[#allocation3 + $0x98] sm:$0xf0]  ;;  %v5583_v36 = vor.u32 %v4613_v55, %v4111_v2  ;;  %v4610_v19 = vld [vmem:[#allocation3 + $0x94] sm:$0xf]  ;;  %v4099_v33 = vld [vmem:[#allocation3 + $0x9c] sm:$0xf0]  ;;  %v1442_v55 = vpack.c.bf16 %v5579_v28, %v5579_v28 }
 0x5ea   :  { %1571 = vmatpush.bf16.msra.mxu2 %v5581_v8  ;;  %v5586_v61 = vor.u32 %v4611_v29, %v4097_v16  ;;  %v5589_v53 = vor.u32 %v4610_v19, %v4099_v33  ;;  %v4085_v50 = vld [vmem:[#allocation3 + $0x78] sm:$0xf]  ;;  %v4608_v48 = vld [vmem:[#allocation3 + $0x80] sm:$0xf0]  ;;  %v4607_v4 = vld [vmem:[#allocation3 + $0x7c] sm:$0xf] }
 0x5eb   :  { %1584 = vmatpush.bf16.msrb.mxu3 %v5583_v36  ;;  %v4087_v56 = vld [vmem:[#allocation3 + $0x84] sm:$0xf0]  ;;  %v5592_v18 = vor.u32 %v4608_v48, %v4085_v50  ;;  %v4073_v60 = vld [vmem:[#allocation3 + $0x60] sm:$0xf]  ;;  %v4605_v59 = vld [vmem:[#allocation3 + $0x68] sm:$0xf0] }
 0x5ec   :  { %v5595_v25 = vor.u32 %v4607_v4, %v4087_v56  ;;  %v4604_v49 = vld [vmem:[#allocation3 + $0x64] sm:$0xf]  ;;  %v4075_v57 = vld [vmem:[#allocation3 + $0x6c] sm:$0xf0]  ;;  %v5598_v21 = vor.u32 %v4605_v59, %v4073_v60  ;;  %v4615_v38 = vld [vmem:[#allocation3 + $0xb8] sm:$0xf0] }
 0x5ed   :  { %v4117_v51 = vld [vmem:[#allocation3 + $0xb0] sm:$0xf]  ;;  %v4105_v52 = vld [vmem:[#allocation3 + $0x98] sm:$0xf]  ;;  %v4612_v39 = vld [vmem:[#allocation3 + $0xa0] sm:$0xf0]  ;;  %v5601_v24 = vor.u32 %v4604_v49, %v4075_v57 }
 0x5ee   :  { %1572 = vmatpush.bf16.msra.mxu2 %v5586_v61  ;;  %v4061_v20 = vld [vmem:[#allocation3 + $0x48] sm:$0xf]  ;;  %v4602_v6 = vld [vmem:[#allocation3 + $0x50] sm:$0xf0]  ;;  %v5603_v13 = vor.u32 %v4615_v38, %v4117_v51  ;;  %v4601_v63 = vld [vmem:[#allocation3 + $0x4c] sm:$0xf]  ;;  %v5606_v5 = vor.u32 %v4612_v39, %v4105_v52 }
 0x5ef   :  { %1585 = vmatpush.bf16.msrb.mxu3 %v5589_v53  ;;  %v4063_v12 = vld [vmem:[#allocation3 + $0x54] sm:$0xf0]  ;;  %v5609_v9 = vor.u32 %v4602_v6, %v4061_v20  ;;  %v4093_v44 = vld [vmem:[#allocation3 + $0x80] sm:$0xf]  ;;  %v4609_v32 = vld [vmem:[#allocation3 + $0x88] sm:$0xf0] }
 0x5f0   :  { %1597 = vmatpush.bf16.msrb.mxu0 %v5603_v13  ;;  %v5612_v46 = vor.u32 %v4601_v63, %v4063_v12  ;;  %v4049_v0 = vld [vmem:[#allocation3 + $0x30] sm:$0xf]  ;;  %v4599_v47 = vld [vmem:[#allocation3 + $0x38] sm:$0xf0]  ;;  %v4598_v43 = vld [vmem:[#allocation3 + $0x34] sm:$0xf]  ;;  %v5615_v31 = vor.u32 %v4609_v32, %v4093_v44 }
 0x5f1   :  { %7146 = vst [vmem:[#allocation33_spill] sm:$0xff] %v5609_v9  ;;  %v4051_v22 = vld [vmem:[#allocation3 + $0x3c] sm:$0xf0]  ;;  %v5618_v62 = vor.u32 %v4599_v47, %v4049_v0  ;;  %v4081_v7 = vld [vmem:[#allocation3 + $0x68] sm:$0xf]  ;;  %s3764_s20 = sshll.u32 %s6949_s11, 4  ;;  %s3765_s20 = int_to_ptr.hbm [resolvable:$true] %s3764_s20 }
 0x5f2   :  { %1573 = vmatpush.bf16.msra.mxu2 %v5592_v18  ;;  %7147 = vst [vmem:[#allocation35_spill] sm:$0xff] %v5612_v46  ;;  %v4606_v10 = vld [vmem:[#allocation3 + $0x70] sm:$0xf0]  ;;  %v5621_v11 = vor.u32 %v4598_v43, %v4051_v22  ;;  %v4037_v40 = vld [vmem:[#allocation3 + $0x18] sm:$0xf]  ;;  %s5102_s21 = smov 256  }
 0x5f3   :  { %1586 = vmatpush.bf16.msrb.mxu3 %v5595_v25  ;;  %7148 = vst [vmem:[#allocation36_spill] sm:$0xff] %v5618_v62  ;;  %v4596_v26 = vld [vmem:[#allocation3 + $0x20] sm:$0xf0]  ;;  %v4595_v41 = vld [vmem:[#allocation3 + $0x1c] sm:$0xf]  ;;  %v5624_v1 = vor.u32 %v4606_v10, %v4081_v7  ;;  %s5103_s0 = smov 16  }
 0x5f4   :  { %1598 = vmatpush.bf16.msrb.mxu0 %v5606_v5  ;;  %7149 = vst [vmem:[#allocation34_spill] sm:$0xff] %v5621_v11  ;;  %v4039_v54 = vld [vmem:[#allocation3 + $0x24] sm:$0xf0]  ;;  %v5627_v15 = vor.u32 %v4596_v26, %v4037_v40  ;;  %v4069_v17 = vld [vmem:[#allocation3 + $0x50] sm:$0xf] }
 0x5f5   :  { %v4603_v27 = vld [vmem:[#allocation3 + $0x58] sm:$0xf0]  ;;  %v5630_v35 = vor.u32 %v4595_v41, %v4039_v54  ;;  %v4025_v23 = vld [vmem:[#allocation3] sm:$0xf]  ;;  %v4593_v34 = vld [vmem:[#allocation3 + $0x8] sm:$0xf0] }
 0x5f6   :  { %1574 = vmatpush.bf16.msra.mxu2 %v5598_v21  ;;  %7150 = vst [vmem:[#allocation32_spill] sm:$0xff] %v5627_v15  ;;  %v4592_v45 = vld [vmem:[#allocation3 + $0x4] sm:$0xf]  ;;  %v4027_v3 = vld [vmem:[#allocation3 + $0xc] sm:$0xf0]  ;;  %v5633_v30 = vor.u32 %v4603_v27, %v4069_v17  ;;  %v5636_v58 = vor.u32 %v4593_v34, %v4025_v23 }
 0x5f7   :  { %1587 = vmatpush.bf16.msrb.mxu3 %v5601_v24  ;;  %7151 = vst [vmem:[#allocation37_spill] sm:$0xff] %v5630_v35  ;;  %v4057_v14 = vld [vmem:[#allocation3 + $0x38] sm:$0xf]  ;;  %v4600_v37 = vld [vmem:[#allocation3 + $0x40] sm:$0xf0]  ;;  %v5639_v42 = vor.u32 %v4592_v45, %v4027_v3  ;;  %v1440_v34 = vld [vmem:[#allocation15 + $0x8] sm:$0xff] }
 0x5f8   :  { %1599 = vmatpush.bf16.msrb.mxu0 %v5615_v31  ;;  %7152 = vst [vmem:[#allocation38_spill] sm:$0xff] %v5633_v30  ;;  %v5644_v2 = vor.u32 %v4600_v37, %v4057_v14  ;;  %v4045_v16 = vld [vmem:[#allocation3 + $0x20] sm:$0xf]  ;;  %v4597_v29 = vld [vmem:[#allocation3 + $0x28] sm:$0xf0]  ;;  %v1439_v27 = vld [vmem:[#allocation15] sm:$0xff] }
 0x5f9   :  { %7153 = vst [vmem:[#allocation39_spill] sm:$0xff] %v5636_v58  ;;  %v5649_v19 = vor.u32 %v4597_v29, %v4045_v16  ;;  %v4033_v33 = vld [vmem:[#allocation3 + $0x8] sm:$0xf]  ;;  %v4594_v50 = vld [vmem:[#allocation3 + $0x10] sm:$0xf0] }
 0x5fa   :  { %1575 = vmatpush.bf16.msra.mxu2 %v5609_v9  ;;  %7154 = vst [vmem:[#allocation40_spill] sm:$0xff] %v5639_v42  ;;  %v5652_v48 = vor.u32 %v4594_v50, %v4033_v33  ;;  %v4179_v4 = vld [vmem:[#allocation4 + $0x70] sm:$0xf]  ;;  %v4631_v56 = vld [vmem:[#allocation4 + $0x74] sm:$0xf0] }
 0x5fb   :  { %1588 = vmatpush.bf16.msrb.mxu3 %v5612_v46  ;;  %7155 = vst [vmem:[#allocation41_spill] sm:$0xff] %v5644_v2  ;;  %v4630_v60 = vld [vmem:[#allocation4 + $0x74] sm:$0xf]  ;;  %v5655_v59 = vor.u32 %v4631_v56, %v4179_v4  ;;  %v4181_v49 = vld [vmem:[#allocation4 + $0x78] sm:$0xf0] }
 0x5fc   :  { %1600 = vmatpush.bf16.msrb.mxu0 %v5624_v1  ;;  %7156 = vst [vmem:[#allocation42_spill] sm:$0xff] %v5649_v19  ;;  %v5657_v57 = vor.u32 %v4630_v60, %v4181_v49  ;;  %v4171_v51 = vld [vmem:[#allocation4 + $0x60] sm:$0xf]  ;;  %v4629_v38 = vld [vmem:[#allocation4 + $0x64] sm:$0xf0] }
 0x5fd   :  { %7157 = vst [vmem:[#allocation43_spill] sm:$0xff] %v5652_v48  ;;  %1738 = vmatpush.bf16.msrb.mxu1 %v5655_v59  ;;  %v4628_v52 = vld [vmem:[#allocation4 + $0x64] sm:$0xf]  ;;  %v5661_v39 = vor.u32 %v4629_v38, %v4171_v51  ;;  %v4173_v20 = vld [vmem:[#allocation4 + $0x68] sm:$0xf0] }
 0x5fe   :  { %1576 = vmatpush.bf16.msra.mxu2 %v5618_v62  ;;  %v5663_v6 = vor.u32 %v4628_v52, %v4173_v20  ;;  %v5668_v63 = vld [vmem:[%s6946_s8] sm:$0x7]  ;;  %v4163_v12 = vld [vmem:[#allocation4 + $0x50] sm:$0xf]  ;;  %v4627_v44 = vld [vmem:[#allocation4 + $0x54] sm:$0xf0] }
 0x5ff   :  { %1589 = vmatpush.bf16.msrb.mxu3 %v5621_v11  ;;  %v4626_v32 = vld [vmem:[#allocation4 + $0x54] sm:$0xf]  ;;  %v5672_v0 = vor.u32 %v4627_v44, %v4163_v12  ;;  %v4165_v47 = vld [vmem:[#allocation4 + $0x58] sm:$0xf0]  ;;  %v5677_v22 = vperm.slane %v5668_v63, 0  ;;  %v5682_v26 = vperm.slane %v5668_v63, 1 }
 0x600   :  { %1601 = vmatpush.bf16.msrb.mxu0 %v5633_v30  ;;  %v5674_v43 = vor.u32 %v4626_v32, %v4165_v47  ;;  %v4155_v7 = vld [vmem:[#allocation4 + $0x40] sm:$0xf]  ;;  %v4625_v10 = vld [vmem:[#allocation4 + $0x44] sm:$0xf0]  ;;  %v4624_v40 = vld [vmem:[#allocation4 + $0x44] sm:$0xf] }
 0x601   :  { %1739 = vmatpush.bf16.msrb.mxu1 %v5661_v39  ;;  %7158 = vst [vmem:[#allocation44_spill] sm:$0xff] %v5677_v22  ;;  %v5684_v41 = vor.u32 %v4625_v10, %v4155_v7  ;;  %v4157_v54 = vld [vmem:[#allocation4 + $0x48] sm:$0xf0]  ;;  %v4147_v14 = vld [vmem:[#allocation4 + $0x30] sm:$0xf] }
 0x602   :  { %1577 = vmatpush.bf16.msra.mxu2 %v5627_v15  ;;  %7159 = vst [vmem:[#allocation45_spill] sm:$0xff] %v5682_v26  ;;  %v5686_v17 = vor.u32 %v4624_v40, %v4157_v54  ;;  %v4623_v37 = vld [vmem:[#allocation4 + $0x34] sm:$0xf0]  ;;  %v4149_v33 = vld [vmem:[#allocation4 + $0x38] sm:$0xf0] }
 0x603   :  { %1590 = vmatpush.bf16.msrb.mxu3 %v5630_v35  ;;  %v5692_v29 = vor.u32 %v4623_v37, %v4147_v14  ;;  %v4139_v51 = vld [vmem:[#allocation4 + $0x20] sm:$0xf]  ;;  %v4621_v38 = vld [vmem:[#allocation4 + $0x24] sm:$0xf0]  ;;  %v4620_v12 = vld [vmem:[#allocation4 + $0x24] sm:$0xf] }
 0x604   :  { %1602 = vmatpush.bf16.msrb.mxu0 %v5644_v2  ;;  %v5698_v20 = vor.u32 %v4621_v38, %v4139_v51  ;;  %v4141_v44 = vld [vmem:[#allocation4 + $0x28] sm:$0xf0]  ;;  %v4131_v10 = vld [vmem:[#allocation4 + $0x10] sm:$0xf]  ;;  %v4619_v40 = vld [vmem:[#allocation4 + $0x14] sm:$0xf0] }
 0x605   :  { %1740 = vmatpush.bf16.msrb.mxu1 %v5672_v0  ;;  %7160 = vst [vmem:[#allocation46_spill] sm:$0xff] %v5692_v29  ;;  %v5700_v32 = vor.u32 %v4620_v12, %v4141_v44  ;;  %v4618_v54 = vld [vmem:[#allocation4 + $0x14] sm:$0xf]  ;;  %v4616_v14 = vld [vmem:[#allocation4 + $0x4] sm:$0xf] }
 0x606   :  { %1578 = vmatpush.bf16.msra.mxu2 %v5636_v58  ;;  %7162 = vst [vmem:[#allocation48_spill] sm:$0xff] %v5698_v20  ;;  %v4299_v2 = vld [vmem:[#allocation2 + $0xe4] sm:$0xf0] }
 0x607   :  { %1591 = vmatpush.bf16.msrb.mxu3 %v5639_v42  ;;  %7163 = vst [vmem:[#allocation49_spill] sm:$0xff] %v5700_v32 }
 0x608   :  { %1603 = vmatpush.bf16.msrb.mxu0 %v5649_v19  ;;  %v4335_v19 = vld [vmem:[#allocation2 + $0x12c] sm:$0xf0] }
 0x609   :  { %1579 = vmatmul.bf16.vlgmr.msra.gmra.mxu2 %v1442_v55  ;;  %1741 = vmatpush.bf16.msrb.mxu1 %v5684_v41 }
 0x60a   :  { %1592 = vmatmul.bf16.vlgmr.msrb.gmra.mxu3 %v1442_v55  ;;  %1751 = vmatpush.bf16.msrb.mxu2 %v5657_v57 }
 0x60c   :  { %1604 = vmatpush.bf16.msrb.mxu0 %v5652_v48  ;;  %v4225_v48 = vld [vmem:[#allocation2 + $0x48] sm:$0xf] }
 0x60d   :  { %1742 = vmatpush.bf16.msrb.mxu1 %v5692_v29 }
 0x60e   :  { %1752 = vmatpush.bf16.msrb.mxu2 %v5663_v6 }
 0x60f   :  { %1605 = vmatmul.bf16.vlgmr.msrb.gmra.mxu0 %v1442_v55  ;;  %v4622_v55 = vld [vmem:[#allocation4 + $0x34] sm:$0xf] }
 0x610   :  { %v5694_v4 = vor.u32 %v4622_v55, %v4149_v33  ;;  %v4125_v33 = vld [vmem:[#allocation4 + $0x8] sm:$0xf0] }
 0x611   :  { %1743 = vmatpush.bf16.msrb.mxu1 %v5698_v20  ;;  %v4311_v20 = vld [vmem:[#allocation2 + $0xfc] sm:$0xf0] }
 0x612   :  { %1753 = vmatpush.bf16.msrb.mxu2 %v5674_v43  ;;  %7161 = vst [vmem:[#allocation47_spill] sm:$0xff] %v5694_v4 }
 0x616   :  { %1754 = vmatpush.bf16.msrb.mxu2 %v5686_v17 }
 0x61a   :  { %1755 = vmatpush.bf16.msrb.mxu2 %v5694_v4  ;;  %v4564_v4 = vld [vmem:[#allocation2 + $0xa0] sm:$0xf0] }
 0x61e   :  { %1756 = vmatpush.bf16.msrb.mxu2 %v5700_v32  ;;  %v4323_v32 = vld [vmem:[#allocation2 + $0x114] sm:$0xf0] }
 0x68c   :  { %v1580_v23 = vpop.f32.mrf.mxu2  ;;  %v1606_v49 = vpop.f32.mrf.mxu0 }
 0x68d   :  { %v1581_v45 = vadd.f32 %v1580_v23, %v5677_v22  ;;  %v1593_v3 = vpop.f32.mrf.mxu3  ;;  %v4133_v23 = vld [vmem:[#allocation4 + $0x18] sm:$0xf0] }
 0x68e   :  { %v1594_v16 = vadd.f32 %v1593_v3, %v5682_v26  ;;  %v4617_v3 = vld [vmem:[#allocation4 + $0x4] sm:$0xf0] }
 0x68f   :  { %v1610_v50 = vadd.f32 %v1581_v45, %v1439_v27  ;;  %v5704_v27 = vor.u32 %v4619_v40, %v4131_v10  ;;  %v4123_v45 = vld [vmem:[#allocation4] sm:$0xf] }
 0x690   :  { %v1630_v56 = vadd.f32 %v1594_v16, %v1440_v34  ;;  %v5706_v34 = vor.u32 %v4618_v54, %v4133_v23  ;;  %v5710_v16 = vor.u32 %v4617_v3, %v4123_v45 }
 0x691   :  { %v4119_v60 = vmul.f32 -1.442695, %v1610_v50  ;;  %7164 = vst [vmem:[#allocation50_spill] sm:$0xff] %v5704_v27  ;;  %1744 = vmatpush.bf16.msrb.mxu1 %v5704_v27  ;;  %v4554_v27 = vld [vmem:[#allocation2 + $0x50] sm:$0xf0] }
 0x692   :  { %v4120_v52 = vmul.f32 -1.442695, %v1630_v56  ;;  %7165 = vst [vmem:[#allocation51_spill] sm:$0xff] %v5706_v34  ;;  %1757 = vmatpush.bf16.msrb.mxu2 %v5706_v34  ;;  %v4239_v34 = vld [vmem:[#allocation2 + $0x6c] sm:$0xf0] }
 0x693   :  { %4729 = vpow2.f32 %v4119_v60  ;;  %7166 = vst [vmem:[#allocation52_spill] sm:$0xff] %v5710_v16  ;;  %v5712_v60 = vor.u32 %v4616_v14, %v4125_v33  ;;  %v1441_v33 = vld [vmem:[#allocation15 + $0x10] sm:$0xff] }
 0x694   :  { %4731 = vpow2.f32 %v4120_v52  ;;  %v1582_v47 = vpop.f32.mrf.mxu2  ;;  %v1608_v55 = vpop.f32.mrf.mxu0 }
 0x695   :  { %v1595_v7 = vpop.f32.mrf.mxu3  ;;  %7167 = vst [vmem:[#allocation53_spill] sm:$0xff] %v5712_v60  ;;  %1745 = vmatpush.bf16.msrb.mxu1 %v5710_v16  ;;  %v5717_v47 = vperm.slane %v5668_v63, 2  ;;  %v4347_v16 = vld [vmem:[#allocation2 + $0x144] sm:$0xf0] }
 0x696   :  { %1758 = vmatpush.bf16.msrb.mxu2 %v5712_v60  ;;  %v4583_v60 = vld [vmem:[#allocation2 + $0x13c] sm:$0xf] }
 0x697   :  { %7168 = vst [vmem:[#allocation54_spill] sm:$0xff] %v5717_v47  ;;  %v1607_v3 = vadd.f32 %v1606_v49, %v5717_v47  ;;  %v4586_v47 = vld [vmem:[#allocation2 + $0x154] sm:$0xf] }
 0x699   :  { %v4730_v37 = vpop.eup %4729 }
 0x69a   :  { %v4732_v50 = vpop.eup %4731  ;;  %v1614_v56 = vadd.f32 1.0, %v4730_v37 }
 0x69b   :  { %v1634_v51 = vadd.f32 1.0, %v4732_v50 }
 0x69c   :  { %4733 = vrcp.f32 %v1614_v56  ;;  %v1626_v40 = vand.u32 2147483648, %v1614_v56  ;;  %v1624_v23 = vand.u32 2147483647, %v1614_v56  ;;  %vm1620_vm1 = vweird.f32 %v1614_v56 }
 0x69d   :  { %4735 = vrcp.f32 %v1634_v51  ;;  %vm1640_vm4 = vweird.f32 %v1634_v51  ;;  %v1644_v26 = vand.u32 2147483647, %v1634_v51 }
 0x69e   :  { %v1627_v37 = vor.u32 1.1754944e-38, %v1626_v40  ;;  %vm1625_vm3 = vcmp.eq.f32.partialorder %v1624_v23, 8.507059e+37 }
 0x69f   :  { %vm1645_vm7 = vcmp.eq.f32.partialorder %v1644_v26, 8.507059e+37  ;;  %v1430_v26 = vld [vmem:[%s6947_s9] sm:$0x3]  ;;  %s5101_s9 = smov [#allocation16]  }
 0x6a0   :  { %s3762_s17 = sshll.u32 %s5101_s9, 4  ;;  %s3763_s17 = int_to_ptr.vmem [resolvable:$true] %s3762_s17 }
 0x6a2   :  { %v4734_v38 = vpop.eup %4733 }
 0x6a3   :  { %v4736_v52 = vpop.eup %4735  ;;  %v1616_v12 = vmul.f32 %v4734_v38, %v1614_v56  ;;  %vm1621_vm0 = vweird.f32 %v4734_v38 }
 0x6a4   :  { %v1636_v44 = vmul.f32 %v4736_v52, %v1634_v51  ;;  %vm1622_vm2 = vmor %vm1620_vm1, %vm1621_vm0  ;;  %vm1641_vm5 = vweird.f32 %v4736_v52 }
 0x6a5   :  { %v1617_v7 = vsub.f32 1.0, %v1616_v12  ;;  %v1646_v12 = vand.u32 2147483648, %v1634_v51  ;;  %vm1642_vm6 = vmor %vm1640_vm4, %vm1641_vm5  ;;  %v5732_v51 = vperm.slane %v1430_v26, 0 }
 0x6a6   :  { %v1637_v10 = vsub.f32 1.0, %v1636_v44 }
 0x6a7   :  { %v1618_v54 = vmul.f32 %v4734_v38, %v1617_v7  ;;  %7170 = vst [vmem:[#allocation56_spill] sm:$0xff] %v5732_v51 }
 0x6a8   :  { %v1638_v45 = vmul.f32 %v4736_v52, %v1637_v10  ;;  %v1647_v10 = vor.u32 1.1754944e-38, %v1646_v12 }
 0x6a9   :  { %v1619_v14 = vadd.f32 %v4734_v38, %v1618_v54 }
 0x6aa   :  { %v1639_v50 = vadd.f32 %v4736_v52, %v1638_v45 }
 0x6ab   :  { %v1623_v55 = vsel %vm1622_vm2, %v4734_v38, %v1619_v14 }
 0x6ac   :  { %v1628_v63 = vsel %vm1625_vm3, %v1627_v37, %v1623_v55  ;;  %v1643_v22 = vsel %vm1642_vm6, %v4736_v52, %v1639_v50  ;;  %v5734_v52 = vperm.slane %v1430_v26, 1  ;;  %v4261_v26 = vld [vmem:[#allocation2 + $0x90] sm:$0xf] }
 0x6ad   :  { %v1650_v44 = vmul.f32 %v1628_v63, %v1607_v3  ;;  %v1648_v49 = vsel %vm1645_vm7, %v1647_v10, %v1643_v22  ;;  %v1436_v63 = vlaneseq }
 0x6ae   :  { %v1653_v56 = vsub.f32 1.0, %v1648_v49  ;;  %v1655_v38 = vmul.f32 %v1648_v49, %v5579_v28  ;;  %7171 = vst [vmem:[#allocation57_spill] sm:$0xff] %v5734_v52 }
 0x6af   :  { %v1651_v7 = vadd.f32 %v1650_v44, %v1441_v33  ;;  %v5747_v50 = vand.u32 127, %v1436_v63 }
 0x6b1   :  { %4737 = vtanh.f32 %v1651_v7  ;;  %v5750_v12 = vadd.s32 128, %v5747_v50 }
 0x6b7   :  { %v4738_v54 = vpop.eup %4737 }
 0x6b8   :  { %v1654_v40 = vmul.f32 %v4738_v54, %v1653_v56 }
 0x6ba   :  { %v5721_v23 = vadd.f32 %v1655_v38, %v1654_v40  ;;  %v4273_v40 = vld [vmem:[#allocation2 + $0xa8] sm:$0xf]  ;;  %v4566_v38 = vld [vmem:[#allocation2 + $0xb0] sm:$0xf0] }
 0x6bc   :  { %7169 = vst [vmem:[#allocation55_spill] sm:$0xff] %v5721_v23  ;;  %v5725_v45 = vpack.c.bf16 %v5721_v23, %v5721_v23  ;;  %v4263_v23 = vld [vmem:[#allocation2 + $0x9c] sm:$0xf0] }
 0x6be   :  { %1746 = vmatmul.bf16.vlgmr.msrb.gmra.mxu1 %v5725_v45  ;;  %1759 = vmatmul.bf16.vlgmr.msrb.gmra.mxu2 %v5725_v45 }
 0x73b   :  { %v1747_v22 = vpop.f32.mrf.mxu1 }
 0x73c   :  { %v5737_v3 = vadd.f32 %v1747_v22, %v5732_v51  ;;  %v5762_v22 = vor.u32 %v4566_v38, %v4273_v40  ;;  %v4357_v40 = vld [vmem:[#allocation2 + $0x150] sm:$0xf]  ;;  %v4587_v38 = vld [vmem:[#allocation2 + $0x158] sm:$0xf0] }
 0x73e   :  { %7172 = vst [vmem:[#allocation58_spill] sm:$0xff] %v5737_v3  ;;  %2053 = vmatpush.bf16.msra.mxu3 %v5762_v22 }
 0x741   :  { %v1760_v28 = vpop.f32.mrf.mxu2 }
 0x742   :  { %v5740_v14 = vadd.f32 %v1760_v28, %v5734_v52  ;;  %v4563_v28 = vld [vmem:[#allocation2 + $0x98] sm:$0xf0]  ;;  %v4371_v52 = vld [vmem:[#allocation2 + $0x174] sm:$0xf0] }
 0x743   :  { %v1749_v37 = vpop.f32.mrf.mxu1  ;;  %v5765_v63 = vor.u32 %v4563_v28, %v4261_v26  ;;  %v5775_v26 = vor.u32 %v4587_v38, %v4357_v40  ;;  %v4562_v28 = vld [vmem:[#allocation2 + $0x94] sm:$0xf]  ;;  %v4559_v40 = vld [vmem:[#allocation2 + $0x7c] sm:$0xf]  ;;  %v4251_v38 = vld [vmem:[#allocation2 + $0x84] sm:$0xf0] }
 0x744   :  { %7173 = vst [vmem:[#allocation59_spill] sm:$0xff] %v5740_v14  ;;  %v5744_v55 = vmax.f32 %v5737_v3, %v5740_v14  ;;  %v4249_v37 = vld [vmem:[#allocation2 + $0x78] sm:$0xf] }
 0x745   :  { %7178 = vst [vmem:[#allocation64_spill] sm:$0xff] %v5775_v26  ;;  %2054 = vmatpush.bf16.msra.mxu3 %v5765_v63 }
 0x746   :  { %7174 = vst [vmem:[#allocation60_spill] sm:$0xff] %v5744_v55  ;;  %1767 = vmax.xlane.f32.xlu0 %v5744_v55  ;;  %v4589_v55 = vld [vmem:[#allocation2 + $0x16c] sm:$0xf] }
 0x747   :  { %v5771_v51 = vor.u32 %v4589_v55, %v4371_v52  ;;  %v5781_v52 = vor.u32 %v4562_v28, %v4263_v23  ;;  %v4359_v55 = vld [vmem:[#allocation2 + $0x15c] sm:$0xf0]  ;;  %v5795_v28 = vor.u32 %v4583_v60, %v4347_v16  ;;  %v5804_v16 = vor.u32 %v4554_v27, %v4225_v48  ;;  %v4309_v48 = vld [vmem:[#allocation2 + $0xf0] sm:$0xf] }
 0x748   :  { %v4333_v23 = vld [vmem:[#allocation2 + $0x120] sm:$0xf] }
 0x749   :  { %v1762_v33 = vpop.f32.mrf.mxu2  ;;  %7177 = vst [vmem:[#allocation63_spill] sm:$0xff] %v5771_v51  ;;  %2092 = vmatpush.bf16.msra.mxu2 %v5771_v51  ;;  %v4556_v51 = vld [vmem:[#allocation2 + $0x64] sm:$0xf] }
 0x74a   :  { %v4369_v33 = vld [vmem:[#allocation2 + $0x168] sm:$0xf]  ;;  %7179 = vst [vmem:[#allocation65_spill] sm:$0xff] %v5781_v52 }
 0x74b   :  { %7183 = vst [vmem:[#allocation69_spill] sm:$0xff] %v5795_v28 }
 0x74c   :  { %7186 = vst [vmem:[#allocation72_spill] sm:$0xff] %v5804_v16 }
 0x7b9   :  { %v1768_v44 = vpop.xlane.xlu0 %1767 }
 0x7ba   :  { %vm1769_vm8 = vcmp.eq.f32.partialorder %v5737_v3, %v1768_v44  ;;  %vm1770_vm9 = vcmp.eq.f32.partialorder %v5740_v14, %v1768_v44  ;;  %v4590_v44 = vld [vmem:[#allocation2 + $0x170] sm:$0xf0]  ;;  %v4560_v14 = vld [vmem:[#allocation2 + $0x80] sm:$0xf0] }
 0x7bb   :  { %v1771_v7 = vsel %vm1769_vm8, %v5747_v50, 256  ;;  %v1772_v10 = vsel %vm1770_vm9, %v5750_v12, 256 }
 0x7bc   :  { %vm1773_vm10 = vcmp.lt.s32.totalorder %v1771_v7, %v1772_v10 }
 0x7bd   :  { %v5756_v49 = vsel %vm1773_vm10, %v1771_v7, %v1772_v10  ;;  %v4565_v7 = vld [vmem:[#allocation2 + $0xac] sm:$0xf]  ;;  %v4275_v10 = vld [vmem:[#allocation2 + $0xb4] sm:$0xf0] }
 0x7be   :  { %v1776_v56 = vshra.s32 %v5756_v49, 16  ;;  %v5769_v3 = vor.u32 %v4565_v7, %v4275_v10  ;;  %v4557_v7 = vld [vmem:[#allocation2 + $0x68] sm:$0xf0]  ;;  %v5783_v10 = vor.u32 %v4586_v47, %v4359_v55 }
 0x7bf   :  { %v4581_v55 = vld [vmem:[#allocation2 + $0x128] sm:$0xf0] }
 0x7c0   :  { %v5759_v54 = vcvt.s32.f32 %v1776_v56  ;;  %v5767_v56 = vor.u32 %v4590_v44, %v4369_v33  ;;  %7176 = vst [vmem:[#allocation62_spill] sm:$0xff] %v5769_v3  ;;  %2079 = vmatpush.bf16.msra.mxu1 %v5769_v3  ;;  %v5778_v33 = vor.u32 %v4560_v14, %v4249_v37  ;;  %v4237_v44 = vld [vmem:[#allocation2 + $0x60] sm:$0xf]  ;;  %v4584_v3 = vld [vmem:[#allocation2 + $0x140] sm:$0xf0]  ;;  %v5789_v37 = vor.u32 %v4559_v40, %v4251_v38 }
 0x7c1   :  { %7180 = vst [vmem:[#allocation66_spill] sm:$0xff] %v5783_v10  ;;  %v5792_v47 = vor.u32 %v4557_v7, %v4237_v44  ;;  %2093 = vmatpush.bf16.msra.mxu2 %v5783_v10  ;;  %v4321_v44 = vld [vmem:[#allocation2 + $0x108] sm:$0xf]  ;;  %v4578_v7 = vld [vmem:[#allocation2 + $0x110] sm:$0xf0] }
 0x7c2   :  { %1779 = vmin.xlane.f32.xlu0 %v5759_v54  ;;  %7175 = vst [vmem:[#allocation61_spill] sm:$0xff] %v5767_v56  ;;  %2066 = vmatpush.bf16.msra.mxu0 %v5767_v56  ;;  %v4345_v56 = vld [vmem:[#allocation2 + $0x138] sm:$0xf]  ;;  %v4553_v40 = vld [vmem:[#allocation2 + $0x4c] sm:$0xf] }
 0x7c3   :  { %v5787_v14 = vor.u32 %v4584_v3, %v4345_v56  ;;  %7182 = vst [vmem:[#allocation68_spill] sm:$0xff] %v5789_v37  ;;  %2055 = vmatpush.bf16.msra.mxu3 %v5778_v33  ;;  %v5799_v3 = vor.u32 %v4581_v55, %v4333_v23  ;;  %v5801_v56 = vor.u32 %v4556_v51, %v4239_v34  ;;  %v4227_v38 = vld [vmem:[#allocation2 + $0x54] sm:$0xf0]  ;;  %v4551_v10 = vld [vmem:[#allocation2 + $0x38] sm:$0xf0] }
 0x7c4   :  { %2080 = vmatpush.bf16.msra.mxu1 %v5781_v52  ;;  %v4213_v52 = vld [vmem:[#allocation2 + $0x30] sm:$0xf]  ;;  %v5811_v34 = vor.u32 %v4578_v7, %v4321_v44  ;;  %v5813_v51 = vor.u32 %v4553_v40, %v4227_v38  ;;  %v4550_v23 = vld [vmem:[#allocation2 + $0x34] sm:$0xf]  ;;  %v4215_v55 = vld [vmem:[#allocation2 + $0x3c] sm:$0xf0] }
 0x7c5   :  { %7181 = vst [vmem:[#allocation67_spill] sm:$0xff] %v5787_v14  ;;  %2094 = vmatpush.bf16.msra.mxu2 %v5795_v28  ;;  %v4548_v28 = vld [vmem:[#allocation2 + $0x20] sm:$0xf0]  ;;  %v5825_v7 = vor.u32 %v4550_v23, %v4215_v55  ;;  %v4547_v40 = vld [vmem:[#allocation2 + $0x1c] sm:$0xf] }
 0x7c6   :  { %2067 = vmatpush.bf16.msra.mxu0 %v5775_v26  ;;  %v4580_v26 = vld [vmem:[#allocation2 + $0x124] sm:$0xf]  ;;  %7184 = vst [vmem:[#allocation70_spill] sm:$0xff] %v5799_v3  ;;  %v4203_v38 = vld [vmem:[#allocation2 + $0x24] sm:$0xf0] }
 0x7c7   :  { %7185 = vst [vmem:[#allocation71_spill] sm:$0xff] %v5801_v56  ;;  %2056 = vmatpush.bf16.msra.mxu3 %v5792_v47  ;;  %v5807_v60 = vor.u32 %v4580_v26, %v4335_v19  ;;  %v5816_v19 = vor.u32 %v4551_v10, %v4213_v52  ;;  %v4575_v26 = vld [vmem:[#allocation2 + $0xf8] sm:$0xf0]  ;;  %v4297_v52 = vld [vmem:[#allocation2 + $0xd8] sm:$0xf] }
 0x7c8   :  { %2081 = vmatpush.bf16.msra.mxu1 %v5789_v37  ;;  %v4201_v37 = vld [vmem:[#allocation2 + $0x18] sm:$0xf]  ;;  %7188 = vst [vmem:[#allocation74_spill] sm:$0xff] %v5811_v34  ;;  %v5823_v44 = vor.u32 %v4575_v26, %v4309_v48  ;;  %v1775_v48 = vand.u32 65535, %v5756_v49  ;;  %v4281_v26 = vld [vmem:[#allocation2 + $0xb0] sm:$0xf] }
 0x7c9   :  { %7187 = vst [vmem:[#allocation73_spill] sm:$0xff] %v5807_v60  ;;  %2095 = vmatpush.bf16.msra.mxu2 %v5807_v60  ;;  %v4545_v60 = vld [vmem:[#allocation2 + $0x8] sm:$0xf0]  ;;  %v4567_v23 = vld [vmem:[#allocation2 + $0xb8] sm:$0xf0] }
 0x7ca   :  { %2068 = vmatpush.bf16.msra.mxu0 %v5787_v14  ;;  %v4577_v14 = vld [vmem:[#allocation2 + $0x10c] sm:$0xf]  ;;  %7189 = vst [vmem:[#allocation75_spill] sm:$0xff] %v5813_v51  ;;  %v4544_v49 = vld [vmem:[#allocation2 + $0x4] sm:$0xf] }
 0x7cb   :  { %2057 = vmatpush.bf16.msra.mxu3 %v5804_v16  ;;  %7190 = vst [vmem:[#allocation76_spill] sm:$0xff] %v5816_v19  ;;  %v5819_v27 = vor.u32 %v4577_v14, %v4323_v32  ;;  %v5828_v32 = vor.u32 %v4548_v28, %v4201_v37  ;;  %v4572_v14 = vld [vmem:[#allocation2 + $0xe0] sm:$0xf0]  ;;  %v5838_v28 = vor.u32 %v4547_v40, %v4203_v38  ;;  %v1777_v38 = vcvt.s32.f32 %v1775_v48  ;;  %v4269_v16 = vld [vmem:[#allocation2 + $0x98] sm:$0xf] }
 0x7cc   :  { %2082 = vmatpush.bf16.msra.mxu1 %v5801_v56  ;;  %v4189_v56 = vld [vmem:[#allocation2] sm:$0xf]  ;;  %7192 = vst [vmem:[#allocation78_spill] sm:$0xff] %v5823_v44  ;;  %v5836_v37 = vor.u32 %v4572_v14, %v4297_v52  ;;  %v4377_v52 = vld [vmem:[#allocation2 + $0x170] sm:$0xf] }
 0x7cd   :  { %7191 = vst [vmem:[#allocation77_spill] sm:$0xff] %v5819_v27  ;;  %2096 = vmatpush.bf16.msra.mxu2 %v5819_v27  ;;  %v5841_v55 = vor.u32 %v4545_v60, %v4189_v56  ;;  %v4591_v14 = vld [vmem:[#allocation2 + $0x178] sm:$0xf0] }
 0x7ce   :  { %2069 = vmatpush.bf16.msra.mxu0 %v5799_v3  ;;  %v4574_v3 = vld [vmem:[#allocation2 + $0xf4] sm:$0xf]  ;;  %7193 = vst [vmem:[#allocation79_spill] sm:$0xff] %v5825_v7  ;;  %v5862_v48 = vor.u32 %v4591_v14, %v4377_v52  ;;  %v4555_v52 = vld [vmem:[#allocation2 + $0x58] sm:$0xf0] }
 0x7cf   :  { %2058 = vmatpush.bf16.msra.mxu3 %v5816_v19  ;;  %7194 = vst [vmem:[#allocation80_spill] sm:$0xff] %v5828_v32  ;;  %v5831_v10 = vor.u32 %v4574_v3, %v4311_v20  ;;  %v4285_v20 = vld [vmem:[#allocation2 + $0xc0] sm:$0xf]  ;;  %v4569_v3 = vld [vmem:[#allocation2 + $0xc8] sm:$0xf0] }
 0x7d0   :  { %2083 = vmatpush.bf16.msra.mxu1 %v5813_v51  ;;  %7196 = vst [vmem:[#allocation82_spill] sm:$0xff] %v5836_v37  ;;  %v4191_v51 = vld [vmem:[#allocation2 + $0xc] sm:$0xf0]  ;;  %v4568_v19 = vld [vmem:[#allocation2 + $0xc4] sm:$0xf] }
 0x7d1   :  { %7195 = vst [vmem:[#allocation81_spill] sm:$0xff] %v5831_v10  ;;  %2097 = vmatpush.bf16.msra.mxu2 %v5831_v10  ;;  %v5856_v56 = vor.u32 %v4544_v49, %v4191_v51  ;;  %v4233_v49 = vld [vmem:[#allocation2 + $0x50] sm:$0xf] }
 0x7d2   :  { %2070 = vmatpush.bf16.msra.mxu0 %v5811_v34  ;;  %v4571_v34 = vld [vmem:[#allocation2 + $0xdc] sm:$0xf]  ;;  %7197 = vst [vmem:[#allocation83_spill] sm:$0xff] %v5838_v28  ;;  %v5885_v14 = vor.u32 %v4555_v52, %v4233_v49  ;;  %v4341_v52 = vld [vmem:[#allocation2 + $0x128] sm:$0xf] }
 0x7d3   :  { %2059 = vmatpush.bf16.msra.mxu3 %v5828_v32  ;;  %7198 = vst [vmem:[#allocation84_spill] sm:$0xff] %v5841_v55  ;;  %v5844_v27 = vor.u32 %v4571_v34, %v4299_v2  ;;  %v5854_v2 = vor.u32 %v4569_v3, %v4285_v20  ;;  %v4257_v20 = vld [vmem:[#allocation2 + $0x80] sm:$0xf]  ;;  %v4561_v3 = vld [vmem:[#allocation2 + $0x88] sm:$0xf0] }
 0x7d4   :  { %2084 = vmatpush.bf16.msra.mxu1 %v5825_v7  ;;  %v4287_v7 = vld [vmem:[#allocation2 + $0xcc] sm:$0xf0]  ;;  %7202 = vst [vmem:[#allocation88_spill] sm:$0xff] %v5856_v56 }
 0x7d5   :  { %7199 = vst [vmem:[#allocation85_spill] sm:$0xff] %v5844_v27  ;;  %2098 = vmatpush.bf16.msra.mxu2 %v5844_v27  ;;  %v5860_v34 = vor.u32 %v4568_v19, %v4287_v7  ;;  %v5874_v19 = vor.u32 %v4561_v3, %v4257_v20  ;;  %v4585_v20 = vld [vmem:[#allocation2 + $0x148] sm:$0xf0] }
 0x7d6   :  { %2071 = vmatpush.bf16.msra.mxu0 %v5823_v44  ;;  %v5846_v44 = vor.u32 %v4567_v23, %v4281_v26  ;;  %7201 = vst [vmem:[#allocation87_spill] sm:$0xff] %v5854_v2  ;;  %v4365_v26 = vld [vmem:[#allocation2 + $0x158] sm:$0xf]  ;;  %v4588_v23 = vld [vmem:[#allocation2 + $0x160] sm:$0xf0] }
 0x7d7   :  { %2060 = vmatpush.bf16.msra.mxu3 %v5841_v55  ;;  %7203 = vst [vmem:[#allocation89_spill] sm:$0xff] %v5860_v34  ;;  %v5871_v51 = vor.u32 %v4588_v23, %v4365_v26  ;;  %v4353_v23 = vld [vmem:[#allocation2 + $0x140] sm:$0xf] }
 0x7d8   :  { %7200 = vst [vmem:[#allocation86_spill] sm:$0xff] %v5846_v44  ;;  %2085 = vmatpush.bf16.msra.mxu1 %v5838_v28  ;;  %v5903_v3 = vor.u32 %v4585_v20, %v4353_v23  ;;  %v4329_v23 = vld [vmem:[#allocation2 + $0x110] sm:$0xf]  ;;  %v4579_v20 = vld [vmem:[#allocation2 + $0x118] sm:$0xf0] }
 0x7d9   :  { %7204 = vst [vmem:[#allocation90_spill] sm:$0xff] %v5862_v48  ;;  %2099 = vmatpush.bf16.msra.mxu2 %v5860_v34 }
 0x7da   :  { %2072 = vmatpush.bf16.msra.mxu0 %v5836_v37  ;;  %7206 = vst [vmem:[#allocation92_spill] sm:$0xff] %v5871_v51 }
 0x7db   :  { %2105 = vmatpush.bf16.msrb.mxu3 %v5846_v44  ;;  %7207 = vst [vmem:[#allocation93_spill] sm:$0xff] %v5874_v19 }
 0x7dc   :  { %2086 = vmatpush.bf16.msra.mxu1 %v5856_v56  ;;  %7209 = vst [vmem:[#allocation95_spill] sm:$0xff] %v5885_v14 }
 0x7dd   :  { %2144 = vmatpush.bf16.msrb.mxu2 %v5583_v36  ;;  %7211 = vst [vmem:[#allocation97_spill] sm:$0xff] %v5903_v3 }
 0x7de   :  { %2073 = vmatpush.bf16.msra.mxu0 %v5854_v2 }
 0x7e0   :  { %2131 = vmatpush.bf16.msrb.mxu1 %v5581_v8 }
 0x7e1   :  { %2145 = vmatpush.bf16.msrb.mxu2 %v5589_v53 }
 0x7e2   :  { %2118 = vmatpush.bf16.msrb.mxu0 %v5862_v48 }
 0x7e4   :  { %2132 = vmatpush.bf16.msrb.mxu1 %v5586_v61 }
 0x7e5   :  { %2146 = vmatpush.bf16.msrb.mxu2 %v5595_v25 }
 0x7e6   :  { %2119 = vmatpush.bf16.msrb.mxu0 %v5871_v51 }
 0x7e8   :  { %2133 = vmatpush.bf16.msrb.mxu1 %v5592_v18 }
 0x7e9   :  { %2147 = vmatpush.bf16.msrb.mxu2 %v5601_v24 }
 0x7ea   :  { %2120 = vmatpush.bf16.msrb.mxu0 %v5903_v3 }
 0x7ec   :  { %2134 = vmatpush.bf16.msrb.mxu1 %v5598_v21 }
 0x7ed   :  { %2148 = vmatpush.bf16.msrb.mxu2 %v5612_v46 }
 0x7f0   :  { %2135 = vmatpush.bf16.msrb.mxu1 %v5609_v9 }
 0x7f1   :  { %2149 = vmatpush.bf16.msrb.mxu2 %v5621_v11  ;;  %v4573_v11 = vld [vmem:[#allocation2 + $0xe8] sm:$0xf0] }
 0x7f4   :  { %2136 = vmatpush.bf16.msrb.mxu1 %v5618_v62 }
 0x7f5   :  { %2150 = vmatpush.bf16.msrb.mxu2 %v5630_v35 }
 0x7f8   :  { %2137 = vmatpush.bf16.msrb.mxu1 %v5627_v15  ;;  %v5914_v15 = vor.u32 %v4579_v20, %v4329_v23 }
 0x7f9   :  { %2151 = vmatpush.bf16.msrb.mxu2 %v5639_v42  ;;  %v4546_v42 = vld [vmem:[#allocation2 + $0x10] sm:$0xf0] }
 0x7fa   :  { %7215 = vst [vmem:[#allocation101_spill] sm:$0xff] %v5914_v15 }
 0x7fc   :  { %2138 = vmatpush.bf16.msrb.mxu1 %v5636_v58  ;;  %v4197_v58 = vld [vmem:[#allocation2 + $0x8] sm:$0xf] }
 0x7fd   :  { %v5912_v35 = vor.u32 %v4546_v42, %v4197_v58  ;;  %v4293_v58 = vld [vmem:[#allocation2 + $0xc8] sm:$0xf]  ;;  %v4570_v42 = vld [vmem:[#allocation2 + $0xd0] sm:$0xf0] }
 0x7fe   :  { %v5924_v23 = vor.u32 %v4570_v42, %v4293_v58  ;;  %v7226_v42 = vld [vmem:[#allocation48_spill] sm:$0xff]  ;;  %v7231_v58 = vld [vmem:[#allocation51_spill] sm:$0xff] }
 0x7ff   :  { %7214 = vst [vmem:[#allocation100_spill] sm:$0xff] %v5912_v35 }
 0x800   :  { %7218 = vst [vmem:[#allocation104_spill] sm:$0xff] %v5924_v23 }
 0x835   :  { %v5848_v40 = vpop.xlane.xlu0 %1779 }
 0x836   :  { %vm1781_vm11 = vcmp.eq.f32.partialorder %v5759_v54, %v5848_v40  ;;  %v5865_v54 = vor.u32 %v4564_v4, %v4269_v16  ;;  %v4245_v4 = vld [vmem:[#allocation2 + $0x68] sm:$0xf]  ;;  %v4558_v16 = vld [vmem:[#allocation2 + $0x70] sm:$0xf0]  ;;  %v1786_v20 = vcvt.f32.s32 %v5848_v40 }
 0x837   :  { %v1782_v60 = vsel %vm1781_vm11, %v1777_v38, inf  ;;  %v5880_v7 = vor.u32 %v4558_v16, %v4245_v4  ;;  %v4221_v38 = vld [vmem:[#allocation2 + $0x38] sm:$0xf]  ;;  %v4209_v4 = vld [vmem:[#allocation2 + $0x20] sm:$0xf]  ;;  %v7225_v40 = vld [vmem:[#allocation41_spill] sm:$0xff] }
 0x838   :  { %1783 = vmin.xlane.f32.xlu1 %v1782_v60  ;;  %7205 = vst [vmem:[#allocation91_spill] sm:$0xff] %v5865_v54  ;;  %2106 = vmatpush.bf16.msrb.mxu3 %v5865_v54  ;;  %v4552_v60 = vld [vmem:[#allocation2 + $0x40] sm:$0xf0]  ;;  %v4549_v16 = vld [vmem:[#allocation2 + $0x28] sm:$0xf0]  ;;  %v1787_v9 = vshll.u32 %v1786_v20, 16 }
 0x839   :  { %7208 = vst [vmem:[#allocation94_spill] sm:$0xff] %v5880_v7  ;;  %v5890_v26 = vor.u32 %v4552_v60, %v4221_v38  ;;  %v5906_v49 = vor.u32 %v4549_v16, %v4209_v4  ;;  %v4582_v38 = vld [vmem:[#allocation2 + $0x130] sm:$0xf0]  ;;  %v4317_v4 = vld [vmem:[#allocation2 + $0xf8] sm:$0xf]  ;;  %v7227_v20 = vld [vmem:[#allocation49_spill] sm:$0xff] }
 0x83a   :  { %v5908_v60 = vor.u32 %v4582_v38, %v4341_v52  ;;  %v4576_v16 = vld [vmem:[#allocation2 + $0x100] sm:$0xf0]  ;;  %v4305_v38 = vld [vmem:[#allocation2 + $0xe0] sm:$0xf] }
 0x83b   :  { %7210 = vst [vmem:[#allocation96_spill] sm:$0xff] %v5890_v26  ;;  %v5918_v52 = vor.u32 %v4576_v16, %v4317_v4  ;;  %v5921_v62 = vor.u32 %v4573_v11, %v4305_v38  ;;  %v7041_v38 = vmov 1.0|1.0   ;;  %v7230_v11 = vld [vmem:[#allocation50_spill] sm:$0xff] }
 0x83c   :  { %2107 = vmatpush.bf16.msrb.mxu3 %v5874_v19  ;;  %7212 = vst [vmem:[#allocation98_spill] sm:$0xff] %v5906_v49  ;;  %2121 = vmatpush.bf16.msrb.mxu0 %v5908_v60 }
 0x83d   :  { %7213 = vst [vmem:[#allocation99_spill] sm:$0xff] %v5908_v60 }
 0x83e   :  { %7216 = vst [vmem:[#allocation102_spill] sm:$0xff] %v5918_v52 }
 0x83f   :  { %7217 = vst [vmem:[#allocation103_spill] sm:$0xff] %v5921_v62 }
 0x840   :  { %2108 = vmatpush.bf16.msrb.mxu3 %v5880_v7  ;;  %2122 = vmatpush.bf16.msrb.mxu0 %v5914_v15 }
 0x844   :  { %2109 = vmatpush.bf16.msrb.mxu3 %v5885_v14  ;;  %2123 = vmatpush.bf16.msrb.mxu0 %v5918_v52 }
 0x848   :  { %2110 = vmatpush.bf16.msrb.mxu3 %v5890_v26  ;;  %2124 = vmatpush.bf16.msrb.mxu0 %v5921_v62 }
 0x84c   :  { %2111 = vmatpush.bf16.msrb.mxu3 %v5906_v49  ;;  %2125 = vmatpush.bf16.msrb.mxu0 %v5924_v23 }
 0x850   :  { %2112 = vmatpush.bf16.msrb.mxu3 %v5912_v35 }
 0x8ab   :  { %v1784_v46 = vpop.xlane.xlu1 %1783 }
 0x8ac   :  { %v1785_v4 = vcvt.f32.s32 %v1784_v46  ;;  %v7224_v46 = vld [vmem:[#allocation72_spill] sm:$0xff] }
 0x8ae   :  { %v1788_v16 = vadd.s32 %v1787_v9, %v1785_v4  ;;  %v7223_v9 = vld [vmem:[#allocation47_spill] sm:$0xff]  ;;  %v7228_v4 = vld [vmem:[#allocation76_spill] sm:$0xff] }
 0x8b0   :  { %vm1789_vm12 = vcmp.eq.s32.totalorder %v5747_v50, %v1788_v16  ;;  %vm1790_vm13 = vcmp.eq.s32.totalorder %v5750_v12, %v1788_v16  ;;  %v7229_v16 = vld [vmem:[#allocation42_spill] sm:$0xff] }
 0x8b1   :  { %vm5930_vm14 = vmpackc.low %vm1789_vm12, %vm1789_vm12 }
 0x8b2   :  { %4380 = vmatmul.msk.bf16.vlgmr.msra.gmra.mxu3 %vm5930_vm14, %v7041_v38  ;;  %vm5937_vm15 = vmpackc.low %vm1790_vm13, %vm1790_vm13  ;;  %4384 = vmatmul.msk.bf16.vlgmr.msra.gmra.mxu1 %vm5930_vm14, %v7041_v38 }
 0x8b3   :  { %4382 = vmatmul.msk.bf16.vlgmr.msra.gmra.mxu0 %vm5937_vm15, %v7041_v38  ;;  %4386 = vmatmul.msk.bf16.vlgmr.msra.gmra.mxu2 %vm5937_vm15, %v7041_v38 }
 0x8b4   :  { %2157 = vmatpush.bf16.msra.mxu3 %v5603_v13  ;;  %2218 = vmatpush.bf16.msra.mxu0 %v5655_v59 }
 0x8b5   :  { %2231 = vmatpush.bf16.msra.mxu1 %v5657_v57  ;;  %2277 = vmatpush.bf16.msra.mxu2 %v5762_v22 }
 0x8b8   :  { %2158 = vmatpush.bf16.msra.mxu3 %v5606_v5  ;;  %2219 = vmatpush.bf16.msra.mxu0 %v5661_v39 }
 0x8b9   :  { %2232 = vmatpush.bf16.msra.mxu1 %v5663_v6  ;;  %2278 = vmatpush.bf16.msra.mxu2 %v5765_v63 }
 0x8bc   :  { %2159 = vmatpush.bf16.msra.mxu3 %v5615_v31  ;;  %2220 = vmatpush.bf16.msra.mxu0 %v5672_v0 }
 0x8bd   :  { %2233 = vmatpush.bf16.msra.mxu1 %v5674_v43  ;;  %2279 = vmatpush.bf16.msra.mxu2 %v5778_v33 }
 0x8c0   :  { %2160 = vmatpush.bf16.msra.mxu3 %v5624_v1  ;;  %2221 = vmatpush.bf16.msra.mxu0 %v5684_v41 }
 0x8c1   :  { %2234 = vmatpush.bf16.msra.mxu1 %v5686_v17  ;;  %2280 = vmatpush.bf16.msra.mxu2 %v5792_v47 }
 0x8c2   :  { %4388 = vmatmul.msk.bf16.vlgmr.msrb.gmra.mxu3 %vm5930_vm14, %v7041_v38  ;;  %2139 = vmatmul.bf16.vlgmr.msrb.gmra.mxu1 %v5725_v45 }
 0x8c3   :  { %4390 = vmatmul.msk.bf16.vlgmr.msrb.gmra.mxu0 %vm5937_vm15, %v7041_v38  ;;  %2152 = vmatmul.bf16.vlgmr.msrb.gmra.mxu2 %v5725_v45  ;;  %v7232_v38 = vld [vmem:[#allocation43_spill] sm:$0xff] }
 0x8c4   :  { %2161 = vmatpush.bf16.msra.mxu3 %v5633_v30  ;;  %2222 = vmatpush.bf16.msra.mxu0 %v5692_v29 }
 0x8c5   :  { %2235 = vmatpush.bf16.msra.mxu1 %v7223_v9  ;;  %2281 = vmatpush.bf16.msra.mxu2 %v7224_v46  ;;  %v7233_v9 = vld [vmem:[#allocation52_spill] sm:$0xff]  ;;  %v7234_v46 = vld [vmem:[#allocation53_spill] sm:$0xff] }
 0x8c8   :  { %2162 = vmatpush.bf16.msra.mxu3 %v7225_v40  ;;  %2223 = vmatpush.bf16.msra.mxu0 %v7226_v42  ;;  %v7235_v40 = vld [vmem:[#allocation61_spill] sm:$0xff]  ;;  %v7236_v42 = vld [vmem:[#allocation62_spill] sm:$0xff] }
 0x8c9   :  { %2236 = vmatpush.bf16.msra.mxu1 %v7227_v20  ;;  %2282 = vmatpush.bf16.msra.mxu2 %v7228_v4  ;;  %v7237_v20 = vld [vmem:[#allocation63_spill] sm:$0xff] }
 0x8cc   :  { %2163 = vmatpush.bf16.msra.mxu3 %v7229_v16  ;;  %2224 = vmatpush.bf16.msra.mxu0 %v7230_v11 }
 0x8cd   :  { %2237 = vmatpush.bf16.msra.mxu1 %v7231_v58  ;;  %2283 = vmatpush.bf16.msra.mxu2 %v5828_v32  ;;  %v7238_v58 = vld [vmem:[#allocation64_spill] sm:$0xff]  ;;  %v7239_v32 = vld [vmem:[#allocation65_spill] sm:$0xff] }
 0x8d0   :  { %2164 = vmatpush.bf16.msra.mxu3 %v7232_v38  ;;  %2225 = vmatpush.bf16.msra.mxu0 %v7233_v9  ;;  %v7240_v38 = vld [vmem:[#allocation66_spill] sm:$0xff] }
 0x8d1   :  { %2238 = vmatpush.bf16.msra.mxu1 %v7234_v46  ;;  %2284 = vmatpush.bf16.msra.mxu2 %v5841_v55  ;;  %v7241_v46 = vld [vmem:[#allocation67_spill] sm:$0xff] }
 0x8d2   :  { %v7245_v55 = vld [vmem:[#allocation71_spill] sm:$0xff] }
 0x8d3   :  { %2165 = vmatmul.bf16.vlgmr.msra.gmra.mxu3 %v5725_v45  ;;  %v7244_v45 = vld [vmem:[#allocation70_spill] sm:$0xff] }
 0x8d4   :  { %2290 = vmatpush.bf16.msrb.mxu3 %v7235_v40  ;;  %2303 = vmatpush.bf16.msrb.mxu0 %v7236_v42  ;;  %v7242_v40 = vld [vmem:[#allocation68_spill] sm:$0xff]  ;;  %v7243_v42 = vld [vmem:[#allocation69_spill] sm:$0xff] }
 0x8d5   :  { %2316 = vmatpush.bf16.msrb.mxu1 %v7237_v20  ;;  %2329 = vmatpush.bf16.msrb.mxu2 %v5846_v44  ;;  %v7246_v44 = vld [vmem:[#allocation73_spill] sm:$0xff] }
 0x8d8   :  { %2291 = vmatpush.bf16.msrb.mxu3 %v7238_v58  ;;  %2304 = vmatpush.bf16.msrb.mxu0 %v7239_v32  ;;  %v7247_v32 = vld [vmem:[#allocation74_spill] sm:$0xff] }
 0x8d9   :  { %2317 = vmatpush.bf16.msrb.mxu1 %v7240_v38  ;;  %2330 = vmatpush.bf16.msrb.mxu2 %v5865_v54  ;;  %v7248_v38 = vld [vmem:[#allocation75_spill] sm:$0xff]  ;;  %v7249_v54 = vld [vmem:[#allocation77_spill] sm:$0xff] }
 0x8dc   :  { %2292 = vmatpush.bf16.msrb.mxu3 %v7241_v46  ;;  %2305 = vmatpush.bf16.msrb.mxu0 %v7242_v40  ;;  %v7250_v40 = vld [vmem:[#allocation78_spill] sm:$0xff] }
 0x8dd   :  { %2318 = vmatpush.bf16.msrb.mxu1 %v7243_v42  ;;  %2331 = vmatpush.bf16.msrb.mxu2 %v5874_v19  ;;  %v7251_v42 = vld [vmem:[#allocation79_spill] sm:$0xff] }
 0x8e0   :  { %2293 = vmatpush.bf16.msrb.mxu3 %v7244_v45  ;;  %2306 = vmatpush.bf16.msrb.mxu0 %v7245_v55 }
 0x8e1   :  { %2319 = vmatpush.bf16.msrb.mxu1 %v7246_v44  ;;  %2332 = vmatpush.bf16.msrb.mxu2 %v5880_v7 }
 0x8e4   :  { %2294 = vmatpush.bf16.msrb.mxu3 %v7247_v32  ;;  %2307 = vmatpush.bf16.msrb.mxu0 %v7248_v38 }
 0x8e5   :  { %2320 = vmatpush.bf16.msrb.mxu1 %v7249_v54  ;;  %2333 = vmatpush.bf16.msrb.mxu2 %v5885_v14 }
 0x8e8   :  { %2295 = vmatpush.bf16.msrb.mxu3 %v7250_v40  ;;  %2308 = vmatpush.bf16.msrb.mxu0 %v7251_v42 }
 0x8e9   :  { %2321 = vmatpush.bf16.msrb.mxu1 %v5831_v10  ;;  %2334 = vmatpush.bf16.msrb.mxu2 %v5890_v26 }
 0x8ec   :  { %2296 = vmatpush.bf16.msrb.mxu3 %v5836_v37  ;;  %2309 = vmatpush.bf16.msrb.mxu0 %v5838_v28 }
 0x8ed   :  { %2322 = vmatpush.bf16.msrb.mxu1 %v5844_v27  ;;  %2335 = vmatpush.bf16.msrb.mxu2 %v5906_v49 }
 0x8f0   :  { %2297 = vmatpush.bf16.msrb.mxu3 %v5854_v2  ;;  %2310 = vmatpush.bf16.msrb.mxu0 %v5856_v56 }
 0x8f1   :  { %2323 = vmatpush.bf16.msrb.mxu1 %v5860_v34  ;;  %2336 = vmatpush.bf16.msrb.mxu2 %v5912_v35 }
 0x8f4   :  { %2342 = vmatpush.bf16.msra.mxu3 %v5862_v48 }
 0x8f8   :  { %2343 = vmatpush.bf16.msra.mxu3 %v5871_v51 }
 0x8fc   :  { %2344 = vmatpush.bf16.msra.mxu3 %v5903_v3 }
 0x900   :  { %2345 = vmatpush.bf16.msra.mxu3 %v5908_v60  ;;  %v7252_v60 = vld [vmem:[#allocation44_spill] sm:$0xff] }
 0x904   :  { %2346 = vmatpush.bf16.msra.mxu3 %v5914_v15 }
 0x908   :  { %2347 = vmatpush.bf16.msra.mxu3 %v5918_v52 }
 0x90c   :  { %2348 = vmatpush.bf16.msra.mxu3 %v5921_v62 }
 0x910   :  { %2349 = vmatpush.bf16.msra.mxu3 %v5924_v23  ;;  %v7253_v23 = vld [vmem:[#allocation45_spill] sm:$0xff] }
 0x92f   :  { %v2088_v56 = vpop.f32.mrf.mxu1 }
 0x930   :  { %v2075_v34 = vpop.f32.mrf.mxu0 }
 0x935   :  { %v2062_v2 = vpop.f32.mrf.mxu3 }
 0x936   :  { %v2101_v48 = vpop.f32.mrf.mxu2  ;;  %v2076_v3 = vadd.f32 %v2075_v34, %v2062_v2 }
 0x937   :  { %v2090_v49 = vpop.f32.mrf.mxu1  ;;  %v2102_v42 = vadd.f32 %v2101_v48, %v2088_v56 }
 0x938   :  { %v2077_v35 = vpop.f32.mrf.mxu0 }
 0x93d   :  { %v2064_v27 = vpop.f32.mrf.mxu3 }
 0x93e   :  { %v2103_v51 = vpop.f32.mrf.mxu2 }
 0x93f   :  { %v2140_v28 = vpop.f32.mrf.mxu1 }
 0x940   :  { %v2127_v37 = vpop.f32.mrf.mxu0  ;;  %v2141_v26 = vadd.f32 %v2140_v28, %v7252_v60 }
 0x942   :  { %v2170_v15 = vadd.f32 %v2141_v26, %v2076_v3 }
 0x944   :  { %v4391_v10 = vmul.f32 -1.442695, %v2170_v15 }
 0x945   :  { %v2114_v52 = vpop.f32.mrf.mxu3 }
 0x946   :  { %4739 = vpow2.f32 %v4391_v10  ;;  %v2153_v62 = vpop.f32.mrf.mxu2 }
 0x947   :  { %v2154_v40 = vadd.f32 %v2153_v62, %v7253_v23  ;;  %v2142_v14 = vpop.f32.mrf.mxu1  ;;  %v2128_v23 = vadd.f32 %v2127_v37, %v2114_v52 }
 0x948   :  { %v2129_v54 = vpop.f32.mrf.mxu0 }
 0x949   :  { %v2190_v38 = vadd.f32 %v2154_v40, %v2102_v42  ;;  %v7254_v42 = vld [vmem:[#allocation54_spill] sm:$0xff] }
 0x94b   :  { %v4392_v49 = vmul.f32 -1.442695, %v2190_v38 }
 0x94c   :  { %v4740_v35 = vpop.eup %4739 }
 0x94d   :  { %v2174_v27 = vadd.f32 1.0, %v4740_v35  ;;  %4741 = vpow2.f32 %v4392_v49  ;;  %v2116_v51 = vpop.f32.mrf.mxu3 }
 0x94e   :  { %v2155_v2 = vpop.f32.mrf.mxu2 }
 0x94f   :  { %4743 = vrcp.f32 %v2174_v27  ;;  %v2186_v56 = vand.u32 2147483648, %v2174_v27  ;;  %v2184_v62 = vand.u32 2147483647, %v2174_v27  ;;  %vm2180_vm1 = vweird.f32 %v2174_v27 }
 0x951   :  { %v2187_v40 = vor.u32 1.1754944e-38, %v2186_v56  ;;  %vm2185_vm3 = vcmp.eq.f32.partialorder %v2184_v62, 8.507059e+37 }
 0x953   :  { %v4742_v34 = vpop.eup %4741 }
 0x954   :  { %v2194_v28 = vadd.f32 1.0, %v4742_v34 }
 0x955   :  { %v4744_v26 = vpop.eup %4743 }
 0x956   :  { %4745 = vrcp.f32 %v2194_v28  ;;  %v2166_v15 = vpop.f32.mrf.mxu3  ;;  %v2176_v10 = vmul.f32 %v4744_v26, %v2174_v27  ;;  %vm2181_vm0 = vweird.f32 %v4744_v26  ;;  %v2206_v60 = vand.u32 2147483648, %v2194_v28 }
 0x957   :  { %vm2182_vm2 = vmor %vm2180_vm1, %vm2181_vm0  ;;  %v2167_v49 = vadd.f32 %v2166_v15, %v7254_v42  ;;  %vm2200_vm5 = vweird.f32 %v2194_v28 }
 0x958   :  { %v2177_v3 = vsub.f32 1.0, %v2176_v10  ;;  %v2207_v27 = vor.u32 1.1754944e-38, %v2206_v60  ;;  %v7258_v60 = vld [vmem:[#allocation36_spill] sm:$0xff] }
 0x95a   :  { %v2178_v48 = vmul.f32 %v4744_v26, %v2177_v3  ;;  %v2204_v3 = vand.u32 2147483647, %v2194_v28 }
 0x95c   :  { %v4746_v54 = vpop.eup %4745  ;;  %v2179_v14 = vadd.f32 %v4744_v26, %v2178_v48  ;;  %vm2205_vm7 = vcmp.eq.f32.partialorder %v2204_v3, 8.507059e+37  ;;  %v7266_v3 = vld [vmem:[#allocation57_spill] sm:$0xff] }
 0x95d   :  { %v2196_v38 = vmul.f32 %v4746_v54, %v2194_v28  ;;  %vm2201_vm4 = vweird.f32 %v4746_v54  ;;  %v7260_v28 = vld [vmem:[#allocation32_spill] sm:$0xff] }
 0x95e   :  { %v2183_v35 = vsel %vm2182_vm2, %v4744_v26, %v2179_v14  ;;  %v2168_v51 = vpop.f32.mrf.mxu3  ;;  %vm2202_vm6 = vmor %vm2200_vm5, %vm2201_vm4 }
 0x95f   :  { %v2197_v2 = vsub.f32 1.0, %v2196_v38  ;;  %v2188_v34 = vsel %vm2185_vm3, %v2187_v40, %v2183_v35  ;;  %v7255_v38 = vld [vmem:[#allocation55_spill] sm:$0xff]  ;;  %v7263_v35 = vld [vmem:[#allocation40_spill] sm:$0xff] }
 0x960   :  { %v2210_v10 = vmul.f32 %v2188_v34, %v2167_v49  ;;  %v7262_v49 = vld [vmem:[#allocation39_spill] sm:$0xff]  ;;  %v7264_v34 = vld [vmem:[#allocation56_spill] sm:$0xff] }
 0x961   :  { %v2198_v32 = vmul.f32 %v4746_v54, %v2197_v2 }
 0x962   :  { %v2211_v7 = vadd.f32 %v2210_v10, %v2128_v23  ;;  %v7259_v23 = vld [vmem:[#allocation34_spill] sm:$0xff] }
 0x963   :  { %v2199_v48 = vadd.f32 %v4746_v54, %v2198_v32  ;;  %v7256_v32 = vld [vmem:[#allocation33_spill] sm:$0xff] }
 0x964   :  { %4747 = vtanh.f32 %v2211_v7  ;;  %v7257_v7 = vld [vmem:[#allocation35_spill] sm:$0xff] }
 0x965   :  { %v2203_v56 = vsel %vm2202_vm6, %v4746_v54, %v2199_v48  ;;  %v7261_v54 = vld [vmem:[#allocation37_spill] sm:$0xff] }
 0x966   :  { %v2208_v15 = vsel %vm2205_vm7, %v2207_v27, %v2203_v56 }
 0x967   :  { %v2213_v26 = vsub.f32 1.0, %v2208_v15  ;;  %v2215_v40 = vmul.f32 %v2208_v15, %v7255_v38 }
 0x96a   :  { %v4748_v62 = vpop.eup %4747 }
 0x96b   :  { %v2214_v14 = vmul.f32 %v4748_v62, %v2213_v26 }
 0x96d   :  { %v6035_v37 = vadd.f32 %v2215_v40, %v2214_v14 }
 0x96f   :  { %v6039_v52 = vpack.c.bf16 %v6035_v37, %v6035_v37 }
 0x971   :  { %2226 = vmatmul.bf16.vlgmr.msra.gmra.mxu0 %v6039_v52  ;;  %2239 = vmatmul.bf16.vlgmr.msra.gmra.mxu1 %v6039_v52 }
 0x972   :  { %2355 = vmatpush.bf16.msra.mxu0 %v5581_v8  ;;  %2368 = vmatpush.bf16.msra.mxu1 %v5583_v36 }
 0x976   :  { %2356 = vmatpush.bf16.msra.mxu0 %v5586_v61  ;;  %2369 = vmatpush.bf16.msra.mxu1 %v5589_v53 }
 0x97a   :  { %2357 = vmatpush.bf16.msra.mxu0 %v5592_v18  ;;  %2370 = vmatpush.bf16.msra.mxu1 %v5595_v25 }
 0x97e   :  { %2358 = vmatpush.bf16.msra.mxu0 %v5598_v21  ;;  %2371 = vmatpush.bf16.msra.mxu1 %v5601_v24 }
 0x982   :  { %2359 = vmatpush.bf16.msra.mxu0 %v7256_v32  ;;  %2372 = vmatpush.bf16.msra.mxu1 %v7257_v7 }
 0x986   :  { %2360 = vmatpush.bf16.msra.mxu0 %v7258_v60  ;;  %2373 = vmatpush.bf16.msra.mxu1 %v7259_v23 }
 0x98a   :  { %2361 = vmatpush.bf16.msra.mxu0 %v7260_v28  ;;  %2374 = vmatpush.bf16.msra.mxu1 %v7261_v54 }
 0x98e   :  { %2362 = vmatpush.bf16.msra.mxu0 %v7262_v49  ;;  %2375 = vmatpush.bf16.msra.mxu1 %v7263_v35 }
 0x9ee   :  { %v2227_v51 = vpop.f32.mrf.mxu0  ;;  %v2240_v2 = vpop.f32.mrf.mxu1 }
 0x9ef   :  { %v6060_v10 = vadd.f32 %v2227_v51, %v7264_v34  ;;  %v6063_v48 = vadd.f32 %v2240_v2, %v7266_v3 }
 0x9f1   :  { %7265 = vst [vmem:[#allocation54_spill] sm:$0xff] %v6060_v10  ;;  %v6067_v27 = vmax.f32 %v6060_v10, %v6063_v48 }
 0x9f2   :  { %7267 = vst [vmem:[#allocation55_spill] sm:$0xff] %v6063_v48 }
 0x9f3   :  { %7268 = vst [vmem:[#allocation33_spill] sm:$0xff] %v6067_v27  ;;  %2247 = vmax.xlane.f32.xlu1 %v6067_v27 }
 0x9f6   :  { %v2229_v56 = vpop.f32.mrf.mxu0  ;;  %v2242_v15 = vpop.f32.mrf.mxu1 }
 0xa66   :  { %v2248_v26 = vpop.xlane.xlu1 %2247 }
 0xa67   :  { %vm2249_vm8 = vcmp.eq.f32.partialorder %v6060_v10, %v2248_v26  ;;  %vm2250_vm9 = vcmp.eq.f32.partialorder %v6063_v48, %v2248_v26  ;;  %v7287_v48 = vld [vmem:[#allocation65_spill] sm:$0xff] }
 0xa68   :  { %v2251_v62 = vsel %vm2249_vm8, %v5747_v50, 256  ;;  %v2252_v14 = vsel %vm2250_vm9, %v5750_v12, 256 }
 0xa69   :  { %vm2253_vm10 = vcmp.lt.s32.totalorder %v2251_v62, %v2252_v14 }
 0xa6a   :  { %v2254_v38 = vsel %vm2253_vm10, %v2251_v62, %v2252_v14  ;;  %v7285_v62 = vld [vmem:[#allocation84_spill] sm:$0xff]  ;;  %v7286_v14 = vld [vmem:[#allocation86_spill] sm:$0xff] }
 0xa6b   :  { %v2256_v40 = vshra.s32 %v2254_v38, 16  ;;  %v2255_v2 = vand.u32 65535, %v2254_v38  ;;  %v7273_v38 = vmov 1.0|1.0  }
 0xa6d   :  { %v2258_v51 = vcvt.s32.f32 %v2256_v40  ;;  %v2257_v3 = vcvt.s32.f32 %v2255_v2  ;;  %v7279_v40 = vld [vmem:[#allocation51_spill] sm:$0xff] }
 0xa6e   :  { %v7281_v2 = vld [vmem:[#allocation43_spill] sm:$0xff] }
 0xa6f   :  { %2259 = vmin.xlane.f32.xlu2 %v2258_v51 }
 0xae2   :  { %v2260_v34 = vpop.xlane.xlu2 %2259 }
 0xae3   :  { %vm2261_vm11 = vcmp.eq.f32.partialorder %v2258_v51, %v2260_v34  ;;  %v2266_v15 = vcvt.f32.s32 %v2260_v34  ;;  %v7275_v34 = vld [vmem:[#allocation72_spill] sm:$0xff] }
 0xae4   :  { %v2262_v56 = vsel %vm2261_vm11, %v2257_v3, inf  ;;  %v7277_v3 = vld [vmem:[#allocation48_spill] sm:$0xff] }
 0xae5   :  { %2263 = vmin.xlane.f32.xlu2 %v2262_v56  ;;  %v2267_v10 = vshll.u32 %v2266_v15, 16  ;;  %v7280_v51 = vld [vmem:[#allocation80_spill] sm:$0xff]  ;;  %v7282_v56 = vld [vmem:[#allocation53_spill] sm:$0xff] }
 0xae6   :  { %v7283_v15 = vld [vmem:[#allocation61_spill] sm:$0xff] }
 0xb58   :  { %v2264_v27 = vpop.xlane.xlu2 %2263 }
 0xb59   :  { %v2265_v35 = vcvt.f32.s32 %v2264_v27  ;;  %v7278_v27 = vld [vmem:[#allocation49_spill] sm:$0xff] }
 0xb5b   :  { %v2268_v26 = vadd.s32 %v2267_v10, %v2265_v35  ;;  %v7274_v35 = vld [vmem:[#allocation47_spill] sm:$0xff]  ;;  %v7276_v10 = vld [vmem:[#allocation41_spill] sm:$0xff] }
 0xb5d   :  { %vm2269_vm12 = vcmp.eq.s32.totalorder %v5747_v50, %v2268_v26  ;;  %vm2270_vm13 = vcmp.eq.s32.totalorder %v5750_v12, %v2268_v26  ;;  %v7284_v26 = vld [vmem:[#allocation62_spill] sm:$0xff] }
 0xb5e   :  { %vm6076_vm14 = vmpackc.low %vm2269_vm12, %vm2269_vm12 }
 0xb5f   :  { %vm6080_vm15 = vmpackc.low %vm2270_vm13, %vm2270_vm13  ;;  %4396 = vmatmul.msk.bf16.vlgmr.msra.gmra.mxu2 %vm6076_vm14, %v7273_v38  ;;  %4400 = vmatmul.msk.bf16.vlgmr.msrb.gmra.mxu0 %vm6076_vm14, %v7273_v38 }
 0xb60   :  { %4398 = vmatmul.msk.bf16.vlgmr.msrb.gmra.mxu3 %vm6080_vm15, %v7273_v38  ;;  %4402 = vmatmul.msk.bf16.vlgmr.msrb.gmra.mxu1 %vm6080_vm15, %v7273_v38 }
 0xb61   :  { %2381 = vmatpush.bf16.msra.mxu2 %v5603_v13  ;;  %2442 = vmatpush.bf16.msrb.mxu3 %v5655_v59 }
 0xb62   :  { %2455 = vmatpush.bf16.msrb.mxu0 %v5657_v57  ;;  %2501 = vmatpush.bf16.msrb.mxu1 %v5762_v22 }
 0xb65   :  { %2382 = vmatpush.bf16.msra.mxu2 %v5606_v5  ;;  %2443 = vmatpush.bf16.msrb.mxu3 %v5661_v39 }
 0xb66   :  { %2456 = vmatpush.bf16.msrb.mxu0 %v5663_v6  ;;  %2502 = vmatpush.bf16.msrb.mxu1 %v5765_v63 }
 0xb69   :  { %2383 = vmatpush.bf16.msra.mxu2 %v5615_v31  ;;  %2444 = vmatpush.bf16.msrb.mxu3 %v5672_v0 }
 0xb6a   :  { %2457 = vmatpush.bf16.msrb.mxu0 %v5674_v43  ;;  %2503 = vmatpush.bf16.msrb.mxu1 %v5778_v33 }
 0xb6d   :  { %2384 = vmatpush.bf16.msra.mxu2 %v5624_v1  ;;  %2445 = vmatpush.bf16.msrb.mxu3 %v5684_v41 }
 0xb6e   :  { %2458 = vmatpush.bf16.msrb.mxu0 %v5686_v17  ;;  %2504 = vmatpush.bf16.msrb.mxu1 %v5792_v47 }
 0xb6f   :  { %4404 = vmatmul.msk.bf16.vlgmr.msrb.gmra.mxu2 %vm6076_vm14, %v7273_v38  ;;  %2363 = vmatmul.bf16.vlgmr.msra.gmra.mxu0 %v6039_v52 }
 0xb70   :  { %4406 = vmatmul.msk.bf16.vlgmr.msra.gmra.mxu3 %vm6080_vm15, %v7273_v38  ;;  %2376 = vmatmul.bf16.vlgmr.msra.gmra.mxu1 %v6039_v52 }
 0xb71   :  { %2385 = vmatpush.bf16.msra.mxu2 %v5633_v30  ;;  %2446 = vmatpush.bf16.msrb.mxu3 %v5692_v29 }
 0xb72   :  { %2459 = vmatpush.bf16.msrb.mxu0 %v7274_v35  ;;  %2505 = vmatpush.bf16.msrb.mxu1 %v7275_v34 }
 0xb75   :  { %2386 = vmatpush.bf16.msra.mxu2 %v7276_v10  ;;  %2447 = vmatpush.bf16.msrb.mxu3 %v7277_v3 }
 0xb76   :  { %2460 = vmatpush.bf16.msrb.mxu0 %v7278_v27  ;;  %2506 = vmatpush.bf16.msrb.mxu1 %v7228_v4 }
 0xb79   :  { %2387 = vmatpush.bf16.msra.mxu2 %v7229_v16  ;;  %2448 = vmatpush.bf16.msrb.mxu3 %v7230_v11 }
 0xb7a   :  { %2461 = vmatpush.bf16.msrb.mxu0 %v7279_v40  ;;  %2507 = vmatpush.bf16.msrb.mxu1 %v7280_v51  ;;  %v7318_v40 = vld [vmem:[#allocation45_spill] sm:$0xff] }
 0xb7d   :  { %2388 = vmatpush.bf16.msra.mxu2 %v7281_v2  ;;  %2449 = vmatpush.bf16.msrb.mxu3 %v7233_v9  ;;  %v7288_v2 = vld [vmem:[#allocation66_spill] sm:$0xff]  ;;  %v7289_v9 = vld [vmem:[#allocation91_spill] sm:$0xff] }
 0xb7e   :  { %2462 = vmatpush.bf16.msrb.mxu0 %v7282_v56  ;;  %2508 = vmatpush.bf16.msrb.mxu1 %v7285_v62  ;;  %v7317_v56 = vld [vmem:[#allocation44_spill] sm:$0xff] }
 0xb80   :  { %2389 = vmatmul.bf16.vlgmr.msra.gmra.mxu2 %v6039_v52  ;;  %v7292_v52 = vld [vmem:[#allocation94_spill] sm:$0xff] }
 0xb81   :  { %2514 = vmatpush.bf16.msrb.mxu2 %v7283_v15  ;;  %2527 = vmatpush.bf16.msra.mxu3 %v7284_v26  ;;  %v7290_v15 = vld [vmem:[#allocation68_spill] sm:$0xff]  ;;  %v7291_v26 = vld [vmem:[#allocation69_spill] sm:$0xff] }
 0xb82   :  { %2540 = vmatpush.bf16.msra.mxu0 %v7237_v20  ;;  %2553 = vmatpush.bf16.msra.mxu1 %v7286_v14 }
 0xb85   :  { %2515 = vmatpush.bf16.msrb.mxu2 %v7238_v58  ;;  %2528 = vmatpush.bf16.msra.mxu3 %v7287_v48  ;;  %v7293_v48 = vld [vmem:[#allocation74_spill] sm:$0xff] }
 0xb86   :  { %2541 = vmatpush.bf16.msra.mxu0 %v7288_v2  ;;  %2554 = vmatpush.bf16.msra.mxu1 %v7289_v9  ;;  %v7294_v2 = vld [vmem:[#allocation75_spill] sm:$0xff]  ;;  %v7295_v9 = vld [vmem:[#allocation77_spill] sm:$0xff] }
 0xb89   :  { %2516 = vmatpush.bf16.msrb.mxu2 %v7241_v46  ;;  %2529 = vmatpush.bf16.msra.mxu3 %v7290_v15  ;;  %v7296_v46 = vld [vmem:[#allocation95_spill] sm:$0xff]  ;;  %v7297_v15 = vld [vmem:[#allocation78_spill] sm:$0xff] }
 0xb8a   :  { %2542 = vmatpush.bf16.msra.mxu0 %v7291_v26  ;;  %2555 = vmatpush.bf16.msra.mxu1 %v5874_v19  ;;  %v7298_v26 = vld [vmem:[#allocation79_spill] sm:$0xff]  ;;  %v7299_v19 = vld [vmem:[#allocation81_spill] sm:$0xff] }
 0xb8d   :  { %2517 = vmatpush.bf16.msrb.mxu2 %v7244_v45  ;;  %2530 = vmatpush.bf16.msra.mxu3 %v7245_v55  ;;  %v7300_v45 = vld [vmem:[#allocation96_spill] sm:$0xff]  ;;  %v7301_v55 = vld [vmem:[#allocation82_spill] sm:$0xff] }
 0xb8e   :  { %2543 = vmatpush.bf16.msra.mxu0 %v7246_v44  ;;  %2556 = vmatpush.bf16.msra.mxu1 %v7292_v52  ;;  %v7302_v44 = vld [vmem:[#allocation83_spill] sm:$0xff]  ;;  %v7303_v52 = vld [vmem:[#allocation85_spill] sm:$0xff] }
 0xb91   :  { %2518 = vmatpush.bf16.msrb.mxu2 %v7293_v48  ;;  %2531 = vmatpush.bf16.msra.mxu3 %v7294_v2  ;;  %v7304_v48 = vld [vmem:[#allocation98_spill] sm:$0xff]  ;;  %v7305_v2 = vld [vmem:[#allocation87_spill] sm:$0xff] }
 0xb92   :  { %2544 = vmatpush.bf16.msra.mxu0 %v7295_v9  ;;  %2557 = vmatpush.bf16.msra.mxu1 %v7296_v46  ;;  %v7306_v9 = vld [vmem:[#allocation88_spill] sm:$0xff]  ;;  %v7307_v46 = vld [vmem:[#allocation89_spill] sm:$0xff] }
 0xb95   :  { %2519 = vmatpush.bf16.msrb.mxu2 %v7297_v15  ;;  %2532 = vmatpush.bf16.msra.mxu3 %v7298_v26  ;;  %v7308_v15 = vld [vmem:[#allocation90_spill] sm:$0xff]  ;;  %v7309_v26 = vld [vmem:[#allocation100_spill] sm:$0xff] }
 0xb96   :  { %2545 = vmatpush.bf16.msra.mxu0 %v7299_v19  ;;  %2558 = vmatpush.bf16.msra.mxu1 %v7300_v45  ;;  %v7310_v19 = vld [vmem:[#allocation92_spill] sm:$0xff]  ;;  %v7311_v45 = vld [vmem:[#allocation97_spill] sm:$0xff] }
 0xb99   :  { %2520 = vmatpush.bf16.msrb.mxu2 %v7301_v55  ;;  %2533 = vmatpush.bf16.msra.mxu3 %v7302_v44  ;;  %v7312_v55 = vld [vmem:[#allocation99_spill] sm:$0xff]  ;;  %v7313_v44 = vld [vmem:[#allocation101_spill] sm:$0xff] }
 0xb9a   :  { %2546 = vmatpush.bf16.msra.mxu0 %v7303_v52  ;;  %2559 = vmatpush.bf16.msra.mxu1 %v7304_v48  ;;  %v7314_v52 = vld [vmem:[#allocation102_spill] sm:$0xff]  ;;  %v7315_v48 = vld [vmem:[#allocation103_spill] sm:$0xff] }
 0xb9d   :  { %2521 = vmatpush.bf16.msrb.mxu2 %v7305_v2  ;;  %2534 = vmatpush.bf16.msra.mxu3 %v7306_v9  ;;  %v7316_v2 = vld [vmem:[#allocation104_spill] sm:$0xff] }
 0xb9e   :  { %2547 = vmatpush.bf16.msra.mxu0 %v7307_v46  ;;  %2560 = vmatpush.bf16.msra.mxu1 %v7309_v26 }
 0xba1   :  { %2566 = vmatpush.bf16.msra.mxu2 %v7308_v15 }
 0xba5   :  { %2567 = vmatpush.bf16.msra.mxu2 %v7310_v19 }
 0xba9   :  { %2568 = vmatpush.bf16.msra.mxu2 %v7311_v45 }
 0xbad   :  { %2569 = vmatpush.bf16.msra.mxu2 %v7312_v55 }
 0xbb1   :  { %2570 = vmatpush.bf16.msra.mxu2 %v7313_v44 }
 0xbb5   :  { %2571 = vmatpush.bf16.msra.mxu2 %v7314_v52 }
 0xbb9   :  { %2572 = vmatpush.bf16.msra.mxu2 %v7315_v48 }
 0xbbd   :  { %2573 = vmatpush.bf16.msra.mxu2 %v7316_v2 }
 0xbdc   :  { %v2312_v9 = vpop.f32.mrf.mxu0 }
 0xbdd   :  { %v2325_v46 = vpop.f32.mrf.mxu1 }
 0xbde   :  { %v2326_v44 = vadd.f32 %v2325_v46, %v2312_v9 }
 0xbe2   :  { %v2286_v58 = vpop.f32.mrf.mxu2 }
 0xbe3   :  { %v2299_v15 = vpop.f32.mrf.mxu3 }
 0xbe4   :  { %v2314_v14 = vpop.f32.mrf.mxu0  ;;  %v2300_v45 = vadd.f32 %v2299_v15, %v2286_v58 }
 0xbe5   :  { %v2327_v26 = vpop.f32.mrf.mxu1 }
 0xbea   :  { %v2288_v62 = vpop.f32.mrf.mxu2 }
 0xbeb   :  { %v2301_v19 = vpop.f32.mrf.mxu3 }
 0xbec   :  { %v2364_v20 = vpop.f32.mrf.mxu0 }
 0xbed   :  { %v2365_v55 = vadd.f32 %v2364_v20, %v7317_v56  ;;  %v2377_v51 = vpop.f32.mrf.mxu1 }
 0xbee   :  { %v2378_v52 = vadd.f32 %v2377_v51, %v7318_v40 }
 0xbef   :  { %v2394_v11 = vadd.f32 %v2365_v55, %v2300_v45 }
 0xbf0   :  { %v2414_v48 = vadd.f32 %v2378_v52, %v2326_v44 }
 0xbf1   :  { %v4407_v16 = vmul.f32 -1.442695, %v2394_v11 }
 0xbf2   :  { %v4408_v2 = vmul.f32 -1.442695, %v2414_v48  ;;  %v2338_v4 = vpop.f32.mrf.mxu2 }
 0xbf3   :  { %4749 = vpow2.f32 %v4407_v16  ;;  %v2351_v27 = vpop.f32.mrf.mxu3 }
 0xbf4   :  { %4751 = vpow2.f32 %v4408_v2  ;;  %v2366_v14 = vpop.f32.mrf.mxu0 }
 0xbf5   :  { %v2379_v26 = vpop.f32.mrf.mxu1 }
 0xbf9   :  { %v4750_v62 = vpop.eup %4749 }
 0xbfa   :  { %v4752_v19 = vpop.eup %4751  ;;  %v2398_v3 = vadd.f32 1.0, %v4750_v62  ;;  %v2340_v58 = vpop.f32.mrf.mxu2 }
 0xbfb   :  { %v2418_v15 = vadd.f32 1.0, %v4752_v19  ;;  %v2353_v20 = vpop.f32.mrf.mxu3 }
 0xbfc   :  { %4753 = vrcp.f32 %v2398_v3  ;;  %v2410_v16 = vand.u32 2147483648, %v2398_v3  ;;  %v2408_v2 = vand.u32 2147483647, %v2398_v3  ;;  %vm2404_vm1 = vweird.f32 %v2398_v3 }
 0xbfd   :  { %4755 = vrcp.f32 %v2418_v15  ;;  %v2430_v40 = vand.u32 2147483648, %v2418_v15  ;;  %vm2424_vm5 = vweird.f32 %v2418_v15 }
 0xbfe   :  { %v2411_v26 = vor.u32 1.1754944e-38, %v2410_v16  ;;  %vm2409_vm3 = vcmp.eq.f32.partialorder %v2408_v2, 8.507059e+37 }
 0xc02   :  { %v4754_v9 = vpop.eup %4753 }
 0xc03   :  { %v4756_v46 = vpop.eup %4755  ;;  %v2390_v55 = vpop.f32.mrf.mxu2  ;;  %v2400_v44 = vmul.f32 %v4754_v9, %v2398_v3  ;;  %vm2405_vm0 = vweird.f32 %v4754_v9 }
 0xc04   :  { %v2420_v11 = vmul.f32 %v4756_v46, %v2418_v15  ;;  %vm2406_vm2 = vmor %vm2404_vm1, %vm2405_vm0  ;;  %v2391_v62 = vadd.f32 %v2390_v55, %v7254_v42  ;;  %vm2425_vm4 = vweird.f32 %v4756_v46 }
 0xc05   :  { %v2401_v45 = vsub.f32 1.0, %v2400_v44  ;;  %v2352_v44 = vadd.f32 %v2351_v27, %v2338_v4  ;;  %vm2426_vm6 = vmor %vm2424_vm5, %vm2425_vm4 }
 0xc06   :  { %v2421_v48 = vsub.f32 1.0, %v2420_v11 }
 0xc07   :  { %v2402_v51 = vmul.f32 %v4754_v9, %v2401_v45  ;;  %v2428_v45 = vand.u32 2147483647, %v2418_v15  ;;  %v7322_v15 = vld [vmem:[#allocation56_spill] sm:$0xff] }
 0xc08   :  { %v2422_v52 = vmul.f32 %v4756_v46, %v2421_v48 }
 0xc09   :  { %v2403_v14 = vadd.f32 %v4754_v9, %v2402_v51  ;;  %v2431_v51 = vor.u32 1.1754944e-38, %v2430_v40  ;;  %vm2429_vm7 = vcmp.eq.f32.partialorder %v2428_v45, 8.507059e+37  ;;  %v7320_v40 = vld [vmem:[#allocation57_spill] sm:$0xff] }
 0xc0a   :  { %v2423_v56 = vadd.f32 %v4756_v46, %v2422_v52 }
 0xc0b   :  { %v2407_v19 = vsel %vm2406_vm2, %v4754_v9, %v2403_v14  ;;  %v2392_v58 = vpop.f32.mrf.mxu2 }
 0xc0c   :  { %v2412_v20 = vsel %vm2409_vm3, %v2411_v26, %v2407_v19  ;;  %v2427_v48 = vsel %vm2426_vm6, %v4756_v46, %v2423_v56 }
 0xc0d   :  { %v2434_v11 = vmul.f32 %v2412_v20, %v2391_v62  ;;  %v2432_v3 = vsel %vm2429_vm7, %v2431_v51, %v2427_v48 }
 0xc0e   :  { %v2437_v16 = vsub.f32 1.0, %v2432_v3  ;;  %v2439_v2 = vmul.f32 %v2432_v3, %v6035_v37  ;;  %v7319_v37 = vld [vmem:[#allocation40_spill] sm:$0xff] }
 0xc0f   :  { %v2435_v10 = vadd.f32 %v2434_v11, %v2352_v44 }
 0xc11   :  { %4757 = vtanh.f32 %v2435_v10 }
 0xc17   :  { %v4758_v55 = vpop.eup %4757 }
 0xc18   :  { %v2438_v9 = vmul.f32 %v4758_v55, %v2437_v16 }
 0xc1a   :  { %v6181_v14 = vadd.f32 %v2439_v2, %v2438_v9 }
 0xc1c   :  { %v6185_v4 = vpack.c.bf16 %v6181_v14, %v6181_v14 }
 0xc1e   :  { %2450 = vmatmul.bf16.vlgmr.msrb.gmra.mxu3 %v6185_v4  ;;  %2463 = vmatmul.bf16.vlgmr.msrb.gmra.mxu0 %v6185_v4 }
 0xc1f   :  { %2579 = vmatpush.bf16.msrb.mxu3 %v5581_v8  ;;  %2592 = vmatpush.bf16.msrb.mxu0 %v5583_v36 }
 0xc23   :  { %2580 = vmatpush.bf16.msrb.mxu3 %v5586_v61  ;;  %2593 = vmatpush.bf16.msrb.mxu0 %v5589_v53 }
 0xc27   :  { %2581 = vmatpush.bf16.msrb.mxu3 %v5592_v18  ;;  %2594 = vmatpush.bf16.msrb.mxu0 %v5595_v25 }
 0xc2b   :  { %2582 = vmatpush.bf16.msrb.mxu3 %v5598_v21  ;;  %2595 = vmatpush.bf16.msrb.mxu0 %v5601_v24 }
 0xc2f   :  { %2583 = vmatpush.bf16.msrb.mxu3 %v7256_v32  ;;  %2596 = vmatpush.bf16.msrb.mxu0 %v7257_v7 }
 0xc33   :  { %2584 = vmatpush.bf16.msrb.mxu3 %v7258_v60  ;;  %2597 = vmatpush.bf16.msrb.mxu0 %v7259_v23 }
 0xc37   :  { %2585 = vmatpush.bf16.msrb.mxu3 %v7260_v28  ;;  %2598 = vmatpush.bf16.msrb.mxu0 %v7261_v54 }
 0xc3b   :  { %2586 = vmatpush.bf16.msrb.mxu3 %v7262_v49  ;;  %2599 = vmatpush.bf16.msrb.mxu0 %v7319_v37 }
 0xc9b   :  { %v2464_v10 = vpop.f32.mrf.mxu0 }
 0xc9c   :  { %v6206_v56 = vadd.f32 %v2464_v10, %v7320_v40 }
 0xc9e   :  { %7321 = vst [vmem:[#allocation35_spill] sm:$0xff] %v6206_v56 }
 0xca1   :  { %v2451_v27 = vpop.f32.mrf.mxu3 }
 0xca2   :  { %v6209_v46 = vadd.f32 %v2451_v27, %v7322_v15 }
 0xca3   :  { %v2466_v52 = vpop.f32.mrf.mxu0 }
 0xca4   :  { %7323 = vst [vmem:[#allocation36_spill] sm:$0xff] %v6209_v46  ;;  %v6213_v26 = vmax.f32 %v6209_v46, %v6206_v56  ;;  %v7344_v52 = vld [vmem:[#allocation86_spill] sm:$0xff] }
 0xca6   :  { %7324 = vst [vmem:[#allocation34_spill] sm:$0xff] %v6213_v26  ;;  %2471 = vmax.xlane.f32.xlu0 %v6213_v26  ;;  %v7348_v26 = vld [vmem:[#allocation91_spill] sm:$0xff] }
 0xca9   :  { %v2453_v62 = vpop.f32.mrf.mxu3 }
 0xcaa   :  { %v7345_v62 = vld [vmem:[#allocation64_spill] sm:$0xff] }
 0xd19   :  { %v2472_v19 = vpop.xlane.xlu0 %2471 }
 0xd1a   :  { %vm2473_vm8 = vcmp.eq.f32.partialorder %v6209_v46, %v2472_v19  ;;  %vm2474_vm9 = vcmp.eq.f32.partialorder %v6206_v56, %v2472_v19  ;;  %v7329_v19 = vld [vmem:[#allocation41_spill] sm:$0xff]  ;;  %v7347_v46 = vld [vmem:[#allocation66_spill] sm:$0xff] }
 0xd1b   :  { %v2475_v58 = vsel %vm2473_vm8, %v5747_v50, 256  ;;  %v2476_v20 = vsel %vm2474_vm9, %v5750_v12, 256  ;;  %v7346_v56 = vld [vmem:[#allocation65_spill] sm:$0xff] }
 0xd1c   :  { %vm2477_vm10 = vcmp.lt.s32.totalorder %v2475_v58, %v2476_v20 }
 0xd1d   :  { %v2478_v44 = vsel %vm2477_vm10, %v2475_v58, %v2476_v20  ;;  %v7330_v58 = vld [vmem:[#allocation48_spill] sm:$0xff]  ;;  %v7331_v20 = vld [vmem:[#allocation49_spill] sm:$0xff] }
 0xd1e   :  { %v2480_v11 = vshra.s32 %v2478_v44, 16  ;;  %v2479_v48 = vand.u32 65535, %v2478_v44  ;;  %v7332_v44 = vld [vmem:[#allocation76_spill] sm:$0xff] }
 0xd20   :  { %v2482_v45 = vcvt.s32.f32 %v2480_v11  ;;  %v2481_v3 = vcvt.s32.f32 %v2479_v48  ;;  %v7333_v11 = vld [vmem:[#allocation42_spill] sm:$0xff]  ;;  %v7335_v48 = vld [vmem:[#allocation51_spill] sm:$0xff] }
 0xd22   :  { %2483 = vmin.xlane.f32.xlu1 %v2482_v45 }
 0xd95   :  { %v2484_v51 = vpop.xlane.xlu1 %2483 }
 0xd96   :  { %vm2485_vm11 = vcmp.eq.f32.partialorder %v2482_v45, %v2484_v51  ;;  %v2490_v55 = vcvt.f32.s32 %v2484_v51  ;;  %v7334_v45 = vld [vmem:[#allocation50_spill] sm:$0xff]  ;;  %v7336_v51 = vld [vmem:[#allocation80_spill] sm:$0xff] }
 0xd97   :  { %v2486_v16 = vsel %vm2485_vm11, %v2481_v3, inf  ;;  %v7337_v3 = vld [vmem:[#allocation43_spill] sm:$0xff] }
 0xd98   :  { %2487 = vmin.xlane.f32.xlu2 %v2486_v16  ;;  %v2491_v2 = vshll.u32 %v2490_v55, 16  ;;  %v7338_v16 = vld [vmem:[#allocation52_spill] sm:$0xff]  ;;  %v7339_v55 = vld [vmem:[#allocation53_spill] sm:$0xff] }
 0xe0b   :  { %v2488_v9 = vpop.xlane.xlu2 %2487 }
 0xe0c   :  { %v2489_v10 = vcvt.f32.s32 %v2488_v9  ;;  %v7340_v9 = vld [vmem:[#allocation61_spill] sm:$0xff] }
 0xe0e   :  { %v2492_v27 = vadd.s32 %v2491_v2, %v2489_v10  ;;  %v7341_v2 = vld [vmem:[#allocation62_spill] sm:$0xff]  ;;  %v7342_v10 = vld [vmem:[#allocation63_spill] sm:$0xff] }
 0xe10   :  { %vm2493_vm12 = vcmp.eq.s32.totalorder %v5747_v50, %v2492_v27  ;;  %vm2494_vm13 = vcmp.eq.s32.totalorder %v5750_v12, %v2492_v27  ;;  %v7343_v27 = vld [vmem:[#allocation84_spill] sm:$0xff] }
 0xe11   :  { %vm6222_vm14 = vmpackc.low %vm2493_vm12, %vm2493_vm12 }
 0xe12   :  { %vm6226_vm15 = vmpackc.low %vm2494_vm13, %vm2494_vm13  ;;  %4412 = vmatmul.msk.bf16.vlgmr.msrb.gmra.mxu1 %vm6222_vm14, %v7273_v38  ;;  %4416 = vmatmul.msk.bf16.vlgmr.msra.gmra.mxu3 %vm6222_vm14, %v7273_v38 }
 0xe13   :  { %4414 = vmatmul.msk.bf16.vlgmr.msrb.gmra.mxu2 %vm6226_vm15, %v7273_v38  ;;  %4418 = vmatmul.msk.bf16.vlgmr.msra.gmra.mxu0 %vm6226_vm15, %v7273_v38 }
 0xe14   :  { %2605 = vmatpush.bf16.msrb.mxu1 %v5603_v13  ;;  %2666 = vmatpush.bf16.msrb.mxu2 %v5655_v59 }
 0xe15   :  { %2679 = vmatpush.bf16.msra.mxu3 %v5657_v57  ;;  %2725 = vmatpush.bf16.msra.mxu0 %v5762_v22 }
 0xe18   :  { %2606 = vmatpush.bf16.msrb.mxu1 %v5606_v5  ;;  %2667 = vmatpush.bf16.msrb.mxu2 %v5661_v39 }
 0xe19   :  { %2680 = vmatpush.bf16.msra.mxu3 %v5663_v6  ;;  %2726 = vmatpush.bf16.msra.mxu0 %v5765_v63 }
 0xe1c   :  { %2607 = vmatpush.bf16.msrb.mxu1 %v5615_v31  ;;  %2668 = vmatpush.bf16.msrb.mxu2 %v5672_v0 }
 0xe1d   :  { %2681 = vmatpush.bf16.msra.mxu3 %v5674_v43  ;;  %2727 = vmatpush.bf16.msra.mxu0 %v5778_v33 }
 0xe20   :  { %2608 = vmatpush.bf16.msrb.mxu1 %v5624_v1  ;;  %2669 = vmatpush.bf16.msrb.mxu2 %v5684_v41 }
 0xe21   :  { %2682 = vmatpush.bf16.msra.mxu3 %v5686_v17  ;;  %2728 = vmatpush.bf16.msra.mxu0 %v5792_v47 }
 0xe22   :  { %4420 = vmatmul.msk.bf16.vlgmr.msra.gmra.mxu1 %vm6222_vm14, %v7273_v38  ;;  %2587 = vmatmul.bf16.vlgmr.msrb.gmra.mxu3 %v6185_v4 }
 0xe23   :  { %4422 = vmatmul.msk.bf16.vlgmr.msra.gmra.mxu2 %vm6226_vm15, %v7273_v38  ;;  %2600 = vmatmul.bf16.vlgmr.msrb.gmra.mxu0 %v6185_v4 }
 0xe24   :  { %2609 = vmatpush.bf16.msrb.mxu1 %v5633_v30  ;;  %2670 = vmatpush.bf16.msrb.mxu2 %v5692_v29 }
 0xe25   :  { %2683 = vmatpush.bf16.msra.mxu3 %v7274_v35  ;;  %2729 = vmatpush.bf16.msra.mxu0 %v7275_v34 }
 0xe28   :  { %2610 = vmatpush.bf16.msrb.mxu1 %v7329_v19  ;;  %2671 = vmatpush.bf16.msrb.mxu2 %v7330_v58  ;;  %v7382_v58 = vld [vmem:[#allocation44_spill] sm:$0xff] }
 0xe29   :  { %2684 = vmatpush.bf16.msra.mxu3 %v7331_v20  ;;  %2730 = vmatpush.bf16.msra.mxu0 %v7332_v44 }
 0xe2c   :  { %2611 = vmatpush.bf16.msrb.mxu1 %v7333_v11  ;;  %2672 = vmatpush.bf16.msrb.mxu2 %v7334_v45 }
 0xe2d   :  { %2685 = vmatpush.bf16.msra.mxu3 %v7335_v48  ;;  %2731 = vmatpush.bf16.msra.mxu0 %v7336_v51 }
 0xe30   :  { %2612 = vmatpush.bf16.msrb.mxu1 %v7337_v3  ;;  %2673 = vmatpush.bf16.msrb.mxu2 %v7338_v16 }
 0xe31   :  { %2686 = vmatpush.bf16.msra.mxu3 %v7339_v55  ;;  %2732 = vmatpush.bf16.msra.mxu0 %v7343_v27  ;;  %v7349_v55 = vld [vmem:[#allocation67_spill] sm:$0xff] }
 0xe32   :  { %v7354_v27 = vld [vmem:[#allocation71_spill] sm:$0xff] }
 0xe33   :  { %2613 = vmatmul.bf16.vlgmr.msrb.gmra.mxu1 %v6185_v4  ;;  %v7353_v4 = vld [vmem:[#allocation70_spill] sm:$0xff] }
 0xe34   :  { %2738 = vmatpush.bf16.msra.mxu1 %v7340_v9  ;;  %2751 = vmatpush.bf16.msra.mxu2 %v7341_v2  ;;  %v7350_v9 = vld [vmem:[#allocation68_spill] sm:$0xff]  ;;  %v7351_v2 = vld [vmem:[#allocation69_spill] sm:$0xff] }
 0xe35   :  { %2764 = vmatpush.bf16.msrb.mxu3 %v7342_v10  ;;  %2777 = vmatpush.bf16.msrb.mxu0 %v7344_v52  ;;  %v7352_v10 = vld [vmem:[#allocation93_spill] sm:$0xff] }
 0xe36   :  { %v7355_v52 = vld [vmem:[#allocation73_spill] sm:$0xff] }
 0xe38   :  { %2739 = vmatpush.bf16.msra.mxu1 %v7345_v62  ;;  %2752 = vmatpush.bf16.msra.mxu2 %v7346_v56  ;;  %v7356_v62 = vld [vmem:[#allocation94_spill] sm:$0xff] }
 0xe39   :  { %2765 = vmatpush.bf16.msrb.mxu3 %v7347_v46  ;;  %2778 = vmatpush.bf16.msrb.mxu0 %v7348_v26  ;;  %v7357_v56 = vld [vmem:[#allocation74_spill] sm:$0xff]  ;;  %v7358_v46 = vld [vmem:[#allocation75_spill] sm:$0xff]  ;;  %v7359_v26 = vld [vmem:[#allocation77_spill] sm:$0xff] }
 0xe3c   :  { %2740 = vmatpush.bf16.msra.mxu1 %v7349_v55  ;;  %2753 = vmatpush.bf16.msra.mxu2 %v7350_v9  ;;  %v7360_v55 = vld [vmem:[#allocation95_spill] sm:$0xff]  ;;  %v7361_v9 = vld [vmem:[#allocation78_spill] sm:$0xff] }
 0xe3d   :  { %2766 = vmatpush.bf16.msrb.mxu3 %v7351_v2  ;;  %2779 = vmatpush.bf16.msrb.mxu0 %v7352_v10  ;;  %v7362_v2 = vld [vmem:[#allocation79_spill] sm:$0xff]  ;;  %v7363_v10 = vld [vmem:[#allocation81_spill] sm:$0xff] }
 0xe40   :  { %2741 = vmatpush.bf16.msra.mxu1 %v7353_v4  ;;  %2754 = vmatpush.bf16.msra.mxu2 %v7354_v27  ;;  %v7364_v4 = vld [vmem:[#allocation96_spill] sm:$0xff]  ;;  %v7365_v27 = vld [vmem:[#allocation82_spill] sm:$0xff] }
 0xe41   :  { %2767 = vmatpush.bf16.msrb.mxu3 %v7355_v52  ;;  %2780 = vmatpush.bf16.msrb.mxu0 %v7356_v62  ;;  %v7366_v52 = vld [vmem:[#allocation83_spill] sm:$0xff]  ;;  %v7367_v62 = vld [vmem:[#allocation85_spill] sm:$0xff] }
 0xe44   :  { %2742 = vmatpush.bf16.msra.mxu1 %v7357_v56  ;;  %2755 = vmatpush.bf16.msra.mxu2 %v7358_v46  ;;  %v7368_v56 = vld [vmem:[#allocation98_spill] sm:$0xff]  ;;  %v7369_v46 = vld [vmem:[#allocation87_spill] sm:$0xff] }
 0xe45   :  { %2768 = vmatpush.bf16.msrb.mxu3 %v7359_v26  ;;  %2781 = vmatpush.bf16.msrb.mxu0 %v7360_v55  ;;  %v7370_v26 = vld [vmem:[#allocation88_spill] sm:$0xff]  ;;  %v7371_v55 = vld [vmem:[#allocation89_spill] sm:$0xff] }
 0xe48   :  { %2743 = vmatpush.bf16.msra.mxu1 %v7361_v9  ;;  %2756 = vmatpush.bf16.msra.mxu2 %v7362_v2  ;;  %v7372_v9 = vld [vmem:[#allocation90_spill] sm:$0xff]  ;;  %v7373_v2 = vld [vmem:[#allocation100_spill] sm:$0xff] }
 0xe49   :  { %2769 = vmatpush.bf16.msrb.mxu3 %v7363_v10  ;;  %2782 = vmatpush.bf16.msrb.mxu0 %v7364_v4  ;;  %v7374_v10 = vld [vmem:[#allocation92_spill] sm:$0xff]  ;;  %v7375_v4 = vld [vmem:[#allocation97_spill] sm:$0xff] }
 0xe4c   :  { %2744 = vmatpush.bf16.msra.mxu1 %v7365_v27  ;;  %2757 = vmatpush.bf16.msra.mxu2 %v7366_v52  ;;  %v7376_v27 = vld [vmem:[#allocation99_spill] sm:$0xff]  ;;  %v7377_v52 = vld [vmem:[#allocation101_spill] sm:$0xff] }
 0xe4d   :  { %2770 = vmatpush.bf16.msrb.mxu3 %v7367_v62  ;;  %2783 = vmatpush.bf16.msrb.mxu0 %v7368_v56  ;;  %v7378_v62 = vld [vmem:[#allocation102_spill] sm:$0xff]  ;;  %v7379_v56 = vld [vmem:[#allocation103_spill] sm:$0xff] }
 0xe50   :  { %2745 = vmatpush.bf16.msra.mxu1 %v7369_v46  ;;  %2758 = vmatpush.bf16.msra.mxu2 %v7370_v26  ;;  %v7380_v46 = vld [vmem:[#allocation104_spill] sm:$0xff] }
 0xe51   :  { %2771 = vmatpush.bf16.msrb.mxu3 %v7371_v55  ;;  %2784 = vmatpush.bf16.msrb.mxu0 %v7373_v2 }
 0xe54   :  { %2790 = vmatpush.bf16.msrb.mxu1 %v7372_v9 }
 0xe58   :  { %2791 = vmatpush.bf16.msrb.mxu1 %v7374_v10 }
 0xe5c   :  { %2792 = vmatpush.bf16.msrb.mxu1 %v7375_v4 }
 0xe60   :  { %2793 = vmatpush.bf16.msrb.mxu1 %v7376_v27  ;;  %v7381_v27 = vld [vmem:[#allocation45_spill] sm:$0xff] }
 0xe64   :  { %2794 = vmatpush.bf16.msrb.mxu1 %v7377_v52 }
 0xe68   :  { %2795 = vmatpush.bf16.msrb.mxu1 %v7378_v62 }
 0xe6c   :  { %2796 = vmatpush.bf16.msrb.mxu1 %v7379_v56 }
 0xe70   :  { %2797 = vmatpush.bf16.msrb.mxu1 %v7380_v46 }
 0xe8f   :  { %v2510_v26 = vpop.f32.mrf.mxu1 }
 0xe90   :  { %v2549_v55 = vpop.f32.mrf.mxu0 }
 0xe95   :  { %v2536_v16 = vpop.f32.mrf.mxu3 }
 0xe96   :  { %v2523_v9 = vpop.f32.mrf.mxu2  ;;  %v2550_v45 = vadd.f32 %v2549_v55, %v2536_v16 }
 0xe97   :  { %v2512_v3 = vpop.f32.mrf.mxu1  ;;  %v2524_v20 = vadd.f32 %v2523_v9, %v2510_v26 }
 0xe98   :  { %v2551_v2 = vpop.f32.mrf.mxu0 }
 0xe9d   :  { %v2538_v51 = vpop.f32.mrf.mxu3 }
 0xe9e   :  { %v2525_v10 = vpop.f32.mrf.mxu2 }
 0xe9f   :  { %v2562_v48 = vpop.f32.mrf.mxu1 }
 0xea0   :  { %v2601_v4 = vpop.f32.mrf.mxu0 }
 0xea1   :  { %v2602_v11 = vadd.f32 %v2601_v4, %v7381_v27 }
 0xea3   :  { %v2638_v52 = vadd.f32 %v2602_v11, %v2550_v45 }
 0xea5   :  { %v4424_v44 = vmul.f32 -1.442695, %v2638_v52  ;;  %v2588_v62 = vpop.f32.mrf.mxu3 }
 0xea6   :  { %v2575_v56 = vpop.f32.mrf.mxu2  ;;  %v2589_v46 = vadd.f32 %v2588_v62, %v7382_v58 }
 0xea7   :  { %4759 = vpow2.f32 %v4424_v44  ;;  %v2564_v19 = vpop.f32.mrf.mxu1  ;;  %v2576_v27 = vadd.f32 %v2575_v56, %v2562_v48 }
 0xea8   :  { %v2618_v34 = vadd.f32 %v2589_v46, %v2524_v20  ;;  %v2603_v35 = vpop.f32.mrf.mxu0 }
 0xeaa   :  { %v4423_v3 = vmul.f32 -1.442695, %v2618_v34 }
 0xeac   :  { %4761 = vpow2.f32 %v4423_v3 }
 0xead   :  { %v4760_v51 = vpop.eup %4759  ;;  %v2590_v2 = vpop.f32.mrf.mxu3 }
 0xeae   :  { %v2642_v10 = vadd.f32 1.0, %v4760_v51  ;;  %v2577_v29 = vpop.f32.mrf.mxu2 }
 0xeb0   :  { %4763 = vrcp.f32 %v2642_v10  ;;  %v2614_v16 = vpop.f32.mrf.mxu1  ;;  %vm2648_vm5 = vweird.f32 %v2642_v10 }
 0xeb1   :  { %v2615_v3 = vadd.f32 %v2614_v16, %v7254_v42 }
 0xeb2   :  { %v4762_v55 = vpop.eup %4761 }
 0xeb3   :  { %v2622_v11 = vadd.f32 1.0, %v4762_v55 }
 0xeb5   :  { %4765 = vrcp.f32 %v2622_v11  ;;  %v2634_v46 = vand.u32 2147483648, %v2622_v11  ;;  %v2632_v34 = vand.u32 2147483647, %v2622_v11  ;;  %vm2628_vm1 = vweird.f32 %v2622_v11 }
 0xeb6   :  { %v4764_v45 = vpop.eup %4763 }
 0xeb7   :  { %v2644_v9 = vmul.f32 %v4764_v45, %v2642_v10  ;;  %v2635_v29 = vor.u32 1.1754944e-38, %v2634_v46  ;;  %vm2633_vm3 = vcmp.eq.f32.partialorder %v2632_v34, 8.507059e+37  ;;  %vm2649_vm4 = vweird.f32 %v4764_v45 }
 0xeb8   :  { %v2616_v26 = vpop.f32.mrf.mxu1  ;;  %vm2650_vm6 = vmor %vm2648_vm5, %vm2649_vm4 }
 0xeb9   :  { %v2645_v44 = vsub.f32 1.0, %v2644_v9  ;;  %v2654_v26 = vand.u32 2147483648, %v2642_v10 }
 0xebb   :  { %v4766_v52 = vpop.eup %4765  ;;  %v2646_v20 = vmul.f32 %v4764_v45, %v2645_v44  ;;  %v2655_v44 = vor.u32 1.1754944e-38, %v2654_v26 }
 0xebc   :  { %v2624_v62 = vmul.f32 %v4766_v52, %v2622_v11  ;;  %vm2629_vm0 = vweird.f32 %v4766_v52 }
 0xebd   :  { %vm2630_vm2 = vmor %vm2628_vm1, %vm2629_vm0  ;;  %v2647_v55 = vadd.f32 %v4764_v45, %v2646_v20 }
 0xebe   :  { %v2625_v19 = vsub.f32 1.0, %v2624_v62  ;;  %v2652_v62 = vand.u32 2147483647, %v2642_v10 }
 0xebf   :  { %v2651_v58 = vsel %vm2650_vm6, %v4764_v45, %v2647_v55 }
 0xec0   :  { %v2626_v35 = vmul.f32 %v4766_v52, %v2625_v19  ;;  %vm2653_vm7 = vcmp.eq.f32.partialorder %v2652_v62, 8.507059e+37 }
 0xec1   :  { %v2656_v11 = vsel %vm2653_vm7, %v2655_v44, %v2651_v58 }
 0xec2   :  { %v2627_v4 = vadd.f32 %v4766_v52, %v2626_v35  ;;  %v2661_v46 = vsub.f32 1.0, %v2656_v11 }
 0xec4   :  { %v2631_v51 = vsel %vm2630_vm2, %v4766_v52, %v2627_v4  ;;  %v2663_v52 = vmul.f32 %v2656_v11, %v6181_v14 }
 0xec5   :  { %v2636_v2 = vsel %vm2633_vm3, %v2635_v29, %v2631_v51 }
 0xec6   :  { %v2658_v9 = vmul.f32 %v2636_v2, %v2615_v3 }
 0xec8   :  { %v2659_v19 = vadd.f32 %v2658_v9, %v2576_v27 }
 0xeca   :  { %4767 = vtanh.f32 %v2659_v19 }
 0xed0   :  { %v4768_v35 = vpop.eup %4767 }
 0xed1   :  { %v2662_v16 = vmul.f32 %v4768_v35, %v2661_v46 }
 0xed3   :  { %v6327_v34 = vadd.f32 %v2663_v52, %v2662_v16  ;;  %v7408_v52 = vld [vmem:[#allocation86_spill] sm:$0xff] }
 0xed5   :  { %v6331_v56 = vpack.c.bf16 %v6327_v34, %v6327_v34 }
 0xed7   :  { %2674 = vmatmul.bf16.vlgmr.msrb.gmra.mxu2 %v6331_v56  ;;  %2687 = vmatmul.bf16.vlgmr.msra.gmra.mxu3 %v6331_v56 }
 0xed8   :  { %2803 = vmatpush.bf16.msrb.mxu2 %v5581_v8  ;;  %2816 = vmatpush.bf16.msra.mxu3 %v5583_v36 }
 0xedc   :  { %2804 = vmatpush.bf16.msrb.mxu2 %v5586_v61  ;;  %2817 = vmatpush.bf16.msra.mxu3 %v5589_v53 }
 0xee0   :  { %2805 = vmatpush.bf16.msrb.mxu2 %v5592_v18  ;;  %2818 = vmatpush.bf16.msra.mxu3 %v5595_v25 }
 0xee4   :  { %2806 = vmatpush.bf16.msrb.mxu2 %v5598_v21  ;;  %2819 = vmatpush.bf16.msra.mxu3 %v5601_v24 }
 0xee8   :  { %2807 = vmatpush.bf16.msrb.mxu2 %v7256_v32  ;;  %2820 = vmatpush.bf16.msra.mxu3 %v7257_v7 }
 0xeec   :  { %2808 = vmatpush.bf16.msrb.mxu2 %v7258_v60  ;;  %2821 = vmatpush.bf16.msra.mxu3 %v7259_v23 }
 0xef0   :  { %2809 = vmatpush.bf16.msrb.mxu2 %v7260_v28  ;;  %2822 = vmatpush.bf16.msra.mxu3 %v7261_v54 }
 0xef4   :  { %2810 = vmatpush.bf16.msrb.mxu2 %v7262_v49  ;;  %2823 = vmatpush.bf16.msra.mxu3 %v7319_v37 }
 0xf5a   :  { %v2675_v14 = vpop.f32.mrf.mxu2  ;;  %v2688_v58 = vpop.f32.mrf.mxu3 }
 0xf5b   :  { %v6352_v48 = vadd.f32 %v2675_v14, %v7322_v15  ;;  %v6355_v27 = vadd.f32 %v2688_v58, %v7320_v40  ;;  %v7390_v58 = vld [vmem:[#allocation46_spill] sm:$0xff]  ;;  %v7409_v14 = vld [vmem:[#allocation64_spill] sm:$0xff] }
 0xf5d   :  { %7383 = vst [vmem:[#allocation32_spill] sm:$0xff] %v6352_v48  ;;  %v6359_v10 = vmax.f32 %v6352_v48, %v6355_v27 }
 0xf5e   :  { %7384 = vst [vmem:[#allocation37_spill] sm:$0xff] %v6355_v27 }
 0xf5f   :  { %7385 = vst [vmem:[#allocation39_spill] sm:$0xff] %v6359_v10  ;;  %2695 = vmax.xlane.f32.xlu0 %v6359_v10  ;;  %v7412_v10 = vld [vmem:[#allocation91_spill] sm:$0xff] }
 0xf62   :  { %v2677_v45 = vpop.f32.mrf.mxu2  ;;  %v2690_v20 = vpop.f32.mrf.mxu3 }
 0xf63   :  { %v7391_v45 = vld [vmem:[#allocation47_spill] sm:$0xff]  ;;  %v7392_v20 = vld [vmem:[#allocation72_spill] sm:$0xff] }
 0xfd2   :  { %v2696_v4 = vpop.xlane.xlu0 %2695 }
 0xfd3   :  { %vm2697_vm8 = vcmp.eq.f32.partialorder %v6352_v48, %v2696_v4  ;;  %vm2698_vm9 = vcmp.eq.f32.partialorder %v6355_v27, %v2696_v4  ;;  %v7393_v4 = vld [vmem:[#allocation41_spill] sm:$0xff]  ;;  %v7411_v48 = vld [vmem:[#allocation66_spill] sm:$0xff] }
 0xfd4   :  { %v2699_v29 = vsel %vm2697_vm8, %v5747_v50, 256  ;;  %v2700_v3 = vsel %vm2698_vm9, %v5750_v12, 256  ;;  %v7410_v27 = vld [vmem:[#allocation65_spill] sm:$0xff] }
 0xfd5   :  { %vm2701_vm10 = vcmp.lt.s32.totalorder %v2699_v29, %v2700_v3 }
 0xfd6   :  { %v2702_v51 = vsel %vm2701_vm10, %v2699_v29, %v2700_v3  ;;  %v7394_v29 = vld [vmem:[#allocation48_spill] sm:$0xff]  ;;  %v7395_v3 = vld [vmem:[#allocation49_spill] sm:$0xff] }
 0xfd7   :  { %v2704_v2 = vshra.s32 %v2702_v51, 16  ;;  %v2703_v26 = vand.u32 65535, %v2702_v51  ;;  %v7396_v51 = vld [vmem:[#allocation76_spill] sm:$0xff] }
 0xfd9   :  { %v2706_v55 = vcvt.s32.f32 %v2704_v2  ;;  %v2705_v62 = vcvt.s32.f32 %v2703_v26  ;;  %v7397_v2 = vld [vmem:[#allocation42_spill] sm:$0xff]  ;;  %v7399_v26 = vld [vmem:[#allocation51_spill] sm:$0xff] }
 0xfdb   :  { %2707 = vmin.xlane.f32.xlu1 %v2706_v55 }
0x104e   :  { %v2708_v9 = vpop.xlane.xlu1 %2707 }
0x104f   :  { %vm2709_vm11 = vcmp.eq.f32.partialorder %v2706_v55, %v2708_v9  ;;  %v2714_v44 = vcvt.f32.s32 %v2708_v9  ;;  %v7398_v55 = vld [vmem:[#allocation50_spill] sm:$0xff]  ;;  %v7400_v9 = vld [vmem:[#allocation80_spill] sm:$0xff] }
0x1050   :  { %v2710_v19 = vsel %vm2709_vm11, %v2705_v62, inf  ;;  %v7401_v62 = vld [vmem:[#allocation43_spill] sm:$0xff] }
0x1051   :  { %2711 = vmin.xlane.f32.xlu2 %v2710_v19  ;;  %v2715_v46 = vshll.u32 %v2714_v44, 16  ;;  %v7402_v19 = vld [vmem:[#allocation52_spill] sm:$0xff]  ;;  %v7403_v44 = vld [vmem:[#allocation53_spill] sm:$0xff] }
0x10c4   :  { %v2712_v11 = vpop.xlane.xlu2 %2711 }
0x10c5   :  { %v2713_v35 = vcvt.f32.s32 %v2712_v11  ;;  %v7404_v11 = vld [vmem:[#allocation61_spill] sm:$0xff] }
0x10c7   :  { %v2716_v16 = vadd.s32 %v2715_v46, %v2713_v35  ;;  %v7405_v46 = vld [vmem:[#allocation62_spill] sm:$0xff]  ;;  %v7406_v35 = vld [vmem:[#allocation63_spill] sm:$0xff] }
0x10c9   :  { %vm2717_vm12 = vcmp.eq.s32.totalorder %v5747_v50, %v2716_v16  ;;  %vm2718_vm13 = vcmp.eq.s32.totalorder %v5750_v12, %v2716_v16  ;;  %v7407_v16 = vld [vmem:[#allocation84_spill] sm:$0xff] }
0x10ca   :  { %vm6368_vm14 = vmpackc.low %vm2717_vm12, %vm2717_vm12 }
0x10cb   :  { %vm6372_vm15 = vmpackc.low %vm2718_vm13, %vm2718_vm13  ;;  %4428 = vmatmul.msk.bf16.vlgmr.msra.gmra.mxu0 %vm6368_vm14, %v7273_v38  ;;  %4432 = vmatmul.msk.bf16.vlgmr.msra.gmra.mxu2 %vm6368_vm14, %v7273_v38 }
0x10cc   :  { %4430 = vmatmul.msk.bf16.vlgmr.msra.gmra.mxu1 %vm6372_vm15, %v7273_v38  ;;  %4434 = vmatmul.msk.bf16.vlgmr.msrb.gmra.mxu3 %vm6372_vm15, %v7273_v38 }
0x10cd   :  { %2829 = vmatpush.bf16.msra.mxu0 %v5603_v13  ;;  %2890 = vmatpush.bf16.msra.mxu1 %v5655_v59 }
0x10ce   :  { %2903 = vmatpush.bf16.msra.mxu2 %v5657_v57  ;;  %2949 = vmatpush.bf16.msrb.mxu3 %v5762_v22 }
0x10d1   :  { %2830 = vmatpush.bf16.msra.mxu0 %v5606_v5  ;;  %2891 = vmatpush.bf16.msra.mxu1 %v5661_v39 }
0x10d2   :  { %2904 = vmatpush.bf16.msra.mxu2 %v5663_v6  ;;  %2950 = vmatpush.bf16.msrb.mxu3 %v5765_v63 }
0x10d5   :  { %2831 = vmatpush.bf16.msra.mxu0 %v5615_v31  ;;  %2892 = vmatpush.bf16.msra.mxu1 %v5672_v0 }
0x10d6   :  { %2905 = vmatpush.bf16.msra.mxu2 %v5674_v43  ;;  %2951 = vmatpush.bf16.msrb.mxu3 %v5778_v33 }
0x10d9   :  { %2832 = vmatpush.bf16.msra.mxu0 %v5624_v1  ;;  %2893 = vmatpush.bf16.msra.mxu1 %v5684_v41 }
0x10da   :  { %2906 = vmatpush.bf16.msra.mxu2 %v5686_v17  ;;  %2952 = vmatpush.bf16.msrb.mxu3 %v5792_v47 }
0x10db   :  { %4436 = vmatmul.msk.bf16.vlgmr.msrb.gmra.mxu0 %vm6368_vm14, %v7273_v38  ;;  %2811 = vmatmul.bf16.vlgmr.msrb.gmra.mxu2 %v6331_v56 }
0x10dc   :  { %4438 = vmatmul.msk.bf16.vlgmr.msrb.gmra.mxu1 %vm6372_vm15, %v7273_v38  ;;  %2824 = vmatmul.bf16.vlgmr.msra.gmra.mxu3 %v6331_v56 }
0x10dd   :  { %2833 = vmatpush.bf16.msra.mxu0 %v5633_v30  ;;  %2894 = vmatpush.bf16.msra.mxu1 %v7390_v58 }
0x10de   :  { %2907 = vmatpush.bf16.msra.mxu2 %v7391_v45  ;;  %2953 = vmatpush.bf16.msrb.mxu3 %v7392_v20 }
0x10e1   :  { %2834 = vmatpush.bf16.msra.mxu0 %v7393_v4  ;;  %2895 = vmatpush.bf16.msra.mxu1 %v7394_v29 }
0x10e2   :  { %2908 = vmatpush.bf16.msra.mxu2 %v7395_v3  ;;  %2954 = vmatpush.bf16.msrb.mxu3 %v7396_v51  ;;  %v7446_v3 = vld [vmem:[#allocation45_spill] sm:$0xff] }
0x10e5   :  { %2835 = vmatpush.bf16.msra.mxu0 %v7397_v2  ;;  %2896 = vmatpush.bf16.msra.mxu1 %v7398_v55  ;;  %v7445_v2 = vld [vmem:[#allocation44_spill] sm:$0xff] }
0x10e6   :  { %2909 = vmatpush.bf16.msra.mxu2 %v7399_v26  ;;  %2955 = vmatpush.bf16.msrb.mxu3 %v7400_v9 }
0x10e9   :  { %2836 = vmatpush.bf16.msra.mxu0 %v7401_v62  ;;  %2897 = vmatpush.bf16.msra.mxu1 %v7402_v19 }
0x10ea   :  { %2910 = vmatpush.bf16.msra.mxu2 %v7403_v44  ;;  %2956 = vmatpush.bf16.msrb.mxu3 %v7407_v16  ;;  %v7413_v44 = vld [vmem:[#allocation67_spill] sm:$0xff] }
0x10eb   :  { %v7418_v16 = vld [vmem:[#allocation71_spill] sm:$0xff] }
0x10ec   :  { %2837 = vmatmul.bf16.vlgmr.msra.gmra.mxu0 %v6331_v56  ;;  %v7417_v56 = vld [vmem:[#allocation70_spill] sm:$0xff] }
0x10ed   :  { %2962 = vmatpush.bf16.msrb.mxu0 %v7404_v11  ;;  %2975 = vmatpush.bf16.msrb.mxu1 %v7405_v46  ;;  %v7414_v11 = vld [vmem:[#allocation68_spill] sm:$0xff]  ;;  %v7415_v46 = vld [vmem:[#allocation69_spill] sm:$0xff] }
0x10ee   :  { %2988 = vmatpush.bf16.msrb.mxu2 %v7406_v35  ;;  %3001 = vmatpush.bf16.msra.mxu3 %v7408_v52  ;;  %v7416_v35 = vld [vmem:[#allocation93_spill] sm:$0xff] }
0x10ef   :  { %v7419_v52 = vld [vmem:[#allocation73_spill] sm:$0xff] }
0x10f1   :  { %2963 = vmatpush.bf16.msrb.mxu0 %v7409_v14  ;;  %2976 = vmatpush.bf16.msrb.mxu1 %v7410_v27  ;;  %v7420_v14 = vld [vmem:[#allocation94_spill] sm:$0xff] }
0x10f2   :  { %2989 = vmatpush.bf16.msrb.mxu2 %v7411_v48  ;;  %3002 = vmatpush.bf16.msra.mxu3 %v7412_v10  ;;  %v7421_v27 = vld [vmem:[#allocation74_spill] sm:$0xff]  ;;  %v7422_v48 = vld [vmem:[#allocation75_spill] sm:$0xff]  ;;  %v7423_v10 = vld [vmem:[#allocation77_spill] sm:$0xff] }
0x10f5   :  { %2964 = vmatpush.bf16.msrb.mxu0 %v7413_v44  ;;  %2977 = vmatpush.bf16.msrb.mxu1 %v7414_v11  ;;  %v7424_v44 = vld [vmem:[#allocation95_spill] sm:$0xff]  ;;  %v7425_v11 = vld [vmem:[#allocation78_spill] sm:$0xff] }
0x10f6   :  { %2990 = vmatpush.bf16.msrb.mxu2 %v7415_v46  ;;  %3003 = vmatpush.bf16.msra.mxu3 %v7416_v35  ;;  %v7426_v46 = vld [vmem:[#allocation79_spill] sm:$0xff]  ;;  %v7427_v35 = vld [vmem:[#allocation81_spill] sm:$0xff] }
0x10f9   :  { %2965 = vmatpush.bf16.msrb.mxu0 %v7417_v56  ;;  %2978 = vmatpush.bf16.msrb.mxu1 %v7418_v16  ;;  %v7428_v56 = vld [vmem:[#allocation96_spill] sm:$0xff]  ;;  %v7429_v16 = vld [vmem:[#allocation82_spill] sm:$0xff] }
0x10fa   :  { %2991 = vmatpush.bf16.msrb.mxu2 %v7419_v52  ;;  %3004 = vmatpush.bf16.msra.mxu3 %v7420_v14  ;;  %v7430_v52 = vld [vmem:[#allocation83_spill] sm:$0xff]  ;;  %v7431_v14 = vld [vmem:[#allocation85_spill] sm:$0xff] }
0x10fd   :  { %2966 = vmatpush.bf16.msrb.mxu0 %v7421_v27  ;;  %2979 = vmatpush.bf16.msrb.mxu1 %v7422_v48  ;;  %v7432_v27 = vld [vmem:[#allocation98_spill] sm:$0xff]  ;;  %v7433_v48 = vld [vmem:[#allocation87_spill] sm:$0xff] }
0x10fe   :  { %2992 = vmatpush.bf16.msrb.mxu2 %v7423_v10  ;;  %3005 = vmatpush.bf16.msra.mxu3 %v7424_v44  ;;  %v7434_v10 = vld [vmem:[#allocation88_spill] sm:$0xff]  ;;  %v7435_v44 = vld [vmem:[#allocation89_spill] sm:$0xff] }
0x1101   :  { %2967 = vmatpush.bf16.msrb.mxu0 %v7425_v11  ;;  %2980 = vmatpush.bf16.msrb.mxu1 %v7426_v46  ;;  %v7436_v11 = vld [vmem:[#allocation90_spill] sm:$0xff]  ;;  %v7437_v46 = vld [vmem:[#allocation100_spill] sm:$0xff] }
0x1102   :  { %2993 = vmatpush.bf16.msrb.mxu2 %v7427_v35  ;;  %3006 = vmatpush.bf16.msra.mxu3 %v7428_v56  ;;  %v7438_v35 = vld [vmem:[#allocation92_spill] sm:$0xff]  ;;  %v7439_v56 = vld [vmem:[#allocation97_spill] sm:$0xff] }
0x1105   :  { %2968 = vmatpush.bf16.msrb.mxu0 %v7429_v16  ;;  %2981 = vmatpush.bf16.msrb.mxu1 %v7430_v52  ;;  %v7440_v16 = vld [vmem:[#allocation99_spill] sm:$0xff]  ;;  %v7441_v52 = vld [vmem:[#allocation101_spill] sm:$0xff] }
0x1106   :  { %2994 = vmatpush.bf16.msrb.mxu2 %v7431_v14  ;;  %3007 = vmatpush.bf16.msra.mxu3 %v7432_v27  ;;  %v7442_v14 = vld [vmem:[#allocation102_spill] sm:$0xff]  ;;  %v7443_v27 = vld [vmem:[#allocation103_spill] sm:$0xff] }
0x1109   :  { %2969 = vmatpush.bf16.msrb.mxu0 %v7433_v48  ;;  %2982 = vmatpush.bf16.msrb.mxu1 %v7434_v10  ;;  %v7444_v48 = vld [vmem:[#allocation104_spill] sm:$0xff] }
0x110a   :  { %2995 = vmatpush.bf16.msrb.mxu2 %v7435_v44  ;;  %3008 = vmatpush.bf16.msra.mxu3 %v7437_v46 }
0x110d   :  { %3014 = vmatpush.bf16.msra.mxu0 %v7436_v11 }
0x1111   :  { %3015 = vmatpush.bf16.msra.mxu0 %v7438_v35 }
0x1115   :  { %3016 = vmatpush.bf16.msra.mxu0 %v7439_v56 }
0x1119   :  { %3017 = vmatpush.bf16.msra.mxu0 %v7440_v16 }
0x111d   :  { %3018 = vmatpush.bf16.msra.mxu0 %v7441_v52 }
0x1121   :  { %3019 = vmatpush.bf16.msra.mxu0 %v7442_v14 }
0x1125   :  { %3020 = vmatpush.bf16.msra.mxu0 %v7443_v27 }
0x1129   :  { %3021 = vmatpush.bf16.msra.mxu0 %v7444_v48 }
0x1148   :  { %v2734_v10 = vpop.f32.mrf.mxu0 }
0x1149   :  { %v2747_v44 = vpop.f32.mrf.mxu1 }
0x114a   :  { %v2748_v16 = vadd.f32 %v2747_v44, %v2734_v10 }
0x114e   :  { %v2760_v19 = vpop.f32.mrf.mxu2 }
0x114f   :  { %v2773_v11 = vpop.f32.mrf.mxu3 }
0x1150   :  { %v2736_v62 = vpop.f32.mrf.mxu0  ;;  %v2774_v14 = vadd.f32 %v2773_v11, %v2760_v19 }
0x1151   :  { %v2749_v46 = vpop.f32.mrf.mxu1 }
0x1156   :  { %v2762_v9 = vpop.f32.mrf.mxu2 }
0x1157   :  { %v2775_v35 = vpop.f32.mrf.mxu3 }
0x1158   :  { %v2786_v26 = vpop.f32.mrf.mxu0 }
0x1159   :  { %v2799_v56 = vpop.f32.mrf.mxu1 }
0x115e   :  { %v2812_v55 = vpop.f32.mrf.mxu2 }
0x115f   :  { %v2813_v52 = vadd.f32 %v2812_v55, %v7445_v2  ;;  %v2825_v51 = vpop.f32.mrf.mxu3 }
0x1160   :  { %v2826_v27 = vadd.f32 %v2825_v51, %v7446_v3  ;;  %v2788_v29 = vpop.f32.mrf.mxu0 }
0x1161   :  { %v2842_v48 = vadd.f32 %v2813_v52, %v2748_v16  ;;  %v2801_v4 = vpop.f32.mrf.mxu1 }
0x1162   :  { %v2862_v20 = vadd.f32 %v2826_v27, %v2774_v14 }
0x1163   :  { %v4439_v45 = vmul.f32 -1.442695, %v2842_v48 }
0x1164   :  { %v4440_v58 = vmul.f32 -1.442695, %v2862_v20 }
0x1165   :  { %4769 = vpow2.f32 %v4439_v45 }
0x1166   :  { %4771 = vpow2.f32 %v4440_v58  ;;  %v2814_v9 = vpop.f32.mrf.mxu2 }
0x1167   :  { %v2827_v62 = vpop.f32.mrf.mxu3 }
0x1169   :  { %v2838_v46 = vpop.f32.mrf.mxu0 }
0x116b   :  { %v4770_v35 = vpop.eup %4769 }
0x116c   :  { %v4772_v30 = vpop.eup %4771  ;;  %v2846_v10 = vadd.f32 1.0, %v4770_v35  ;;  %v2800_v35 = vadd.f32 %v2799_v56, %v2786_v26 }
0x116d   :  { %v2866_v44 = vadd.f32 1.0, %v4772_v30  ;;  %v2839_v30 = vadd.f32 %v2838_v46, %v7254_v42 }
0x116e   :  { %4773 = vrcp.f32 %v2846_v10  ;;  %v2858_v48 = vand.u32 2147483648, %v2846_v10  ;;  %v2856_v58 = vand.u32 2147483647, %v2846_v10  ;;  %vm2852_vm1 = vweird.f32 %v2846_v10 }
0x116f   :  { %4775 = vrcp.f32 %v2866_v44  ;;  %vm2872_vm5 = vweird.f32 %v2866_v44 }
0x1170   :  { %v2859_v52 = vor.u32 1.1754944e-38, %v2858_v48  ;;  %vm2857_vm3 = vcmp.eq.f32.partialorder %v2856_v58, 8.507059e+37 }
0x1171   :  { %v2840_v55 = vpop.f32.mrf.mxu0 }
0x1172   :  { %v2878_v55 = vand.u32 2147483648, %v2866_v44 }
0x1174   :  { %v4774_v19 = vpop.eup %4773 }
0x1175   :  { %v4776_v51 = vpop.eup %4775  ;;  %v2848_v29 = vmul.f32 %v4774_v19, %v2846_v10  ;;  %vm2853_vm0 = vweird.f32 %v4774_v19 }
0x1176   :  { %v2868_v11 = vmul.f32 %v4776_v51, %v2866_v44  ;;  %vm2854_vm2 = vmor %vm2852_vm1, %vm2853_vm0  ;;  %vm2873_vm4 = vweird.f32 %v4776_v51 }
0x1177   :  { %v2849_v4 = vsub.f32 1.0, %v2848_v29  ;;  %vm2874_vm6 = vmor %vm2872_vm5, %vm2873_vm4 }
0x1178   :  { %v2869_v27 = vsub.f32 1.0, %v2868_v11  ;;  %v2876_v11 = vand.u32 2147483647, %v2866_v44 }
0x1179   :  { %v2850_v20 = vmul.f32 %v4774_v19, %v2849_v4 }
0x117a   :  { %v2870_v45 = vmul.f32 %v4776_v51, %v2869_v27  ;;  %v2879_v27 = vor.u32 1.1754944e-38, %v2878_v55  ;;  %vm2877_vm7 = vcmp.eq.f32.partialorder %v2876_v11, 8.507059e+37 }
0x117b   :  { %v2851_v16 = vadd.f32 %v4774_v19, %v2850_v20 }
0x117c   :  { %v2871_v62 = vadd.f32 %v4776_v51, %v2870_v45 }
0x117d   :  { %v2855_v14 = vsel %vm2854_vm2, %v4774_v19, %v2851_v16 }
0x117e   :  { %v2860_v9 = vsel %vm2857_vm3, %v2859_v52, %v2855_v14  ;;  %v2875_v3 = vsel %vm2874_vm6, %v4776_v51, %v2871_v62 }
0x117f   :  { %v2882_v29 = vmul.f32 %v2860_v9, %v2839_v30  ;;  %v2880_v10 = vsel %vm2877_vm7, %v2879_v27, %v2875_v3 }
0x1180   :  { %v2885_v48 = vsub.f32 1.0, %v2880_v10  ;;  %v2887_v19 = vmul.f32 %v2880_v10, %v6327_v34 }
0x1181   :  { %v2883_v4 = vadd.f32 %v2882_v29, %v2800_v35 }
0x1183   :  { %4777 = vtanh.f32 %v2883_v4 }
0x1189   :  { %v4778_v20 = vpop.eup %4777 }
0x118a   :  { %v2886_v46 = vmul.f32 %v4778_v20, %v2885_v48 }
0x118c   :  { %v6473_v58 = vadd.f32 %v2887_v19, %v2886_v46  ;;  %v7472_v19 = vld [vmem:[#allocation84_spill] sm:$0xff] }
0x118e   :  { %v6477_v26 = vpack.c.bf16 %v6473_v58, %v6473_v58 }
0x1190   :  { %2898 = vmatmul.bf16.vlgmr.msra.gmra.mxu1 %v6477_v26  ;;  %2911 = vmatmul.bf16.vlgmr.msra.gmra.mxu2 %v6477_v26 }
0x1191   :  { %3027 = vmatpush.bf16.msra.mxu1 %v5581_v8  ;;  %3040 = vmatpush.bf16.msra.mxu2 %v5583_v36 }
0x1195   :  { %3028 = vmatpush.bf16.msra.mxu1 %v5586_v61  ;;  %3041 = vmatpush.bf16.msra.mxu2 %v5589_v53 }
0x1199   :  { %3029 = vmatpush.bf16.msra.mxu1 %v5592_v18  ;;  %3042 = vmatpush.bf16.msra.mxu2 %v5595_v25 }
0x119d   :  { %3030 = vmatpush.bf16.msra.mxu1 %v5598_v21  ;;  %3043 = vmatpush.bf16.msra.mxu2 %v5601_v24 }
0x11a1   :  { %3031 = vmatpush.bf16.msra.mxu1 %v7256_v32  ;;  %3044 = vmatpush.bf16.msra.mxu2 %v7257_v7 }
0x11a5   :  { %3032 = vmatpush.bf16.msra.mxu1 %v7258_v60  ;;  %3045 = vmatpush.bf16.msra.mxu2 %v7259_v23 }
0x11a9   :  { %3033 = vmatpush.bf16.msra.mxu1 %v7260_v28  ;;  %3046 = vmatpush.bf16.msra.mxu2 %v7261_v54 }
0x11ad   :  { %3034 = vmatpush.bf16.msra.mxu1 %v7262_v49  ;;  %3047 = vmatpush.bf16.msra.mxu2 %v7319_v37 }
0x120d   :  { %v2899_v34 = vpop.f32.mrf.mxu1 }
0x120e   :  { %v6498_v56 = vadd.f32 %v2899_v34, %v7322_v15  ;;  %v7473_v34 = vld [vmem:[#allocation86_spill] sm:$0xff] }
0x1210   :  { %7447 = vst [vmem:[#allocation40_spill] sm:$0xff] %v6498_v56 }
0x1213   :  { %v2912_v3 = vpop.f32.mrf.mxu2 }
0x1214   :  { %v6501_v44 = vadd.f32 %v2912_v3, %v7320_v40  ;;  %v7454_v3 = vld [vmem:[#allocation38_spill] sm:$0xff] }
0x1215   :  { %v2901_v51 = vpop.f32.mrf.mxu1 }
0x1216   :  { %7448 = vst [vmem:[#allocation57_spill] sm:$0xff] %v6501_v44  ;;  %v6505_v45 = vmax.f32 %v6498_v56, %v6501_v44  ;;  %v7455_v51 = vld [vmem:[#allocation46_spill] sm:$0xff] }
0x1218   :  { %7449 = vst [vmem:[#allocation56_spill] sm:$0xff] %v6505_v45  ;;  %2919 = vmax.xlane.f32.xlu0 %v6505_v45  ;;  %v7476_v45 = vld [vmem:[#allocation66_spill] sm:$0xff] }
0x121b   :  { %v2914_v16 = vpop.f32.mrf.mxu2 }
0x121c   :  { %v7456_v16 = vld [vmem:[#allocation47_spill] sm:$0xff] }
0x128b   :  { %v2920_v52 = vpop.xlane.xlu0 %2919 }
0x128c   :  { %vm2921_vm8 = vcmp.eq.f32.partialorder %v6498_v56, %v2920_v52  ;;  %vm2922_vm9 = vcmp.eq.f32.partialorder %v6501_v44, %v2920_v52  ;;  %v7457_v52 = vld [vmem:[#allocation72_spill] sm:$0xff]  ;;  %v7475_v56 = vld [vmem:[#allocation65_spill] sm:$0xff] }
0x128d   :  { %v2923_v30 = vsel %vm2921_vm8, %v5747_v50, 256  ;;  %v2924_v14 = vsel %vm2922_vm9, %v5750_v12, 256  ;;  %v7474_v44 = vld [vmem:[#allocation64_spill] sm:$0xff] }
0x128e   :  { %vm2925_vm10 = vcmp.lt.s32.totalorder %v2923_v30, %v2924_v14 }
0x128f   :  { %v2926_v9 = vsel %vm2925_vm10, %v2923_v30, %v2924_v14  ;;  %v7458_v30 = vld [vmem:[#allocation41_spill] sm:$0xff]  ;;  %v7459_v14 = vld [vmem:[#allocation48_spill] sm:$0xff] }
0x1290   :  { %v2928_v62 = vshra.s32 %v2926_v9, 16  ;;  %v2927_v55 = vand.u32 65535, %v2926_v9  ;;  %v7460_v9 = vld [vmem:[#allocation49_spill] sm:$0xff] }
0x1292   :  { %v2930_v35 = vcvt.s32.f32 %v2928_v62  ;;  %v2929_v11 = vcvt.s32.f32 %v2927_v55  ;;  %v7461_v62 = vld [vmem:[#allocation76_spill] sm:$0xff]  ;;  %v7463_v55 = vld [vmem:[#allocation50_spill] sm:$0xff] }
0x1294   :  { %2931 = vmin.xlane.f32.xlu1 %v2930_v35 }
0x1307   :  { %v2932_v29 = vpop.xlane.xlu1 %2931 }
0x1308   :  { %vm2933_vm11 = vcmp.eq.f32.partialorder %v2930_v35, %v2932_v29  ;;  %v2938_v27 = vcvt.f32.s32 %v2932_v29  ;;  %v7462_v35 = vld [vmem:[#allocation42_spill] sm:$0xff]  ;;  %v7464_v29 = vld [vmem:[#allocation51_spill] sm:$0xff] }
0x1309   :  { %v2934_v4 = vsel %vm2933_vm11, %v2929_v11, inf  ;;  %v7465_v11 = vld [vmem:[#allocation80_spill] sm:$0xff] }
0x130a   :  { %2935 = vmin.xlane.f32.xlu2 %v2934_v4  ;;  %v2939_v48 = vshll.u32 %v2938_v27, 16  ;;  %v7466_v4 = vld [vmem:[#allocation43_spill] sm:$0xff]  ;;  %v7467_v27 = vld [vmem:[#allocation52_spill] sm:$0xff] }
0x137d   :  { %v2936_v10 = vpop.xlane.xlu2 %2935 }
0x137e   :  { %v2937_v20 = vcvt.f32.s32 %v2936_v10  ;;  %v7468_v10 = vld [vmem:[#allocation53_spill] sm:$0xff] }
0x1380   :  { %v2940_v46 = vadd.s32 %v2939_v48, %v2937_v20  ;;  %v7469_v48 = vld [vmem:[#allocation61_spill] sm:$0xff]  ;;  %v7470_v20 = vld [vmem:[#allocation62_spill] sm:$0xff] }
0x1382   :  { %vm2941_vm12 = vcmp.eq.s32.totalorder %v5747_v50, %v2940_v46  ;;  %vm2942_vm13 = vcmp.eq.s32.totalorder %v5750_v12, %v2940_v46  ;;  %v7471_v46 = vld [vmem:[#allocation63_spill] sm:$0xff] }
0x1383   :  { %vm6514_vm14 = vmpackc.low %vm2941_vm12, %vm2941_vm12 }
0x1384   :  { %vm6518_vm15 = vmpackc.low %vm2942_vm13, %vm2942_vm13  ;;  %4444 = vmatmul.msk.bf16.vlgmr.msrb.gmra.mxu3 %vm6514_vm14, %v7273_v38  ;;  %4448 = vmatmul.msk.bf16.vlgmr.msrb.gmra.mxu1 %vm6514_vm14, %v7273_v38 }
0x1385   :  { %4446 = vmatmul.msk.bf16.vlgmr.msrb.gmra.mxu0 %vm6518_vm15, %v7273_v38  ;;  %4450 = vmatmul.msk.bf16.vlgmr.msrb.gmra.mxu2 %vm6518_vm15, %v7273_v38 }
0x1386   :  { %3053 = vmatpush.bf16.msrb.mxu3 %v5603_v13  ;;  %3114 = vmatpush.bf16.msrb.mxu0 %v5655_v59 }
0x1387   :  { %3127 = vmatpush.bf16.msrb.mxu1 %v5657_v57  ;;  %3173 = vmatpush.bf16.msrb.mxu2 %v5762_v22 }
0x138a   :  { %3054 = vmatpush.bf16.msrb.mxu3 %v5606_v5  ;;  %3115 = vmatpush.bf16.msrb.mxu0 %v5661_v39 }
0x138b   :  { %3128 = vmatpush.bf16.msrb.mxu1 %v5663_v6  ;;  %3174 = vmatpush.bf16.msrb.mxu2 %v5765_v63 }
0x138e   :  { %3055 = vmatpush.bf16.msrb.mxu3 %v5615_v31  ;;  %3116 = vmatpush.bf16.msrb.mxu0 %v5672_v0 }
0x138f   :  { %3129 = vmatpush.bf16.msrb.mxu1 %v5674_v43  ;;  %3175 = vmatpush.bf16.msrb.mxu2 %v5778_v33 }
0x1392   :  { %3056 = vmatpush.bf16.msrb.mxu3 %v5624_v1  ;;  %3117 = vmatpush.bf16.msrb.mxu0 %v5684_v41 }
0x1393   :  { %3130 = vmatpush.bf16.msrb.mxu1 %v5686_v17  ;;  %3176 = vmatpush.bf16.msrb.mxu2 %v5792_v47 }
0x1394   :  { %4452 = vmatmul.msk.bf16.vlgmr.msra.gmra.mxu3 %vm6514_vm14, %v7273_v38  ;;  %3035 = vmatmul.bf16.vlgmr.msra.gmra.mxu1 %v6477_v26 }
0x1395   :  { %4454 = vmatmul.msk.bf16.vlgmr.msra.gmra.mxu0 %vm6518_vm15, %v7273_v38  ;;  %3048 = vmatmul.bf16.vlgmr.msra.gmra.mxu2 %v6477_v26 }
0x1396   :  { %3057 = vmatpush.bf16.msrb.mxu3 %v7454_v3  ;;  %3118 = vmatpush.bf16.msrb.mxu0 %v7455_v51 }
0x1397   :  { %3131 = vmatpush.bf16.msrb.mxu1 %v7456_v16  ;;  %3177 = vmatpush.bf16.msrb.mxu2 %v7457_v52 }
0x139a   :  { %3058 = vmatpush.bf16.msrb.mxu3 %v7458_v30  ;;  %3119 = vmatpush.bf16.msrb.mxu0 %v7459_v14 }
0x139b   :  { %3132 = vmatpush.bf16.msrb.mxu1 %v7460_v9  ;;  %3178 = vmatpush.bf16.msrb.mxu2 %v7461_v62 }
0x139e   :  { %3059 = vmatpush.bf16.msrb.mxu3 %v7462_v35  ;;  %3120 = vmatpush.bf16.msrb.mxu0 %v7463_v55 }
0x139f   :  { %3133 = vmatpush.bf16.msrb.mxu1 %v7464_v29  ;;  %3179 = vmatpush.bf16.msrb.mxu2 %v7465_v11 }
0x13a2   :  { %3060 = vmatpush.bf16.msrb.mxu3 %v7466_v4  ;;  %3121 = vmatpush.bf16.msrb.mxu0 %v7467_v27  ;;  %v7477_v27 = vld [vmem:[#allocation91_spill] sm:$0xff] }
0x13a3   :  { %3134 = vmatpush.bf16.msrb.mxu1 %v7468_v10  ;;  %3180 = vmatpush.bf16.msrb.mxu2 %v7472_v19  ;;  %v7478_v10 = vld [vmem:[#allocation67_spill] sm:$0xff] }
0x13a4   :  { %v7483_v19 = vld [vmem:[#allocation71_spill] sm:$0xff] }
0x13a5   :  { %3061 = vmatmul.bf16.vlgmr.msrb.gmra.mxu3 %v6477_v26  ;;  %v7482_v26 = vld [vmem:[#allocation70_spill] sm:$0xff] }
0x13a6   :  { %3186 = vmatpush.bf16.msra.mxu3 %v7469_v48  ;;  %3199 = vmatpush.bf16.msra.mxu0 %v7470_v20  ;;  %v7479_v48 = vld [vmem:[#allocation68_spill] sm:$0xff]  ;;  %v7480_v20 = vld [vmem:[#allocation69_spill] sm:$0xff] }
0x13a7   :  { %3212 = vmatpush.bf16.msra.mxu1 %v7471_v46  ;;  %3225 = vmatpush.bf16.msra.mxu2 %v7473_v34  ;;  %v7481_v46 = vld [vmem:[#allocation93_spill] sm:$0xff] }
0x13a8   :  { %v7484_v34 = vld [vmem:[#allocation73_spill] sm:$0xff] }
0x13aa   :  { %3187 = vmatpush.bf16.msra.mxu3 %v7474_v44  ;;  %3200 = vmatpush.bf16.msra.mxu0 %v7475_v56  ;;  %v7485_v44 = vld [vmem:[#allocation94_spill] sm:$0xff] }
0x13ab   :  { %3213 = vmatpush.bf16.msra.mxu1 %v7476_v45  ;;  %3226 = vmatpush.bf16.msra.mxu2 %v7477_v27  ;;  %v7486_v56 = vld [vmem:[#allocation74_spill] sm:$0xff]  ;;  %v7487_v45 = vld [vmem:[#allocation75_spill] sm:$0xff]  ;;  %v7488_v27 = vld [vmem:[#allocation77_spill] sm:$0xff] }
0x13ae   :  { %3188 = vmatpush.bf16.msra.mxu3 %v7478_v10  ;;  %3201 = vmatpush.bf16.msra.mxu0 %v7479_v48  ;;  %v7489_v10 = vld [vmem:[#allocation95_spill] sm:$0xff]  ;;  %v7490_v48 = vld [vmem:[#allocation78_spill] sm:$0xff] }
0x13af   :  { %3214 = vmatpush.bf16.msra.mxu1 %v7480_v20  ;;  %3227 = vmatpush.bf16.msra.mxu2 %v7481_v46  ;;  %v7491_v20 = vld [vmem:[#allocation79_spill] sm:$0xff]  ;;  %v7492_v46 = vld [vmem:[#allocation81_spill] sm:$0xff] }
0x13b2   :  { %3189 = vmatpush.bf16.msra.mxu3 %v7482_v26  ;;  %3202 = vmatpush.bf16.msra.mxu0 %v7483_v19  ;;  %v7493_v26 = vld [vmem:[#allocation96_spill] sm:$0xff]  ;;  %v7494_v19 = vld [vmem:[#allocation82_spill] sm:$0xff] }
0x13b3   :  { %3215 = vmatpush.bf16.msra.mxu1 %v7484_v34  ;;  %3228 = vmatpush.bf16.msra.mxu2 %v7485_v44  ;;  %v7495_v34 = vld [vmem:[#allocation83_spill] sm:$0xff]  ;;  %v7496_v44 = vld [vmem:[#allocation85_spill] sm:$0xff] }
0x13b6   :  { %3190 = vmatpush.bf16.msra.mxu3 %v7486_v56  ;;  %3203 = vmatpush.bf16.msra.mxu0 %v7487_v45  ;;  %v7497_v56 = vld [vmem:[#allocation98_spill] sm:$0xff]  ;;  %v7498_v45 = vld [vmem:[#allocation87_spill] sm:$0xff] }
0x13b7   :  { %3216 = vmatpush.bf16.msra.mxu1 %v7488_v27  ;;  %3229 = vmatpush.bf16.msra.mxu2 %v7489_v10  ;;  %v7499_v27 = vld [vmem:[#allocation88_spill] sm:$0xff]  ;;  %v7500_v10 = vld [vmem:[#allocation89_spill] sm:$0xff] }
0x13ba   :  { %3191 = vmatpush.bf16.msra.mxu3 %v7490_v48  ;;  %3204 = vmatpush.bf16.msra.mxu0 %v7491_v20  ;;  %v7501_v48 = vld [vmem:[#allocation90_spill] sm:$0xff]  ;;  %v7502_v20 = vld [vmem:[#allocation100_spill] sm:$0xff] }
0x13bb   :  { %3217 = vmatpush.bf16.msra.mxu1 %v7492_v46  ;;  %3230 = vmatpush.bf16.msra.mxu2 %v7493_v26  ;;  %v7503_v46 = vld [vmem:[#allocation92_spill] sm:$0xff]  ;;  %v7504_v26 = vld [vmem:[#allocation97_spill] sm:$0xff] }
0x13be   :  { %3192 = vmatpush.bf16.msra.mxu3 %v7494_v19  ;;  %3205 = vmatpush.bf16.msra.mxu0 %v7495_v34  ;;  %v7505_v19 = vld [vmem:[#allocation99_spill] sm:$0xff]  ;;  %v7506_v34 = vld [vmem:[#allocation101_spill] sm:$0xff] }
0x13bf   :  { %3218 = vmatpush.bf16.msra.mxu1 %v7496_v44  ;;  %3231 = vmatpush.bf16.msra.mxu2 %v7497_v56  ;;  %v7507_v44 = vld [vmem:[#allocation102_spill] sm:$0xff]  ;;  %v7508_v56 = vld [vmem:[#allocation103_spill] sm:$0xff] }
0x13c2   :  { %3193 = vmatpush.bf16.msra.mxu3 %v7498_v45  ;;  %3206 = vmatpush.bf16.msra.mxu0 %v7499_v27  ;;  %v7509_v45 = vld [vmem:[#allocation104_spill] sm:$0xff] }
0x13c3   :  { %3219 = vmatpush.bf16.msra.mxu1 %v7500_v10  ;;  %3232 = vmatpush.bf16.msra.mxu2 %v7502_v20 }
0x13c6   :  { %3238 = vmatpush.bf16.msrb.mxu3 %v7501_v48 }
0x13ca   :  { %3239 = vmatpush.bf16.msrb.mxu3 %v7503_v46 }
0x13ce   :  { %3240 = vmatpush.bf16.msrb.mxu3 %v7504_v26 }
0x13d2   :  { %3241 = vmatpush.bf16.msrb.mxu3 %v7505_v19 }
0x13d6   :  { %3242 = vmatpush.bf16.msrb.mxu3 %v7506_v34 }
0x13da   :  { %3243 = vmatpush.bf16.msrb.mxu3 %v7507_v44 }
0x13de   :  { %3244 = vmatpush.bf16.msrb.mxu3 %v7508_v56 }
0x13e2   :  { %3245 = vmatpush.bf16.msrb.mxu3 %v7509_v45  ;;  %v7510_v45 = vld [vmem:[#allocation45_spill] sm:$0xff] }
0x1401   :  { %v2984_v27 = vpop.f32.mrf.mxu1 }
0x1402   :  { %v2971_v10 = vpop.f32.mrf.mxu0 }
0x1407   :  { %v2958_v4 = vpop.f32.mrf.mxu3 }
0x1408   :  { %v2997_v48 = vpop.f32.mrf.mxu2  ;;  %v2972_v26 = vadd.f32 %v2971_v10, %v2958_v4 }
0x1409   :  { %v2986_v11 = vpop.f32.mrf.mxu1  ;;  %v2998_v9 = vadd.f32 %v2997_v48, %v2984_v27 }
0x140a   :  { %v2973_v20 = vpop.f32.mrf.mxu0 }
0x140f   :  { %v2960_v29 = vpop.f32.mrf.mxu3 }
0x1410   :  { %v2999_v46 = vpop.f32.mrf.mxu2 }
0x1411   :  { %v3036_v55 = vpop.f32.mrf.mxu1 }
0x1412   :  { %v3023_v35 = vpop.f32.mrf.mxu0  ;;  %v3037_v19 = vadd.f32 %v3036_v55, %v7445_v2 }
0x1414   :  { %v3066_v34 = vadd.f32 %v3037_v19, %v2972_v26 }
0x1416   :  { %v4455_v62 = vmul.f32 -1.442695, %v3066_v34 }
0x1417   :  { %v3010_v44 = vpop.f32.mrf.mxu3 }
0x1418   :  { %4779 = vpow2.f32 %v4455_v62  ;;  %v3049_v56 = vpop.f32.mrf.mxu2 }
0x1419   :  { %v3050_v14 = vadd.f32 %v3049_v56, %v7510_v45  ;;  %v3038_v30 = vpop.f32.mrf.mxu1 }
0x141a   :  { %v3025_v52 = vpop.f32.mrf.mxu0 }
0x141b   :  { %v3086_v16 = vadd.f32 %v3050_v14, %v2998_v9 }
0x141d   :  { %v4456_v11 = vmul.f32 -1.442695, %v3086_v16 }
0x141e   :  { %v4780_v20 = vpop.eup %4779 }
0x141f   :  { %v3070_v29 = vadd.f32 1.0, %v4780_v20  ;;  %4781 = vpow2.f32 %v4456_v11  ;;  %v3012_v46 = vpop.f32.mrf.mxu3 }
0x1420   :  { %v3051_v4 = vpop.f32.mrf.mxu2 }
0x1421   :  { %4783 = vrcp.f32 %v3070_v29  ;;  %v3082_v27 = vand.u32 2147483648, %v3070_v29  ;;  %v3080_v56 = vand.u32 2147483647, %v3070_v29  ;;  %vm3076_vm1 = vweird.f32 %v3070_v29 }
0x1423   :  { %v3083_v14 = vor.u32 1.1754944e-38, %v3082_v27  ;;  %vm3081_vm3 = vcmp.eq.f32.partialorder %v3080_v56, 8.507059e+37 }
0x1425   :  { %v4782_v10 = vpop.eup %4781 }
0x1426   :  { %v3090_v55 = vadd.f32 1.0, %v4782_v10  ;;  %v3024_v10 = vadd.f32 %v3023_v35, %v3010_v44 }
0x1427   :  { %v4784_v19 = vpop.eup %4783 }
0x1428   :  { %4785 = vrcp.f32 %v3090_v55  ;;  %v3062_v34 = vpop.f32.mrf.mxu3  ;;  %v3072_v62 = vmul.f32 %v4784_v19, %v3070_v29  ;;  %vm3077_vm0 = vweird.f32 %v4784_v19  ;;  %v3102_v45 = vand.u32 2147483648, %v3090_v55 }
0x1429   :  { %vm3078_vm2 = vmor %vm3076_vm1, %vm3077_vm0  ;;  %v3063_v9 = vadd.f32 %v3062_v34, %v7254_v42  ;;  %vm3096_vm5 = vweird.f32 %v3090_v55 }
0x142a   :  { %v3073_v26 = vsub.f32 1.0, %v3072_v62  ;;  %v3103_v29 = vor.u32 1.1754944e-38, %v3102_v45 }
0x142c   :  { %v3074_v48 = vmul.f32 %v4784_v19, %v3073_v26  ;;  %v3100_v26 = vand.u32 2147483647, %v3090_v55 }
0x142e   :  { %v4786_v52 = vpop.eup %4785  ;;  %v3075_v30 = vadd.f32 %v4784_v19, %v3074_v48  ;;  %vm3101_vm7 = vcmp.eq.f32.partialorder %v3100_v26, 8.507059e+37 }
0x142f   :  { %v3092_v16 = vmul.f32 %v4786_v52, %v3090_v55  ;;  %vm3097_vm4 = vweird.f32 %v4786_v52 }
0x1430   :  { %v3079_v11 = vsel %vm3078_vm2, %v4784_v19, %v3075_v30  ;;  %v3064_v20 = vpop.f32.mrf.mxu3  ;;  %vm3098_vm6 = vmor %vm3096_vm5, %vm3097_vm4 }
0x1431   :  { %v3093_v46 = vsub.f32 1.0, %v3092_v16  ;;  %v3084_v4 = vsel %vm3081_vm3, %v3083_v14, %v3079_v11 }
0x1432   :  { %v3106_v62 = vmul.f32 %v3084_v4, %v3063_v9 }
0x1433   :  { %v3094_v2 = vmul.f32 %v4786_v52, %v3093_v46 }
0x1434   :  { %v3107_v51 = vadd.f32 %v3106_v62, %v3024_v10 }
0x1435   :  { %v3095_v48 = vadd.f32 %v4786_v52, %v3094_v2 }
0x1436   :  { %4787 = vtanh.f32 %v3107_v51 }
0x1437   :  { %v3099_v27 = vsel %vm3098_vm6, %v4786_v52, %v3095_v48 }
0x1438   :  { %v3104_v34 = vsel %vm3101_vm7, %v3103_v29, %v3099_v27 }
0x1439   :  { %v3109_v19 = vsub.f32 1.0, %v3104_v34  ;;  %v3111_v16 = vmul.f32 %v3104_v34, %v6473_v58 }
0x143c   :  { %v4788_v56 = vpop.eup %4787 }
0x143d   :  { %v3110_v30 = vmul.f32 %v4788_v56, %v3109_v19 }
0x143f   :  { %v6619_v44 = vadd.f32 %v3111_v16, %v3110_v30  ;;  %v7539_v16 = vld [vmem:[#allocation91_spill] sm:$0xff] }
0x1441   :  { %v6623_v35 = vpack.c.bf16 %v6619_v44, %v6619_v44 }
0x1443   :  { %3122 = vmatmul.bf16.vlgmr.msrb.gmra.mxu0 %v6623_v35  ;;  %3135 = vmatmul.bf16.vlgmr.msrb.gmra.mxu1 %v6623_v35 }
0x1444   :  { %3251 = vmatpush.bf16.msrb.mxu0 %v5581_v8  ;;  %3264 = vmatpush.bf16.msrb.mxu1 %v5583_v36 }
0x1448   :  { %3252 = vmatpush.bf16.msrb.mxu0 %v5586_v61  ;;  %3265 = vmatpush.bf16.msrb.mxu1 %v5589_v53 }
0x144c   :  { %3253 = vmatpush.bf16.msrb.mxu0 %v5592_v18  ;;  %3266 = vmatpush.bf16.msrb.mxu1 %v5595_v25 }
0x1450   :  { %3254 = vmatpush.bf16.msrb.mxu0 %v5598_v21  ;;  %3267 = vmatpush.bf16.msrb.mxu1 %v5601_v24 }
0x1454   :  { %3255 = vmatpush.bf16.msrb.mxu0 %v7256_v32  ;;  %3268 = vmatpush.bf16.msrb.mxu1 %v7257_v7 }
0x1458   :  { %3256 = vmatpush.bf16.msrb.mxu0 %v7258_v60  ;;  %3269 = vmatpush.bf16.msrb.mxu1 %v7259_v23 }
0x145c   :  { %3257 = vmatpush.bf16.msrb.mxu0 %v7260_v28  ;;  %3270 = vmatpush.bf16.msrb.mxu1 %v7261_v54 }
0x1460   :  { %3258 = vmatpush.bf16.msrb.mxu0 %v7262_v49  ;;  %3271 = vmatpush.bf16.msrb.mxu1 %v7319_v37 }
0x14c0   :  { %v3123_v2 = vpop.f32.mrf.mxu0  ;;  %v3136_v58 = vpop.f32.mrf.mxu1 }
0x14c1   :  { %v6644_v45 = vadd.f32 %v3123_v2, %v7322_v15  ;;  %v6647_v51 = vadd.f32 %v3136_v58, %v7320_v40  ;;  %v7521_v58 = vld [vmem:[#allocation48_spill] sm:$0xff]  ;;  %v7540_v2 = vld [vmem:[#allocation67_spill] sm:$0xff] }
0x14c3   :  { %7511 = vst [vmem:[#allocation38_spill] sm:$0xff] %v6644_v45  ;;  %v6651_v55 = vmax.f32 %v6644_v45, %v6647_v51 }
0x14c4   :  { %7512 = vst [vmem:[#allocation105_spill] sm:$0xff] %v6647_v51 }
0x14c5   :  { %3143 = vmax.xlane.f32.xlu0 %v6651_v55 }
0x14c8   :  { %v3125_v52 = vpop.f32.mrf.mxu0  ;;  %v3138_v14 = vpop.f32.mrf.mxu1 }
0x14c9   :  { %v7522_v52 = vld [vmem:[#allocation49_spill] sm:$0xff]  ;;  %v7523_v14 = vld [vmem:[#allocation76_spill] sm:$0xff] }
0x1538   :  { %v3144_v9 = vpop.xlane.xlu0 %3143 }
0x1539   :  { %vm3145_vm8 = vcmp.eq.f32.partialorder %v6644_v45, %v3144_v9  ;;  %vm3146_vm9 = vcmp.eq.f32.partialorder %v6647_v51, %v3144_v9  ;;  %v7524_v9 = vld [vmem:[#allocation42_spill] sm:$0xff]  ;;  %v7572_v45 = vld [vmem:[#allocation44_spill] sm:$0xff] }
0x153a   :  { %v3147_v11 = vsel %vm3145_vm8, %v5747_v50, 256  ;;  %v3148_v20 = vsel %vm3146_vm9, %v5750_v12, 256 }
0x153b   :  { %vm3149_vm10 = vcmp.lt.s32.totalorder %v3147_v11, %v3148_v20 }
0x153c   :  { %v3150_v46 = vsel %vm3149_vm10, %v3147_v11, %v3148_v20  ;;  %v7525_v11 = vld [vmem:[#allocation50_spill] sm:$0xff]  ;;  %v7526_v20 = vld [vmem:[#allocation51_spill] sm:$0xff] }
0x153d   :  { %v3152_v4 = vshra.s32 %v3150_v46, 16  ;;  %v3151_v62 = vand.u32 65535, %v3150_v46  ;;  %v7527_v46 = vld [vmem:[#allocation80_spill] sm:$0xff] }
0x153f   :  { %v3154_v10 = vcvt.s32.f32 %v3152_v4  ;;  %v3153_v48 = vcvt.s32.f32 %v3151_v62  ;;  %v7528_v4 = vld [vmem:[#allocation43_spill] sm:$0xff]  ;;  %v7530_v62 = vld [vmem:[#allocation53_spill] sm:$0xff] }
0x1541   :  { %3155 = vmin.xlane.f32.xlu1 %v3154_v10 }
0x15b4   :  { %v3156_v26 = vpop.xlane.xlu1 %3155 }
0x15b5   :  { %vm3157_vm11 = vcmp.eq.f32.partialorder %v3154_v10, %v3156_v26  ;;  %v3162_v27 = vcvt.f32.s32 %v3156_v26  ;;  %v7529_v10 = vld [vmem:[#allocation52_spill] sm:$0xff]  ;;  %v7531_v26 = vld [vmem:[#allocation61_spill] sm:$0xff] }
0x15b6   :  { %v3158_v29 = vsel %vm3157_vm11, %v3153_v48, inf  ;;  %v7532_v48 = vld [vmem:[#allocation62_spill] sm:$0xff] }
0x15b7   :  { %3159 = vmin.xlane.f32.xlu2 %v3158_v29  ;;  %v3163_v19 = vshll.u32 %v3162_v27, 16  ;;  %v7533_v29 = vld [vmem:[#allocation63_spill] sm:$0xff]  ;;  %v7534_v27 = vld [vmem:[#allocation84_spill] sm:$0xff] }
0x162a   :  { %v3160_v34 = vpop.xlane.xlu2 %3159 }
0x162b   :  { %v3161_v56 = vcvt.f32.s32 %v3160_v34  ;;  %v7535_v34 = vld [vmem:[#allocation86_spill] sm:$0xff] }
0x162d   :  { %v3164_v30 = vadd.s32 %v3163_v19, %v3161_v56  ;;  %v7536_v19 = vld [vmem:[#allocation64_spill] sm:$0xff]  ;;  %v7537_v56 = vld [vmem:[#allocation65_spill] sm:$0xff] }
0x162f   :  { %vm3165_vm12 = vcmp.eq.s32.totalorder %v5747_v50, %v3164_v30  ;;  %vm3166_vm13 = vcmp.eq.s32.totalorder %v5750_v12, %v3164_v30  ;;  %v7538_v30 = vld [vmem:[#allocation66_spill] sm:$0xff] }
0x1630   :  { %vm6660_vm14 = vmpackc.low %vm3165_vm12, %vm3165_vm12 }
0x1631   :  { %vm6664_vm15 = vmpackc.low %vm3166_vm13, %vm3166_vm13  ;;  %4460 = vmatmul.msk.bf16.vlgmr.msrb.gmra.mxu2 %vm6660_vm14, %v7273_v38  ;;  %4464 = vmatmul.msk.bf16.vlgmr.msra.gmra.mxu0 %vm6660_vm14, %v7273_v38 }
0x1632   :  { %4462 = vmatmul.msk.bf16.vlgmr.msra.gmra.mxu3 %vm6664_vm15, %v7273_v38  ;;  %4466 = vmatmul.msk.bf16.vlgmr.msra.gmra.mxu1 %vm6664_vm15, %v7273_v38 }
0x1633   :  { %3277 = vmatpush.bf16.msrb.mxu2 %v5603_v13  ;;  %3338 = vmatpush.bf16.msra.mxu3 %v5655_v59 }
0x1634   :  { %3351 = vmatpush.bf16.msra.mxu0 %v5657_v57  ;;  %3397 = vmatpush.bf16.msra.mxu1 %v5762_v22  ;;  %v7517_v22 = vld [vmem:[#allocation46_spill] sm:$0xff] }
0x1637   :  { %3278 = vmatpush.bf16.msrb.mxu2 %v5606_v5  ;;  %3339 = vmatpush.bf16.msra.mxu3 %v5661_v39 }
0x1638   :  { %3352 = vmatpush.bf16.msra.mxu0 %v5663_v6  ;;  %3398 = vmatpush.bf16.msra.mxu1 %v5765_v63  ;;  %v7518_v63 = vld [vmem:[#allocation47_spill] sm:$0xff] }
0x163b   :  { %3279 = vmatpush.bf16.msrb.mxu2 %v5615_v31  ;;  %3340 = vmatpush.bf16.msra.mxu3 %v5672_v0 }
0x163c   :  { %3353 = vmatpush.bf16.msra.mxu0 %v5674_v43  ;;  %3399 = vmatpush.bf16.msra.mxu1 %v5778_v33  ;;  %v7519_v33 = vld [vmem:[#allocation72_spill] sm:$0xff] }
0x163f   :  { %3280 = vmatpush.bf16.msrb.mxu2 %v5624_v1  ;;  %3341 = vmatpush.bf16.msra.mxu3 %v5684_v41 }
0x1640   :  { %3354 = vmatpush.bf16.msra.mxu0 %v5686_v17  ;;  %3400 = vmatpush.bf16.msra.mxu1 %v5792_v47  ;;  %v7520_v47 = vld [vmem:[#allocation41_spill] sm:$0xff] }
0x1641   :  { %4468 = vmatmul.msk.bf16.vlgmr.msra.gmra.mxu2 %vm6660_vm14, %v7273_v38  ;;  %3259 = vmatmul.bf16.vlgmr.msrb.gmra.mxu0 %v6623_v35 }
0x1642   :  { %4470 = vmatmul.msk.bf16.vlgmr.msrb.gmra.mxu3 %vm6664_vm15, %v7273_v38  ;;  %3272 = vmatmul.bf16.vlgmr.msrb.gmra.mxu1 %v6623_v35 }
0x1643   :  { %3281 = vmatpush.bf16.msrb.mxu2 %v7454_v3  ;;  %3342 = vmatpush.bf16.msra.mxu3 %v7517_v22 }
0x1644   :  { %3355 = vmatpush.bf16.msra.mxu0 %v7518_v63  ;;  %3401 = vmatpush.bf16.msra.mxu1 %v7519_v33  ;;  %v7541_v33 = vld [vmem:[#allocation68_spill] sm:$0xff] }
0x1647   :  { %3282 = vmatpush.bf16.msrb.mxu2 %v7520_v47  ;;  %3343 = vmatpush.bf16.msra.mxu3 %v7521_v58 }
0x1648   :  { %3356 = vmatpush.bf16.msra.mxu0 %v7522_v52  ;;  %3402 = vmatpush.bf16.msra.mxu1 %v7523_v14  ;;  %v7542_v14 = vld [vmem:[#allocation69_spill] sm:$0xff] }
0x164b   :  { %3283 = vmatpush.bf16.msrb.mxu2 %v7524_v9  ;;  %3344 = vmatpush.bf16.msra.mxu3 %v7525_v11 }
0x164c   :  { %3357 = vmatpush.bf16.msra.mxu0 %v7526_v20  ;;  %3403 = vmatpush.bf16.msra.mxu1 %v7527_v46  ;;  %v7543_v46 = vld [vmem:[#allocation93_spill] sm:$0xff] }
0x164f   :  { %3284 = vmatpush.bf16.msrb.mxu2 %v7528_v4  ;;  %3345 = vmatpush.bf16.msra.mxu3 %v7529_v10  ;;  %v7573_v10 = vld [vmem:[#allocation45_spill] sm:$0xff] }
0x1650   :  { %3358 = vmatpush.bf16.msra.mxu0 %v7530_v62  ;;  %3404 = vmatpush.bf16.msra.mxu1 %v7534_v27  ;;  %v7548_v27 = vld [vmem:[#allocation74_spill] sm:$0xff] }
0x1652   :  { %3285 = vmatmul.bf16.vlgmr.msrb.gmra.mxu2 %v6623_v35  ;;  %v7544_v35 = vld [vmem:[#allocation70_spill] sm:$0xff] }
0x1653   :  { %3410 = vmatpush.bf16.msra.mxu2 %v7531_v26  ;;  %3423 = vmatpush.bf16.msrb.mxu3 %v7532_v48  ;;  %v7545_v26 = vld [vmem:[#allocation71_spill] sm:$0xff]  ;;  %v7546_v48 = vld [vmem:[#allocation73_spill] sm:$0xff] }
0x1654   :  { %3436 = vmatpush.bf16.msrb.mxu0 %v7533_v29  ;;  %3449 = vmatpush.bf16.msrb.mxu1 %v7535_v34  ;;  %v7547_v29 = vld [vmem:[#allocation94_spill] sm:$0xff]  ;;  %v7549_v34 = vld [vmem:[#allocation75_spill] sm:$0xff] }
0x1657   :  { %3411 = vmatpush.bf16.msra.mxu2 %v7536_v19  ;;  %3424 = vmatpush.bf16.msrb.mxu3 %v7537_v56  ;;  %v7550_v19 = vld [vmem:[#allocation77_spill] sm:$0xff]  ;;  %v7551_v56 = vld [vmem:[#allocation95_spill] sm:$0xff] }
0x1658   :  { %3437 = vmatpush.bf16.msrb.mxu0 %v7538_v30  ;;  %3450 = vmatpush.bf16.msrb.mxu1 %v7539_v16  ;;  %v7552_v30 = vld [vmem:[#allocation78_spill] sm:$0xff]  ;;  %v7553_v16 = vld [vmem:[#allocation79_spill] sm:$0xff] }
0x165b   :  { %3412 = vmatpush.bf16.msra.mxu2 %v7540_v2  ;;  %3425 = vmatpush.bf16.msrb.mxu3 %v7541_v33  ;;  %v7554_v2 = vld [vmem:[#allocation81_spill] sm:$0xff]  ;;  %v7555_v33 = vld [vmem:[#allocation96_spill] sm:$0xff] }
0x165c   :  { %3438 = vmatpush.bf16.msrb.mxu0 %v7542_v14  ;;  %3451 = vmatpush.bf16.msrb.mxu1 %v7543_v46  ;;  %v7556_v14 = vld [vmem:[#allocation82_spill] sm:$0xff]  ;;  %v7557_v46 = vld [vmem:[#allocation83_spill] sm:$0xff] }
0x165f   :  { %3413 = vmatpush.bf16.msra.mxu2 %v7544_v35  ;;  %3426 = vmatpush.bf16.msrb.mxu3 %v7545_v26  ;;  %v7558_v35 = vld [vmem:[#allocation85_spill] sm:$0xff]  ;;  %v7559_v26 = vld [vmem:[#allocation98_spill] sm:$0xff] }
0x1660   :  { %3439 = vmatpush.bf16.msrb.mxu0 %v7546_v48  ;;  %3452 = vmatpush.bf16.msrb.mxu1 %v7547_v29  ;;  %v7560_v48 = vld [vmem:[#allocation87_spill] sm:$0xff]  ;;  %v7561_v29 = vld [vmem:[#allocation88_spill] sm:$0xff] }
0x1663   :  { %3414 = vmatpush.bf16.msra.mxu2 %v7548_v27  ;;  %3427 = vmatpush.bf16.msrb.mxu3 %v7549_v34  ;;  %v7562_v27 = vld [vmem:[#allocation89_spill] sm:$0xff]  ;;  %v7563_v34 = vld [vmem:[#allocation90_spill] sm:$0xff] }
0x1664   :  { %3440 = vmatpush.bf16.msrb.mxu0 %v7550_v19  ;;  %3453 = vmatpush.bf16.msrb.mxu1 %v7551_v56  ;;  %v7564_v19 = vld [vmem:[#allocation100_spill] sm:$0xff] }
0x1665   :  { %v7565_v56 = vld [vmem:[#allocation92_spill] sm:$0xff] }
0x1667   :  { %3415 = vmatpush.bf16.msra.mxu2 %v7552_v30  ;;  %3428 = vmatpush.bf16.msrb.mxu3 %v7553_v16  ;;  %v7566_v30 = vld [vmem:[#allocation97_spill] sm:$0xff]  ;;  %v7567_v16 = vld [vmem:[#allocation99_spill] sm:$0xff] }
0x1668   :  { %3441 = vmatpush.bf16.msrb.mxu0 %v7554_v2  ;;  %3454 = vmatpush.bf16.msrb.mxu1 %v7555_v33  ;;  %v7568_v2 = vld [vmem:[#allocation101_spill] sm:$0xff]  ;;  %v7569_v33 = vld [vmem:[#allocation102_spill] sm:$0xff] }
0x166b   :  { %3416 = vmatpush.bf16.msra.mxu2 %v7556_v14  ;;  %3429 = vmatpush.bf16.msrb.mxu3 %v7557_v46  ;;  %v7570_v14 = vld [vmem:[#allocation103_spill] sm:$0xff]  ;;  %v7571_v46 = vld [vmem:[#allocation104_spill] sm:$0xff] }
0x166c   :  { %3442 = vmatpush.bf16.msrb.mxu0 %v7558_v35  ;;  %3455 = vmatpush.bf16.msrb.mxu1 %v7559_v26 }
0x166f   :  { %3417 = vmatpush.bf16.msra.mxu2 %v7560_v48  ;;  %3430 = vmatpush.bf16.msrb.mxu3 %v7561_v29 }
0x1670   :  { %3443 = vmatpush.bf16.msrb.mxu0 %v7562_v27  ;;  %3456 = vmatpush.bf16.msrb.mxu1 %v7564_v19 }
0x1673   :  { %3462 = vmatpush.bf16.msrb.mxu2 %v7563_v34 }
0x1677   :  { %3463 = vmatpush.bf16.msrb.mxu2 %v7565_v56 }
0x167b   :  { %3464 = vmatpush.bf16.msrb.mxu2 %v7566_v30 }
0x167f   :  { %3465 = vmatpush.bf16.msrb.mxu2 %v7567_v16 }
0x1683   :  { %3466 = vmatpush.bf16.msrb.mxu2 %v7568_v2 }
0x1687   :  { %3467 = vmatpush.bf16.msrb.mxu2 %v7569_v33 }
0x168b   :  { %3468 = vmatpush.bf16.msrb.mxu2 %v7570_v14 }
0x168f   :  { %3469 = vmatpush.bf16.msrb.mxu2 %v7571_v46 }
0x16ae   :  { %v3208_v35 = vpop.f32.mrf.mxu0 }
0x16af   :  { %v3221_v26 = vpop.f32.mrf.mxu1 }
0x16b0   :  { %v3222_v2 = vadd.f32 %v3221_v26, %v3208_v35 }
0x16b4   :  { %v3182_v48 = vpop.f32.mrf.mxu2 }
0x16b5   :  { %v3195_v29 = vpop.f32.mrf.mxu3 }
0x16b6   :  { %v3210_v27 = vpop.f32.mrf.mxu0  ;;  %v3196_v30 = vadd.f32 %v3195_v29, %v3182_v48 }
0x16b7   :  { %v3223_v34 = vpop.f32.mrf.mxu1 }
0x16bc   :  { %v3184_v19 = vpop.f32.mrf.mxu2 }
0x16bd   :  { %v3197_v56 = vpop.f32.mrf.mxu3 }
0x16be   :  { %v3260_v51 = vpop.f32.mrf.mxu0 }
0x16bf   :  { %v3261_v16 = vadd.f32 %v3260_v51, %v7572_v45  ;;  %v3273_v62 = vpop.f32.mrf.mxu1 }
0x16c0   :  { %v3274_v33 = vadd.f32 %v3273_v62, %v7573_v10 }
0x16c1   :  { %v3290_v4 = vadd.f32 %v3261_v16, %v3196_v30 }
0x16c2   :  { %v3310_v14 = vadd.f32 %v3274_v33, %v3222_v2 }
0x16c3   :  { %v4471_v20 = vmul.f32 -1.442695, %v3290_v4 }
0x16c4   :  { %v4472_v46 = vmul.f32 -1.442695, %v3310_v14  ;;  %v3234_v11 = vpop.f32.mrf.mxu2 }
0x16c5   :  { %4789 = vpow2.f32 %v4471_v20  ;;  %v3247_v9 = vpop.f32.mrf.mxu3 }
0x16c6   :  { %4791 = vpow2.f32 %v4472_v46  ;;  %v3262_v27 = vpop.f32.mrf.mxu0 }
0x16c7   :  { %v3275_v34 = vpop.f32.mrf.mxu1 }
0x16cb   :  { %v4790_v19 = vpop.eup %4789 }
0x16cc   :  { %v4792_v56 = vpop.eup %4791  ;;  %v3294_v52 = vadd.f32 1.0, %v4790_v19  ;;  %v3236_v48 = vpop.f32.mrf.mxu2 }
0x16cd   :  { %v3314_v29 = vadd.f32 1.0, %v4792_v56  ;;  %v3249_v51 = vpop.f32.mrf.mxu3 }
0x16ce   :  { %4793 = vrcp.f32 %v3294_v52  ;;  %v3306_v20 = vand.u32 2147483648, %v3294_v52  ;;  %v3304_v14 = vand.u32 2147483647, %v3294_v52  ;;  %vm3300_vm1 = vweird.f32 %v3294_v52 }
0x16cf   :  { %4795 = vrcp.f32 %v3314_v29  ;;  %v3326_v10 = vand.u32 2147483648, %v3314_v29  ;;  %vm3320_vm5 = vweird.f32 %v3314_v29 }
0x16d0   :  { %v3307_v34 = vor.u32 1.1754944e-38, %v3306_v20  ;;  %vm3305_vm3 = vcmp.eq.f32.partialorder %v3304_v14, 8.507059e+37 }
0x16d4   :  { %v4794_v35 = vpop.eup %4793 }
0x16d5   :  { %v4796_v62 = vpop.eup %4795  ;;  %v3286_v26 = vpop.f32.mrf.mxu2  ;;  %v3296_v30 = vmul.f32 %v4794_v35, %v3294_v52  ;;  %vm3301_vm0 = vweird.f32 %v4794_v35 }
0x16d6   :  { %v3316_v4 = vmul.f32 %v4796_v62, %v3314_v29  ;;  %vm3302_vm2 = vmor %vm3300_vm1, %vm3301_vm0  ;;  %v3287_v19 = vadd.f32 %v3286_v26, %v7254_v42  ;;  %vm3321_vm4 = vweird.f32 %v4796_v62 }
0x16d7   :  { %v3297_v16 = vsub.f32 1.0, %v3296_v30  ;;  %v3248_v30 = vadd.f32 %v3247_v9, %v3234_v11  ;;  %vm3322_vm6 = vmor %vm3320_vm5, %vm3321_vm4 }
0x16d8   :  { %v3317_v2 = vsub.f32 1.0, %v3316_v4 }
0x16d9   :  { %v3298_v33 = vmul.f32 %v4794_v35, %v3297_v16  ;;  %v3324_v16 = vand.u32 2147483647, %v3314_v29 }
0x16da   :  { %v3318_v46 = vmul.f32 %v4796_v62, %v3317_v2 }
0x16db   :  { %v3299_v27 = vadd.f32 %v4794_v35, %v3298_v33  ;;  %v3327_v33 = vor.u32 1.1754944e-38, %v3326_v10  ;;  %vm3325_vm7 = vcmp.eq.f32.partialorder %v3324_v16, 8.507059e+37 }
0x16dc   :  { %v3319_v45 = vadd.f32 %v4796_v62, %v3318_v46 }
0x16dd   :  { %v3303_v56 = vsel %vm3302_vm2, %v4794_v35, %v3299_v27  ;;  %v3288_v48 = vpop.f32.mrf.mxu2 }
0x16de   :  { %v3308_v51 = vsel %vm3305_vm3, %v3307_v34, %v3303_v56  ;;  %v3323_v2 = vsel %vm3322_vm6, %v4796_v62, %v3319_v45  ;;  %v7578_v62 = vld [vmem:[#allocation58_spill] sm:$0xff]  ;;  %v7579_v34 = vld [vmem:[#allocation59_spill] sm:$0xff] }
0x16df   :  { %v3330_v4 = vmul.f32 %v3308_v51, %v3287_v19  ;;  %v3328_v52 = vsel %vm3325_vm7, %v3327_v33, %v3323_v2  ;;  %v7580_v48 = vld [vmem:[#allocation54_spill] sm:$0xff] }
0x16e0   :  { %v3333_v20 = vsub.f32 1.0, %v3328_v52  ;;  %v3335_v14 = vmul.f32 %v3328_v52, %v6619_v44  ;;  %v7577_v44 = vld [vmem:[#allocation56_spill] sm:$0xff] }
0x16e1   :  { %v3331_v58 = vadd.f32 %v3330_v4, %v3248_v30  ;;  %v7581_v30 = vld [vmem:[#allocation55_spill] sm:$0xff] }
0x16e3   :  { %4797 = vtanh.f32 %v3331_v58 }
0x16e9   :  { %v4798_v26 = vpop.eup %4797 }
0x16ea   :  { %v3334_v35 = vmul.f32 %v4798_v26, %v3333_v20  ;;  %v7582_v20 = vld [vmem:[#allocation34_spill] sm:$0xff] }
0x16ec   :  { %v6765_v27 = vadd.f32 %v3335_v14, %v3334_v35  ;;  %v7583_v35 = vld [vmem:[#allocation32_spill] sm:$0xff] }
0x16ee   :  { %v6769_v9 = vpack.c.bf16 %v6765_v27, %v6765_v27 }
0x16f0   :  { %3346 = vmatmul.bf16.vlgmr.msra.gmra.mxu3 %v6769_v9  ;;  %3359 = vmatmul.bf16.vlgmr.msra.gmra.mxu0 %v6769_v9 }
0x16f1   :  { %3475 = vmatpush.bf16.msra.mxu3 %v5581_v8  ;;  %3488 = vmatpush.bf16.msra.mxu0 %v5583_v36 }
0x16f5   :  { %3476 = vmatpush.bf16.msra.mxu3 %v5586_v61  ;;  %3489 = vmatpush.bf16.msra.mxu0 %v5589_v53 }
0x16f9   :  { %3477 = vmatpush.bf16.msra.mxu3 %v5592_v18  ;;  %3490 = vmatpush.bf16.msra.mxu0 %v5595_v25 }
0x16fd   :  { %3478 = vmatpush.bf16.msra.mxu3 %v5598_v21  ;;  %3491 = vmatpush.bf16.msra.mxu0 %v5601_v24  ;;  %v7574_v24 = vld [vmem:[#allocation60_spill] sm:$0xff] }
0x1701   :  { %3479 = vmatpush.bf16.msra.mxu3 %v7256_v32  ;;  %3492 = vmatpush.bf16.msra.mxu0 %v7257_v7  ;;  %v7575_v32 = vld [vmem:[#allocation39_spill] sm:$0xff] }
0x1705   :  { %3480 = vmatpush.bf16.msra.mxu3 %v7258_v60  ;;  %3493 = vmatpush.bf16.msra.mxu0 %v7259_v23 }
0x1709   :  { %3481 = vmatpush.bf16.msra.mxu3 %v7260_v28  ;;  %3494 = vmatpush.bf16.msra.mxu0 %v7261_v54 }
0x170d   :  { %3482 = vmatpush.bf16.msra.mxu3 %v7262_v49  ;;  %3495 = vmatpush.bf16.msra.mxu0 %v7319_v37  ;;  %v7576_v37 = vld [vmem:[#allocation33_spill] sm:$0xff] }
0x176d   :  { %v3360_v8 = vpop.f32.mrf.mxu0 }
0x176e   :  { %v6790_v61 = vadd.f32 %v3360_v8, %v7320_v40  ;;  %v7584_v8 = vld [vmem:[#allocation37_spill] sm:$0xff] }
0x1773   :  { %v3347_v36 = vpop.f32.mrf.mxu3 }
0x1774   :  { %v6793_v53 = vadd.f32 %v3347_v36, %v7322_v15 }
0x1775   :  { %v3362_v18 = vpop.f32.mrf.mxu0 }
0x1776   :  { %v3366_v25 = vmax.f32 %v6793_v53, %v6790_v61 }
0x1778   :  { %3367 = vmax.xlane.f32.xlu0 %v3366_v25 }
0x177b   :  { %v3349_v21 = vpop.f32.mrf.mxu3 }
0x1780   :  { %3607 = vmax.xlane.f32.xlu0 %v7574_v24  ;;  %v7586_v24 = vld [vmem:[#allocation57_spill] sm:$0xff] }
0x1788   :  { %3616 = vmax.xlane.f32.xlu0 %v7575_v32 }
0x1790   :  { %3625 = vmax.xlane.f32.xlu0 %v3366_v25  ;;  %v7585_v25 = vld [vmem:[#allocation40_spill] sm:$0xff] }
0x17eb   :  { %v3368_v7 = vpop.xlane.xlu0 %3367 }
0x17ec   :  { %vm3369_vm8 = vcmp.eq.f32.partialorder %v6793_v53, %v3368_v7  ;;  %vm3370_vm9 = vcmp.eq.f32.partialorder %v6790_v61, %v3368_v7 }
0x17ed   :  { %v3371_v60 = vsel %vm3369_vm8, %v5747_v50, 256  ;;  %v3372_v23 = vsel %vm3370_vm9, %v5750_v12, 256 }
0x17ee   :  { %vm3373_vm10 = vcmp.lt.s32.totalorder %v3371_v60, %v3372_v23 }
0x17ef   :  { %v3374_v28 = vsel %vm3373_vm10, %v3371_v60, %v3372_v23 }
0x17f0   :  { %v3376_v54 = vshra.s32 %v3374_v28, 16  ;;  %v3375_v45 = vand.u32 65535, %v3374_v28 }
0x17f2   :  { %v3378_v49 = vcvt.s32.f32 %v3376_v54  ;;  %v3377_v10 = vcvt.s32.f32 %v3375_v45 }
0x17f3   :  { %v6805_v58 = vpop.xlane.xlu0 %3607 }
0x17f4   :  { %3379 = vmin.xlane.f32.xlu1 %v3378_v49  ;;  %v3630_v46 = vsub.f32 %v7578_v62, %v6805_v58  ;;  %v3631_v19 = vsub.f32 %v7579_v34, %v6805_v58 }
0x17f6   :  { %v3646_v2 = vmul.f32 1.442695, %v3630_v46  ;;  %v3648_v26 = vmul.f32 1.442695, %v3631_v19 }
0x17fb   :  { %v6820_v16 = vpop.xlane.xlu0 %3616 }
0x17fc   :  { %3610 = vmax.xlane.f32.xlu1 %v7576_v37  ;;  %v3636_v14 = vsub.f32 %v7583_v35, %v6820_v16  ;;  %v3637_v36 = vsub.f32 %v7584_v8, %v6820_v16 }
0x17fe   :  { %v3658_v60 = vmul.f32 1.442695, %v3636_v14 }
0x1803   :  { %v6834_v37 = vpop.xlane.xlu0 %3625 }
0x1804   :  { %3619 = vmax.xlane.f32.xlu1 %v7577_v44  ;;  %v3643_v46 = vsub.f32 %v6790_v61, %v6834_v37 }
0x1867   :  { %v6807_v11 = vpop.xlane.xlu1 %3379 }
0x1868   :  { %vm3381_vm11 = vcmp.eq.f32.partialorder %v3378_v49, %v6807_v11  ;;  %v3660_v49 = vmul.f32 1.442695, %v3637_v36 }
0x1869   :  { %v3382_v29 = vsel %vm3381_vm11, %v3377_v10, inf }
0x186a   :  { %3383 = vmin.xlane.f32.xlu2 %v3382_v29  ;;  %v3642_v29 = vsub.f32 %v6793_v53, %v6834_v37 }
0x186f   :  { %v6814_v56 = vpop.xlane.xlu1 %3610 }
0x1870   :  { %v3632_v51 = vsub.f32 %v7580_v48, %v6814_v56  ;;  %v3633_v4 = vsub.f32 %v7581_v30, %v6814_v56 }
0x1872   :  { %v3650_v33 = vmul.f32 1.442695, %v3632_v51  ;;  %v3652_v52 = vmul.f32 1.442695, %v3633_v4  ;;  %3613 = vmax.xlane.f32.xlu2 %v7582_v20  ;;  %v3670_v51 = vmul.f32 1.442695, %v3642_v29 }
0x1873   :  { %v7597_v29 = vld [vmem:[#allocation52_spill] sm:$0xff] }
0x1874   :  { %4799 = vpow2.f32 %v3650_v33 }
0x1875   :  { %4801 = vpow2.f32 %v3652_v52 }
0x1876   :  { %4803 = vpow2.f32 %v3646_v2  ;;  %v3672_v2 = vmul.f32 1.442695, %v3643_v46 }
0x1877   :  { %4805 = vpow2.f32 %v3648_v26  ;;  %v6827_v18 = vpop.xlane.xlu1 %3619 }
0x1878   :  { %v3638_v21 = vsub.f32 %v7585_v25, %v6827_v18  ;;  %v3639_v32 = vsub.f32 %v7586_v24, %v6827_v18 }
0x187a   :  { %v4800_v7 = vpop.eup %4799  ;;  %v3662_v23 = vmul.f32 1.442695, %v3638_v21  ;;  %v3664_v28 = vmul.f32 1.442695, %v3639_v32  ;;  %3622 = vmax.xlane.f32.xlu2 %v6651_v55  ;;  %v3386_v32 = vcvt.f32.s32 %v6807_v11 }
0x187b   :  { %v4802_v54 = vpop.eup %4801 }
0x187c   :  { %v4804_v44 = vpop.eup %4803  ;;  %4807 = vpow2.f32 %v3662_v23  ;;  %v3681_v45 = vadd.f32 %v4802_v54, %v4800_v7  ;;  %v7600_v54 = vld [vmem:[#allocation44_spill] sm:$0xff] }
0x187d   :  { %v4806_v10 = vpop.eup %4805  ;;  %4809 = vpow2.f32 %v3664_v28 }
0x187e   :  { %4811 = vpow2.f32 %v3658_v60  ;;  %3682 = vadd.xlane.f32.xlu0 %v3681_v45  ;;  %v3678_v19 = vadd.f32 %v4806_v10, %v4804_v44  ;;  %v3387_v60 = vshll.u32 %v3386_v32, 16  ;;  %v7596_v10 = vld [vmem:[#allocation43_spill] sm:$0xff] }
0x187f   :  { %4813 = vpow2.f32 %v3660_v49 }
0x1880   :  { %4815 = vpow2.f32 %v3670_v51 }
0x1881   :  { %4817 = vpow2.f32 %v3672_v2 }
0x1882   :  { %v4808_v55 = vpop.eup %4807  ;;  %3679 = vadd.xlane.f32.xlu2 %v3678_v19 }
0x1883   :  { %v4810_v4 = vpop.eup %4809 }
0x1884   :  { %v4812_v33 = vpop.eup %4811  ;;  %v3690_v52 = vadd.f32 %v4810_v4, %v4808_v55 }
0x1885   :  { %v4814_v20 = vpop.eup %4813 }
0x1886   :  { %3691 = vadd.xlane.f32.xlu0 %v3690_v52  ;;  %v3687_v26 = vadd.f32 %v4814_v20, %v4812_v33  ;;  %v4816_v14 = vpop.eup %4815 }
0x1887   :  { %v4818_v36 = vpop.eup %4817 }
0x1888   :  { %v3696_v21 = vadd.f32 %v4818_v36, %v4816_v14 }
0x188a   :  { %3688 = vadd.xlane.f32.xlu2 %v3687_v26 }
0x1892   :  { %3697 = vadd.xlane.f32.xlu2 %v3696_v21 }
0x18dd   :  { %v3384_v7 = vpop.xlane.xlu2 %3383 }
0x18de   :  { %v3385_v23 = vcvt.f32.s32 %v3384_v7  ;;  %v7599_v7 = vld [vmem:[#allocation45_spill] sm:$0xff] }
0x18e0   :  { %v3388_v28 = vadd.s32 %v3387_v60, %v3385_v23 }
0x18e2   :  { %vm3389_vm12 = vcmp.eq.s32.totalorder %v5747_v50, %v3388_v28  ;;  %vm3390_vm13 = vcmp.eq.s32.totalorder %v5750_v12, %v3388_v28 }
0x18e3   :  { %vm6843_vm14 = vmpackc.low %vm3389_vm12, %vm3389_vm12 }
0x18e4   :  { %vm6847_vm15 = vmpackc.low %vm3390_vm13, %vm3390_vm13  ;;  %4476 = vmatmul.msk.bf16.vlgmr.msra.gmra.mxu1 %vm6843_vm14, %v7273_v38  ;;  %4480 = vmatmul.msk.bf16.vlgmr.msrb.gmra.mxu3 %vm6843_vm14, %v7273_v38 }
0x18e5   :  { %4478 = vmatmul.msk.bf16.vlgmr.msra.gmra.mxu2 %vm6847_vm15, %v7273_v38  ;;  %4482 = vmatmul.msk.bf16.vlgmr.msrb.gmra.mxu0 %vm6847_vm15, %v7273_v38  ;;  %v6863_v50 = vpop.xlane.xlu2 %3613 }
0x18e6   :  { %3501 = vmatpush.bf16.msra.mxu1 %v5603_v13  ;;  %3562 = vmatpush.bf16.msra.mxu2 %v5655_v59 }
0x18e7   :  { %3575 = vmatpush.bf16.msrb.mxu3 %v5657_v57  ;;  %v7592_v57 = vld [vmem:[#allocation49_spill] sm:$0xff] }
0x18ea   :  { %3502 = vmatpush.bf16.msra.mxu1 %v5606_v5  ;;  %3563 = vmatpush.bf16.msra.mxu2 %v5661_v39 }
0x18eb   :  { %3576 = vmatpush.bf16.msrb.mxu3 %v5663_v6 }
0x18ed   :  { %v6871_v12 = vpop.xlane.xlu2 %3622 }
0x18ee   :  { %3503 = vmatpush.bf16.msra.mxu1 %v5615_v31  ;;  %3564 = vmatpush.bf16.msra.mxu2 %v5672_v0 }
0x18ef   :  { %3577 = vmatpush.bf16.msrb.mxu3 %v5674_v43 }
0x18f1   :  { %v3683_v11 = vpop.xlane.xlu0 %3682 }
0x18f2   :  { %3504 = vmatpush.bf16.msra.mxu1 %v5624_v1  ;;  %3565 = vmatpush.bf16.msra.mxu2 %v5684_v41  ;;  %4819 = vlog2.f32 %v3683_v11  ;;  %v7591_v1 = vld [vmem:[#allocation48_spill] sm:$0xff]  ;;  %v7593_v41 = vld [vmem:[#allocation42_spill] sm:$0xff] }
0x18f3   :  { %3578 = vmatpush.bf16.msrb.mxu3 %v5686_v17  ;;  %v7594_v17 = vld [vmem:[#allocation50_spill] sm:$0xff] }
0x18f4   :  { %4484 = vmatmul.msk.bf16.vlgmr.msrb.gmra.mxu1 %vm6843_vm14, %v7273_v38  ;;  %3483 = vmatmul.bf16.vlgmr.msra.gmra.mxu3 %v6769_v9 }
0x18f5   :  { %4486 = vmatmul.msk.bf16.vlgmr.msrb.gmra.mxu2 %vm6847_vm15, %v7273_v38  ;;  %3496 = vmatmul.bf16.vlgmr.msra.gmra.mxu0 %v6769_v9  ;;  %v3680_v13 = vpop.xlane.xlu2 %3679 }
0x18f6   :  { %3505 = vmatpush.bf16.msra.mxu1 %v7454_v3  ;;  %4821 = vlog2.f32 %v3680_v13  ;;  %3566 = vmatpush.bf16.msra.mxu2 %v7517_v22 }
0x18f7   :  { %3579 = vmatpush.bf16.msrb.mxu3 %v7518_v63  ;;  %v7595_v63 = vld [vmem:[#allocation51_spill] sm:$0xff] }
0x18f8   :  { %v4820_v31 = vpop.eup %4819 }
0x18f9   :  { %v3692_v5 = vpop.xlane.xlu0 %3691  ;;  %v3705_v59 = vmul.f32 0.6931472, %v4820_v31 }
0x18fa   :  { %4823 = vlog2.f32 %v3692_v5  ;;  %3506 = vmatpush.bf16.msra.mxu1 %v7520_v47  ;;  %3567 = vmatpush.bf16.msra.mxu2 %v7591_v1 }
0x18fb   :  { %3580 = vmatpush.bf16.msrb.mxu3 %v7592_v57  ;;  %v3719_v6 = vadd.f32 %v3705_v59, %v6814_v56 }
0x18fc   :  { %v4822_v39 = vpop.eup %4821 }
0x18fd   :  { %v3703_v0 = vmul.f32 0.6931472, %v4822_v39  ;;  %v3689_v43 = vpop.xlane.xlu2 %3688  ;;  %v3728_v38 = vsub.f32 %v7580_v48, %v3719_v6  ;;  %v3729_v3 = vsub.f32 %v7581_v30, %v3719_v6  ;;  %v7598_v30 = vld [vmem:[#allocation53_spill] sm:$0xff] }
0x18fe   :  { %3507 = vmatpush.bf16.msra.mxu1 %v7593_v41  ;;  %4825 = vlog2.f32 %v3689_v43  ;;  %3568 = vmatpush.bf16.msra.mxu2 %v7594_v17 }
0x18ff   :  { %v3718_v22 = vadd.f32 %v3703_v0, %v6805_v58  ;;  %3581 = vmatpush.bf16.msrb.mxu3 %v7595_v63  ;;  %3744 = vst [vmem:[#allocation16 + $0x10] sm:$0xff] %v3728_v38 }
0x1900   :  { %v4824_v47 = vpop.eup %4823  ;;  %3745 = vst [vmem:[#allocation16 + $0x18] sm:$0xff] %v3729_v3 }
0x1901   :  { %v3726_v44 = vsub.f32 %v7578_v62, %v3718_v22  ;;  %v3727_v56 = vsub.f32 %v7579_v34, %v3718_v22  ;;  %v3711_v45 = vmul.f32 0.6931472, %v4824_v47 }
0x1902   :  { %3508 = vmatpush.bf16.msra.mxu1 %v7596_v10  ;;  %3569 = vmatpush.bf16.msra.mxu2 %v7597_v29 }
0x1903   :  { %3742 = vst [vmem:[#allocation16] sm:$0xff] %v3726_v44  ;;  %v3722_v48 = vadd.f32 %v3711_v45, %v6827_v18  ;;  %3582 = vmatpush.bf16.msrb.mxu3 %v7598_v30 }
0x1904   :  { %v4826_v58 = vpop.eup %4825  ;;  %3743 = vst [vmem:[#allocation16 + $0x8] sm:$0xff] %v3727_v56 }
0x1905   :  { %v3734_v46 = vsub.f32 %v7585_v25, %v3722_v48  ;;  %v3735_v19 = vsub.f32 %v7586_v24, %v3722_v48  ;;  %v3709_v62 = vmul.f32 0.6931472, %v4826_v58  ;;  %3509 = vmatmul.bf16.vlgmr.msra.gmra.mxu1 %v6769_v9  ;;  %v3698_v34 = vpop.xlane.xlu2 %3697 }
0x1906   :  { %4827 = vlog2.f32 %v3698_v34 }
0x1907   :  { %3750 = vst [vmem:[#allocation16 + $0x40] sm:$0xff] %v3734_v46  ;;  %v3721_v55 = vadd.f32 %v3709_v62, %v6820_v16 }
0x1908   :  { %3751 = vst [vmem:[#allocation16 + $0x48] sm:$0xff] %v3735_v19 }
0x1909   :  { %v3732_v51 = vsub.f32 %v7583_v35, %v3721_v55  ;;  %v3733_v18 = vsub.f32 %v7584_v8, %v3721_v55 }
0x190b   :  { %3748 = vst [vmem:[#allocation16 + $0x30] sm:$0xff] %v3732_v51 }
0x190c   :  { %v4828_v4 = vpop.eup %4827  ;;  %3749 = vst [vmem:[#allocation16 + $0x38] sm:$0xff] %v3733_v18 }
0x190d   :  { %v3715_v2 = vmul.f32 0.6931472, %v4828_v4 }
0x190f   :  { %v3724_v25 = vadd.f32 %v3715_v2, %v6834_v37 }
0x1911   :  { %v3738_v24 = vsub.f32 %v6793_v53, %v3724_v25  ;;  %v3739_v9 = vsub.f32 %v6790_v61, %v3724_v25 }
0x1913   :  { %3754 = vst [vmem:[#allocation16 + $0x60] sm:$0xff] %v3738_v24 }
0x1914   :  { %3755 = vst [vmem:[#allocation16 + $0x68] sm:$0xff] %v3739_v9 }
0x1961   :  { %v3406_v33 = vpop.f32.mrf.mxu1 }
0x1962   :  { %v3445_v52 = vpop.f32.mrf.mxu0 }
0x1967   :  { %v3432_v16 = vpop.f32.mrf.mxu3 }
0x1968   :  { %v3419_v20 = vpop.f32.mrf.mxu2  ;;  %v3446_v32 = vadd.f32 %v3445_v52, %v3432_v16 }
0x1969   :  { %v3408_v26 = vpop.f32.mrf.mxu1  ;;  %v3420_v28 = vadd.f32 %v3419_v20, %v3406_v33  ;;  %v7601_v20 = vld [vmem:[#allocation36_spill] sm:$0xff] }
0x196a   :  { %v3447_v35 = vpop.f32.mrf.mxu0  ;;  %v3634_v26 = vsub.f32 %v7601_v20, %v6863_v50 }
0x196b   :  { %v7602_v35 = vld [vmem:[#allocation35_spill] sm:$0xff] }
0x196f   :  { %v3434_v14 = vpop.f32.mrf.mxu3 }
0x1970   :  { %v3421_v8 = vpop.f32.mrf.mxu2  ;;  %v3635_v14 = vsub.f32 %v7602_v35, %v6863_v50 }
0x1971   :  { %v3458_v36 = vpop.f32.mrf.mxu1  ;;  %v3654_v8 = vmul.f32 1.442695, %v3634_v26 }
0x1972   :  { %v3497_v21 = vpop.f32.mrf.mxu0 }
0x1973   :  { %v3498_v60 = vadd.f32 %v3497_v21, %v7599_v7  ;;  %v7603_v7 = vld [vmem:[#allocation38_spill] sm:$0xff] }
0x1975   :  { %v3534_v37 = vadd.f32 %v3498_v60, %v3446_v32  ;;  %v3640_v60 = vsub.f32 %v7603_v7, %v6871_v12 }
0x1977   :  { %v4488_v23 = vmul.f32 -1.442695, %v3534_v37  ;;  %v3484_v53 = vpop.f32.mrf.mxu3 }
0x1978   :  { %v3471_v61 = vpop.f32.mrf.mxu2  ;;  %v3485_v49 = vadd.f32 %v3484_v53, %v7600_v54 }
0x1979   :  { %4829 = vpow2.f32 %v4488_v23  ;;  %v3460_v11 = vpop.f32.mrf.mxu1  ;;  %v3472_v34 = vadd.f32 %v3471_v61, %v3458_v36  ;;  %v3656_v36 = vmul.f32 1.442695, %v3635_v14  ;;  %v7604_v23 = vld [vmem:[#allocation105_spill] sm:$0xff]  ;;  %v3666_v61 = vmul.f32 1.442695, %v3640_v60 }
0x197a   :  { %v3514_v13 = vadd.f32 %v3485_v49, %v3420_v28  ;;  %v3499_v5 = vpop.f32.mrf.mxu0  ;;  %v3641_v53 = vsub.f32 %v7604_v23, %v6871_v12 }
0x197c   :  { %v4487_v31 = vmul.f32 -1.442695, %v3514_v13  ;;  %v3668_v54 = vmul.f32 1.442695, %v3641_v53 }
0x197e   :  { %4831 = vpow2.f32 %v4487_v31 }
0x197f   :  { %v4830_v1 = vpop.eup %4829  ;;  %v3486_v59 = vpop.f32.mrf.mxu3 }
0x1980   :  { %v3538_v57 = vadd.f32 1.0, %v4830_v1  ;;  %v3473_v39 = vpop.f32.mrf.mxu2 }
0x1982   :  { %4833 = vrcp.f32 %v3538_v57  ;;  %v3510_v6 = vpop.f32.mrf.mxu1  ;;  %v3550_v62 = vand.u32 2147483648, %v3538_v57  ;;  %vm3544_vm5 = vweird.f32 %v3538_v57  ;;  %v3548_v51 = vand.u32 2147483647, %v3538_v57 }
0x1983   :  { %v3511_v30 = vadd.f32 %v3510_v6, %v7254_v42 }
0x1984   :  { %v4832_v0 = vpop.eup %4831  ;;  %v3551_v2 = vor.u32 1.1754944e-38, %v3550_v62  ;;  %vm3549_vm7 = vcmp.eq.f32.partialorder %v3548_v51, 8.507059e+37 }
0x1985   :  { %v3518_v43 = vadd.f32 1.0, %v4832_v0 }
0x1987   :  { %4835 = vrcp.f32 %v3518_v43  ;;  %v3530_v44 = vand.u32 2147483648, %v3518_v43  ;;  %v3528_v45 = vand.u32 2147483647, %v3518_v43  ;;  %vm3524_vm1 = vweird.f32 %v3518_v43 }
0x1988   :  { %v4834_v41 = vpop.eup %4833 }
0x1989   :  { %v3540_v38 = vmul.f32 %v4834_v41, %v3538_v57  ;;  %v3531_v48 = vor.u32 1.1754944e-38, %v3530_v44  ;;  %vm3529_vm3 = vcmp.eq.f32.partialorder %v3528_v45, 8.507059e+37  ;;  %vm3545_vm4 = vweird.f32 %v4834_v41 }
0x198a   :  { %v3512_v17 = vpop.f32.mrf.mxu1  ;;  %vm3546_vm6 = vmor %vm3544_vm5, %vm3545_vm4 }
0x198b   :  { %v3541_v63 = vsub.f32 1.0, %v3540_v38 }
0x198d   :  { %v4836_v3 = vpop.eup %4835  ;;  %v3542_v10 = vmul.f32 %v4834_v41, %v3541_v63 }
0x198e   :  { %v3520_v22 = vmul.f32 %v4836_v3, %v3518_v43  ;;  %vm3525_vm0 = vweird.f32 %v4836_v3 }
0x198f   :  { %vm3526_vm2 = vmor %vm3524_vm1, %vm3525_vm0  ;;  %v3543_v19 = vadd.f32 %v4834_v41, %v3542_v10 }
0x1990   :  { %v3521_v47 = vsub.f32 1.0, %v3520_v22 }
0x1991   :  { %v3547_v4 = vsel %vm3546_vm6, %v4834_v41, %v3543_v19 }
0x1992   :  { %v3522_v56 = vmul.f32 %v4836_v3, %v3521_v47  ;;  %v3552_v25 = vsel %vm3549_vm7, %v3551_v2, %v3547_v4 }
0x1993   :  { %v3557_v24 = vsub.f32 1.0, %v3552_v25  ;;  %v3559_v33 = vmul.f32 %v3552_v25, %v6765_v27 }
0x1994   :  { %v3523_v29 = vadd.f32 %v4836_v3, %v3522_v56 }
0x1996   :  { %v3527_v58 = vsel %vm3526_vm2, %v4836_v3, %v3523_v29 }
0x1997   :  { %v3532_v46 = vsel %vm3529_vm3, %v3531_v48, %v3527_v58 }
0x1998   :  { %v3554_v55 = vmul.f32 %v3532_v46, %v3511_v30 }
0x199a   :  { %v3555_v18 = vadd.f32 %v3554_v55, %v3472_v34 }
0x199c   :  { %4837 = vtanh.f32 %v3555_v18 }
0x199d   :  { %4839 = vpow2.f32 %v3654_v8 }
0x199e   :  { %4841 = vpow2.f32 %v3656_v36 }
0x199f   :  { %4843 = vpow2.f32 %v3666_v61 }
0x19a0   :  { %4845 = vpow2.f32 %v3668_v54 }
0x19a2   :  { %v4838_v9 = vpop.eup %4837 }
0x19a3   :  { %v3558_v42 = vmul.f32 %v4838_v9, %v3557_v24  ;;  %v4840_v49 = vpop.eup %4839 }
0x19a4   :  { %v4842_v11 = vpop.eup %4841 }
0x19a5   :  { %v3560_v52 = vadd.f32 %v3559_v33, %v3558_v42  ;;  %v3684_v31 = vadd.f32 %v4842_v11, %v4840_v49  ;;  %v4844_v1 = vpop.eup %4843 }
0x19a7   :  { %v3561_v16 = vpack.c.bf16 %v3560_v52, %v3560_v52 }
0x19a9   :  { %3570 = vmatmul.bf16.vlgmr.msra.gmra.mxu2 %v3561_v16  ;;  %3583 = vmatmul.bf16.vlgmr.msrb.gmra.mxu3 %v3561_v16 }
0x1a2c   :  { %v3571_v21 = vpop.f32.mrf.mxu2  ;;  %v3584_v32 = vpop.f32.mrf.mxu3 }
0x1a2d   :  { %v3572_v27 = vadd.f32 %v3571_v21, %v7322_v15  ;;  %v3585_v37 = vadd.f32 %v3584_v32, %v7320_v40  ;;  %v4846_v15 = vpop.eup %4845 }
0x1a2e   :  { %v3693_v59 = vadd.f32 %v4846_v15, %v4844_v1 }
0x1a2f   :  { %v3627_v28 = vmax.f32 %v3572_v27, %v3585_v37 }
0x1a31   :  { %3628 = vmax.xlane.f32.xlu1 %v3627_v28 }
0x1a34   :  { %v3573_v13 = vpop.f32.mrf.mxu2  ;;  %v3586_v5 = vpop.f32.mrf.mxu3 }
0x1a39   :  { %3685 = vadd.xlane.f32.xlu1 %v3684_v31 }
0x1a41   :  { %3694 = vadd.xlane.f32.xlu1 %v3693_v59 }
0x1aa4   :  { %v3629_v40 = vpop.xlane.xlu1 %3628 }
0x1aa5   :  { %v3644_v57 = vsub.f32 %v3572_v27, %v3629_v40  ;;  %v3645_v39 = vsub.f32 %v3585_v37, %v3629_v40 }
0x1aa7   :  { %v3674_v6 = vmul.f32 1.442695, %v3644_v57  ;;  %v3676_v0 = vmul.f32 1.442695, %v3645_v39 }
0x1aa9   :  { %4847 = vpow2.f32 %v3674_v6 }
0x1aaa   :  { %4849 = vpow2.f32 %v3676_v0 }
0x1aac   :  { %v3686_v43 = vpop.xlane.xlu1 %3685 }
0x1aad   :  { %4851 = vlog2.f32 %v3686_v43 }
0x1aaf   :  { %v4848_v41 = vpop.eup %4847 }
0x1ab0   :  { %v4850_v17 = vpop.eup %4849 }
0x1ab1   :  { %v3699_v38 = vadd.f32 %v4850_v17, %v4848_v41 }
0x1ab3   :  { %v4852_v3 = vpop.eup %4851  ;;  %3700 = vadd.xlane.f32.xlu0 %v3699_v38 }
0x1ab4   :  { %v3707_v22 = vmul.f32 0.6931472, %v4852_v3  ;;  %v3695_v63 = vpop.xlane.xlu1 %3694 }
0x1ab5   :  { %4853 = vlog2.f32 %v3695_v63 }
0x1ab6   :  { %v3720_v47 = vadd.f32 %v3707_v22, %v6863_v50 }
0x1ab8   :  { %v3730_v44 = vsub.f32 %v7601_v20, %v3720_v47  ;;  %v3731_v56 = vsub.f32 %v7602_v35, %v3720_v47 }
0x1aba   :  { %3746 = vst [vmem:[#allocation16 + $0x20] sm:$0xff] %v3730_v44 }
0x1abb   :  { %v4854_v45 = vpop.eup %4853  ;;  %3747 = vst [vmem:[#allocation16 + $0x28] sm:$0xff] %v3731_v56 }
0x1abc   :  { %v3713_v10 = vmul.f32 0.6931472, %v4854_v45 }
0x1abe   :  { %v3723_v29 = vadd.f32 %v3713_v10, %v6871_v12 }
0x1ac0   :  { %v3736_v48 = vsub.f32 %v7603_v7, %v3723_v29  ;;  %v3737_v30 = vsub.f32 %v7604_v23, %v3723_v29 }
0x1ac2   :  { %3752 = vst [vmem:[#allocation16 + $0x50] sm:$0xff] %v3736_v48 }
0x1ac3   :  { %3753 = vst [vmem:[#allocation16 + $0x58] sm:$0xff] %v3737_v30 }
0x1b26   :  { %v3701_v58 = vpop.xlane.xlu0 %3700 }
0x1b27   :  { %4855 = vlog2.f32 %v3701_v58 }
0x1b2d   :  { %v4856_v46 = vpop.eup %4855 }
0x1b2e   :  { %v3717_v50 = vmul.f32 0.6931472, %v4856_v46 }
0x1b30   :  { %v3725_v19 = vadd.f32 %v3717_v50, %v3629_v40 }
0x1b32   :  { %v3740_v62 = vsub.f32 %v3572_v27, %v3725_v19  ;;  %v3741_v34 = vsub.f32 %v3585_v37, %v3725_v19 }
0x1b34   :  { %3756 = vst [vmem:[#allocation16 + $0x70] sm:$0xff] %v3740_v62 }
0x1b35   :  { %3757 = vst [vmem:[#allocation16 + $0x78] sm:$0xff] %v3741_v34 }
0x1b36   :  { %3770 = dma.vmem_to_hbm [thread:$0]  %s3763_s17, 2048, %s3765_s20, [#allocation9], %s5102_s21, %s5102_s21, %s5103_s0  }
0x1b37   :  { %5085 = dma.done.wait [#allocation9], 2048  }
0x1b38   :  { %5086 = vsyncadd [#allocation9], 4294965248 }
0x1b39   :  { %3775 = vsyncpa [#allocation8], 1 }
0x1b3a   :  { %3776 = vsyncpa [#allocation11], 1 }
0x1b3b   :  { %3777 = vsyncpa [#allocation14], 1 }
0x1b3c   :  { %3778 = vsyncpa [#allocation9], 1 }
0x1b3d   :  { %3779 = vsyncmov [#allocation6] }
0x1b40   :  { %s3780_s22 = vpop.sfrf %3779 }
0x1b41   :  { %p4489_p0 = scmp.ne.s32.totalorder %s3780_s22, 0 }
0x1b43   :  { %3784 = shalt.err (%p4489_p0)  }
0x1b44   :  { %3786 = vsyncmov [#allocation6 + $0x1] }
0x1b47   :  { %s3787_s11 = vpop.sfrf %3786 }
0x1b48   :  { %p4490_p1 = scmp.ne.s32.totalorder %s3787_s11, 0 }
0x1b4a   :  { %3791 = shalt.err (%p4490_p1)  }
0x1b4b   :  { %3793 = vsyncmov [#allocation6 + $0x2] }
0x1b4e   :  { %s3794_s23 = vpop.sfrf %3793 }
0x1b4f   :  { %p4491_p2 = scmp.ne.s32.totalorder %s3794_s23, 0 }
0x1b51   :  { %3798 = shalt.err (%p4491_p2)  }

</bundles_post_ra>
